<compile_context>
chip_gen: v6e
topology: v6e:2x2x1
jax: 0.10.0
libtpu: 0.0.40
codegen_flags: <defaults>
</compile_context>

<pallas_src>
import jax
import jax.numpy as jnp
from jax.experimental import pallas as pl
from jax.experimental.pallas import tpu as pltpu


def head_kernel(slab_ref, w1_ref, c_ref, out_ref, acc_ref):
    # Zero the per-edge partial-loss accumulator on the first inner tile.
    @pl.when(pl.program_id(1) == 0)
    def _():
        acc_ref[...] = jnp.zeros_like(acc_ref)

    xs = slab_ref[...]                                    # (TE, 2*nhid+1) bf16
    c = c_ref[...]                                        # (4, nhid) f32

    # Linear 1 over the packed slab: single bf16 MXU dot, f32 acc, then PReLU.
    # (The sign column multiplies a zero weight row -> no contribution.)
    h = jnp.dot(xs, w1_ref[...], preferred_element_type=jnp.float32) + c[0:1, :]
    h = jnp.where(h >= 0.0, h, c[1:2, :] * h)             # PReLU(nhid)

    # Collapsed 2-class head: s = z0 - z1.
    s = jnp.sum(h * c[2:3, :], axis=-1, keepdims=True) + c[3:4, 0:1]   # (TE, 1)

    # sign folded into the slab as the last bf16 lane; 0 marks padded rows.
    sign = xs[:, -1:].astype(jnp.float32)                 # (TE, 1)

    # Per-edge cross-entropy: softplus(sign * s), numerically stable form.
    t = sign * s
    loss_i = jnp.maximum(t, 0.0) + jnp.log1p(jnp.exp(-jnp.abs(t)))
    acc_ref[...] += jnp.abs(sign) * loss_i                # padded rows -> 0

    # Single cross-lane reduce + store on the last inner tile only.
    @pl.when(pl.program_id(1) == pl.num_programs(1) - 1)
    def _():
        out_ref[...] = jnp.full((1, 1, 1), jnp.sum(acc_ref[...]), jnp.float32)


def _round_up(x, m):
    return ((x + m - 1) // m) * m


def head_forward(feature, row, col, label, params, *, nhid,
                 tile_e=2048, num_cores=1):
    """Returns the scalar mean cross-entropy loss (matches HEAD.forward)."""
    w1, b1, alpha, w2, b2 = params   # w1: (2*nhid, nhid) == W1.T ; w2: (nhid, 2) == W2.T
    feature = feature.reshape(-1, nhid)
    E = row.shape[0]
    width = 2 * nhid + 1             # packed slab columns: [f[row] | f[col] | sign]

    # Adaptive edge tiling: big tiles (step-overhead bound), but no over-padding
    # for small graphs.
    per_core = -(-E // num_cores)
    eff_tile = _round_up(min(tile_e, per_core), 128)
    step = num_cores * eff_tile
    E_pad = _round_up(E, step)
    pad = E_pad - E
    n_inner = E_pad // step

    # Pad the TINY index arrays before the gather (avoids a second HBM rewrite
    # of the big gathered slab).  Padded indices point at node 0 (valid row);
    # their sign is forced to 0 so they are masked out in-kernel.
    row_p = jnp.pad(row, (0, pad)) if pad else row
    col_p = jnp.pad(col, (0, pad)) if pad else col
    valid = jnp.arange(E_pad) < E
    y = (label[row_p] == label[col_p]).astype(jnp.float32)
    sign = jnp.where(valid, 2.0 * y - 1.0, 0.0).astype(jnp.bfloat16)[:, None]

    # One lane-dense bf16 per-edge stream (written to HBM once by XLA).
    feat_bf = feature.astype(jnp.bfloat16)
    slab = jnp.concatenate([feat_bf[row_p], feat_bf[col_p], sign], axis=1)  # (E_pad, width)

    # Stacked W1 (split-over-concat) + a zero row for the sign column.
    w1full = jnp.concatenate(
        [w1.astype(jnp.float32), jnp.zeros((1, nhid), jnp.float32)], axis=0
    ).astype(jnp.bfloat16)                                                   # (width, nhid)

    # Pack all small f32 constants into one block: [b1; alpha; w2d; b2d].
    w2d = (w2[:, 0] - w2[:, 1]).reshape(1, nhid)
    b2d = b2[0, 0] - b2[0, 1]
    cpack = jnp.concatenate(
        [b1.reshape(1, nhid), alpha.reshape(1, nhid), w2d,
         jnp.full((1, nhid), b2d)], axis=0).astype(jnp.float32)              # (4, nhid)

    grid = (num_cores, n_inner)
    edge_map = lambda c, i: (c * n_inner + i, 0)
    const_map = lambda c, i: (0, 0)

    partials = pl.pallas_call(
        head_kernel,
        out_shape=jax.ShapeDtypeStruct((num_cores, 1, 1), jnp.float32),
        grid_spec=pltpu.PrefetchScalarGridSpec(
            num_scalar_prefetch=0,
            grid=grid,
            in_specs=[
                pl.BlockSpec((eff_tile, width), edge_map),   # packed edge slab (bf16)
                pl.BlockSpec((width, nhid), const_map),      # stacked W1 (bf16)
                pl.BlockSpec((4, nhid), const_map),          # [b1; alpha; w2d; b2d] (f32)
            ],
            out_specs=pl.BlockSpec((1, 1, 1), lambda c, i: (c, 0, 0)),
            scratch_shapes=[pltpu.VMEM((eff_tile, 1), jnp.float32)],
        ),
        # TODO(synk): on v7x, switch the leading axis to CORE_PARALLEL (or
        # pl.core_map) if xprof shows plain "parallel" is not sharded across TCs.
        compiler_params=pltpu.CompilerParams(
            dimension_semantics=("parallel", "arbitrary")),
    )(slab, w1full, cpack)

    # CrossEntropyLoss default reduction = mean over the TRUE edge count.
    return jnp.sum(partials) / E


def init_params(key, nhid):
    """Deterministic init matching torch defaults (U(-1/sqrt(fan_in), .), PReLU=0.25)."""
    k1, k2, k3, k4 = jax.random.split(key, 4)
    lim1 = 1.0 / jnp.sqrt(2.0 * nhid)
    lim2 = 1.0 / jnp.sqrt(float(nhid))
    w1 = jax.random.uniform(k1, (2 * nhid, nhid), jnp.float32, -lim1, lim1)
    b1 = jax.random.uniform(k2, (1, nhid), jnp.float32, -lim1, lim1)
    alpha = jnp.full((1, nhid), 0.25, jnp.float32)
    w2 = jax.random.uniform(k3, (nhid, 2), jnp.float32, -lim2, lim2)
    b2 = jax.random.uniform(k4, (1, 2), jnp.float32, -lim2, lim2)
    return (w1, b1, alpha, w2, b2)


def reference_forward(feature, row, col, label, params, nhid):
    """Pure-JAX reference; mirrors the kernel's bf16 rounding of streamed operands."""
    w1, b1, alpha, w2, b2 = params
    feature = feature.reshape(-1, nhid)
    f = feature.astype(jnp.bfloat16).astype(jnp.float32)
    w1f = w1.astype(jnp.bfloat16).astype(jnp.float32)
    x = jnp.concatenate([f[row], f[col]], axis=1)
    y = (label[row] == label[col]).astype(jnp.int32)
    h = jnp.dot(x, w1f, precision=jax.lax.Precision.HIGHEST) + b1
    h = jnp.where(h >= 0.0, h, alpha * h)
    z = jnp.dot(h, w2, precision=jax.lax.Precision.HIGHEST) + b2
    lse = jax.nn.logsumexp(z, axis=-1)
    picked = jnp.take_along_axis(z, y[:, None], axis=-1)[:, 0]
    return jnp.mean(lse - picked)


if __name__ == "__main__":
    nhid = 32
    n_nodes = 64
    n_edges = 1000          # NOT a multiple of the tile -> exercises padding + mask

    key = jax.random.PRNGKey(0)
    k_feat, k_row, k_col, k_lab, k_par = jax.random.split(key, 5)

    feature = jax.random.normal(k_feat, (n_nodes, nhid), jnp.float32)
    row = jax.random.randint(k_row, (n_edges,), 0, n_nodes, jnp.int32)
    col = jax.random.randint(k_col, (n_edges,), 0, n_nodes, jnp.int32)
    label = jax.random.randint(k_lab, (n_nodes,), 0, 4, jnp.int32)
    params = init_params(k_par, nhid)

    ref = reference_forward(feature, row, col, label, params, nhid)

    # Default config: 1 core (v5e/v6e friendly), adaptive big tile -> grid (1, 1).
    loss = head_forward(feature, row, col, label, params, nhid=nhid)
    loss = jax.block_until_ready(loss)
    assert jnp.allclose(loss, ref, rtol=5e-4, atol=5e-4), (loss, ref)

    # Multi-tile / multi-partial path (shape of a v7x 2-TC launch).
    loss2 = head_forward(feature, row, col, label, params, nhid=nhid,
                         tile_e=128, num_cores=2)
    loss2 = jax.block_until_ready(loss2)
    assert jnp.allclose(loss2, ref, rtol=5e-4, atol=5e-4), (loss2, ref)

    print("KERNEL_OK")
</pallas_src>

<mosaic_0001>
module attributes {stable_mosaic.version = 11 : i64} {
  func.func @head_kernel(%arg0: i32, %arg1: i32, %arg2: memref<1024x65xbf16, #tpu.memory_space<vmem>>, %arg3: memref<65x32xbf16, #tpu.memory_space<vmem>>, %arg4: memref<4x32xf32, #tpu.memory_space<vmem>>, %arg5: memref<1x1x1xf32, #tpu.memory_space<vmem>>, %arg6: memref<1024x1xf32, #tpu.memory_space<vmem>>) attributes {dimension_semantics = [#tpu.dimension_semantics<parallel>, #tpu.dimension_semantics<arbitrary>], iteration_bounds = array<i64: 1, 1>, scalar_prefetch = 0 : i64, scratch_operands = 1 : i64, tpu.core_type = #tpu.core_type<tc>, window_params = [{transform_indices = @transform_0, window_bounds = array<i64: 1024, 65>}, {pipeline_mode = #tpu.pipeline_mode<synchronous>, transform_indices = @transform_1, window_bounds = array<i64: 65, 32>}, {pipeline_mode = #tpu.pipeline_mode<synchronous>, transform_indices = @transform_2, window_bounds = array<i64: 4, 32>}, {transform_indices = @transform_3, window_bounds = array<i64: 1, 1, 1>}]} {
    %c0_i32 = arith.constant 0 : i32
    %0 = arith.cmpi eq, %arg1, %c0_i32 : i32
    %1 = arith.extui %0 : i1 to i32
    %c0_i32_0 = arith.constant 0 : i32
    %2 = arith.cmpi ne, %1, %c0_i32_0 : i32
    scf.if %2 {
      %cst_16 = arith.constant 0.000000e+00 : f32
      %43 = vector.broadcast %cst_16 : f32 to vector<1024x1xf32>
      %c0_17 = arith.constant 0 : index
      %c0_18 = arith.constant 0 : index
      %44 = vector.load %arg6[%c0_17, %c0_18] : memref<1024x1xf32, #tpu.memory_space<vmem>>, vector<1024x1xf32>
      tpu.vector_store %arg6[%c0_17, %c0_18], %43 {strides = array<i32>} : memref<1024x1xf32, #tpu.memory_space<vmem>>, vector<1024x1xf32>,
    } else {
    }
    %c0 = arith.constant 0 : index
    %c0_1 = arith.constant 0 : index
    %3 = vector.load %arg2[%c0, %c0_1] : memref<1024x65xbf16, #tpu.memory_space<vmem>>, vector<1024x65xbf16>
    %c0_2 = arith.constant 0 : index
    %c0_3 = arith.constant 0 : index
    %4 = vector.load %arg4[%c0_2, %c0_3] : memref<4x32xf32, #tpu.memory_space<vmem>>, vector<4x32xf32>
    %c0_4 = arith.constant 0 : index
    %c0_5 = arith.constant 0 : index
    %5 = vector.load %arg3[%c0_4, %c0_5] : memref<65x32xbf16, #tpu.memory_space<vmem>>, vector<65x32xbf16>
    %cst = arith.constant dense<0.000000e+00> : vector<1024x32xf32>
    %6 = tpu.matmul %3, %5, %cst {dimension_numbers = #tpu.dot_dimension_numbers<[1], [0], [0], [1], [0, 0, 1, 1], [], []>} : vector<1024x65xbf16>, vector<65x32xbf16>, vector<1024x32xf32> -> vector<1024x32xf32>
    %7 = vector.extract_strided_slice %4 {offsets = [0, 0], sizes = [1, 32], strides = [1, 1]} : vector<4x32xf32> to vector<1x32xf32>
    %8 = vector.broadcast %7 : vector<1x32xf32> to vector<1024x32xf32>
    %9 = arith.addf %6, %8 : vector<1024x32xf32>
    %cst_6 = arith.constant 0.000000e+00 : f32
    %10 = vector.broadcast %cst_6 : f32 to vector<1024x32xf32>
    %11 = arith.cmpf oge, %9, %10 : vector<1024x32xf32>
    %12 = vector.extract_strided_slice %4 {offsets = [1, 0], sizes = [1, 32], strides = [1, 1]} : vector<4x32xf32> to vector<1x32xf32>
    %13 = vector.broadcast %12 : vector<1x32xf32> to vector<1024x32xf32>
    %14 = arith.mulf %13, %9 : vector<1024x32xf32>
    %15 = arith.select %11, %9, %14 : vector<1024x32xi1>, vector<1024x32xf32>
    %16 = vector.extract_strided_slice %4 {offsets = [2, 0], sizes = [1, 32], strides = [1, 1]} : vector<4x32xf32> to vector<1x32xf32>
    %17 = vector.broadcast %16 : vector<1x32xf32> to vector<1024x32xf32>
    %18 = arith.mulf %15, %17 : vector<1024x32xf32>
    %cst_7 = arith.constant dense<0.000000e+00> : vector<1024xf32>
    %19 = vector.multi_reduction <add>, %18, %cst_7 [1] : vector<1024x32xf32> to vector<1024xf32>
    %20 = vector.shape_cast %19 : vector<1024xf32> to vector<1024x1xf32>
    %21 = vector.extract_strided_slice %4 {offsets = [3, 0], sizes = [1, 1], strides = [1, 1]} : vector<4x32xf32> to vector<1x1xf32>
    %22 = vector.broadcast %21 : vector<1x1xf32> to vector<1024x1xf32>
    %23 = arith.addf %20, %22 : vector<1024x1xf32>
    %24 = vector.extract_strided_slice %3 {offsets = [0, 64], sizes = [1024, 1], strides = [1, 1]} : vector<1024x65xbf16> to vector<1024x1xbf16>
    %25 = arith.extf %24 : vector<1024x1xbf16> to vector<1024x1xf32>
    %26 = arith.mulf %25, %23 : vector<1024x1xf32>
    %cst_8 = arith.constant 0.000000e+00 : f32
    %27 = vector.broadcast %cst_8 : f32 to vector<1024x1xf32>
    %28 = arith.maximumf %26, %27 : vector<1024x1xf32>
    %29 = math.absf %26 : vector<1024x1xf32>
    %cst_9 = arith.constant 0.000000e+00 : f32
    %30 = vector.broadcast %cst_9 : f32 to vector<1024x1xf32>
    %31 = arith.subf %30, %29 : vector<1024x1xf32>
    %32 = math.exp %31 : vector<1024x1xf32>
    %33 = math.log1p %32 : vector<1024x1xf32>
    %34 = arith.addf %28, %33 : vector<1024x1xf32>
    %c0_10 = arith.constant 0 : index
    %c0_11 = arith.constant 0 : index
    %35 = vector.load %arg6[%c0_10, %c0_11] : memref<1024x1xf32, #tpu.memory_space<vmem>>, vector<1024x1xf32>
    %36 = math.absf %25 : vector<1024x1xf32>
    %37 = arith.mulf %36, %34 : vector<1024x1xf32>
    %38 = arith.addf %35, %37 : vector<1024x1xf32>
    %c0_12 = arith.constant 0 : index
    %c0_13 = arith.constant 0 : index
    %39 = vector.load %arg6[%c0_12, %c0_13] : memref<1024x1xf32, #tpu.memory_space<vmem>>, vector<1024x1xf32>
    tpu.vector_store %arg6[%c0_12, %c0_13], %38 {strides = array<i32>} : memref<1024x1xf32, #tpu.memory_space<vmem>>, vector<1024x1xf32>,
    %c0_i32_14 = arith.constant 0 : i32
    %40 = arith.cmpi eq, %arg1, %c0_i32_14 : i32
    %41 = arith.extui %40 : i1 to i32
    %c0_i32_15 = arith.constant 0 : i32
    %42 = arith.cmpi ne, %41, %c0_i32_15 : i32
    scf.if %42 {
      %c0_16 = arith.constant 0 : index
      %c0_17 = arith.constant 0 : index
      %43 = vector.load %arg6[%c0_16, %c0_17] : memref<1024x1xf32, #tpu.memory_space<vmem>>, vector<1024x1xf32>
      %44 = vector.shape_cast %43 : vector<1024x1xf32> to vector<1x1024x1xf32>
      %cst_18 = arith.constant dense<0.000000e+00> : vector<1xf32>
      %45 = vector.multi_reduction <add>, %44, %cst_18 [1, 2] : vector<1x1024x1xf32> to vector<1xf32>
      %46 = vector.shape_cast %45 : vector<1xf32> to vector<1x1x1xf32>
      %47 = vector.extract %46[0, 0, 0] : f32 from vector<1x1x1xf32>
      %48 = vector.broadcast %47 : f32 to vector<1x1x1xf32>
      %c0_19 = arith.constant 0 : index
      %c0_20 = arith.constant 0 : index
      %c0_21 = arith.constant 0 : index
      %49 = vector.load %arg5[%c0_19, %c0_20, %c0_21] : memref<1x1x1xf32, #tpu.memory_space<vmem>>, vector<1x1x1xf32>
      tpu.vector_store %arg5[%c0_19, %c0_20, %c0_21], %48 {strides = array<i32>} : memref<1x1x1xf32, #tpu.memory_space<vmem>>, vector<1x1x1xf32>,
    } else {
    }
    return
  }
  func.func @transform_0(%arg0: i32, %arg1: i32) -> (i32, i32) {
    %c1_i32 = arith.constant 1 : i32
    %0 = arith.muli %arg0, %c1_i32 : i32
    %1 = arith.addi %0, %arg1 : i32
    %c0_i32 = arith.constant 0 : i32
    %c0_i32_0 = arith.constant 0 : i32
    return %1, %c0_i32 : i32, i32
  }
  func.func @transform_1(%arg0: i32, %arg1: i32) -> (i32, i32) {
    %c0_i32 = arith.constant 0 : i32
    %c0_i32_0 = arith.constant 0 : i32
    %c0_i32_1 = arith.constant 0 : i32
    return %c0_i32, %c0_i32_0 : i32, i32
  }
  func.func @transform_2(%arg0: i32, %arg1: i32) -> (i32, i32) {
    %c0_i32 = arith.constant 0 : i32
    %c0_i32_0 = arith.constant 0 : i32
    %c0_i32_1 = arith.constant 0 : i32
    return %c0_i32, %c0_i32_0 : i32, i32
  }
  func.func @transform_3(%arg0: i32, %arg1: i32) -> (i32, i32, i32) {
    %c0_i32 = arith.constant 0 : i32
    %c0_i32_0 = arith.constant 0 : i32
    %c0_i32_1 = arith.constant 0 : i32
    return %arg0, %c0_i32, %c0_i32_0 : i32, i32, i32
  }
}

</mosaic_0001>

<bundles_post_ra>
// kernel: tpu_custom_call.1
= control target key start
LH: loop header
LB: loop body
LE: loop exit
PB: predicated region body
PF: predicated region fallthrough
CT: control target
= control target key end

     0   :  { %vm853_vm0 = vcmask 1040384   ;;  %v7788_v1 = vmov 0   ;;  %vm660_vm1 = vcmask 531456   ;;  %s14074_s0 = inlined_call_operand.vmem [shape: bf16[1024,65], index: 0, kind: input, shape index: {}]   ;;  %s14075_s1 = inlined_call_operand.vmem [shape: bf16[65,32], index: 1, kind: input, shape index: {}]   ;;  %s14076_s2 = inlined_call_operand.vmem [shape: f32[4,32], index: 2, kind: input, shape index: {}]   ;;  %s14077_s3 = inlined_call_operand.hbm [shape: f32[1,1,1], index: 3, kind: output, shape index: {}]  }
   0x1   :  { %v7056_v0 = vld [vmem:[%s14075_s1 + $0x20] ss:$0 sps:$4 sm:$0x11]   ;;  %v855_v2 = vsel %vm853_vm0, 65535, %v7788_v1  ;;  %v7057_v4 = vld [vmem:[%s14075_s1 + $0x18] sm:$0xff]   ;;  %v7058_v7 = vld [vmem:[%s14075_s1 + $0x10] sm:$0xff]  }
   0x2   :  { %v857_v3 = vand.u32 %v7056_v0, %v855_v2  ;;  %v171_v5 = vld [vmem:[%s14074_s0] sm:$0xff]   ;;  %v7059_v8 = vld [vmem:[%s14075_s1 + $0x8] sm:$0xff]   ;;  %v175_v12 = vld [vmem:[%s14074_s0 + $0x10] sm:$0xff]  }
   0x3   :  { %v235_v6 = vld [vmem:[%s14074_s0 + $0x100] sm:$0xff]   ;;  %6912 = vmatprep.mubr.msk.bf16.mxu0 %vm660_vm1, %v171_v5  ;;  %v173_v10 = vld [vmem:[%s14074_s0 + $0x8] sm:$0xff]   ;;  %v239_v13 = vld [vmem:[%s14074_s0 + $0x110] sm:$0xff]  }
   0x4   :  { %6902 = vmatprep.subr.bf16.mxu0 %v857_v3  ;;  %7040 = vmatprep.subr.bf16.mxu1 %v857_v3  ;;  %v7060_v9 = vld [vmem:[%s14075_s1] sm:$0xff]   ;;  %v237_v11 = vld [vmem:[%s14074_s0 + $0x108] sm:$0xff]  }
   0x5   :  { %6903 = vmatpush3.bf16.msra.mxu0 %v857_v3  ;;  %7045 = vmatpush3.bf16.msra.mxu1 %v857_v3 }
   0x6   :  { %6904 = vmatprep.subr.bf16.mxu0 %v7057_v4  ;;  %7041 = vmatprep.subr.bf16.mxu1 %v7057_v4 }
   0x7   :  { %6976 = vmatprep.mubr.msk.bf16.mxu1 %vm660_vm1, %v235_v6 }
   0x9   :  { %6905 = vmatpush3.bf16.msra.mxu0 %v7057_v4  ;;  %7046 = vmatpush3.bf16.msra.mxu1 %v7057_v4 }
   0xa   :  { %6906 = vmatprep.subr.bf16.mxu0 %v7058_v7  ;;  %7042 = vmatprep.subr.bf16.mxu1 %v7058_v7 }
   0xd   :  { %6907 = vmatpush3.bf16.msra.mxu0 %v7058_v7  ;;  %7047 = vmatpush3.bf16.msra.mxu1 %v7058_v7 }
   0xe   :  { %6908 = vmatprep.subr.bf16.mxu0 %v7059_v8  ;;  %7043 = vmatprep.subr.bf16.mxu1 %v7059_v8 }
  0x11   :  { %6909 = vmatpush3.bf16.msra.mxu0 %v7059_v8  ;;  %7048 = vmatpush3.bf16.msra.mxu1 %v7059_v8 }
  0x12   :  { %6910 = vmatprep.subr.bf16.mxu0 %v7060_v9  ;;  %7044 = vmatprep.subr.bf16.mxu1 %v7060_v9 }
  0x15   :  { %6911 = vmatpush3.bf16.msra.mxu0 %v7060_v9  ;;  %7049 = vmatpush3.bf16.msra.mxu1 %v7060_v9 }
  0x16   :  { %8 = vsyncpa [#allocation4], 0  ;;  %v177_v14 = vld [vmem:[%s14074_s0 + $0x18] sm:$0xff]   ;;  %v179_v16 = vld [vmem:[%s14074_s0 + $0x20] sm:$0xff]   ;;  %v309_v4 = vlaneseq  ;;  %vm1924_vm4 = vcmask 261120   ;;  %s7789_s10 = smov 64  }
  0x17   :  { %v241_v15 = vld [vmem:[%s14074_s0 + $0x118] sm:$0xff]   ;;  %v243_v17 = vld [vmem:[%s14074_s0 + $0x120] sm:$0xff]   ;;  %v181_v18 = vld [vmem:[%s14074_s0 + $0x28] sm:$0xff]  }
  0x18   :  { %6913 = vmatmul.mubr.msk.bf16.vlgmr.msra.gmra.mxu0 %vm660_vm1, %v173_v10  ;;  %6977 = vmatmul.mubr.msk.bf16.vlgmr.msra.gmra.mxu1 %vm660_vm1, %v237_v11  ;;  %v245_v19 = vld [vmem:[%s14074_s0 + $0x128] sm:$0xff]   ;;  %v183_v20 = vld [vmem:[%s14074_s0 + $0x30] sm:$0xff]   ;;  %v185_v22 = vld [vmem:[%s14074_s0 + $0x38] sm:$0xff]   ;;  %v8067_v5 = vshrl.u32 %v309_v4, 7 }
  0x19   :  { %6916 = vmatprep.mubr.msk.bf16.mxu0 %vm660_vm1, %v175_v12  ;;  %6980 = vmatprep.mubr.msk.bf16.mxu1 %vm660_vm1, %v239_v13  ;;  %v247_v21 = vld [vmem:[%s14074_s0 + $0x130] sm:$0xff]   ;;  %v249_v23 = vld [vmem:[%s14074_s0 + $0x138] sm:$0xff]   ;;  %v187_v24 = vld [vmem:[%s14074_s0 + $0x40] sm:$0xff]  }
  0x1a   :  { %v251_v25 = vld [vmem:[%s14074_s0 + $0x140] sm:$0xff]   ;;  %v189_v26 = vld [vmem:[%s14074_s0 + $0x48] sm:$0xff]   ;;  %v191_v28 = vld [vmem:[%s14074_s0 + $0x50] sm:$0xff]   ;;  %v311_v6 = vsub.s32 0, %v8067_v5  ;;  %v1534_v8 = vsub.s32 1, %v8067_v5  ;;  %v1794_v11 = vsub.s32 2, %v8067_v5 }
  0x1b   :  { %v253_v27 = vld [vmem:[%s14074_s0 + $0x148] sm:$0xff]   ;;  %v255_v29 = vld [vmem:[%s14074_s0 + $0x150] sm:$0xff]   ;;  %v193_v30 = vld [vmem:[%s14074_s0 + $0x58] sm:$0xff]  }
  0x1c   :  { %v257_v31 = vld [vmem:[%s14074_s0 + $0x158] sm:$0xff]   ;;  %v195_v32 = vld [vmem:[%s14074_s0 + $0x60] sm:$0xff]   ;;  %v197_v34 = vld [vmem:[%s14074_s0 + $0x68] sm:$0xff]  }
  0x1d   :  { %v259_v33 = vld [vmem:[%s14074_s0 + $0x160] sm:$0xff]   ;;  %v261_v35 = vld [vmem:[%s14074_s0 + $0x168] sm:$0xff]   ;;  %v199_v36 = vld [vmem:[%s14074_s0 + $0x70] sm:$0xff]  }
  0x1e   :  { %v263_v37 = vld [vmem:[%s14074_s0 + $0x170] sm:$0xff]   ;;  %v201_v38 = vld [vmem:[%s14074_s0 + $0x78] sm:$0xff]   ;;  %v203_v40 = vld [vmem:[%s14074_s0 + $0x80] sm:$0xff]  }
  0x1f   :  { %v265_v39 = vld [vmem:[%s14074_s0 + $0x178] sm:$0xff]   ;;  %v267_v41 = vld [vmem:[%s14074_s0 + $0x180] sm:$0xff]   ;;  %v205_v42 = vld [vmem:[%s14074_s0 + $0x88] sm:$0xff]  }
  0x20   :  { %6917 = vmatmul.mubr.msk.bf16.gmra.mxu0 %vm660_vm1, %v177_v14  ;;  %6981 = vmatmul.mubr.msk.bf16.gmra.mxu1 %vm660_vm1, %v241_v15  ;;  %v269_v43 = vld [vmem:[%s14074_s0 + $0x188] sm:$0xff]   ;;  %v207_v44 = vld [vmem:[%s14074_s0 + $0x90] sm:$0xff]   ;;  %v209_v46 = vld [vmem:[%s14074_s0 + $0x98] sm:$0xff]  }
  0x21   :  { %6920 = vmatprep.mubr.msk.bf16.mxu0 %vm660_vm1, %v179_v16  ;;  %6984 = vmatprep.mubr.msk.bf16.mxu1 %vm660_vm1, %v243_v17  ;;  %v271_v45 = vld [vmem:[%s14074_s0 + $0x190] sm:$0xff]   ;;  %v273_v47 = vld [vmem:[%s14074_s0 + $0x198] sm:$0xff]   ;;  %v211_v48 = vld [vmem:[%s14074_s0 + $0xa0] sm:$0xff]  }
  0x22   :  { %v275_v49 = vld [vmem:[%s14074_s0 + $0x1a0] sm:$0xff]   ;;  %v213_v50 = vld [vmem:[%s14074_s0 + $0xa8] sm:$0xff]   ;;  %v215_v52 = vld [vmem:[%s14074_s0 + $0xb0] sm:$0xff]  }
  0x23   :  { %v277_v51 = vld [vmem:[%s14074_s0 + $0x1a8] sm:$0xff]   ;;  %v279_v53 = vld [vmem:[%s14074_s0 + $0x1b0] sm:$0xff]   ;;  %v217_v54 = vld [vmem:[%s14074_s0 + $0xb8] sm:$0xff]  }
  0x24   :  { %v281_v55 = vld [vmem:[%s14074_s0 + $0x1b8] sm:$0xff]   ;;  %v219_v56 = vld [vmem:[%s14074_s0 + $0xc0] sm:$0xff]   ;;  %v221_v58 = vld [vmem:[%s14074_s0 + $0xc8] sm:$0xff]  }
  0x25   :  { %v283_v57 = vld [vmem:[%s14074_s0 + $0x1c0] sm:$0xff]   ;;  %v285_v59 = vld [vmem:[%s14074_s0 + $0x1c8] sm:$0xff]   ;;  %v223_v60 = vld [vmem:[%s14074_s0 + $0xd0] sm:$0xff]  }
  0x26   :  { %v287_v61 = vld [vmem:[%s14074_s0 + $0x1d0] sm:$0xff]   ;;  %v225_v62 = vld [vmem:[%s14074_s0 + $0xd8] sm:$0xff]   ;;  %v227_v0 = vld [vmem:[%s14074_s0 + $0xe0] sm:$0xff]  }
  0x27   :  { %v289_v63 = vld [vmem:[%s14074_s0 + $0x1d8] sm:$0xff]   ;;  %v229_v1 = vld [vmem:[%s14074_s0 + $0xe8] sm:$0xff]   ;;  %v231_v2 = vld [vmem:[%s14074_s0 + $0xf0] sm:$0xff]  }
  0x28   :  { %6921 = vmatmul.mubr.msk.bf16.gmra.mxu0 %vm660_vm1, %v181_v18  ;;  %6985 = vmatmul.mubr.msk.bf16.gmra.mxu1 %vm660_vm1, %v245_v19  ;;  %v233_v3 = vld [vmem:[%s14074_s0 + $0xf8] sm:$0xff]   ;;  %v299_v7 = vld [vmem:[%s14076_s2] sm:$0xf] }
  0x29   :  { %6924 = vmatprep.mubr.msk.bf16.mxu0 %vm660_vm1, %v183_v20  ;;  %6988 = vmatprep.mubr.msk.bf16.mxu1 %vm660_vm1, %v247_v21  ;;  %v8074_v9 = vrot.slane %v299_v7, %v311_v6  ;;  %v8076_v10 = vrot.slane %v299_v7, %v1534_v8  ;;  %v8083_v20 = vrot.slane %v299_v7, %v1794_v11 }
  0x2b   :  { %14167 = vst [vmem:[#allocation6_spill] sm:$0xff] %v8074_v9  ;;  %14168 = vst [vmem:[#allocation7_spill] sm:$0xff] %v8076_v10 }
  0x30   :  { %6925 = vmatmul.mubr.msk.bf16.gmra.mxu0 %vm660_vm1, %v185_v22  ;;  %6989 = vmatmul.mubr.msk.bf16.gmra.mxu1 %vm660_vm1, %v249_v23 }
  0x31   :  { %6928 = vmatprep.mubr.msk.bf16.mxu0 %vm660_vm1, %v187_v24  ;;  %6992 = vmatprep.mubr.msk.bf16.mxu1 %vm660_vm1, %v251_v25 }
  0x38   :  { %6929 = vmatmul.mubr.msk.bf16.gmra.mxu0 %vm660_vm1, %v189_v26  ;;  %6993 = vmatmul.mubr.msk.bf16.gmra.mxu1 %vm660_vm1, %v253_v27 }
  0x39   :  { %6932 = vmatprep.mubr.msk.bf16.mxu0 %vm660_vm1, %v191_v28  ;;  %6996 = vmatprep.mubr.msk.bf16.mxu1 %vm660_vm1, %v255_v29 }
  0x40   :  { %6933 = vmatmul.mubr.msk.bf16.gmra.mxu0 %vm660_vm1, %v193_v30  ;;  %6997 = vmatmul.mubr.msk.bf16.gmra.mxu1 %vm660_vm1, %v257_v31 }
  0x41   :  { %6936 = vmatprep.mubr.msk.bf16.mxu0 %vm660_vm1, %v195_v32  ;;  %7000 = vmatprep.mubr.msk.bf16.mxu1 %vm660_vm1, %v259_v33 }
  0x48   :  { %6937 = vmatmul.mubr.msk.bf16.gmra.mxu0 %vm660_vm1, %v197_v34  ;;  %7001 = vmatmul.mubr.msk.bf16.gmra.mxu1 %vm660_vm1, %v261_v35 }
  0x49   :  { %6940 = vmatprep.mubr.msk.bf16.mxu0 %vm660_vm1, %v199_v36  ;;  %7004 = vmatprep.mubr.msk.bf16.mxu1 %vm660_vm1, %v263_v37 }
  0x50   :  { %6941 = vmatmul.mubr.msk.bf16.gmra.mxu0 %vm660_vm1, %v201_v38  ;;  %7005 = vmatmul.mubr.msk.bf16.gmra.mxu1 %vm660_vm1, %v265_v39 }
  0x51   :  { %6944 = vmatprep.mubr.msk.bf16.mxu0 %vm660_vm1, %v203_v40  ;;  %7008 = vmatprep.mubr.msk.bf16.mxu1 %vm660_vm1, %v267_v41 }
  0x58   :  { %6945 = vmatmul.mubr.msk.bf16.gmra.mxu0 %vm660_vm1, %v205_v42  ;;  %7009 = vmatmul.mubr.msk.bf16.gmra.mxu1 %vm660_vm1, %v269_v43 }
  0x59   :  { %6948 = vmatprep.mubr.msk.bf16.mxu0 %vm660_vm1, %v207_v44  ;;  %7012 = vmatprep.mubr.msk.bf16.mxu1 %vm660_vm1, %v271_v45 }
  0x60   :  { %6949 = vmatmul.mubr.msk.bf16.gmra.mxu0 %vm660_vm1, %v209_v46  ;;  %7013 = vmatmul.mubr.msk.bf16.gmra.mxu1 %vm660_vm1, %v273_v47 }
  0x61   :  { %6952 = vmatprep.mubr.msk.bf16.mxu0 %vm660_vm1, %v211_v48  ;;  %7016 = vmatprep.mubr.msk.bf16.mxu1 %vm660_vm1, %v275_v49 }
  0x68   :  { %6953 = vmatmul.mubr.msk.bf16.gmra.mxu0 %vm660_vm1, %v213_v50  ;;  %7017 = vmatmul.mubr.msk.bf16.gmra.mxu1 %vm660_vm1, %v277_v51 }
  0x69   :  { %6956 = vmatprep.mubr.msk.bf16.mxu0 %vm660_vm1, %v215_v52  ;;  %7020 = vmatprep.mubr.msk.bf16.mxu1 %vm660_vm1, %v279_v53 }
  0x70   :  { %6957 = vmatmul.mubr.msk.bf16.gmra.mxu0 %vm660_vm1, %v217_v54  ;;  %7021 = vmatmul.mubr.msk.bf16.gmra.mxu1 %vm660_vm1, %v281_v55 }
  0x71   :  { %6960 = vmatprep.mubr.msk.bf16.mxu0 %vm660_vm1, %v219_v56  ;;  %7024 = vmatprep.mubr.msk.bf16.mxu1 %vm660_vm1, %v283_v57 }
  0x78   :  { %6961 = vmatmul.mubr.msk.bf16.gmra.mxu0 %vm660_vm1, %v221_v58  ;;  %7025 = vmatmul.mubr.msk.bf16.gmra.mxu1 %vm660_vm1, %v285_v59 }
  0x79   :  { %6964 = vmatprep.mubr.msk.bf16.mxu0 %vm660_vm1, %v223_v60  ;;  %7028 = vmatprep.mubr.msk.bf16.mxu1 %vm660_vm1, %v287_v61 }
  0x80   :  { %6965 = vmatmul.mubr.msk.bf16.gmra.mxu0 %vm660_vm1, %v225_v62  ;;  %7029 = vmatmul.mubr.msk.bf16.gmra.mxu1 %vm660_vm1, %v289_v63 }
  0x81   :  { %6968 = vmatprep.mubr.msk.bf16.mxu0 %vm660_vm1, %v227_v0 }
  0x88   :  { %6969 = vmatmul.mubr.msk.bf16.gmra.mxu0 %vm660_vm1, %v229_v1 }
  0x89   :  { %6972 = vmatprep.mubr.msk.bf16.mxu0 %vm660_vm1, %v231_v2 }
  0x90   :  { %6973 = vmatmul.mubr.msk.bf16.gmra.mxu0 %vm660_vm1, %v233_v3 }
  0xd8   :  { %v6914_v12 = vpop.f32.mrf.mxu0  ;;  %v6978_v13 = vpop.f32.mrf.mxu1 }
  0xd9   :  { %v902_v14 = vadd.f32 %v6914_v12, %v8074_v9  ;;  %v1158_v15 = vadd.f32 %v6978_v13, %v8074_v9 }
  0xda   :  { %v893_v16 = vpop.f32.mrf.mxu0  ;;  %v1149_v17 = vpop.f32.mrf.mxu1 }
  0xdb   :  { %v1538_v18 = vmul.f32 %v8076_v10, %v902_v14  ;;  %v1602_v19 = vmul.f32 %v8076_v10, %v1158_v15  ;;  %vm1470_vm2 = vcmp.ge.f32.partialorder %v1158_v15, 0.0  ;;  %vm1406_vm3 = vcmp.ge.f32.partialorder %v902_v14, 0.0 }
  0xdc   :  { %v6915_v21 = vpop.f32.mrf.mxu0  ;;  %v6979_v22 = vpop.f32.mrf.mxu1  ;;  %v894_v23 = vadd.f32 %v893_v16, %v8074_v9  ;;  %v1150_v34 = vadd.f32 %v1149_v17, %v8074_v9 }
  0xdd   :  { %v905_v24 = vadd.f32 %v6915_v21, %v8074_v9  ;;  %v1730_v26 = vsel %vm1470_vm2, %v1158_v15, %v1602_v19  ;;  %v1666_v27 = vsel %vm1406_vm3, %v902_v14, %v1538_v18  ;;  %v1161_v28 = vadd.f32 %v6979_v22, %v8074_v9 }
  0xde   :  { %v896_v25 = vpop.f32.mrf.mxu0  ;;  %v1152_v29 = vpop.f32.mrf.mxu1  ;;  %v1862_v30 = vmul.f32 %v8083_v20, %v1730_v26  ;;  %v1798_v31 = vmul.f32 %v8083_v20, %v1666_v27  ;;  %v1536_v35 = vmul.f32 %v8076_v10, %v894_v23  ;;  %vm1404_vm6 = vcmp.ge.f32.partialorder %v894_v23, 0.0 }
  0xdf   :  { %vm1407_vm5 = vcmp.ge.f32.partialorder %v905_v24, 0.0  ;;  %v1539_v32 = vmul.f32 %v8076_v10, %v905_v24  ;;  %v897_v36 = vadd.f32 %v896_v25, %v8074_v9  ;;  %v1603_v40 = vmul.f32 %v8076_v10, %v1161_v28 }
  0xe0   :  { %v6918_v33 = vpop.f32.mrf.mxu0  ;;  %v2123_v37 = vsel %vm1924_vm4, %v1862_v30, 0.0  ;;  %v1931_v38 = vsel %vm1924_vm4, %v1798_v31, 0.0  ;;  %v1153_v41 = vadd.f32 %v1152_v29, %v8074_v9  ;;  %v6982_v42 = vpop.f32.mrf.mxu1  ;;  %vm1471_vm7 = vcmp.ge.f32.partialorder %v1161_v28, 0.0 }
  0xe1   :  { %2124 = vadd.xlane.f32.xlu0 %v2123_v37  ;;  %1932 = vadd.xlane.f32.xlu1 %v1931_v38  ;;  %v1667_v43 = vsel %vm1407_vm5, %v905_v24, %v1539_v32  ;;  %vm1468_vm8 = vcmp.ge.f32.partialorder %v1150_v34, 0.0  ;;  %v1600_v45 = vmul.f32 %v8076_v10, %v1150_v34  ;;  %v1537_v46 = vmul.f32 %v8076_v10, %v897_v36 }
  0xe2   :  { %v909_v39 = vpop.f32.mrf.mxu0  ;;  %v918_v47 = vadd.f32 %v6918_v33, %v8074_v9  ;;  %v1799_v48 = vmul.f32 %v8083_v20, %v1667_v43  ;;  %v1664_v49 = vsel %vm1404_vm6, %v894_v23, %v1536_v35  ;;  %v1601_v50 = vmul.f32 %v8076_v10, %v1153_v41  ;;  %v1165_v51 = vpop.f32.mrf.mxu1 }
  0xe3   :  { %v1796_v53 = vmul.f32 %v8083_v20, %v1664_v49  ;;  %v1731_v54 = vsel %vm1471_vm7, %v1161_v28, %v1603_v40  ;;  %vm1405_vm9 = vcmp.ge.f32.partialorder %v897_v36, 0.0  ;;  %vm1469_vm10 = vcmp.ge.f32.partialorder %v1153_v41, 0.0 }
  0xe4   :  { %v6919_v44 = vpop.f32.mrf.mxu0  ;;  %v1934_v55 = vsel %vm1924_vm4, %v1799_v48, 0.0  ;;  %vm1410_vm11 = vcmp.ge.f32.partialorder %v918_v47, 0.0  ;;  %v1174_v58 = vadd.f32 %v6982_v42, %v8074_v9  ;;  %v1863_v59 = vmul.f32 %v8083_v20, %v1731_v54  ;;  %v6983_v62 = vpop.f32.mrf.mxu1 }
  0xe5   :  { %v921_v52 = vadd.f32 %v6919_v44, %v8074_v9  ;;  %v1925_v56 = vsel %vm1924_vm4, %v1796_v53, 0.0  ;;  %1935 = vadd.xlane.f32.xlu1 %v1934_v55  ;;  %v1728_v60 = vsel %vm1468_vm8, %v1150_v34, %v1600_v45  ;;  %v1729_v1 = vsel %vm1469_vm10, %v1153_v41, %v1601_v50 }
  0xe6   :  { %v912_v57 = vpop.f32.mrf.mxu0  ;;  %1926 = vadd.xlane.f32.xlu0 %v1925_v56  ;;  %v1860_v63 = vmul.f32 %v8083_v20, %v1728_v60  ;;  %v1665_v2 = vsel %vm1405_vm9, %v897_v36, %v1537_v46  ;;  %v1542_v3 = vmul.f32 %v8076_v10, %v918_v47  ;;  %v1177_v4 = vadd.f32 %v6983_v62, %v8074_v9  ;;  %v1168_v15 = vpop.f32.mrf.mxu1 }
  0xe7   :  { %v1543_v61 = vmul.f32 %v8076_v10, %v921_v52  ;;  %vm1411_vm12 = vcmp.ge.f32.partialorder %v921_v52, 0.0  ;;  %v913_v6 = vadd.f32 %v912_v57, %v8074_v9  ;;  %v2126_v7 = vsel %vm1924_vm4, %v1863_v59, 0.0 }
  0xe8   :  { %v6922_v0 = vpop.f32.mrf.mxu0  ;;  %v2117_v8 = vsel %vm1924_vm4, %v1860_v63, 0.0  ;;  %v1861_v11 = vmul.f32 %v8083_v20, %v1729_v1  ;;  %v1797_v12 = vmul.f32 %v8083_v20, %v1665_v2  ;;  %v910_v13 = vadd.f32 %v909_v39, %v8074_v9  ;;  %v6986_v25 = vpop.f32.mrf.mxu1 }
  0xe9   :  { %2127 = vadd.xlane.f32.xlu1 %v2126_v7  ;;  %vm1474_vm13 = vcmp.ge.f32.partialorder %v1174_v58, 0.0  ;;  %v1606_v14 = vmul.f32 %v8076_v10, %v1174_v58  ;;  %v1671_v17 = vsel %vm1411_vm12, %v921_v52, %v1543_v61  ;;  %vm1475_vm14 = vcmp.ge.f32.partialorder %v1177_v4, 0.0 }
  0xea   :  { %2118 = vadd.xlane.f32.xlu0 %v2117_v8  ;;  %v925_v16 = vpop.f32.mrf.mxu0  ;;  %v1607_v18 = vmul.f32 %v8076_v10, %v1177_v4  ;;  %v1803_v19 = vmul.f32 %v8083_v20, %v1671_v17  ;;  %v1670_v21 = vsel %vm1410_vm11, %v918_v47, %v1542_v3  ;;  %v1541_v22 = vmul.f32 %v8076_v10, %v913_v6  ;;  %v1181_v37 = vpop.f32.mrf.mxu1 }
  0xeb   :  { %v2120_v23 = vsel %vm1924_vm4, %v1861_v11, 0.0  ;;  %v1928_v24 = vsel %vm1924_vm4, %v1797_v12, 0.0  ;;  %v1802_v26 = vmul.f32 %v8083_v20, %v1670_v21  ;;  %v1540_v27 = vmul.f32 %v8076_v10, %v910_v13 }
  0xec   :  { %v1166_v28 = vadd.f32 %v1165_v51, %v8074_v9  ;;  %vm1409_vm15 = vcmp.ge.f32.partialorder %v913_v6, 0.0  ;;  %v1169_v29 = vadd.f32 %v1168_v15, %v8074_v9  ;;  %vm1408_vm0 = vcmp.ge.f32.partialorder %v910_v13, 0.0  ;;  %v6923_v31 = vpop.f32.mrf.mxu0  ;;  %v6987_v49 = vpop.f32.mrf.mxu1 }
  0xed   :  { %2121 = vadd.xlane.f32.xlu1 %v2120_v23  ;;  %v934_v30 = vadd.f32 %v6922_v0, %v8074_v9  ;;  %v937_v32 = vadd.f32 %v6923_v31, %v8074_v9  ;;  %v1946_v33 = vsel %vm1924_vm4, %v1803_v19, 0.0  ;;  %v1735_v34 = vsel %vm1475_vm14, %v1177_v4, %v1607_v18 }
  0xee   :  { %1929 = vadd.xlane.f32.xlu0 %v1928_v24  ;;  %v1734_v35 = vsel %vm1474_vm13, %v1174_v58, %v1606_v14  ;;  %v1943_v36 = vsel %vm1924_vm4, %v1802_v26, 0.0  ;;  %v1867_v38 = vmul.f32 %v8083_v20, %v1735_v34  ;;  %v1669_v40 = vsel %vm1409_vm15, %v913_v6, %v1541_v22  ;;  %v928_v48 = vpop.f32.mrf.mxu0  ;;  %v1184_v3 = vpop.f32.mrf.mxu1 }
  0xef   :  { %v1866_v39 = vmul.f32 %v8083_v20, %v1734_v35  ;;  %v1604_v41 = vmul.f32 %v8076_v10, %v1166_v28  ;;  %v1605_v42 = vmul.f32 %v8076_v10, %v1169_v29  ;;  %v1668_v43 = vsel %vm1408_vm0, %v910_v13, %v1540_v27 }
  0xf0   :  { %vm1472_vm2 = vcmp.ge.f32.partialorder %v1166_v28, 0.0  ;;  %vm1473_vm3 = vcmp.ge.f32.partialorder %v1169_v29, 0.0  ;;  %v1546_v44 = vmul.f32 %v8076_v10, %v934_v30  ;;  %v1547_v45 = vmul.f32 %v8076_v10, %v937_v32  ;;  %v6926_v56 = vpop.f32.mrf.mxu0  ;;  %v6990_v14 = vpop.f32.mrf.mxu1 }
  0xf1   :  { %1947 = vadd.xlane.f32.xlu1 %v1946_v33  ;;  %v1801_v46 = vmul.f32 %v8083_v20, %v1669_v40  ;;  %v1190_v47 = vadd.f32 %v6986_v25, %v8074_v9  ;;  %v2138_v50 = vsel %vm1924_vm4, %v1867_v38, 0.0  ;;  %v2135_v51 = vsel %vm1924_vm4, %v1866_v39, 0.0 }
  0xf2   :  { %1944 = vadd.xlane.f32.xlu0 %v1943_v36  ;;  %v1800_v52 = vmul.f32 %v8083_v20, %v1668_v43  ;;  %vm1415_vm5 = vcmp.ge.f32.partialorder %v937_v32, 0.0  ;;  %v1193_v53 = vadd.f32 %v6987_v49, %v8074_v9  ;;  %v1733_v54 = vsel %vm1473_vm3, %v1169_v29, %v1605_v42  ;;  %v941_v4 = vpop.f32.mrf.mxu0  ;;  %v1197_v25 = vpop.f32.mrf.mxu1 }
  0xf3   :  { %v1732_v55 = vsel %vm1472_vm2, %v1166_v28, %v1604_v41  ;;  %vm1414_vm6 = vcmp.ge.f32.partialorder %v934_v30, 0.0  ;;  %v926_v57 = vadd.f32 %v925_v16, %v8074_v9  ;;  %v929_v58 = vadd.f32 %v928_v48, %v8074_v9 }
  0xf4   :  { %v1940_v59 = vsel %vm1924_vm4, %v1801_v46, 0.0  ;;  %v1937_v60 = vsel %vm1924_vm4, %v1800_v52, 0.0  ;;  %v1865_v61 = vmul.f32 %v8083_v20, %v1733_v54  ;;  %v1864_v62 = vmul.f32 %v8083_v20, %v1732_v55  ;;  %v6927_v19 = vpop.f32.mrf.mxu0 }
  0xf5   :  { %2139 = vadd.xlane.f32.xlu1 %v2138_v50  ;;  %v1675_v63 = vsel %vm1415_vm5, %v937_v32, %v1547_v45  ;;  %v1610_v0 = vmul.f32 %v8076_v10, %v1190_v47  ;;  %v1611_v1 = vmul.f32 %v8076_v10, %v1193_v53  ;;  %v1674_v2 = vsel %vm1414_vm6, %v934_v30, %v1546_v44 }
  0xf6   :  { %2136 = vadd.xlane.f32.xlu0 %v2135_v51  ;;  %vm1478_vm7 = vcmp.ge.f32.partialorder %v1190_v47, 0.0  ;;  %vm1479_vm8 = vcmp.ge.f32.partialorder %v1193_v53, 0.0  ;;  %v1544_v6 = vmul.f32 %v8076_v10, %v926_v57  ;;  %v1182_v7 = vadd.f32 %v1181_v37, %v8074_v9  ;;  %v944_v36 = vpop.f32.mrf.mxu0  ;;  %v6991_v37 = vpop.f32.mrf.mxu1 }
  0xf7   :  { %v1807_v8 = vmul.f32 %v8083_v20, %v1675_v63  ;;  %v1545_v11 = vmul.f32 %v8076_v10, %v929_v58  ;;  %v2132_v12 = vsel %vm1924_vm4, %v1865_v61, 0.0  ;;  %v2129_v13 = vsel %vm1924_vm4, %v1864_v62, 0.0 }
  0xf8   :  { %v1806_v15 = vmul.f32 %v8083_v20, %v1674_v2  ;;  %vm1413_vm9 = vcmp.ge.f32.partialorder %v929_v58, 0.0  ;;  %v1185_v16 = vadd.f32 %v1184_v3, %v8074_v9  ;;  %v1739_v17 = vsel %vm1479_vm8, %v1193_v53, %v1611_v1  ;;  %v6930_v44 = vpop.f32.mrf.mxu0  ;;  %v1200_v55 = vpop.f32.mrf.mxu1 }
  0xf9   :  { %1941 = vadd.xlane.f32.xlu1 %v1940_v59  ;;  %v1738_v18 = vsel %vm1478_vm7, %v1190_v47, %v1610_v0  ;;  %vm1412_vm10 = vcmp.ge.f32.partialorder %v926_v57, 0.0  ;;  %v950_v21 = vadd.f32 %v6926_v56, %v8074_v9  ;;  %v953_v22 = vadd.f32 %v6927_v19, %v8074_v9 }
  0xfa   :  { %1938 = vadd.xlane.f32.xlu0 %v1937_v60  ;;  %v1958_v23 = vsel %vm1924_vm4, %v1807_v8, 0.0  ;;  %v1955_v24 = vsel %vm1924_vm4, %v1806_v15, 0.0  ;;  %v1871_v26 = vmul.f32 %v8083_v20, %v1739_v17  ;;  %v1870_v27 = vmul.f32 %v8083_v20, %v1738_v18  ;;  %v957_v56 = vpop.f32.mrf.mxu0  ;;  %v6994_v63 = vpop.f32.mrf.mxu1 }
  0xfb   :  { %v1673_v28 = vsel %vm1413_vm9, %v929_v58, %v1545_v11  ;;  %v1608_v29 = vmul.f32 %v8076_v10, %v1182_v7  ;;  %v1609_v30 = vmul.f32 %v8076_v10, %v1185_v16  ;;  %v1672_v31 = vsel %vm1412_vm10, %v926_v57, %v1544_v6 }
  0xfc   :  { %vm1476_vm11 = vcmp.ge.f32.partialorder %v1182_v7, 0.0  ;;  %vm1477_vm12 = vcmp.ge.f32.partialorder %v1185_v16, 0.0  ;;  %v1550_v32 = vmul.f32 %v8076_v10, %v950_v21  ;;  %v1206_v33 = vadd.f32 %v6990_v14, %v8074_v9 }
  0xfd   :  { %2133 = vadd.xlane.f32.xlu1 %v2132_v12  ;;  %v1805_v34 = vmul.f32 %v8083_v20, %v1673_v28  ;;  %v1551_v35 = vmul.f32 %v8076_v10, %v953_v22  ;;  %v2150_v38 = vsel %vm1924_vm4, %v1871_v26, 0.0  ;;  %v2147_v39 = vsel %vm1924_vm4, %v1870_v27, 0.0  ;;  %v1213_v12 = vpop.f32.mrf.mxu1 }
  0xfe   :  { %2130 = vadd.xlane.f32.xlu0 %v2129_v13  ;;  %v1804_v40 = vmul.f32 %v8083_v20, %v1672_v31  ;;  %vm1419_vm13 = vcmp.ge.f32.partialorder %v953_v22, 0.0  ;;  %v1209_v41 = vadd.f32 %v6991_v37, %v8074_v9  ;;  %v1737_v42 = vsel %vm1477_vm12, %v1185_v16, %v1609_v30 }
  0xff   :  { %v1736_v43 = vsel %vm1476_vm11, %v1182_v7, %v1608_v29  ;;  %vm1418_vm14 = vcmp.ge.f32.partialorder %v950_v21, 0.0  ;;  %v942_v45 = vadd.f32 %v941_v4, %v8074_v9  ;;  %v945_v46 = vadd.f32 %v944_v36, %v8074_v9  ;;  %v6931_v4 = vpop.f32.mrf.mxu0 }
 0x100   :  { %v1952_v47 = vsel %vm1924_vm4, %v1805_v34, 0.0  ;;  %v1949_v48 = vsel %vm1924_vm4, %v1804_v40, 0.0  ;;  %v1869_v49 = vmul.f32 %v8083_v20, %v1737_v42  ;;  %v1868_v50 = vmul.f32 %v8083_v20, %v1736_v43 }
 0x101   :  { %1959 = vadd.xlane.f32.xlu1 %v1958_v23  ;;  %v1679_v51 = vsel %vm1419_vm13, %v953_v22, %v1551_v35  ;;  %v1614_v52 = vmul.f32 %v8076_v10, %v1206_v33  ;;  %v1615_v53 = vmul.f32 %v8076_v10, %v1209_v41  ;;  %v1678_v54 = vsel %vm1418_vm14, %v950_v21, %v1550_v32  ;;  %v960_v22 = vpop.f32.mrf.mxu0 }
 0x102   :  { %1956 = vadd.xlane.f32.xlu0 %v1955_v24  ;;  %vm1482_vm15 = vcmp.ge.f32.partialorder %v1206_v33, 0.0  ;;  %vm1483_vm0 = vcmp.ge.f32.partialorder %v1209_v41, 0.0  ;;  %v1548_v57 = vmul.f32 %v8076_v10, %v942_v45  ;;  %v1198_v58 = vadd.f32 %v1197_v25, %v8074_v9  ;;  %v6995_v25 = vpop.f32.mrf.mxu1 }
 0x103   :  { %v1811_v59 = vmul.f32 %v8083_v20, %v1679_v51  ;;  %v1549_v60 = vmul.f32 %v8076_v10, %v945_v46  ;;  %v2144_v61 = vsel %vm1924_vm4, %v1869_v49, 0.0  ;;  %v2141_v62 = vsel %vm1924_vm4, %v1868_v50, 0.0  ;;  %v6934_v30 = vpop.f32.mrf.mxu0 }
 0x104   :  { %v1810_v0 = vmul.f32 %v8083_v20, %v1678_v54  ;;  %vm1417_vm2 = vcmp.ge.f32.partialorder %v945_v46, 0.0  ;;  %v1201_v1 = vadd.f32 %v1200_v55, %v8074_v9  ;;  %v1743_v2 = vsel %vm1483_vm0, %v1209_v41, %v1615_v53 }
 0x105   :  { %2151 = vadd.xlane.f32.xlu1 %v2150_v38  ;;  %v1742_v3 = vsel %vm1482_vm15, %v1206_v33, %v1614_v52  ;;  %vm1416_vm3 = vcmp.ge.f32.partialorder %v942_v45, 0.0  ;;  %v966_v6 = vadd.f32 %v6930_v44, %v8074_v9  ;;  %v969_v7 = vadd.f32 %v6931_v4, %v8074_v9  ;;  %v973_v42 = vpop.f32.mrf.mxu0  ;;  %v1216_v44 = vpop.f32.mrf.mxu1 }
 0x106   :  { %2148 = vadd.xlane.f32.xlu0 %v2147_v39  ;;  %v1970_v8 = vsel %vm1924_vm4, %v1811_v59, 0.0  ;;  %v1967_v11 = vsel %vm1924_vm4, %v1810_v0, 0.0  ;;  %v1875_v13 = vmul.f32 %v8083_v20, %v1743_v2  ;;  %v1874_v14 = vmul.f32 %v8083_v20, %v1742_v3 }
 0x107   :  { %v1677_v15 = vsel %vm1417_vm2, %v945_v46, %v1549_v60  ;;  %v1612_v16 = vmul.f32 %v8076_v10, %v1198_v58  ;;  %v1613_v17 = vmul.f32 %v8076_v10, %v1201_v1  ;;  %v1676_v18 = vsel %vm1416_vm3, %v942_v45, %v1548_v57  ;;  %v6998_v51 = vpop.f32.mrf.mxu1  ;;  %v6935_v54 = vpop.f32.mrf.mxu0 }
 0x108   :  { %vm1480_vm5 = vcmp.ge.f32.partialorder %v1198_v58, 0.0  ;;  %vm1481_vm6 = vcmp.ge.f32.partialorder %v1201_v1, 0.0  ;;  %v1554_v19 = vmul.f32 %v8076_v10, %v966_v6  ;;  %v1222_v21 = vadd.f32 %v6994_v63, %v8074_v9 }
 0x109   :  { %1953 = vadd.xlane.f32.xlu1 %v1952_v47  ;;  %v1809_v23 = vmul.f32 %v8083_v20, %v1677_v15  ;;  %v1555_v24 = vmul.f32 %v8076_v10, %v969_v7  ;;  %v2162_v26 = vsel %vm1924_vm4, %v1875_v13, 0.0  ;;  %v2159_v27 = vsel %vm1924_vm4, %v1874_v14, 0.0  ;;  %v976_v3 = vpop.f32.mrf.mxu0 }
 0x10a   :  { %1950 = vadd.xlane.f32.xlu0 %v1949_v48  ;;  %v1808_v28 = vmul.f32 %v8083_v20, %v1676_v18  ;;  %vm1423_vm7 = vcmp.ge.f32.partialorder %v969_v7, 0.0  ;;  %v1225_v29 = vadd.f32 %v6995_v25, %v8074_v9  ;;  %v1741_v31 = vsel %vm1481_vm6, %v1201_v1, %v1613_v17 }
 0x10b   :  { %v1740_v32 = vsel %vm1480_vm5, %v1198_v58, %v1612_v16  ;;  %vm1422_vm8 = vcmp.ge.f32.partialorder %v966_v6, 0.0  ;;  %v958_v33 = vadd.f32 %v957_v56, %v8074_v9  ;;  %v961_v34 = vadd.f32 %v960_v22, %v8074_v9 }
 0x10c   :  { %v1964_v35 = vsel %vm1924_vm4, %v1809_v23, 0.0  ;;  %v1961_v36 = vsel %vm1924_vm4, %v1808_v28, 0.0  ;;  %v1873_v37 = vmul.f32 %v8083_v20, %v1741_v31  ;;  %v1872_v38 = vmul.f32 %v8083_v20, %v1740_v32 }
 0x10d   :  { %2145 = vadd.xlane.f32.xlu1 %v2144_v61  ;;  %v1683_v39 = vsel %vm1423_vm7, %v969_v7, %v1555_v24  ;;  %v1618_v40 = vmul.f32 %v8076_v10, %v1222_v21  ;;  %v1619_v41 = vmul.f32 %v8076_v10, %v1225_v29  ;;  %v1682_v43 = vsel %vm1422_vm8, %v966_v6, %v1554_v19  ;;  %v1229_v61 = vpop.f32.mrf.mxu1 }
 0x10e   :  { %2142 = vadd.xlane.f32.xlu0 %v2141_v62  ;;  %vm1486_vm9 = vcmp.ge.f32.partialorder %v1222_v21, 0.0  ;;  %vm1487_vm10 = vcmp.ge.f32.partialorder %v1225_v29, 0.0  ;;  %v1552_v45 = vmul.f32 %v8076_v10, %v958_v33  ;;  %v1214_v46 = vadd.f32 %v1213_v12, %v8074_v9 }
 0x10f   :  { %v1815_v47 = vmul.f32 %v8083_v20, %v1683_v39  ;;  %v1553_v48 = vmul.f32 %v8076_v10, %v961_v34  ;;  %v2156_v49 = vsel %vm1924_vm4, %v1873_v37, 0.0  ;;  %v2153_v50 = vsel %vm1924_vm4, %v1872_v38, 0.0  ;;  %v6999_v13 = vpop.f32.mrf.mxu1 }
 0x110   :  { %v1814_v52 = vmul.f32 %v8083_v20, %v1682_v43  ;;  %vm1421_vm11 = vcmp.ge.f32.partialorder %v961_v34, 0.0  ;;  %v1217_v53 = vadd.f32 %v1216_v44, %v8074_v9  ;;  %v1747_v55 = vsel %vm1487_vm10, %v1225_v29, %v1619_v41 }
 0x111   :  { %1971 = vadd.xlane.f32.xlu1 %v1970_v8  ;;  %v1746_v56 = vsel %vm1486_vm9, %v1222_v21, %v1618_v40  ;;  %vm1420_vm12 = vcmp.ge.f32.partialorder %v958_v33, 0.0  ;;  %v982_v57 = vadd.f32 %v6934_v30, %v8074_v9  ;;  %v985_v58 = vadd.f32 %v6935_v54, %v8074_v9  ;;  %v1232_v32 = vpop.f32.mrf.mxu1 }
 0x112   :  { %1968 = vadd.xlane.f32.xlu0 %v1967_v11  ;;  %v1982_v59 = vsel %vm1924_vm4, %v1815_v47, 0.0  ;;  %v1979_v60 = vsel %vm1924_vm4, %v1814_v52, 0.0  ;;  %v1879_v62 = vmul.f32 %v8083_v20, %v1747_v55  ;;  %v1878_v63 = vmul.f32 %v8083_v20, %v1746_v56  ;;  %v6938_v11 = vpop.f32.mrf.mxu0 }
 0x113   :  { %v1681_v0 = vsel %vm1421_vm11, %v961_v34, %v1553_v48  ;;  %v1616_v1 = vmul.f32 %v8076_v10, %v1214_v46  ;;  %v1617_v2 = vmul.f32 %v8076_v10, %v1217_v53  ;;  %v1680_v4 = vsel %vm1420_vm12, %v958_v33, %v1552_v45  ;;  %v7002_v40 = vpop.f32.mrf.mxu1 }
 0x114   :  { %vm1484_vm13 = vcmp.ge.f32.partialorder %v1214_v46, 0.0  ;;  %vm1485_vm14 = vcmp.ge.f32.partialorder %v1217_v53, 0.0  ;;  %v1558_v6 = vmul.f32 %v8076_v10, %v982_v57  ;;  %v1238_v7 = vadd.f32 %v6998_v51, %v8074_v9  ;;  %v989_v24 = vpop.f32.mrf.mxu0 }
 0x115   :  { %2163 = vadd.xlane.f32.xlu1 %v2162_v26  ;;  %v1813_v8 = vmul.f32 %v8083_v20, %v1681_v0  ;;  %v1559_v12 = vmul.f32 %v8076_v10, %v985_v58  ;;  %v2174_v14 = vsel %vm1924_vm4, %v1879_v62, 0.0  ;;  %v2171_v15 = vsel %vm1924_vm4, %v1878_v63, 0.0 }
 0x116   :  { %2160 = vadd.xlane.f32.xlu0 %v2159_v27  ;;  %v1812_v16 = vmul.f32 %v8083_v20, %v1680_v4  ;;  %vm1427_vm15 = vcmp.ge.f32.partialorder %v985_v58, 0.0  ;;  %v1241_v17 = vadd.f32 %v6999_v13, %v8074_v9  ;;  %v1745_v18 = vsel %vm1485_vm14, %v1217_v53, %v1617_v2 }
 0x117   :  { %v1744_v19 = vsel %vm1484_vm13, %v1214_v46, %v1616_v1  ;;  %vm1426_vm0 = vcmp.ge.f32.partialorder %v982_v57, 0.0  ;;  %v974_v21 = vadd.f32 %v973_v42, %v8074_v9  ;;  %v977_v22 = vadd.f32 %v976_v3, %v8074_v9 }
 0x118   :  { %v1976_v23 = vsel %vm1924_vm4, %v1813_v8, 0.0  ;;  %v1973_v25 = vsel %vm1924_vm4, %v1812_v16, 0.0  ;;  %v1877_v26 = vmul.f32 %v8083_v20, %v1745_v18  ;;  %v1876_v27 = vmul.f32 %v8083_v20, %v1744_v19 }
 0x119   :  { %1965 = vadd.xlane.f32.xlu1 %v1964_v35  ;;  %v1687_v28 = vsel %vm1427_vm15, %v985_v58, %v1559_v12  ;;  %v1622_v29 = vmul.f32 %v8076_v10, %v1238_v7  ;;  %v1623_v30 = vmul.f32 %v8076_v10, %v1241_v17  ;;  %v1686_v31 = vsel %vm1426_vm0, %v982_v57, %v1558_v6  ;;  %v6939_v35 = vpop.f32.mrf.mxu0 }
 0x11a   :  { %1962 = vadd.xlane.f32.xlu0 %v1961_v36  ;;  %vm1490_vm2 = vcmp.ge.f32.partialorder %v1238_v7, 0.0  ;;  %vm1491_vm3 = vcmp.ge.f32.partialorder %v1241_v17, 0.0  ;;  %v1556_v33 = vmul.f32 %v8076_v10, %v974_v21  ;;  %v1230_v34 = vadd.f32 %v1229_v61, %v8074_v9 }
 0x11b   :  { %v1819_v36 = vmul.f32 %v8083_v20, %v1687_v28  ;;  %v1557_v37 = vmul.f32 %v8076_v10, %v977_v22  ;;  %v2168_v38 = vsel %vm1924_vm4, %v1877_v26, 0.0  ;;  %v2165_v39 = vsel %vm1924_vm4, %v1876_v27, 0.0  ;;  %v992_v48 = vpop.f32.mrf.mxu0 }
 0x11c   :  { %v1818_v41 = vmul.f32 %v8083_v20, %v1686_v31  ;;  %vm1425_vm5 = vcmp.ge.f32.partialorder %v977_v22, 0.0  ;;  %v1233_v42 = vadd.f32 %v1232_v32, %v8074_v9  ;;  %v1751_v43 = vsel %vm1491_vm3, %v1241_v17, %v1623_v30 }
 0x11d   :  { %2157 = vadd.xlane.f32.xlu1 %v2156_v49  ;;  %v1750_v44 = vsel %vm1490_vm2, %v1238_v7, %v1622_v29  ;;  %vm1424_vm6 = vcmp.ge.f32.partialorder %v974_v21, 0.0  ;;  %v998_v45 = vadd.f32 %v6938_v11, %v8074_v9  ;;  %v1001_v46 = vadd.f32 %v6939_v35, %v8074_v9  ;;  %v6942_v57 = vpop.f32.mrf.mxu0 }
 0x11e   :  { %2154 = vadd.xlane.f32.xlu0 %v2153_v50  ;;  %v1994_v47 = vsel %vm1924_vm4, %v1819_v36, 0.0  ;;  %v1991_v49 = vsel %vm1924_vm4, %v1818_v41, 0.0  ;;  %v1245_v50 = vpop.f32.mrf.mxu1  ;;  %v1883_v51 = vmul.f32 %v8083_v20, %v1751_v43  ;;  %v1882_v52 = vmul.f32 %v8083_v20, %v1750_v44 }
 0x11f   :  { %v1685_v53 = vsel %vm1425_vm5, %v977_v22, %v1557_v37  ;;  %v1620_v54 = vmul.f32 %v8076_v10, %v1230_v34  ;;  %v1621_v55 = vmul.f32 %v8076_v10, %v1233_v42  ;;  %v1684_v56 = vsel %vm1424_vm6, %v974_v21, %v1556_v33  ;;  %v8287_v6 = vpop.f32.mrf.mxu0 }
 0x120   :  { %vm1488_vm7 = vcmp.ge.f32.partialorder %v1230_v34, 0.0  ;;  %vm1489_vm8 = vcmp.ge.f32.partialorder %v1233_v42, 0.0  ;;  %v1562_v58 = vmul.f32 %v8076_v10, %v998_v45  ;;  %v1563_v61 = vmul.f32 %v8076_v10, %v1001_v46  ;;  %v7003_v62 = vpop.f32.mrf.mxu1 }
 0x121   :  { %1983 = vadd.xlane.f32.xlu1 %v1982_v59  ;;  %v1254_v59 = vadd.f32 %v7002_v40, %v8074_v9  ;;  %v2186_v63 = vsel %vm1924_vm4, %v1883_v51, 0.0  ;;  %v2183_v0 = vsel %vm1924_vm4, %v1882_v52, 0.0  ;;  %v1816_v1 = vmul.f32 %v8083_v20, %v1684_v56  ;;  %v6943_v18 = vpop.f32.mrf.mxu0 }
 0x122   :  { %1980 = vadd.xlane.f32.xlu0 %v1979_v60  ;;  %v1817_v60 = vmul.f32 %v8083_v20, %v1685_v53  ;;  %vm1431_vm9 = vcmp.ge.f32.partialorder %v1001_v46, 0.0  ;;  %v1257_v2 = vadd.f32 %v7003_v62, %v8074_v9  ;;  %v1749_v3 = vsel %vm1489_vm8, %v1233_v42, %v1621_v55  ;;  %v1248_v21 = vpop.f32.mrf.mxu1 }
 0x123   :  { %v1748_v4 = vsel %vm1488_vm7, %v1230_v34, %v1620_v54  ;;  %vm1430_vm10 = vcmp.ge.f32.partialorder %v998_v45, 0.0  ;;  %v990_v7 = vadd.f32 %v989_v24, %v8074_v9  ;;  %v993_v8 = vadd.f32 %v992_v48, %v8074_v9  ;;  %v1008_v31 = vpop.f32.mrf.mxu0 }
 0x124   :  { %v1988_v11 = vsel %vm1924_vm4, %v1817_v60, 0.0  ;;  %v1985_v12 = vsel %vm1924_vm4, %v1816_v1, 0.0  ;;  %v1881_v13 = vmul.f32 %v8083_v20, %v1749_v3  ;;  %v1626_v16 = vmul.f32 %v8076_v10, %v1254_v59  ;;  %v7006_v28 = vpop.f32.mrf.mxu1 }
 0x125   :  { %2175 = vadd.xlane.f32.xlu1 %v2174_v14  ;;  %v1880_v14 = vmul.f32 %v8083_v20, %v1748_v4  ;;  %v1627_v17 = vmul.f32 %v8076_v10, %v1257_v2  ;;  %v1690_v19 = vsel %vm1430_vm10, %v998_v45, %v1562_v58  ;;  %vm1494_vm11 = vcmp.ge.f32.partialorder %v1254_v59, 0.0  ;;  %v6946_v37 = vpop.f32.mrf.mxu0 }
 0x126   :  { %2172 = vadd.xlane.f32.xlu0 %v2171_v15  ;;  %v1691_v15 = vsel %vm1431_vm9, %v1001_v46, %v1563_v61  ;;  %vm1495_vm12 = vcmp.ge.f32.partialorder %v1257_v2, 0.0  ;;  %v1560_v22 = vmul.f32 %v8076_v10, %v990_v7  ;;  %v2180_v26 = vsel %vm1924_vm4, %v1881_v13, 0.0 }
 0x127   :  { %v1823_v24 = vmul.f32 %v8083_v20, %v1691_v15  ;;  %v2177_v27 = vsel %vm1924_vm4, %v1880_v14, 0.0  ;;  %v1822_v29 = vmul.f32 %v8083_v20, %v1690_v19  ;;  %vm1429_vm13 = vcmp.ge.f32.partialorder %v993_v8, 0.0 }
 0x128   :  { %v1249_v30 = vadd.f32 %v1248_v21, %v8074_v9  ;;  %v1755_v32 = vsel %vm1495_vm12, %v1257_v2, %v1627_v17  ;;  %v1754_v33 = vsel %vm1494_vm11, %v1254_v59, %v1626_v16  ;;  %vm1428_vm14 = vcmp.ge.f32.partialorder %v990_v7, 0.0 }
 0x129   :  { %1977 = vadd.xlane.f32.xlu1 %v1976_v23  ;;  %v1246_v23 = vadd.f32 %v1245_v50, %v8074_v9  ;;  %v1014_v34 = vadd.f32 %v6942_v57, %v8074_v9  ;;  %v1017_v35 = vadd.f32 %v6943_v18, %v8074_v9  ;;  %v2006_v36 = vsel %vm1924_vm4, %v1823_v24, 0.0 }
 0x12a   :  { %1974 = vadd.xlane.f32.xlu0 %v1973_v25  ;;  %v1561_v25 = vmul.f32 %v8076_v10, %v993_v8  ;;  %v1887_v40 = vmul.f32 %v8083_v20, %v1755_v32  ;;  %v1886_v41 = vmul.f32 %v8083_v20, %v1754_v33  ;;  %v1625_v44 = vmul.f32 %v8076_v10, %v1249_v30 }
 0x12b   :  { %v1624_v43 = vmul.f32 %v8076_v10, %v1246_v23  ;;  %v1688_v45 = vsel %vm1428_vm14, %v990_v7, %v1560_v22  ;;  %vm1492_vm15 = vcmp.ge.f32.partialorder %v1246_v23, 0.0  ;;  %vm1493_vm0 = vcmp.ge.f32.partialorder %v1249_v30, 0.0 }
 0x12c   :  { %v1689_v42 = vsel %vm1429_vm13, %v993_v8, %v1561_v25  ;;  %v1566_v46 = vmul.f32 %v8076_v10, %v1014_v34  ;;  %v1567_v50 = vmul.f32 %v8076_v10, %v1017_v35  ;;  %v2198_v52 = vsel %vm1924_vm4, %v1887_v40, 0.0 }
 0x12d   :  { %2169 = vadd.xlane.f32.xlu1 %v2168_v38  ;;  %v2003_v38 = vsel %vm1924_vm4, %v1822_v29, 0.0  ;;  %v1821_v48 = vmul.f32 %v8083_v20, %v1689_v42  ;;  %v2195_v53 = vsel %vm1924_vm4, %v1886_v41, 0.0  ;;  %v1820_v54 = vmul.f32 %v8083_v20, %v1688_v45 }
 0x12e   :  { %2166 = vadd.xlane.f32.xlu0 %v2165_v39  ;;  %v1261_v39 = vpop.f32.mrf.mxu1  ;;  %vm1435_vm2 = vcmp.ge.f32.partialorder %v1017_v35, 0.0  ;;  %v1753_v56 = vsel %vm1493_vm0, %v1249_v30, %v1625_v44  ;;  %v1752_v57 = vsel %vm1492_vm15, %v1246_v23, %v1624_v43  ;;  %vm1434_vm3 = vcmp.ge.f32.partialorder %v1014_v34, 0.0 }
 0x12f   :  { %v1006_v58 = vadd.f32 %v8287_v6, %v8074_v9  ;;  %v1009_v59 = vadd.f32 %v1008_v31, %v8074_v9  ;;  %v2000_v60 = vsel %vm1924_vm4, %v1821_v48, 0.0  ;;  %v1997_v62 = vsel %vm1924_vm4, %v1820_v54, 0.0 }
 0x130   :  { %v7007_v51 = vpop.f32.mrf.mxu1  ;;  %v1695_v1 = vsel %vm1435_vm2, %v1017_v35, %v1567_v50  ;;  %v1694_v4 = vsel %vm1434_vm3, %v1014_v34, %v1566_v46  ;;  %v1262_v8 = vadd.f32 %v1261_v39, %v8074_v9  ;;  %v1030_v23 = vadd.f32 %v6946_v37, %v8074_v9 }
 0x131   :  { %1995 = vadd.xlane.f32.xlu1 %v1994_v47  ;;  %v1270_v47 = vadd.f32 %v7006_v28, %v8074_v9  ;;  %v1273_v55 = vadd.f32 %v7007_v51, %v8074_v9  ;;  %v1564_v7 = vmul.f32 %v8076_v10, %v1006_v58  ;;  %v1565_v13 = vmul.f32 %v8076_v10, %v1009_v59 }
 0x132   :  { %1992 = vadd.xlane.f32.xlu0 %v1991_v49  ;;  %v8318_v49 = vpop.f32.mrf.mxu0  ;;  %v1264_v6 = vpop.f32.mrf.mxu1  ;;  %v1826_v17 = vmul.f32 %v8083_v20, %v1694_v4  ;;  %vm1433_vm7 = vcmp.ge.f32.partialorder %v1009_v59, 0.0  ;;  %vm1432_vm8 = vcmp.ge.f32.partialorder %v1006_v58, 0.0  ;;  %v1628_v31 = vmul.f32 %v8076_v10, %v1262_v8 }
 0x133   :  { %v1630_v2 = vmul.f32 %v8076_v10, %v1270_v47  ;;  %v1631_v3 = vmul.f32 %v8076_v10, %v1273_v55  ;;  %vm1498_vm5 = vcmp.ge.f32.partialorder %v1270_v47, 0.0  ;;  %vm1499_vm6 = vcmp.ge.f32.partialorder %v1273_v55, 0.0 }
 0x134   :  { %v6947_v61 = vpop.f32.mrf.mxu0  ;;  %v7010_v16 = vpop.f32.mrf.mxu1  ;;  %v1265_v18 = vadd.f32 %v1264_v6, %v8074_v9  ;;  %v1693_v30 = vsel %vm1433_vm7, %v1009_v59, %v1565_v13  ;;  %v1692_v33 = vsel %vm1432_vm8, %v1006_v58, %v1564_v7  ;;  %vm1496_vm9 = vcmp.ge.f32.partialorder %v1262_v8, 0.0 }
 0x135   :  { %2187 = vadd.xlane.f32.xlu1 %v2186_v63  ;;  %v1885_v63 = vmul.f32 %v8083_v20, %v1753_v56  ;;  %v1759_v19 = vsel %vm1499_vm6, %v1273_v55, %v1631_v3  ;;  %v1758_v21 = vsel %vm1498_vm5, %v1270_v47, %v1630_v2  ;;  %v1033_v24 = vadd.f32 %v6947_v61, %v8074_v9  ;;  %v291_v47 = vld [vmem:[%s14074_s0 + $0x1e0] sm:$0xff]  }
 0x136   :  { %2184 = vadd.xlane.f32.xlu0 %v2183_v0  ;;  %v1884_v0 = vmul.f32 %v8083_v20, %v1752_v57  ;;  %v1891_v28 = vmul.f32 %v8083_v20, %v1759_v19  ;;  %v1890_v29 = vmul.f32 %v8083_v20, %v1758_v21  ;;  %v1629_v32 = vmul.f32 %v8076_v10, %v1265_v18 }
 0x137   :  { %v2192_v14 = vsel %vm1924_vm4, %v1885_v63, 0.0  ;;  %vm1497_vm10 = vcmp.ge.f32.partialorder %v1265_v18, 0.0  ;;  %v1570_v35 = vmul.f32 %v8076_v10, %v1030_v23  ;;  %v1825_v37 = vmul.f32 %v8083_v20, %v1693_v30  ;;  %7032 = vmatprep.mubr.msk.bf16.mxu1 %vm660_vm1, %v291_v47 }
 0x138   :  { %v2189_v15 = vsel %vm1924_vm4, %v1884_v0, 0.0  ;;  %v2210_v40 = vsel %vm1924_vm4, %v1891_v28, 0.0  ;;  %v2207_v41 = vsel %vm1924_vm4, %v1890_v29, 0.0  ;;  %v1824_v42 = vmul.f32 %v8083_v20, %v1692_v33 }
 0x139   :  { %1989 = vadd.xlane.f32.xlu1 %v1988_v11  ;;  %v1827_v11 = vmul.f32 %v8083_v20, %v1695_v1  ;;  %vm1439_vm11 = vcmp.ge.f32.partialorder %v1033_v24, 0.0  ;;  %v1757_v44 = vsel %vm1497_vm10, %v1265_v18, %v1629_v32  ;;  %v1756_v45 = vsel %vm1496_vm9, %v1262_v8, %v1628_v31 }
 0x13a   :  { %1986 = vadd.xlane.f32.xlu0 %v1985_v12  ;;  %v1024_v12 = vpop.f32.mrf.mxu0  ;;  %vm1438_vm12 = vcmp.ge.f32.partialorder %v1030_v23, 0.0  ;;  %v1022_v48 = vadd.f32 %v8318_v49, %v8074_v9  ;;  %v2012_v51 = vsel %vm1924_vm4, %v1825_v37, 0.0  ;;  %v1889_v54 = vmul.f32 %v8083_v20, %v1757_v44 }
 0x13b   :  { %v2018_v25 = vsel %vm1924_vm4, %v1827_v11, 0.0  ;;  %v1025_v50 = vadd.f32 %v1024_v12, %v8074_v9  ;;  %v1888_v55 = vmul.f32 %v8083_v20, %v1756_v45  ;;  %v1698_v49 = vsel %vm1438_vm12, %v1030_v23, %v1570_v35 }
 0x13c   :  { %v8344_v22 = vpop.f32.mrf.mxu0  ;;  %v1568_v61 = vmul.f32 %v8076_v10, %v1022_v48  ;;  %v2204_v3 = vsel %vm1924_vm4, %v1889_v54, 0.0  ;;  %v1830_v7 = vmul.f32 %v8083_v20, %v1698_v49  ;;  %vm1436_vm0 = vcmp.ge.f32.partialorder %v1022_v48, 0.0 }
 0x13d   :  { %2181 = vadd.xlane.f32.xlu1 %v2180_v26  ;;  %v2015_v26 = vsel %vm1924_vm4, %v1826_v17, 0.0  ;;  %v1569_v2 = vmul.f32 %v8076_v10, %v1025_v50  ;;  %v2201_v4 = vsel %vm1924_vm4, %v1888_v55, 0.0  ;;  %vm1437_vm15 = vcmp.ge.f32.partialorder %v1025_v50, 0.0 }
 0x13e   :  { %2178 = vadd.xlane.f32.xlu0 %v2177_v27  ;;  %v1277_v27 = vpop.f32.mrf.mxu1  ;;  %v8354_v34 = vpop.f32.mrf.mxu0  ;;  %v1046_v12 = vadd.f32 %v8344_v22, %v8074_v9 }
 0x13f   :  { %v1697_v21 = vsel %vm1437_vm15, %v1025_v50, %v1569_v2 }
 0x140   :  { %v7011_v39 = vpop.f32.mrf.mxu1  ;;  %v6951_v46 = vpop.f32.mrf.mxu0  ;;  %vm1442_vm6 = vcmp.ge.f32.partialorder %v1046_v12, 0.0 }
 0x141   :  { %2007 = vadd.xlane.f32.xlu1 %v2006_v36  ;;  %v1286_v36 = vadd.f32 %v7010_v16, %v8074_v9  ;;  %v1289_v43 = vadd.f32 %v7011_v39, %v8074_v9  ;;  %v1049_v13 = vadd.f32 %v6951_v46, %v8074_v9  ;;  %v2027_v16 = vsel %vm1924_vm4, %v1830_v7, 0.0 }
 0x142   :  { %2004 = vadd.xlane.f32.xlu0 %v2003_v38  ;;  %v1571_v38 = vmul.f32 %v8076_v10, %v1033_v24  ;;  %v1040_v59 = vpop.f32.mrf.mxu0 }
 0x143   :  { %v1634_v57 = vmul.f32 %v8076_v10, %v1286_v36  ;;  %v1635_v58 = vmul.f32 %v8076_v10, %v1289_v43  ;;  %vm1502_vm13 = vcmp.ge.f32.partialorder %v1286_v36, 0.0  ;;  %vm1503_vm14 = vcmp.ge.f32.partialorder %v1289_v43, 0.0 }
 0x144   :  { %v1699_v56 = vsel %vm1439_vm11, %v1033_v24, %v1571_v38  ;;  %v8384_v1 = vpop.f32.mrf.mxu0  ;;  %v1696_v24 = vsel %vm1436_vm0, %v1022_v48, %v1568_v61  ;;  %v1575_v29 = vmul.f32 %v8076_v10, %v1049_v13  ;;  %vm1443_vm5 = vcmp.ge.f32.partialorder %v1049_v13, 0.0 }
 0x145   :  { %2199 = vadd.xlane.f32.xlu1 %v2198_v52  ;;  %v1280_v52 = vpop.f32.mrf.mxu1  ;;  %v1831_v0 = vmul.f32 %v8083_v20, %v1699_v56  ;;  %v1763_v8 = vsel %vm1503_vm14, %v1289_v43, %v1635_v58  ;;  %v1762_v11 = vsel %vm1502_vm13, %v1286_v36, %v1634_v57  ;;  %v1828_v33 = vmul.f32 %v8083_v20, %v1696_v24 }
 0x146   :  { %2196 = vadd.xlane.f32.xlu0 %v2195_v53  ;;  %v2009_v53 = vsel %vm1924_vm4, %v1824_v42, 0.0  ;;  %v1281_v63 = vadd.f32 %v1280_v52, %v8074_v9  ;;  %v1895_v18 = vmul.f32 %v8083_v20, %v1763_v8  ;;  %v1894_v19 = vmul.f32 %v8083_v20, %v1762_v11 }
 0x147   :  { %v7014_v6 = vpop.f32.mrf.mxu1  ;;  %v1038_v38 = vadd.f32 %v8354_v34, %v8074_v9  ;;  %v1041_v39 = vadd.f32 %v1040_v59, %v8074_v9  ;;  %v2021_v42 = vsel %vm1924_vm4, %v1828_v33, 0.0  ;;  %v1703_v47 = vsel %vm1443_vm5, %v1049_v13, %v1575_v29 }
 0x148   :  { %v1633_v22 = vmul.f32 %v8076_v10, %v1281_v63  ;;  %vm1501_vm3 = vcmp.ge.f32.partialorder %v1281_v63, 0.0  ;;  %v2222_v31 = vsel %vm1924_vm4, %v1895_v18, 0.0  ;;  %v2219_v32 = vsel %vm1924_vm4, %v1894_v19, 0.0 }
 0x149   :  { %2001 = vadd.xlane.f32.xlu1 %v2000_v60  ;;  %v293_v60 = vld [vmem:[%s14074_s0 + $0x1e8] sm:$0xff]   ;;  %v1293_v17 = vpop.f32.mrf.mxu1  ;;  %v1835_v56 = vmul.f32 %v8083_v20, %v1703_v47  ;;  %v1573_v57 = vmul.f32 %v8076_v10, %v1041_v39  ;;  %vm1441_vm9 = vcmp.ge.f32.partialorder %v1041_v39, 0.0  ;;  %vm1440_vm10 = vcmp.ge.f32.partialorder %v1038_v38, 0.0 }
 0x14a   :  { %1998 = vadd.xlane.f32.xlu0 %v1997_v62  ;;  %v1278_v62 = vadd.f32 %v1277_v27, %v8074_v9  ;;  %7033 = vmatmul.mubr.msk.bf16.gmra.mxu1 %vm660_vm1, %v293_v60  ;;  %v1829_v27 = vmul.f32 %v8083_v20, %v1697_v21  ;;  %v1761_v36 = vsel %vm1501_vm3, %v1281_v63, %v1633_v22 }
 0x14b   :  { %v7015_v30 = vpop.f32.mrf.mxu1  ;;  %v1893_v45 = vmul.f32 %v8083_v20, %v1761_v36  ;;  %v1294_v54 = vadd.f32 %v1293_v17, %v8074_v9  ;;  %v1701_v13 = vsel %vm1441_vm9, %v1041_v39, %v1573_v57 }
 0x14c   :  { %v1632_v23 = vmul.f32 %v8076_v10, %v1278_v62  ;;  %vm1500_vm2 = vcmp.ge.f32.partialorder %v1278_v62, 0.0  ;;  %v1305_v35 = vadd.f32 %v7015_v30, %v8074_v9  ;;  %v1833_v24 = vmul.f32 %v8083_v20, %v1701_v13 }
 0x14d   :  { %2193 = vadd.xlane.f32.xlu1 %v2192_v14  ;;  %v2030_v14 = vsel %vm1924_vm4, %v1831_v0, 0.0  ;;  %v1296_v50 = vpop.f32.mrf.mxu1  ;;  %v2216_v58 = vsel %vm1924_vm4, %v1893_v45, 0.0  ;;  %vm1504_vm11 = vcmp.ge.f32.partialorder %v1294_v54, 0.0 }
 0x14e   :  { %2190 = vadd.xlane.f32.xlu0 %v2189_v15  ;;  %v8397_v15 = vpop.f32.mrf.mxu0  ;;  %v1760_v37 = vsel %vm1500_vm2, %v1278_v62, %v1632_v23  ;;  %v1639_v48 = vmul.f32 %v8076_v10, %v1305_v35  ;;  %vm1507_vm8 = vcmp.ge.f32.partialorder %v1305_v35, 0.0  ;;  %v1297_v60 = vadd.f32 %v1296_v50, %v8074_v9 }
 0x14f   :  { %v1892_v46 = vmul.f32 %v8083_v20, %v1760_v37  ;;  %v7018_v55 = vpop.f32.mrf.mxu1  ;;  %v1054_v36 = vadd.f32 %v8397_v15, %v8074_v9  ;;  %v2036_v39 = vsel %vm1924_vm4, %v1833_v24, 0.0 }
 0x150   :  { %v6955_v28 = vpop.f32.mrf.mxu0  ;;  %v1767_v61 = vsel %vm1507_vm8, %v1305_v35, %v1639_v48  ;;  %vm1505_vm12 = vcmp.ge.f32.partialorder %v1297_v60, 0.0  ;;  %v1318_v23 = vadd.f32 %v7018_v55, %v8074_v9 }
 0x151   :  { %2019 = vadd.xlane.f32.xlu1 %v2018_v25  ;;  %v1574_v25 = vmul.f32 %v8076_v10, %v1046_v12  ;;  %v2213_v49 = vsel %vm1924_vm4, %v1892_v46, 0.0  ;;  %v1309_v7 = vpop.f32.mrf.mxu1  ;;  %v1899_v11 = vmul.f32 %v8083_v20, %v1767_v61  ;;  %vm1444_vm3 = vcmp.ge.f32.partialorder %v1054_v36, 0.0 }
 0x152   :  { %2016 = vadd.xlane.f32.xlu0 %v2015_v26  ;;  %v1302_v26 = vadd.f32 %v7014_v6, %v8074_v9  ;;  %v2042_v6 = vsel %vm1924_vm4, %v1835_v56, 0.0  ;;  %vm1510_vm15 = vcmp.ge.f32.partialorder %v1318_v23, 0.0 }
 0x153   :  { %v7019_v22 = vpop.f32.mrf.mxu1 }
 0x154   :  { %v1638_v34 = vmul.f32 %v8076_v10, %v1302_v26  ;;  %vm1506_vm7 = vcmp.ge.f32.partialorder %v1302_v26, 0.0  ;;  %v1321_v29 = vadd.f32 %v7019_v22, %v8074_v9 }
 0x155   :  { %2211 = vadd.xlane.f32.xlu1 %v2210_v40  ;;  %v2024_v40 = vsel %vm1924_vm4, %v1829_v27, 0.0 }
 0x156   :  { %2208 = vadd.xlane.f32.xlu0 %v2207_v41  ;;  %v8418_v41 = vpop.f32.mrf.mxu0  ;;  %v1766_v62 = vsel %vm1506_vm7, %v1302_v26, %v1638_v34  ;;  %v2234_v26 = vsel %vm1924_vm4, %v1899_v11, 0.0  ;;  %v1642_v34 = vmul.f32 %v8076_v10, %v1318_v23  ;;  %v1643_v15 = vmul.f32 %v8076_v10, %v1321_v29 }
 0x157   :  { %v1057_v37 = vadd.f32 %v8418_v41, %v8074_v9  ;;  %vm1511_vm0 = vcmp.ge.f32.partialorder %v1321_v29, 0.0 }
 0x158   :  { %v8431_v52 = vpop.f32.mrf.mxu0 }
 0x159   :  { %2013 = vadd.xlane.f32.xlu1 %v2012_v51  ;;  %v1702_v51 = vsel %vm1442_vm6, %v1046_v12, %v1574_v25  ;;  %v1898_v12 = vmul.f32 %v8083_v20, %v1766_v62  ;;  %v1577_v57 = vmul.f32 %v8076_v10, %v1057_v37  ;;  %vm1445_vm2 = vcmp.ge.f32.partialorder %v1057_v37, 0.0 }
 0x15a   :  { %2010 = vadd.xlane.f32.xlu0 %v2009_v53  ;;  %v1572_v53 = vmul.f32 %v8076_v10, %v1038_v38  ;;  %v1834_v59 = vmul.f32 %v8083_v20, %v1702_v51  ;;  %v8441_v63 = vpop.f32.mrf.mxu0  ;;  %v1771_v62 = vsel %vm1511_vm0, %v1321_v29, %v1643_v15 }
 0x15b   :  { %v2231_v27 = vsel %vm1924_vm4, %v1898_v12, 0.0 }
 0x15c   :  { %v2039_v8 = vsel %vm1924_vm4, %v1834_v59, 0.0  ;;  %v8457_v17 = vpop.f32.mrf.mxu0 }
 0x15d   :  { %2205 = vadd.xlane.f32.xlu1 %v2204_v3  ;;  %v1062_v3 = vadd.f32 %v8384_v1, %v8074_v9  ;;  %v1700_v1 = vsel %vm1440_vm10, %v1038_v38, %v1572_v53  ;;  %v1312_v38 = vpop.f32.mrf.mxu1  ;;  %v1310_v53 = vadd.f32 %v1309_v7, %v8074_v9 }
 0x15e   :  { %2202 = vadd.xlane.f32.xlu0 %v2201_v4  ;;  %v1065_v4 = vadd.f32 %v6955_v28, %v8074_v9  ;;  %v1832_v28 = vmul.f32 %v8083_v20, %v1700_v1  ;;  %v1705_v1 = vsel %vm1445_vm2, %v1057_v37, %v1577_v57 }
 0x15f   :  { %v1578_v21 = vmul.f32 %v8076_v10, %v1062_v3  ;;  %vm1446_vm14 = vcmp.ge.f32.partialorder %v1062_v3, 0.0  ;;  %v7022_v41 = vpop.f32.mrf.mxu1  ;;  %v1640_v7 = vmul.f32 %v8076_v10, %v1310_v53  ;;  %vm1508_vm6 = vcmp.ge.f32.partialorder %v1310_v53, 0.0 }
 0x160   :  { %v1579_v25 = vmul.f32 %v8076_v10, %v1065_v4  ;;  %vm1447_vm13 = vcmp.ge.f32.partialorder %v1065_v4, 0.0  ;;  %v1837_v29 = vmul.f32 %v8083_v20, %v1705_v1 }
 0x161   :  { %2031 = vadd.xlane.f32.xlu1 %v2030_v14  ;;  %v1636_v14 = vmul.f32 %v8076_v10, %v1294_v54  ;;  %v1706_v48 = vsel %vm1446_vm14, %v1062_v3, %v1578_v21  ;;  %v1325_v61 = vpop.f32.mrf.mxu1  ;;  %v1770_v3 = vsel %vm1510_vm15, %v1318_v23, %v1642_v34  ;;  %v1078_v21 = vadd.f32 %v8431_v52, %v8074_v9 }
 0x162   :  { %2028 = vadd.xlane.f32.xlu0 %v2027_v16  ;;  %v1637_v16 = vmul.f32 %v8076_v10, %v1297_v60  ;;  %v1707_v47 = vsel %vm1447_vm13, %v1065_v4, %v1579_v25  ;;  %v1838_v59 = vmul.f32 %v8083_v20, %v1706_v48  ;;  %v1081_v23 = vadd.f32 %v8457_v17, %v8074_v9 }
 0x163   :  { %v1839_v55 = vmul.f32 %v8083_v20, %v1707_v47  ;;  %v7023_v22 = vpop.f32.mrf.mxu1  ;;  %v1582_v37 = vmul.f32 %v8076_v10, %v1078_v21  ;;  %vm1450_vm7 = vcmp.ge.f32.partialorder %v1078_v21, 0.0  ;;  %v1070_v47 = vadd.f32 %v8441_v63, %v8074_v9 }
 0x164   :  { %v1765_v30 = vsel %vm1505_vm12, %v1297_v60, %v1637_v16  ;;  %v1576_v60 = vmul.f32 %v8076_v10, %v1054_v36  ;;  %v2051_v13 = vsel %vm1924_vm4, %v1838_v59, 0.0  ;;  %v1902_v16 = vmul.f32 %v8083_v20, %v1770_v3 }
 0x165   :  { %2223 = vadd.xlane.f32.xlu1 %v2222_v31  ;;  %v1764_v31 = vsel %vm1504_vm11, %v1294_v54, %v1636_v14  ;;  %v1897_v45 = vmul.f32 %v8083_v20, %v1765_v30  ;;  %v1313_v54 = vadd.f32 %v1312_v38, %v8074_v9  ;;  %v2054_v11 = vsel %vm1924_vm4, %v1839_v55, 0.0  ;;  %v1328_v15 = vpop.f32.mrf.mxu1 }
 0x166   :  { %2220 = vadd.xlane.f32.xlu0 %v2219_v32  ;;  %v8472_v32 = vpop.f32.mrf.mxu0  ;;  %v1896_v46 = vmul.f32 %v8083_v20, %v1764_v31  ;;  %v1903_v14 = vmul.f32 %v8083_v20, %v1771_v62  ;;  %v1704_v24 = vsel %vm1444_vm3, %v1054_v36, %v1576_v60  ;;  %v2243_v30 = vsel %vm1924_vm4, %v1902_v16, 0.0 }
 0x167   :  { %vm1509_vm5 = vcmp.ge.f32.partialorder %v1313_v54, 0.0  ;;  %v1836_v31 = vmul.f32 %v8083_v20, %v1704_v24  ;;  %v1583_v38 = vmul.f32 %v8076_v10, %v1081_v23  ;;  %vm1451_vm8 = vcmp.ge.f32.partialorder %v1081_v23, 0.0  ;;  %v7026_v63 = vpop.f32.mrf.mxu1 }
 0x168   :  { %v2246_v17 = vsel %vm1924_vm4, %v1903_v14, 0.0  ;;  %v1073_v57 = vadd.f32 %v8472_v32, %v8074_v9  ;;  %v1326_v3 = vadd.f32 %v1325_v61, %v8074_v9  ;;  %v1580_v16 = vmul.f32 %v8076_v10, %v1070_v47 }
 0x169   :  { %2025 = vadd.xlane.f32.xlu1 %v2024_v40  ;;  %v8483_v40 = vpop.f32.mrf.mxu0  ;;  %vm1448_vm11 = vcmp.ge.f32.partialorder %v1070_v47, 0.0 }
 0x16a   :  { %v8421_v43 = vpop.xlane.xlu0 %2124  ;;  %v8423_v44 = vpop.xlane.xlu1 %1932  ;;  %2022 = vadd.xlane.f32.xlu0 %v2021_v42  ;;  %v2033_v42 = vsel %vm1924_vm4, %v1832_v28, 0.0  ;;  %v1337_v28 = vadd.f32 %v7023_v22, %v8074_v9  ;;  %v1581_v1 = vmul.f32 %v8076_v10, %v1073_v57  ;;  %vm1449_vm12 = vcmp.ge.f32.partialorder %v1073_v57, 0.0 }
 0x16b   :  { %v8499_v56 = vpop.f32.mrf.mxu0  ;;  %vm1512_vm14 = vcmp.ge.f32.partialorder %v1326_v3, 0.0 }
 0x16c   :  { %v1647_v48 = vmul.f32 %v8076_v10, %v1337_v28  ;;  %vm1515_vm9 = vcmp.ge.f32.partialorder %v1337_v28, 0.0 }
 0x16d   :  { %2217 = vadd.xlane.f32.xlu1 %v2216_v58  ;;  %v2228_v58 = vsel %vm1924_vm4, %v1897_v45, 0.0  ;;  %v8515_v12 = vpop.f32.mrf.mxu0 }
 0x16e   :  { %2214 = vadd.xlane.f32.xlu0 %v2213_v49  ;;  %v8443_v0 = vpop.xlane.xlu1 %1935  ;;  %v2225_v49 = vsel %vm1924_vm4, %v1896_v46, 0.0  ;;  %v1775_v14 = vsel %vm1515_vm9, %v1337_v28, %v1647_v48  ;;  %v1350_v48 = vadd.f32 %v7026_v63, %v8074_v9 }
 0x16f   :  { %v8445_v2 = vpop.xlane.xlu0 %1926  ;;  %v8533_v52 = vpop.f32.mrf.mxu0 }
 0x170   :  { %vm1518_vm3 = vcmp.ge.f32.partialorder %v1350_v48, 0.0 }
 0x171   :  { %2043 = vadd.xlane.f32.xlu1 %v2042_v6 }
 0x172   :  { %2040 = vadd.xlane.f32.xlu0 %v2039_v8  ;;  %v8459_v18 = vpop.xlane.xlu1 %2127  ;;  %v1641_v8 = vmul.f32 %v8076_v10, %v1313_v54 }
 0x173   :  { %v8461_v19 = vpop.xlane.xlu0 %2118 }
 0x174   :  { %v1769_v36 = vsel %vm1509_vm5, %v1313_v54, %v1641_v8  ;;  %v2045_v54 = vsel %vm1924_vm4, %v1836_v31, 0.0 }
 0x175   :  { %2235 = vadd.xlane.f32.xlu1 %v2234_v26 }
 0x176   :  { %2232 = vadd.xlane.f32.xlu0 %v2231_v27  ;;  %v8474_v33 = vpop.xlane.xlu1 %2121  ;;  %v1334_v27 = vadd.f32 %v7022_v41, %v8074_v9  ;;  %v1901_v41 = vmul.f32 %v8083_v20, %v1769_v36 }
 0x177   :  { %v8476_v35 = vpop.xlane.xlu0 %1929 }
 0x178   :  { %v1646_v34 = vmul.f32 %v8076_v10, %v1334_v27  ;;  %vm1514_vm10 = vcmp.ge.f32.partialorder %v1334_v27, 0.0  ;;  %v2240_v32 = vsel %vm1924_vm4, %v1901_v41, 0.0 }
 0x179   :  { %2037 = vadd.xlane.f32.xlu1 %v2036_v39  ;;  %v1768_v39 = vsel %vm1508_vm6, %v1310_v53, %v1640_v7  ;;  %v2048_v53 = vsel %vm1924_vm4, %v1837_v29, 0.0  ;;  %v1329_v7 = vadd.f32 %v1328_v15, %v8074_v9  ;;  %v1644_v29 = vmul.f32 %v8076_v10, %v1326_v3 }
 0x17a   :  { %2034 = vadd.xlane.f32.xlu0 %v2033_v42  ;;  %v8492_v50 = vpop.xlane.xlu1 %1947  ;;  %v8541_v42 = vpop.f32.mrf.mxu0  ;;  %v1900_v55 = vmul.f32 %v8083_v20, %v1768_v39  ;;  %v1774_v61 = vsel %vm1514_vm10, %v1334_v27, %v1646_v34  ;;  %v1709_v39 = vsel %vm1449_vm12, %v1073_v57, %v1581_v1  ;;  %v1708_v34 = vsel %vm1448_vm11, %v1070_v47, %v1580_v16 }
 0x17b   :  { %v8494_v51 = vpop.xlane.xlu0 %1944  ;;  %v1645_v28 = vmul.f32 %v8076_v10, %v1329_v7  ;;  %v1906_v36 = vmul.f32 %v8083_v20, %v1774_v61  ;;  %vm1513_vm13 = vcmp.ge.f32.partialorder %v1329_v7, 0.0  ;;  %v1840_v57 = vmul.f32 %v8083_v20, %v1708_v34 }
 0x17c   :  { %v8559_v59 = vpop.f32.mrf.mxu0  ;;  %v2237_v8 = vsel %vm1924_vm4, %v1900_v55, 0.0  ;;  %v1841_v55 = vmul.f32 %v8083_v20, %v1709_v39 }
 0x17d   :  { %2229 = vadd.xlane.f32.xlu1 %v2228_v58  ;;  %v1711_v58 = vsel %vm1451_vm8, %v1081_v23, %v1583_v38  ;;  %v1773_v47 = vsel %vm1513_vm13, %v1329_v7, %v1645_v28  ;;  %v1650_v7 = vmul.f32 %v8076_v10, %v1350_v48  ;;  %v2057_v61 = vsel %vm1924_vm4, %v1840_v57, 0.0 }
 0x17e   :  { %2226 = vadd.xlane.f32.xlu0 %v2225_v49  ;;  %v8508_v4 = vpop.xlane.xlu1 %2139  ;;  %v1710_v49 = vsel %vm1450_vm7, %v1078_v21, %v1582_v37  ;;  %v1341_v21 = vpop.f32.mrf.mxu1  ;;  %v1097_v37 = vadd.f32 %v8515_v12, %v8074_v9  ;;  %v2255_v12 = vsel %vm1924_vm4, %v1906_v36, 0.0  ;;  %v1089_v28 = vadd.f32 %v8533_v52, %v8074_v9 }
 0x17f   :  { %v8510_v6 = vpop.xlane.xlu0 %2136  ;;  %v8574_v23 = vpop.f32.mrf.mxu0  ;;  %v1778_v57 = vsel %vm1518_vm3, %v1350_v48, %v1650_v7 }
 0x180   :  { %v7027_v38 = vpop.f32.mrf.mxu1  ;;  %vm1455_vm0 = vcmp.ge.f32.partialorder %v1097_v37, 0.0  ;;  %vm1453_vm6 = vcmp.ge.f32.partialorder %v1089_v28, 0.0  ;;  %v1910_v7 = vmul.f32 %v8083_v20, %v1778_v57 }
 0x181   :  { %2055 = vadd.xlane.f32.xlu1 %v2054_v11  ;;  %v1843_v11 = vmul.f32 %v8083_v20, %v1711_v58  ;;  %v8591_v15 = vpop.f32.mrf.mxu0 }
 0x182   :  { %2052 = vadd.xlane.f32.xlu0 %v2051_v13  ;;  %v8526_v25 = vpop.xlane.xlu1 %1941  ;;  %v1842_v13 = vmul.f32 %v8083_v20, %v1710_v49  ;;  %v1587_v49 = vmul.f32 %v8076_v10, %v1097_v37  ;;  %v1344_v1 = vpop.f32.mrf.mxu1 }
 0x183   :  { %v8528_v26 = vpop.xlane.xlu0 %1938  ;;  %v2066_v31 = vsel %vm1924_vm4, %v1843_v11, 0.0  ;;  %v8606_v63 = vpop.f32.mrf.mxu0  ;;  %v1345_v39 = vadd.f32 %v1344_v1, %v8074_v9 }
 0x184   :  { %v2063_v27 = vsel %vm1924_vm4, %v1842_v13, 0.0  ;;  %v1086_v13 = vadd.f32 %v8499_v56, %v8074_v9  ;;  %v1715_v56 = vsel %vm1455_vm0, %v1097_v37, %v1587_v49  ;;  %v8649_v1 = vpop.f32.mrf.mxu1 }
 0x185   :  { %2247 = vadd.xlane.f32.xlu1 %v2246_v17  ;;  %v1907_v17 = vmul.f32 %v8083_v20, %v1775_v14  ;;  %v1905_v14 = vmul.f32 %v8083_v20, %v1773_v47  ;;  %14169 = vst [vmem:[#allocation8_spill] sm:$0xff] %v8649_v1  ;;  %vm1517_vm7 = vcmp.ge.f32.partialorder %v1345_v39, 0.0 }
 0x186   :  { %2244 = vadd.xlane.f32.xlu0 %v2243_v30  ;;  %v8543_v45 = vpop.xlane.xlu1 %2133  ;;  %v1094_v30 = vadd.f32 %v8483_v40, %v8074_v9  ;;  %vm1452_vm5 = vcmp.ge.f32.partialorder %v1086_v13, 0.0 }
 0x187   :  { %v8545_v46 = vpop.xlane.xlu0 %2130  ;;  %v2252_v34 = vsel %vm1924_vm4, %v1905_v14, 0.0  ;;  %v1649_v14 = vmul.f32 %v8076_v10, %v1345_v39 }
 0x188   :  { %v1586_v58 = vmul.f32 %v8076_v10, %v1094_v30  ;;  %vm1454_vm15 = vcmp.ge.f32.partialorder %v1094_v30, 0.0 }
 0x189   :  { %2049 = vadd.xlane.f32.xlu1 %v2048_v53  ;;  %v1353_v53 = vadd.f32 %v7027_v38, %v8074_v9  ;;  %v1342_v38 = vadd.f32 %v1341_v21, %v8074_v9 }
 0x18a   :  { %2046 = vadd.xlane.f32.xlu0 %v2045_v54  ;;  %v8561_v60 = vpop.xlane.xlu1 %1959  ;;  %v2258_v54 = vsel %vm1924_vm4, %v1907_v17, 0.0  ;;  %v1714_v17 = vsel %vm1454_vm15, %v1094_v30, %v1586_v58 }
 0x18b   :  { %v8563_v62 = vpop.xlane.xlu0 %1956  ;;  %v1651_v16 = vmul.f32 %v8076_v10, %v1353_v53  ;;  %vm1519_vm2 = vcmp.ge.f32.partialorder %v1353_v53, 0.0  ;;  %v1846_v37 = vmul.f32 %v8083_v20, %v1714_v17  ;;  %v1648_v49 = vmul.f32 %v8076_v10, %v1342_v38 }
 0x18c   :  { %vm1516_vm8 = vcmp.ge.f32.partialorder %v1342_v38, 0.0 }
 0x18d   :  { %2241 = vadd.xlane.f32.xlu1 %v2240_v32  ;;  %v1772_v32 = vsel %vm1512_vm14, %v1326_v3, %v1644_v29  ;;  %v2060_v3 = vsel %vm1924_vm4, %v1841_v55, 0.0  ;;  %v1779_v30 = vsel %vm1519_vm2, %v1353_v53, %v1651_v16  ;;  %v1585_v55 = vmul.f32 %v8076_v10, %v1089_v28 }
 0x18e   :  { %2238 = vadd.xlane.f32.xlu0 %v2237_v8  ;;  %v8576_v22 = vpop.xlane.xlu1 %2151  ;;  %v1904_v29 = vmul.f32 %v8083_v20, %v1772_v32  ;;  %v1110_v32 = vadd.f32 %v8541_v42, %v8074_v9  ;;  %v1911_v53 = vmul.f32 %v8083_v20, %v1779_v30  ;;  %v2075_v48 = vsel %vm1924_vm4, %v1846_v37, 0.0  ;;  %v1357_v30 = vpop.f32.mrf.mxu1 }
 0x18f   :  { %v8578_v24 = vpop.xlane.xlu0 %2148  ;;  %v1777_v37 = vsel %vm1517_vm7, %v1345_v39, %v1649_v14  ;;  %v1358_v14 = vadd.f32 %v1357_v30, %v8074_v9 }
 0x190   :  { %v2249_v52 = vsel %vm1924_vm4, %v1904_v29, 0.0  ;;  %vm1458_vm9 = vcmp.ge.f32.partialorder %v1110_v32, 0.0  ;;  %v1909_v39 = vmul.f32 %v8083_v20, %v1777_v37 }
 0x191   :  { %2067 = vadd.xlane.f32.xlu1 %v2066_v31  ;;  %v8623_v31 = vpop.f32.mrf.mxu0  ;;  %vm1520_vm13 = vcmp.ge.f32.partialorder %v1358_v14, 0.0 }
 0x192   :  { %2064 = vadd.xlane.f32.xlu0 %v2063_v27  ;;  %v8593_v40 = vpop.xlane.xlu1 %1953 }
 0x193   :  { %v8595_v41 = vpop.xlane.xlu0 %1950  ;;  %v6971_v47 = vpop.f32.mrf.mxu0 }
 0x195   :  { %2259 = vadd.xlane.f32.xlu1 %v2258_v54  ;;  %v1847_v54 = vmul.f32 %v8083_v20, %v1715_v56  ;;  %v1120_v29 = vpop.f32.mrf.mxu0 }
 0x196   :  { %2256 = vadd.xlane.f32.xlu0 %v2255_v12  ;;  %v8608_v8 = vpop.xlane.xlu1 %2145  ;;  %v1584_v12 = vmul.f32 %v8076_v10, %v1086_v13 }
 0x197   :  { %v8610_v11 = vpop.xlane.xlu0 %2142  ;;  %v2078_v16 = vsel %vm1924_vm4, %v1847_v54, 0.0  ;;  %v2270_v54 = vsel %vm1924_vm4, %v1911_v53, 0.0 }
 0x198   :  { %v1712_v42 = vsel %vm1452_vm5, %v1086_v13, %v1584_v12  ;;  %v1590_v12 = vmul.f32 %v8076_v10, %v1110_v32 }
 0x199   :  { %2061 = vadd.xlane.f32.xlu1 %v2060_v3  ;;  %v1113_v3 = vadd.f32 %v8574_v23, %v8074_v9  ;;  %v2267_v23 = vsel %vm1924_vm4, %v1910_v7, 0.0  ;;  %v1844_v13 = vmul.f32 %v8083_v20, %v1712_v42 }
 0x19a   :  { %2058 = vadd.xlane.f32.xlu0 %v2057_v61  ;;  %v8625_v27 = vpop.xlane.xlu1 %1971  ;;  %v1713_v61 = vsel %vm1453_vm6, %v1089_v28, %v1585_v55 }
 0x19b   :  { %v8627_v36 = vpop.xlane.xlu0 %1968  ;;  %v1845_v28 = vmul.f32 %v8083_v20, %v1713_v61  ;;  %v1591_v55 = vmul.f32 %v8076_v10, %v1113_v3  ;;  %vm1459_vm10 = vcmp.ge.f32.partialorder %v1113_v3, 0.0  ;;  %v2069_v61 = vsel %vm1924_vm4, %v1844_v13, 0.0 }
 0x19c   :  { %v1121_v13 = vadd.f32 %v1120_v29, %v8074_v9 }
 0x19d   :  { %2253 = vadd.xlane.f32.xlu1 %v2252_v34  ;;  %v1102_v34 = vadd.f32 %v8559_v59, %v8074_v9  ;;  %v6974_v59 = vpop.f32.mrf.mxu0  ;;  %v2072_v7 = vsel %vm1924_vm4, %v1845_v28, 0.0  ;;  %v1126_v28 = vadd.f32 %v8606_v63, %v8074_v9 }
 0x19e   :  { %2250 = vadd.xlane.f32.xlu0 %v2249_v52  ;;  %v8637_v21 = vpop.xlane.xlu1 %2163  ;;  %v1105_v52 = vadd.f32 %v8591_v15, %v8074_v9  ;;  %v1776_v15 = vsel %vm1516_vm8, %v1342_v38, %v1648_v49  ;;  %v1129_v49 = vadd.f32 %v6971_v47, %v8074_v9  ;;  %v1652_v47 = vmul.f32 %v8076_v10, %v1358_v14 }
 0x19f   :  { %v8639_v58 = vpop.xlane.xlu0 %2160  ;;  %v1908_v38 = vmul.f32 %v8083_v20, %v1776_v15  ;;  %v1133_v42 = vpop.f32.mrf.mxu0  ;;  %vm1456_vm11 = vcmp.ge.f32.partialorder %v1102_v34, 0.0  ;;  %v2264_v15 = vsel %vm1924_vm4, %v1909_v39, 0.0  ;;  %vm1462_vm15 = vcmp.ge.f32.partialorder %v1126_v28, 0.0 }
 0x1a0   :  { %vm1457_vm12 = vcmp.ge.f32.partialorder %v1105_v52, 0.0  ;;  %vm1463_vm14 = vcmp.ge.f32.partialorder %v1129_v49, 0.0  ;;  %v1780_v1 = vsel %vm1520_vm13, %v1358_v14, %v1652_v47  ;;  %vm1461_vm0 = vcmp.ge.f32.partialorder %v1121_v13, 0.0 }
 0x1a1   :  { %2079 = vadd.xlane.f32.xlu1 %v2078_v16  ;;  %v1588_v16 = vmul.f32 %v8076_v10, %v1102_v34  ;;  %v1912_v47 = vmul.f32 %v8083_v20, %v1780_v1 }
 0x1a2   :  { %2076 = vadd.xlane.f32.xlu0 %v2075_v48  ;;  %v8654_v56 = vpop.xlane.xlu1 %1965  ;;  %v1589_v48 = vmul.f32 %v8076_v10, %v1105_v52 }
 0x1a3   :  { %v8656_v17 = vpop.xlane.xlu0 %1962  ;;  %v1716_v63 = vsel %vm1456_vm11, %v1102_v34, %v1588_v16  ;;  %v1594_v34 = vmul.f32 %v8076_v10, %v1126_v28  ;;  %v1593_v16 = vmul.f32 %v8076_v10, %v1121_v13 }
 0x1a5   :  { %2271 = vadd.xlane.f32.xlu1 %v2270_v54  ;;  %v1719_v54 = vsel %vm1459_vm10, %v1113_v3, %v1591_v55  ;;  %v6975_v55 = vpop.f32.mrf.mxu0 }
 0x1a6   :  { %2268 = vadd.xlane.f32.xlu0 %v2267_v23  ;;  %v8670_v57 = vpop.xlane.xlu1 %2157  ;;  %v1718_v23 = vsel %vm1458_vm9, %v1110_v32, %v1590_v12  ;;  %v1851_v32 = vmul.f32 %v8083_v20, %v1719_v54  ;;  %v1595_v12 = vmul.f32 %v8076_v10, %v1129_v49  ;;  %v1145_v54 = vadd.f32 %v6975_v55, %v8074_v9 }
 0x1a7   :  { %v8672_v53 = vpop.xlane.xlu0 %2154  ;;  %v1850_v3 = vmul.f32 %v8083_v20, %v1718_v23 }
 0x1a8   :  { %v2090_v23 = vsel %vm1924_vm4, %v1851_v32, 0.0  ;;  %v1599_v55 = vmul.f32 %v8076_v10, %v1145_v54  ;;  %vm1467_vm3 = vcmp.ge.f32.partialorder %v1145_v54, 0.0 }
 0x1a9   :  { %2073 = vadd.xlane.f32.xlu1 %v2072_v7  ;;  %v2261_v7 = vsel %vm1924_vm4, %v1908_v38, 0.0  ;;  %v1118_v38 = vadd.f32 %v8623_v31, %v8074_v9 }
 0x1aa   :  { %2070 = vadd.xlane.f32.xlu0 %v2069_v61  ;;  %v8683_v37 = vpop.xlane.xlu1 %1983  ;;  %v1717_v61 = vsel %vm1457_vm12, %v1105_v52, %v1589_v48  ;;  %v1848_v52 = vmul.f32 %v8083_v20, %v1716_v63  ;;  %v1136_v48 = vpop.f32.mrf.mxu0 }
 0x1ab   :  { %v8685_v30 = vpop.xlane.xlu0 %1980  ;;  %v1592_v32 = vmul.f32 %v8076_v10, %v1118_v38  ;;  %vm1460_vm2 = vcmp.ge.f32.partialorder %v1118_v38, 0.0 }
 0x1ac   :  { %v2081_v63 = vsel %vm1924_vm4, %v1848_v52, 0.0 }
 0x1ad   :  { %2265 = vadd.xlane.f32.xlu1 %v2264_v15  ;;  %v2087_v15 = vsel %vm1924_vm4, %v1850_v3, 0.0  ;;  %v1142_v3 = vadd.f32 %v6974_v59, %v8074_v9  ;;  %v2273_v59 = vsel %vm1924_vm4, %v1912_v47, 0.0 }
 0x1ae   :  { %2262 = vadd.xlane.f32.xlu0 %v2261_v7  ;;  %v8697_v29 = vpop.xlane.xlu1 %2175  ;;  %v1849_v7 = vmul.f32 %v8083_v20, %v1717_v61 }
 0x1af   :  { %14170 = vst [vmem:[#allocation9_spill] sm:$0xff] %v8697_v29  ;;  %v8699_v39 = vpop.xlane.xlu0 %2172  ;;  %v1598_v52 = vmul.f32 %v8076_v10, %v1142_v3  ;;  %vm1466_vm5 = vcmp.ge.f32.partialorder %v1142_v3, 0.0 }
 0x1b0   :  { %14171 = vst [vmem:[#allocation10_spill] sm:$0xff] %v8699_v39  ;;  %v1723_v39 = vsel %vm1463_vm14, %v1129_v49, %v1595_v12  ;;  %v2084_v61 = vsel %vm1924_vm4, %v1849_v7, 0.0  ;;  %v1137_v12 = vadd.f32 %v1136_v48, %v8074_v9  ;;  %v1134_v7 = vadd.f32 %v1133_v42, %v8074_v9 }
 0x1b1   :  { %2091 = vadd.xlane.f32.xlu1 %v2090_v23  ;;  %v1855_v49 = vmul.f32 %v8083_v20, %v1723_v39  ;;  %v1721_v23 = vsel %vm1461_vm0, %v1121_v13, %v1593_v16  ;;  %v1727_v13 = vsel %vm1467_vm3, %v1145_v54, %v1599_v55 }
 0x1b2   :  { %2088 = vadd.xlane.f32.xlu0 %v2087_v15  ;;  %v8710_v31 = vpop.xlane.xlu1 %1977  ;;  %v1722_v15 = vsel %vm1462_vm15, %v1126_v28, %v1594_v34  ;;  %v1853_v48 = vmul.f32 %v8083_v20, %v1721_v23  ;;  %v1597_v28 = vmul.f32 %v8076_v10, %v1137_v12  ;;  %v1720_v34 = vsel %vm1460_vm2, %v1118_v38, %v1592_v32 }
 0x1b3   :  { %v8712_v14 = vpop.xlane.xlu0 %1974  ;;  %v2102_v39 = vsel %vm1924_vm4, %v1855_v49, 0.0  ;;  %vm1465_vm6 = vcmp.ge.f32.partialorder %v1137_v12, 0.0  ;;  %v1859_v49 = vmul.f32 %v8083_v20, %v1727_v13  ;;  %v1852_v23 = vmul.f32 %v8083_v20, %v1720_v34 }
 0x1b4   :  { %v2096_v42 = vsel %vm1924_vm4, %v1853_v48, 0.0  ;;  %v1725_v54 = vsel %vm1465_vm6, %v1137_v12, %v1597_v28  ;;  %v1726_v38 = vsel %vm1466_vm5, %v1142_v3, %v1598_v52  ;;  %vm1464_vm7 = vcmp.ge.f32.partialorder %v1134_v7, 0.0 }
 0x1b5   :  { %2085 = vadd.xlane.f32.xlu1 %v2084_v61  ;;  %v1854_v61 = vmul.f32 %v8083_v20, %v1722_v15  ;;  %v1596_v15 = vmul.f32 %v8076_v10, %v1134_v7  ;;  %v1857_v48 = vmul.f32 %v8083_v20, %v1725_v54 }
 0x1b6   :  { %2082 = vadd.xlane.f32.xlu0 %v2081_v63  ;;  %v8722_v1 = vpop.xlane.xlu1 %2169 }
 0x1b7   :  { %v8724_v29 = vpop.xlane.xlu0 %2166  ;;  %v2099_v63 = vsel %vm1924_vm4, %v1854_v61, 0.0  ;;  %v1858_v61 = vmul.f32 %v8083_v20, %v1726_v38  ;;  %v1724_v13 = vsel %vm1464_vm7, %v1134_v7, %v1596_v15  ;;  %v2108_v3 = vsel %vm1924_vm4, %v1857_v48, 0.0 }
 0x1b8   :  { %v1856_v28 = vmul.f32 %v8083_v20, %v1724_v13  ;;  %v2311_v15 = vsub.s32 3, %v8067_v5 }
 0x1b9   :  { %2103 = vadd.xlane.f32.xlu1 %v2102_v39  ;;  %v2093_v39 = vsel %vm1924_vm4, %v1852_v23, 0.0  ;;  %v2111_v52 = vsel %vm1924_vm4, %v1858_v61, 0.0 }
 0x1ba   :  { %2274 = vadd.xlane.f32.xlu0 %v2273_v59  ;;  %v8733_v16 = vpop.xlane.xlu1 %1995  ;;  %v2114_v59 = vsel %vm1924_vm4, %v1859_v49, 0.0  ;;  %v2105_v49 = vsel %vm1924_vm4, %v1856_v28, 0.0 }
 0x1bb   :  { %v8735_v47 = vpop.xlane.xlu0 %1992 }
 0x1bd   :  { %2097 = vadd.xlane.f32.xlu1 %v2096_v42 }
 0x1be   :  { %2100 = vadd.xlane.f32.xlu0 %v2099_v63  ;;  %v8742_v32 = vpop.xlane.xlu1 %2187 }
 0x1bf   :  { %v8744_v55 = vpop.xlane.xlu0 %2184 }
 0x1c1   :  { %2115 = vadd.xlane.f32.xlu1 %v2114_v59  ;;  %v7701_v59 = vld [vmem:[%s14076_s2] sm:$0xf] }
 0x1c2   :  { %2094 = vadd.xlane.f32.xlu0 %v2093_v39  ;;  %v8750_v34 = vpop.xlane.xlu1 %1989  ;;  %v8774_v39 = vrot.slane %v7701_v59, %v2311_v15 }
 0x1c3   :  { %v8752_v12 = vpop.xlane.xlu0 %1986 }
 0x1c4   :  { %14172 = vst [vmem:[#allocation11_spill] sm:$0xff] %v8774_v39  ;;  %v2315_v13 = vadd.f32 %v8774_v39, %v8423_v44  ;;  %v2316_v15 = vadd.f32 %v8774_v39, %v8443_v0  ;;  %v2379_v44 = vadd.f32 %v8774_v39, %v8421_v43  ;;  %v2317_v43 = vadd.f32 %v8774_v39, %v8528_v26 }
 0x1c5   :  { %2109 = vadd.xlane.f32.xlu1 %v2108_v3 }
 0x1c6   :  { %2112 = vadd.xlane.f32.xlu0 %v2111_v52  ;;  %v8757_v42 = vpop.xlane.xlu1 %2181  ;;  %v2313_v52 = vadd.f32 %v8774_v39, %v8445_v2  ;;  %v2319_v2 = vadd.f32 %v8774_v39, %v8494_v51 }
 0x1c7   :  { %v8759_v63 = vpop.xlane.xlu0 %2178 }
 0x1ca   :  { %2106 = vadd.xlane.f32.xlu0 %v2105_v49  ;;  %v8762_v7 = vpop.xlane.xlu1 %2007 }
 0x1cb   :  { %v8764_v23 = vpop.xlane.xlu0 %2004 }
 0x1ce   :  { %v8767_v54 = vpop.xlane.xlu1 %2199 }
 0x1cf   :  { %v8769_v38 = vpop.xlane.xlu0 %2196 }
 0x1d2   :  { %v8776_v48 = vpop.xlane.xlu1 %2001 }
 0x1d3   :  { %v8778_v61 = vpop.xlane.xlu0 %1998 }
 0x1d6   :  { %2701 = vrot.lane.b32.xlu1 %v2315_v13, %s7789_s10  ;;  %v8783_v5 = vpop.xlane.xlu1 %2193 }
 0x1d7   :  { %v8785_v3 = vpop.xlane.xlu0 %2190 }
 0x1d8   :  { %14173 = vst [vmem:[#allocation12_spill] sm:$0xff] %v8785_v3 }
 0x1da   :  { %v8789_v28 = vpop.xlane.xlu1 %2019  ;;  %2697 = vrot.lane.b32.xlu1 %v2313_v52, %s7789_s10  ;;  %v2377_v52 = vadd.f32 %v8774_v39, %v8461_v19  ;;  %v2323_v19 = vadd.f32 %v8774_v39, %v8563_v62 }
 0x1db   :  { %v8792_v49 = vpop.xlane.xlu0 %2016 }
 0x1de   :  { %v8798_v59 = vpop.xlane.xlu1 %2211  ;;  %2703 = vrot.lane.b32.xlu1 %v2316_v15, %s7789_s10  ;;  %v2380_v15 = vadd.f32 %v8774_v39, %v8459_v18  ;;  %v2321_v18 = vadd.f32 %v8774_v39, %v8595_v41 }
 0x1df   :  { %14174 = vst [vmem:[#allocation13_spill] sm:$0xff] %v8798_v59  ;;  %v8801_v13 = vpop.xlane.xlu0 %2208 }
 0x1e0   :  { %14175 = vst [vmem:[#allocation14_spill] sm:$0xff] %v8801_v13  ;;  %2829 = vrot.lane.b32.xlu0 %v2379_v44, %s7789_s10 }
 0x1e2   :  { %v8808_v3 = vpop.xlane.xlu1 %2013  ;;  %2709 = vrot.lane.b32.xlu1 %v2319_v2, %s7789_s10  ;;  %v2314_v2 = vadd.f32 %v8774_v39, %v8476_v35  ;;  %v2327_v35 = vadd.f32 %v8774_v39, %v8627_v36 }
 0x1e3   :  { %v8811_v0 = vpop.xlane.xlu0 %2010 }
 0x1e4   :  { %2825 = vrot.lane.b32.xlu0 %v2377_v52, %s7789_s10 }
 0x1e6   :  { %v8818_v44 = vpop.xlane.xlu1 %2205  ;;  %2705 = vrot.lane.b32.xlu1 %v2317_v43, %s7789_s10  ;;  %v2378_v43 = vadd.f32 %v8774_v39, %v8474_v33  ;;  %v2325_v33 = vadd.f32 %v8774_v39, %v8656_v17 }
 0x1e7   :  { %14176 = vst [vmem:[#allocation15_spill] sm:$0xff] %v8818_v44  ;;  %v8821_v51 = vpop.xlane.xlu0 %2202 }
 0x1e8   :  { %14177 = vst [vmem:[#allocation16_spill] sm:$0xff] %v8821_v51  ;;  %2831 = vrot.lane.b32.xlu0 %v2380_v15, %s7789_s10 }
 0x1ea   :  { %v8828_v52 = vpop.xlane.xlu1 %2031  ;;  %2717 = vrot.lane.b32.xlu1 %v2323_v19, %s7789_s10  ;;  %v2383_v19 = vadd.f32 %v8774_v39, %v8510_v6  ;;  %v2331_v6 = vadd.f32 %v8774_v39, %v8685_v30 }
 0x1eb   :  { %v8831_v26 = vpop.xlane.xlu0 %2028 }
 0x1ec   :  { %2699 = vrot.lane.b32.xlu0 %v2314_v2, %s7789_s10 }
 0x1ee   :  { %v8838_v15 = vpop.xlane.xlu1 %2223  ;;  %2713 = vrot.lane.b32.xlu1 %v2321_v18, %s7789_s10  ;;  %v2381_v18 = vadd.f32 %v8774_v39, %v8545_v46  ;;  %v2329_v46 = vadd.f32 %v8774_v39, %v8712_v14 }
 0x1ef   :  { %14178 = vst [vmem:[#allocation17_spill] sm:$0xff] %v8838_v15  ;;  %v8841_v62 = vpop.xlane.xlu0 %2220 }
 0x1f0   :  { %14179 = vst [vmem:[#allocation18_spill] sm:$0xff] %v8841_v62  ;;  %2827 = vrot.lane.b32.xlu0 %v2378_v43, %s7789_s10 }
 0x1f2   :  { %v8848_v2 = vpop.xlane.xlu1 %2025  ;;  %2725 = vrot.lane.b32.xlu1 %v2327_v35, %s7789_s10  ;;  %v2320_v35 = vadd.f32 %v8774_v39, %v8492_v50  ;;  %v2335_v50 = vadd.f32 %v8774_v39, %v8735_v47 }
 0x1f3   :  { %v2023_v41 = vpop.xlane.xlu0 %2022 }
 0x1f4   :  { %2837 = vrot.lane.b32.xlu0 %v2383_v19, %s7789_s10 }
 0x1f6   :  { %v8856_v43 = vpop.xlane.xlu1 %2217  ;;  %2721 = vrot.lane.b32.xlu1 %v2325_v33, %s7789_s10  ;;  %v2384_v33 = vadd.f32 %v8774_v39, %v8508_v4  ;;  %v2333_v4 = vadd.f32 %v8774_v39, %v8752_v12 }
 0x1f7   :  { %14180 = vst [vmem:[#allocation19_spill] sm:$0xff] %v8856_v43  ;;  %v8859_v36 = vpop.xlane.xlu0 %2214 }
 0x1f8   :  { %14181 = vst [vmem:[#allocation20_spill] sm:$0xff] %v8859_v36  ;;  %2833 = vrot.lane.b32.xlu0 %v2381_v18, %s7789_s10 }
 0x1fa   :  { %v8866_v19 = vpop.xlane.xlu1 %2043  ;;  %2733 = vrot.lane.b32.xlu1 %v2331_v6, %s7789_s10  ;;  %v2318_v6 = vadd.f32 %v8774_v39, %v8526_v25  ;;  %v2339_v25 = vadd.f32 %v8774_v39, %v8764_v23 }
 0x1fb   :  { %v2041_v17 = vpop.xlane.xlu0 %2040 }
 0x1fc   :  { %2711 = vrot.lane.b32.xlu0 %v2320_v35, %s7789_s10 }
 0x1fe   :  { %v8874_v18 = vpop.xlane.xlu1 %2235  ;;  %2729 = vrot.lane.b32.xlu1 %v2329_v46, %s7789_s10  ;;  %v2382_v46 = vadd.f32 %v8774_v39, %v8543_v45  ;;  %v2337_v45 = vadd.f32 %v8774_v39, %v8778_v61 }
 0x1ff   :  { %14182 = vst [vmem:[#allocation21_spill] sm:$0xff] %v8874_v18  ;;  %v8877_v30 = vpop.xlane.xlu0 %2232 }
 0x200   :  { %14183 = vst [vmem:[#allocation22_spill] sm:$0xff] %v8877_v30  ;;  %2839 = vrot.lane.b32.xlu0 %v2384_v33, %s7789_s10 }
 0x202   :  { %v8884_v35 = vpop.xlane.xlu1 %2037  ;;  %2741 = vrot.lane.b32.xlu1 %v2335_v50, %s7789_s10  ;;  %v2387_v50 = vadd.f32 %v8774_v39, %v8578_v24  ;;  %v2343_v24 = vadd.f32 %v8774_v39, %v8792_v49 }
 0x203   :  { %v2035_v14 = vpop.xlane.xlu0 %2034 }
 0x204   :  { %2707 = vrot.lane.b32.xlu0 %v2318_v6, %s7789_s10 }
 0x206   :  { %v8892_v33 = vpop.xlane.xlu1 %2229  ;;  %2737 = vrot.lane.b32.xlu1 %v2333_v4, %s7789_s10  ;;  %v2385_v4 = vadd.f32 %v8774_v39, %v8610_v11  ;;  %v2341_v11 = vadd.f32 %v8774_v39, %v8811_v0 }
 0x207   :  { %14184 = vst [vmem:[#allocation23_spill] sm:$0xff] %v8892_v33  ;;  %v8895_v47 = vpop.xlane.xlu0 %2226 }
 0x208   :  { %14185 = vst [vmem:[#allocation24_spill] sm:$0xff] %v8895_v47  ;;  %2835 = vrot.lane.b32.xlu0 %v2382_v46, %s7789_s10 }
 0x20a   :  { %v8902_v6 = vpop.xlane.xlu1 %2055  ;;  %2749 = vrot.lane.b32.xlu1 %v2339_v25, %s7789_s10  ;;  %v2324_v25 = vadd.f32 %v8774_v39, %v8561_v60  ;;  %v2347_v60 = vadd.f32 %v8774_v39, %v8831_v26 }
 0x20b   :  { %v2053_v12 = vpop.xlane.xlu0 %2052 }
 0x20c   :  { %2845 = vrot.lane.b32.xlu0 %v2387_v50, %s7789_s10 }
 0x20e   :  { %v8910_v46 = vpop.xlane.xlu1 %2247  ;;  %2745 = vrot.lane.b32.xlu1 %v2337_v45, %s7789_s10  ;;  %v2388_v45 = vadd.f32 %v8774_v39, %v8576_v22  ;;  %v2345_v22 = vadd.f32 %v8774_v39, %v2023_v41 }
 0x20f   :  { %14186 = vst [vmem:[#allocation25_spill] sm:$0xff] %v8910_v46  ;;  %v8913_v23 = vpop.xlane.xlu0 %2244 }
 0x210   :  { %14187 = vst [vmem:[#allocation26_spill] sm:$0xff] %v8913_v23  ;;  %2841 = vrot.lane.b32.xlu0 %v2385_v4, %s7789_s10 }
 0x212   :  { %v8920_v50 = vpop.xlane.xlu1 %2049  ;;  %2757 = vrot.lane.b32.xlu1 %v2343_v24, %s7789_s10  ;;  %v2322_v24 = vadd.f32 %v8774_v39, %v8593_v40  ;;  %v2351_v40 = vadd.f32 %v8774_v39, %v2041_v17 }
 0x213   :  { %v2047_v61 = vpop.xlane.xlu0 %2046 }
 0x214   :  { %2719 = vrot.lane.b32.xlu0 %v2324_v25, %s7789_s10 }
 0x216   :  { %v8928_v4 = vpop.xlane.xlu1 %2241  ;;  %2753 = vrot.lane.b32.xlu1 %v2341_v11, %s7789_s10  ;;  %v2386_v11 = vadd.f32 %v8774_v39, %v8608_v8  ;;  %v2349_v8 = vadd.f32 %v8774_v39, %v2035_v14 }
 0x217   :  { %14188 = vst [vmem:[#allocation27_spill] sm:$0xff] %v8928_v4  ;;  %v8931_v49 = vpop.xlane.xlu0 %2238 }
 0x218   :  { %14189 = vst [vmem:[#allocation28_spill] sm:$0xff] %v8931_v49  ;;  %2847 = vrot.lane.b32.xlu0 %v2388_v45, %s7789_s10  ;;  %v2391_v45 = vadd.f32 %v8774_v39, %v8639_v58  ;;  %v2355_v58 = vadd.f32 %v8774_v39, %v2053_v12 }
 0x21a   :  { %v8938_v25 = vpop.xlane.xlu1 %2067  ;;  %2765 = vrot.lane.b32.xlu1 %v2347_v60, %s7789_s10 }
 0x21b   :  { %v2065_v0 = vpop.xlane.xlu0 %2064 }
 0x21c   :  { %2715 = vrot.lane.b32.xlu0 %v2322_v24, %s7789_s10  ;;  %v2389_v24 = vadd.f32 %v8774_v39, %v8672_v53  ;;  %v2353_v53 = vadd.f32 %v8774_v39, %v2047_v61 }
 0x21e   :  { %v8945_v49 = vpop.xlane.xlu1 %2259  ;;  %2761 = vrot.lane.b32.xlu1 %v2345_v22, %s7789_s10 }
 0x21f   :  { %14190 = vst [vmem:[#allocation29_spill] sm:$0xff] %v8945_v49  ;;  %v8948_v26 = vpop.xlane.xlu0 %2256 }
 0x220   :  { %14191 = vst [vmem:[#allocation30_spill] sm:$0xff] %v8948_v26  ;;  %2843 = vrot.lane.b32.xlu0 %v2386_v11, %s7789_s10  ;;  %v2328_v11 = vadd.f32 %v8774_v39, %v8625_v27  ;;  %v2359_v27 = vadd.f32 %v8774_v39, %v2065_v0 }
 0x222   :  { %v8954_v60 = vpop.xlane.xlu1 %2061  ;;  %2773 = vrot.lane.b32.xlu1 %v2351_v40, %s7789_s10 }
 0x223   :  { %v2059_v41 = vpop.xlane.xlu0 %2058 }
 0x224   :  { %2853 = vrot.lane.b32.xlu0 %v2391_v45, %s7789_s10  ;;  %v2392_v45 = vadd.f32 %v8774_v39, %v8637_v21  ;;  %v2357_v21 = vadd.f32 %v8774_v39, %v2059_v41 }
 0x226   :  { %v8961_v22 = vpop.xlane.xlu1 %2253  ;;  %2769 = vrot.lane.b32.xlu1 %v2349_v8, %s7789_s10 }
 0x227   :  { %14192 = vst [vmem:[#allocation31_spill] sm:$0xff] %v8961_v22  ;;  %v8964_v17 = vpop.xlane.xlu0 %2250 }
 0x228   :  { %14193 = vst [vmem:[#allocation32_spill] sm:$0xff] %v8964_v17  ;;  %2849 = vrot.lane.b32.xlu0 %v2389_v24, %s7789_s10  ;;  %v2326_v24 = vadd.f32 %v8774_v39, %v8654_v56 }
 0x22a   :  { %v8970_v40 = vpop.xlane.xlu1 %2079  ;;  %2781 = vrot.lane.b32.xlu1 %v2355_v58, %s7789_s10 }
 0x22b   :  { %v2077_v14 = vpop.xlane.xlu0 %2076 }
 0x22c   :  { %2727 = vrot.lane.b32.xlu0 %v2328_v11, %s7789_s10  ;;  %v2390_v11 = vadd.f32 %v8774_v39, %v8670_v57  ;;  %v2363_v56 = vadd.f32 %v8774_v39, %v2077_v14 }
 0x22e   :  { %v8977_v8 = vpop.xlane.xlu1 %2271  ;;  %2777 = vrot.lane.b32.xlu1 %v2353_v53, %s7789_s10 }
 0x22f   :  { %14194 = vst [vmem:[#allocation33_spill] sm:$0xff] %v8977_v8  ;;  %v8980_v12 = vpop.xlane.xlu0 %2268 }
 0x230   :  { %14195 = vst [vmem:[#allocation34_spill] sm:$0xff] %v8980_v12  ;;  %2855 = vrot.lane.b32.xlu0 %v2392_v45, %s7789_s10  ;;  %v2393_v45 = vadd.f32 %v8774_v39, %v8724_v29  ;;  %v2330_v29 = vadd.f32 %v8774_v39, %v8710_v31  ;;  %v2334_v31 = vadd.f32 %v8774_v39, %v8750_v34 }
 0x231   :  { %v2342_v34 = vadd.f32 %v8774_v39, %v8808_v3 }
 0x232   :  { %v8986_v58 = vpop.xlane.xlu1 %2073  ;;  %2789 = vrot.lane.b32.xlu1 %v2359_v27, %s7789_s10 }
 0x233   :  { %v2071_v61 = vpop.xlane.xlu0 %2070 }
 0x234   :  { %2723 = vrot.lane.b32.xlu0 %v2326_v24, %s7789_s10  ;;  %v2361_v57 = vadd.f32 %v8774_v39, %v2071_v61  ;;  %v2332_v24 = vadd.f32 %v8774_v39, %v8683_v37  ;;  %v2394_v61 = vadd.f32 %v8774_v39, %v8722_v1  ;;  %v2336_v37 = vadd.f32 %v8774_v39, %v8733_v16 }
 0x235   :  { %v2338_v1 = vadd.f32 %v8774_v39, %v8776_v48  ;;  %v2348_v48 = vadd.f32 %v8774_v39, %v8828_v52 }
 0x236   :  { %v8993_v53 = vpop.xlane.xlu1 %2265  ;;  %2785 = vrot.lane.b32.xlu1 %v2357_v21, %s7789_s10 }
 0x237   :  { %14196 = vst [vmem:[#allocation35_spill] sm:$0xff] %v8993_v53  ;;  %v8996_v0 = vpop.xlane.xlu0 %2262 }
 0x238   :  { %14197 = vst [vmem:[#allocation36_spill] sm:$0xff] %v8996_v0  ;;  %2851 = vrot.lane.b32.xlu0 %v2390_v11, %s7789_s10 }
 0x23a   :  { %2797 = vrot.lane.b32.xlu1 %v2363_v56, %s7789_s10  ;;  %v9007_v41 = vpop.xlane.xlu1 %2091 }
 0x23b   :  { %v9003_v27 = vpop.xlane.xlu0 %2088 }
 0x23c   :  { %2857 = vrot.lane.b32.xlu0 %v2393_v45, %s7789_s10  ;;  %v2340_v45 = vadd.f32 %v8774_v39, %v8762_v7  ;;  %v14198_v7 = vld [vmem:[#allocation8_spill] sm:$0xff] }
 0x23e   :  { %2793 = vrot.lane.b32.xlu1 %v2361_v57, %s7789_s10  ;;  %v9016_v11 = vpop.xlane.xlu1 %2085 }
 0x23f   :  { %v2083_v21 = vpop.xlane.xlu0 %2082 }
 0x240   :  { %v2365_v14 = vadd.f32 %v8774_v39, %v2083_v21  ;;  %2735 = vrot.lane.b32.xlu0 %v2332_v24, %s7789_s10  ;;  %v2344_v24 = vadd.f32 %v8774_v39, %v8789_v28  ;;  %v1366_v21 = vadd.f32 %v14198_v7, %v8074_v9  ;;  %v9057_v28 = vld [vmem:[%s14074_s0 + $0x8] sm:$0xff]  }
 0x241   :  { %v2443_v3 = vunpack.c.l.bf16 %v9057_v28 }
 0x242   :  { %2801 = vrot.lane.b32.xlu1 %v2365_v14, %s7789_s10  ;;  %v9026_v56 = vpop.xlane.xlu1 %2103  ;;  %vm1522_vm8 = vcmp.ge.f32.partialorder %v1366_v21, 0.0 }
 0x244   :  { %2731 = vrot.lane.b32.xlu0 %v2330_v29, %s7789_s10  ;;  %v1654_v29 = vmul.f32 %v8076_v10, %v1366_v21 }
 0x246   :  { %2859 = vrot.lane.b32.xlu1 %v2394_v61, %s7789_s10  ;;  %v9033_v57 = vpop.xlane.xlu1 %2097 }
 0x248   :  { %2743 = vrot.lane.b32.xlu0 %v2336_v37, %s7789_s10  ;;  %v2346_v37 = vadd.f32 %v8774_v39, %v8848_v2 }
 0x24a   :  { %v9039_v16 = vpop.xlane.xlu1 %2115 }
 0x24c   :  { %2739 = vrot.lane.b32.xlu0 %v2334_v31, %s7789_s10  ;;  %v1782_v31 = vsel %vm1522_vm8, %v1366_v21, %v1654_v29  ;;  %v2356_v21 = vadd.f32 %v8774_v39, %v8902_v6  ;;  %v9079_v29 = vpop.xlane.xlu0 %2274  ;;  %v2358_v6 = vadd.f32 %v8774_v39, %v8954_v60  ;;  %v2368_v60 = vadd.f32 %v8774_v39, %v9007_v41 }
 0x24d   :  { %14199 = vst [vmem:[#allocation8_spill] sm:$0xff] %v9079_v29 }
 0x24e   :  { %v9048_v14 = vpop.xlane.xlu1 %2109 }
 0x250   :  { %2751 = vrot.lane.b32.xlu0 %v2340_v45, %s7789_s10  ;;  %v2352_v45 = vadd.f32 %v8774_v39, %v8866_v19  ;;  %v2354_v19 = vadd.f32 %v8774_v39, %v8920_v50 }
 0x252   :  { %v2702_v61 = vpop.permute.xlu1 %2701 }
 0x253   :  { %v3083_v52 = vmul.f32 %v2702_v61, %v2443_v3  ;;  %v2101_v61 = vpop.xlane.xlu0 %2100 }
 0x254   :  { %2747 = vrot.lane.b32.xlu0 %v2338_v1, %s7789_s10  ;;  %v1914_v1 = vmul.f32 %v8083_v20, %v1782_v31 }
 0x256   :  { %v2279_v7 = vsel %vm1924_vm4, %v1914_v1, 0.0 }
 0x257   :  { %v2095_v50 = vpop.xlane.xlu0 %2094 }
 0x258   :  { %2759 = vrot.lane.b32.xlu0 %v2344_v24, %s7789_s10  ;;  %v3339_v24 = vand.u32 2147483647, %v3083_v52 }
 0x25a   :  { %v3467_v2 = vsub.f32 0.0, %v3339_v24  ;;  %v2367_v24 = vadd.f32 %v8774_v39, %v9003_v27 }
 0x25c   :  { %2755 = vrot.lane.b32.xlu0 %v2342_v34, %s7789_s10  ;;  %v2350_v34 = vadd.f32 %v8774_v39, %v8884_v35  ;;  %v2360_v35 = vadd.f32 %v8774_v39, %v8938_v25  ;;  %v2113_v25 = vpop.xlane.xlu0 %2112 }
 0x260   :  { %2767 = vrot.lane.b32.xlu0 %v2348_v48, %s7789_s10  ;;  %v3597_v48 = vmul.f32 1.442695, %v3467_v2 }
 0x262   :  { %7189 = vpow2.f32 %v3597_v48 }
 0x264   :  { %2763 = vrot.lane.b32.xlu0 %v2346_v37, %s7789_s10  ;;  %v2364_v37 = vadd.f32 %v8774_v39, %v8970_v40  ;;  %v2107_v40 = vpop.xlane.xlu0 %2106 }
 0x268   :  { %2775 = vrot.lane.b32.xlu0 %v2352_v45, %s7789_s10  ;;  %v2362_v45 = vadd.f32 %v8774_v39, %v8986_v58  ;;  %v9103_v58 = vpop.permute.xlu0 %2829 }
 0x269   :  { %14200 = vst [vmem:[#allocation37_spill] sm:$0xff] %v9103_v58 }
 0x26a   :  { %2280 = vadd.xlane.f32.xlu1 %v2279_v7  ;;  %v2371_v7 = vadd.f32 %v8774_v39, %v2101_v61  ;;  %v3211_v61 = vmax.f32 %v3083_v52, 0.0  ;;  %v2373_v52 = vadd.f32 %v8774_v39, %v2107_v40 }
 0x26c   :  { %2771 = vrot.lane.b32.xlu0 %v2350_v34, %s7789_s10  ;;  %v2366_v34 = vadd.f32 %v8774_v39, %v9016_v11  ;;  %v2372_v11 = vadd.f32 %v8774_v39, %v9026_v56 }
 0x26f   :  { %v7190_v31 = vpop.eup %7189 }
 0x270   :  { %2783 = vrot.lane.b32.xlu0 %v2356_v21, %s7789_s10  ;;  %v3867_v1 = vadd.f32 1.0, %v7190_v31  ;;  %v3870_v2 = vmul.f32 -0.5, %v7190_v31  ;;  %v2369_v21 = vadd.f32 %v8774_v39, %v2095_v50  ;;  %v3873_v41 = vand.u32 2147483647, %v7190_v31 }
 0x271   :  { %v2370_v50 = vadd.f32 %v8774_v39, %v9033_v57 }
 0x272   :  { %7191 = vlog2.f32 %v3867_v1  ;;  %v3871_v48 = vadd.f32 1.0, %v3870_v2  ;;  %vm3874_vm9 = vcmp.lt.f32.partialorder %v3873_v41, 0.0004427343  ;;  %v5259_v1 = vand.u32 2147483647, %v2443_v3 }
 0x273   :  { %v2376_v3 = vadd.f32 %v8774_v39, %v9039_v16 }
 0x274   :  { %2779 = vrot.lane.b32.xlu0 %v2354_v19, %s7789_s10  ;;  %v9108_v19 = vpop.permute.xlu0 %2825 }
 0x275   :  { %14201 = vst [vmem:[#allocation38_spill] sm:$0xff] %v9108_v19 }
 0x278   :  { %2791 = vrot.lane.b32.xlu0 %v2360_v35, %s7789_s10 }
 0x27c   :  { %2787 = vrot.lane.b32.xlu0 %v2358_v6, %s7789_s10  ;;  %v3872_v6 = vmul.f32 %v7190_v31, %v3871_v48 }
 0x27f   :  { %v7192_v27 = vpop.eup %7191 }
 0x280   :  { %2799 = vrot.lane.b32.xlu0 %v2364_v37, %s7789_s10  ;;  %v3869_v35 = vmul.f32 0.6931472, %v7192_v27  ;;  %v9141_v27 = vpop.f32.mrf.mxu1 }
 0x282   :  { %v3875_v37 = vsel %vm3874_vm9, %v3872_v6, %v3869_v35  ;;  %v1360_v48 = vpop.f32.mrf.mxu1 }
 0x283   :  { %v1361_v41 = vadd.f32 %v1360_v48, %v8074_v9 }
 0x284   :  { %2795 = vrot.lane.b32.xlu0 %v2362_v45, %s7789_s10  ;;  %v9114_v45 = vpop.permute.xlu0 %2831 }
 0x285   :  { %14202 = vst [vmem:[#allocation39_spill] sm:$0xff] %v9114_v45  ;;  %v1653_v16 = vmul.f32 %v8076_v10, %v1361_v41  ;;  %vm1521_vm10 = vcmp.ge.f32.partialorder %v1361_v41, 0.0 }
 0x288   :  { %2805 = vrot.lane.b32.xlu0 %v2367_v24, %s7789_s10  ;;  %v5003_v24 = vadd.f32 %v3875_v37, %v3211_v61  ;;  %v2700_v56 = vpop.permute.xlu0 %2699 }
 0x28a   :  { %v5387_v31 = vmul.f32 %v5259_v1, %v5003_v24 }
 0x28c   :  { %2807 = vrot.lane.b32.xlu0 %v2368_v60, %s7789_s10  ;;  %v2375_v60 = vadd.f32 %v8774_v39, %v2113_v25  ;;  %5645 = vrot.lane.b32.xlu1 %v5387_v31, %s7789_s10  ;;  %v9128_v57 = vpop.permute.xlu0 %2827  ;;  %v2374_v25 = vadd.f32 %v8774_v39, %v9048_v14  ;;  %v1781_v14 = vsel %vm1521_vm10, %v1361_v41, %v1653_v16  ;;  %v14078_v31 = vunpack.c.h.bf16 %v9057_v28 }
 0x28d   :  { %v1913_v6 = vmul.f32 %v8083_v20, %v1781_v14  ;;  %v9174_v14 = vpop.f32.mrf.mxu1 }
 0x28e   :  { %14213 = vst [vmem:[#allocation46_spill] sm:$0xff] %v9174_v14 }
 0x28f   :  { %v2276_v61 = vsel %vm1924_vm4, %v1913_v6, 0.0  ;;  %v1373_v0 = vpop.f32.mrf.mxu1 }
 0x290   :  { %2803 = vrot.lane.b32.xlu0 %v2366_v34, %s7789_s10  ;;  %v14203_v34 = vld [vmem:[#allocation9_spill] sm:$0xff]  ;;  %v9136_v2 = vpop.permute.xlu0 %2837 }
 0x291   :  { %14204 = vst [vmem:[#allocation9_spill] sm:$0xff] %v9128_v57  ;;  %14205 = vst [vmem:[#allocation40_spill] sm:$0xff] %v9136_v2  ;;  %v9199_v17 = vpop.f32.mrf.mxu1 }
 0x292   :  { %14215 = vst [vmem:[#allocation48_spill] sm:$0xff] %v9199_v17 }
 0x294   :  { %2813 = vrot.lane.b32.xlu0 %v2371_v7, %s7789_s10  ;;  %v2396_v7 = vadd.f32 %v8774_v39, %v14203_v34  ;;  %v9139_v40 = vpop.permute.xlu0 %2833 }
 0x295   :  { %14206 = vst [vmem:[#allocation41_spill] sm:$0xff] %v9139_v40 }
 0x296   :  { %2863 = vrot.lane.b32.xlu1 %v2396_v7, %s7789_s10 }
 0x298   :  { %2809 = vrot.lane.b32.xlu0 %v2369_v21, %s7789_s10  ;;  %v9143_v21 = vpop.permute.xlu0 %2711 }
 0x29c   :  { %2815 = vrot.lane.b32.xlu0 %v2372_v11, %s7789_s10  ;;  %v9146_v35 = vpop.permute.xlu0 %2839 }
 0x29d   :  { %14207 = vst [vmem:[#allocation42_spill] sm:$0xff] %v9146_v35 }
 0x2a0   :  { %2811 = vrot.lane.b32.xlu0 %v2370_v50, %s7789_s10  ;;  %v9149_v11 = vpop.permute.xlu0 %2707  ;;  %v9155_v50 = vpop.permute.xlu1 %2697 }
 0x2a4   :  { %2821 = vrot.lane.b32.xlu0 %v2375_v60, %s7789_s10  ;;  %v9152_v37 = vpop.permute.xlu0 %2835  ;;  %v2704_v24 = vpop.permute.xlu1 %2703 }
 0x2a5   :  { %14208 = vst [vmem:[#allocation43_spill] sm:$0xff] %v9152_v37  ;;  %v9166_v7 = vmul.f32 %v2704_v24, %v14078_v31  ;;  %v1374_v24 = vadd.f32 %v1373_v0, %v8074_v9 }
 0x2a7   :  { %v3340_v41 = vand.u32 2147483647, %v9166_v7  ;;  %vm1524_vm11 = vcmp.ge.f32.partialorder %v1374_v24, 0.0 }
 0x2a8   :  { %2817 = vrot.lane.b32.xlu0 %v2373_v52, %s7789_s10  ;;  %v9157_v1 = vpop.permute.xlu0 %2845  ;;  %v2710_v52 = vpop.permute.xlu1 %2709 }
 0x2a9   :  { %14209 = vst [vmem:[#allocation44_spill] sm:$0xff] %v9157_v1  ;;  %v3468_v6 = vsub.f32 0.0, %v3340_v41 }
 0x2ac   :  { %2823 = vrot.lane.b32.xlu0 %v2376_v3, %s7789_s10  ;;  %v9159_v60 = vpop.permute.xlu0 %2841  ;;  %v14211_v3 = vld [vmem:[#allocation10_spill] sm:$0xff]  ;;  %v2706_v48 = vpop.permute.xlu1 %2705 }
 0x2ad   :  { %14210 = vst [vmem:[#allocation45_spill] sm:$0xff] %v9159_v60 }
 0x2b0   :  { %2819 = vrot.lane.b32.xlu0 %v2374_v25, %s7789_s10  ;;  %v9162_v34 = vpop.permute.xlu0 %2719  ;;  %v2395_v25 = vadd.f32 %v8774_v39, %v14211_v3  ;;  %v9184_v3 = vld [vmem:[%s14074_s0] sm:$0xff]  }
 0x2b1   :  { %v14079_v31 = vunpack.c.h.bf16 %v9184_v3 }
 0x2b3   :  { %v9192_v41 = vmul.f32 %v2700_v56, %v14079_v31 }
 0x2b4   :  { %v9171_v16 = vpop.permute.xlu0 %2847 }
 0x2b5   :  { %14212 = vst [vmem:[#allocation10_spill] sm:$0xff] %v9171_v16  ;;  %v3599_v16 = vmul.f32 1.442695, %v3468_v6  ;;  %v3338_v12 = vand.u32 2147483647, %v9192_v41 }
 0x2b7   :  { %7193 = vpow2.f32 %v3599_v16  ;;  %v9207_v16 = vld [vmem:[%s14074_s0 + $0x18] sm:$0xff]   ;;  %v3466_v31 = vsub.f32 0.0, %v3338_v12 }
 0x2b8   :  { %v9178_v29 = vpop.permute.xlu0 %2715  ;;  %v14080_v56 = vunpack.c.l.bf16 %v9207_v16  ;;  %v14083_v37 = vunpack.c.h.bf16 %v9207_v16 }
 0x2b9   :  { %v3595_v26 = vmul.f32 1.442695, %v3466_v31 }
 0x2bb   :  { %7195 = vpow2.f32 %v3595_v26 }
 0x2bc   :  { %v9194_v60 = vpop.permute.xlu0 %2843 }
 0x2bd   :  { %14214 = vst [vmem:[#allocation47_spill] sm:$0xff] %v9194_v60  ;;  %v1376_v60 = vpop.f32.mrf.mxu1 }
 0x2c0   :  { %v9201_v6 = vpop.permute.xlu0 %2853 }
 0x2c1   :  { %14216 = vst [vmem:[#allocation49_spill] sm:$0xff] %v9201_v6  ;;  %v9218_v6 = vld [vmem:[%s14074_s0 + $0x10] sm:$0xff]  }
 0x2c2   :  { %v14082_v26 = vunpack.c.h.bf16 %v9218_v6 }
 0x2c4   :  { %v9223_v1 = vpop.permute.xlu0 %2849  ;;  %v7194_v12 = vpop.eup %7193 }
 0x2c5   :  { %14217 = vst [vmem:[#allocation50_spill] sm:$0xff] %v9223_v1  ;;  %v3882_v19 = vand.u32 2147483647, %v7194_v12 }
 0x2c8   :  { %v9235_v31 = vpop.permute.xlu0 %2727 }
 0x2cc   :  { %v9247_v35 = vpop.permute.xlu0 %2855 }
 0x2cd   :  { %14218 = vst [vmem:[#allocation51_spill] sm:$0xff] %v9247_v35 }
 0x2cf   :  { %2277 = vadd.xlane.f32.xlu0 %v2276_v61  ;;  %v9176_v61 = vpop.permute.xlu1 %2717 }
 0x2d3   :  { %v9187_v53 = vpop.permute.xlu1 %2713 }
 0x2d7   :  { %v9197_v8 = vpop.permute.xlu1 %2725 }
 0x2db   :  { %v9221_v17 = vpop.permute.xlu1 %2721 }
 0x2df   :  { %v9232_v4 = vpop.permute.xlu1 %2733 }
 0x2e3   :  { %v9245_v33 = vpop.permute.xlu1 %2729 }
 0x2e5   :  { %2861 = vrot.lane.b32.xlu0 %v2395_v25, %s7789_s10  ;;  %v1656_v25 = vmul.f32 %v8076_v10, %v1374_v24 }
 0x2e7   :  { %v1784_v0 = vsel %vm1524_vm11, %v1374_v24, %v1656_v25  ;;  %v9213_v25 = vmul.f32 %v2710_v52, %v14080_v56  ;;  %v3876_v56 = vadd.f32 1.0, %v7194_v12 }
 0x2e8   :  { %v1916_v22 = vmul.f32 %v8083_v20, %v1784_v0  ;;  %v14081_v0 = vunpack.c.l.bf16 %v9218_v6 }
 0x2e9   :  { %v3343_v49 = vand.u32 2147483647, %v9213_v25  ;;  %7197 = vlog2.f32 %v3876_v56 }
 0x2ea   :  { %v2285_v24 = vsel %vm1924_vm4, %v1916_v22, 0.0  ;;  %v1377_v22 = vadd.f32 %v1376_v60, %v8074_v9  ;;  %v9229_v52 = vmul.f32 %v2706_v48, %v14081_v0  ;;  %v9241_v48 = vmul.f32 %v9143_v21, %v14083_v37 }
 0x2eb   :  { %2286 = vadd.xlane.f32.xlu1 %v2285_v24  ;;  %v3471_v1 = vsub.f32 0.0, %v3343_v49  ;;  %v9254_v21 = vmul.f32 %v9149_v11, %v14082_v26  ;;  %v9273_v26 = vpop.permute.xlu0 %2723 }
 0x2ec   :  { %v1657_v24 = vmul.f32 %v8076_v10, %v1377_v22  ;;  %vm1525_vm12 = vcmp.ge.f32.partialorder %v1377_v22, 0.0  ;;  %v3341_v60 = vand.u32 2147483647, %v9229_v52  ;;  %v3344_v56 = vand.u32 2147483647, %v9241_v48 }
 0x2ed   :  { %v3605_v46 = vmul.f32 1.442695, %v3471_v1  ;;  %v295_v1 = vld [vmem:[%s14074_s0 + $0x1f0] sm:$0xff]  }
 0x2ee   :  { %v1785_v0 = vsel %vm1525_vm12, %v1377_v22, %v1657_v24  ;;  %v3469_v47 = vsub.f32 0.0, %v3341_v60  ;;  %v9262_v24 = vpop.eup %7195  ;;  %v3472_v60 = vsub.f32 0.0, %v3344_v56  ;;  %7036 = vmatprep.mubr.msk.bf16.mxu1 %vm660_vm1, %v295_v1  ;;  %v9285_v56 = vld [vmem:[%s14074_s0 + $0x20] sm:$0xff]   ;;  %v2441_v1 = vunpack.c.l.bf16 %v9184_v3 }
 0x2ef   :  { %v1917_v23 = vmul.f32 %v8083_v20, %v1785_v0  ;;  %7199 = vpow2.f32 %v3605_v46  ;;  %v297_v0 = vld [vmem:[%s14074_s0 + $0x1f8] sm:$0xff]   ;;  %v9271_v46 = vpop.permute.xlu1 %2741  ;;  %v3858_v37 = vadd.f32 1.0, %v9262_v24  ;;  %v14086_v2 = vunpack.c.l.bf16 %v9285_v56 }
 0x2f0   :  { %v3601_v22 = vmul.f32 1.442695, %v3469_v47  ;;  %v3342_v47 = vand.u32 2147483647, %v9254_v21  ;;  %v3607_v57 = vmul.f32 1.442695, %v3472_v60  ;;  %7037 = vmatmul.mubr.msk.bf16.gmra.mxu1 %vm660_vm1, %v297_v0 }
 0x2f1   :  { %v2288_v49 = vsel %vm1924_vm4, %v1917_v23, 0.0  ;;  %v9267_v23 = vld [vmem:[%s14074_s0 + $0x28] sm:$0xff]   ;;  %v9298_v18 = vmul.f32 %v9187_v53, %v14086_v2  ;;  %vm3883_vm1 = vcmp.lt.f32.partialorder %v3882_v19, 0.0004427343  ;;  %v3861_v2 = vmul.f32 -0.5, %v9262_v24 }
 0x2f2   :  { %2289 = vadd.xlane.f32.xlu1 %v2288_v49  ;;  %v14084_v11 = vunpack.c.l.bf16 %v9267_v23  ;;  %v3879_v49 = vmul.f32 -0.5, %v7194_v12  ;;  %7201 = vpow2.f32 %v3601_v22  ;;  %v3470_v45 = vsub.f32 0.0, %v3342_v47 }
 0x2f3   :  { %v9290_v14 = vpop.permute.xlu1 %2737  ;;  %7203 = vlog2.f32 %v3858_v37  ;;  %v14085_v47 = vunpack.c.h.bf16 %v9267_v23  ;;  %v3345_v36 = vand.u32 2147483647, %v9298_v18  ;;  %v9365_v51 = vand.u32 2147483647, %v2441_v1 }
 0x2f4   :  { %v9280_v40 = vmul.f32 %v9176_v61, %v14084_v11  ;;  %v3880_v22 = vadd.f32 1.0, %v3879_v49  ;;  %v9292_v61 = vpop.permute.xlu0 %2851  ;;  %7205 = vpow2.f32 %v3607_v57  ;;  %v3603_v60 = vmul.f32 1.442695, %v3470_v45 }
 0x2f5   :  { %14219 = vst [vmem:[#allocation52_spill] sm:$0xff] %v9292_v61  ;;  %v9302_v49 = vmul.f32 %v9155_v50, %v2441_v1  ;;  %v3212_v61 = vmax.f32 %v9166_v7, 0.0  ;;  %v9313_v45 = vmul.f32 %v9162_v34, %v14085_v47  ;;  %v9327_v34 = vld [vmem:[%s14074_s0 + $0x38] sm:$0xff]   ;;  %14225 = vst [vmem:[#allocation55_spill] sm:$0xff] %v9365_v51  ;;  %v9385_v51 = vadd.f32 %v9141_v27, %v8074_v9 }
 0x2f6   :  { %v7198_v35 = vpop.eup %7197  ;;  %v3347_v11 = vand.u32 2147483647, %v9280_v40  ;;  %v3881_v0 = vmul.f32 %v7194_v12, %v3880_v22  ;;  %7207 = vpow2.f32 %v3603_v60  ;;  %v14223_v62 = vunpack.c.l.bf16 %v9327_v34 }
 0x2f7   :  { %v3878_v30 = vmul.f32 0.6931472, %v7198_v35  ;;  %v9308_v53 = vpop.permute.xlu1 %2749  ;;  %v3337_v19 = vand.u32 2147483647, %v9302_v49  ;;  %v3348_v57 = vand.u32 2147483647, %v9313_v45 }
 0x2f8   :  { %v3475_v58 = vsub.f32 0.0, %v3347_v11  ;;  %v9316_v50 = vpop.permute.xlu0 %2857  ;;  %v9345_v15 = vmul.f32 %v9197_v8, %v14223_v62  ;;  %v3864_v62 = vand.u32 2147483647, %v9262_v24  ;;  %v9361_v8 = vld [vmem:[%s14074_s0 + $0x100] sm:$0xff]   ;;  %vm1523_vm15 = vcmp.ge.f32.partialorder %v9385_v51, 0.0 }
 0x2f9   :  { %v3884_v37 = vsel %vm3883_vm1, %v3881_v0, %v3878_v30  ;;  %14220 = vst [vmem:[#allocation53_spill] sm:$0xff] %v9316_v50  ;;  %v14221_v30 = vunpack.c.h.bf16 %v9057_v28  ;;  %v3473_v0 = vsub.f32 0.0, %v3345_v36  ;;  %v14222_v28 = vunpack.c.h.bf16 %v9285_v56  ;;  %14224 = vst [vmem:[#allocation54_spill] sm:$0xff] %v9361_v8 }
 0x2fa   :  { %v5004_v12 = vadd.f32 %v3884_v37, %v3212_v61  ;;  %v3613_v60 = vmul.f32 1.442695, %v3475_v58  ;;  %v3465_v37 = vsub.f32 0.0, %v3337_v19  ;;  %v3862_v19 = vadd.f32 1.0, %v3861_v2 }
 0x2fb   :  { %v5260_v7 = vand.u32 2147483647, %v14221_v30  ;;  %v9335_v61 = vmul.f32 %v9178_v29, %v14222_v28  ;;  %v9338_v58 = vpop.permute.xlu1 %2745  ;;  %v3609_v47 = vmul.f32 1.442695, %v3473_v0  ;;  %vm9387_vm13 = vcmp.lt.f32.partialorder %v3864_v62, 0.0004427343 }
 0x2fc   :  { %v9304_v35 = vpop.eup %7199  ;;  %v9340_v50 = vpop.permute.xlu0 %2735  ;;  %v3593_v0 = vmul.f32 1.442695, %v3465_v37  ;;  %v3863_v44 = vmul.f32 %v9262_v24, %v3862_v19  ;;  %v14231_v24 = vunpack.c.l.bf16 %v9361_v8 }
 0x2fd   :  { %v3903_v11 = vadd.f32 1.0, %v9304_v35  ;;  %v5388_v30 = vmul.f32 %v5260_v7, %v5004_v12  ;;  %v3476_v12 = vsub.f32 0.0, %v3348_v57  ;;  %v3351_v57 = vand.u32 2147483647, %v9345_v15 }
 0x2ff   :  { %v9322_v22 = vpop.eup %7201  ;;  %7209 = vlog2.f32 %v3903_v11  ;;  %v9353_v11 = vld [vmem:[%s14074_s0 + $0x30] sm:$0xff]   ;;  %v3615_v28 = vmul.f32 1.442695, %v3476_v12  ;;  %v3906_v12 = vmul.f32 -0.5, %v9304_v35  ;;  %v3479_v27 = vsub.f32 0.0, %v3351_v57 }
 0x300   :  { %v3885_v36 = vadd.f32 1.0, %v9322_v22  ;;  %v7204_v43 = vpop.eup %7203  ;;  %7211 = vpow2.f32 %v3613_v60  ;;  %v3346_v60 = vand.u32 2147483647, %v9335_v61  ;;  %v14227_v13 = vunpack.c.l.bf16 %v9353_v11  ;;  %v9379_v1 = vpop.permute.xlu0 %2731 }
 0x301   :  { %v9348_v29 = vpop.eup %7205 }
 0x302   :  { %7213 = vlog2.f32 %v3885_v36  ;;  %v3912_v37 = vadd.f32 1.0, %v9348_v29  ;;  %v9369_v36 = vpop.permute.xlu1 %2757  ;;  %v9377_v2 = vmul.f32 %v9221_v17, %v14227_v13  ;;  %v9393_v13 = vand.u32 2147483647, %v14231_v24 }
 0x303   :  { %5647 = vrot.lane.b32.xlu1 %v5388_v30, %s7789_s10  ;;  %v3860_v30 = vmul.f32 0.6931472, %v7204_v43  ;;  %7215 = vpow2.f32 %v3609_v47  ;;  %14226 = vst [vmem:[#allocation56_spill] sm:$0xff] %v9369_v36  ;;  %v9371_v7 = vpop.eup %7207  ;;  %v3474_v43 = vsub.f32 0.0, %v3346_v60  ;;  %v14228_v47 = vunpack.c.h.bf16 %v9184_v3 }
 0x304   :  { %7217 = vpow2.f32 %v3593_v0  ;;  %14232 = vst [vmem:[#allocation57_spill] sm:$0xff] %v9393_v13  ;;  %v3210_v17 = vmax.f32 %v9192_v41, 0.0  ;;  %v14087_v3 = vunpack.c.h.bf16 %v9327_v34  ;;  %v3894_v60 = vadd.f32 1.0, %v9371_v7 }
 0x305   :  { %v5258_v59 = vand.u32 2147483647, %v14228_v47  ;;  %v3866_v19 = vsel %vm9387_vm13, %v3863_v44, %v3860_v30  ;;  %7219 = vlog2.f32 %v3912_v37  ;;  %v14233_v0 = vunpack.c.h.bf16 %v9361_v8 }
 0x306   :  { %v3349_v47 = vand.u32 2147483647, %v9377_v2  ;;  %7221 = vpow2.f32 %v3615_v28  ;;  %v3611_v24 = vmul.f32 1.442695, %v3474_v43  ;;  %v9408_v41 = vadd.f32 %v8774_v39, %v8742_v32  ;;  %v9418_v37 = vpop.permute.xlu1 %2753 }
 0x307   :  { %v9403_v62 = vand.u32 2147483647, %v14233_v0  ;;  %v9412_v44 = vadd.f32 %v8774_v39, %v8744_v55  ;;  %v9416_v30 = vmul.f32 %v8076_v10, %v9385_v51  ;;  %v5002_v57 = vadd.f32 %v3866_v19, %v3210_v17  ;;  %14237 = vst [vmem:[#allocation61_spill] sm:$0xff] %v9418_v37  ;;  %v9434_v0 = vpop.permute.xlu0 %2743 }
 0x308   :  { %14235 = vst [vmem:[#allocation59_spill] sm:$0xff] %v9408_v41  ;;  %v9422_v28 = vadd.f32 %v8774_v39, %v8757_v42  ;;  %v9426_v32 = vadd.f32 %v8774_v39, %v8759_v63  ;;  %v9431_v55 = vmul.f32 %v9235_v31, %v14087_v3  ;;  %v3907_v17 = vadd.f32 1.0, %v3906_v12 }
 0x309   :  { %14234 = vst [vmem:[#allocation58_spill] sm:$0xff] %v9403_v62  ;;  %14236 = vst [vmem:[#allocation60_spill] sm:$0xff] %v9412_v44  ;;  %v3888_v19 = vmul.f32 -0.5, %v9322_v22  ;;  %v3621_v62 = vmul.f32 1.442695, %v3479_v27  ;;  %7223 = vlog2.f32 %v3894_v60  ;;  %v9441_v63 = vadd.f32 %v8774_v39, %v8767_v54  ;;  %v9457_v54 = vld [vmem:[%s14074_s0 + $0x48] sm:$0xff]  }
 0x30a   :  { %14238 = vst [vmem:[#allocation62_spill] sm:$0xff] %v9422_v28  ;;  %14239 = vst [vmem:[#allocation63_spill] sm:$0xff] %v9426_v32  ;;  %v3909_v13 = vand.u32 2147483647, %v9304_v35  ;;  %v3477_v41 = vsub.f32 0.0, %v3349_v47  ;;  %7225 = vpow2.f32 %v3611_v24  ;;  %v9446_v31 = vadd.f32 %v8774_v39, %v8769_v38 }
 0x30b   :  { %14240 = vst [vmem:[#allocation64_spill] sm:$0xff] %v9441_v63  ;;  %v14242_v12 = vunpack.c.l.bf16 %v9207_v16  ;;  %v5386_v27 = vmul.f32 %v5258_v59, %v5002_v57  ;;  %v14243_v44 = vunpack.c.l.bf16 %v9218_v6  ;;  %v3352_v38 = vand.u32 2147483647, %v9431_v55 }
 0x30c   :  { %v7210_v36 = vpop.eup %7209  ;;  %14241 = vst [vmem:[#allocation65_spill] sm:$0xff] %v9446_v31  ;;  %v14244_v24 = vunpack.c.h.bf16 %v9353_v11  ;;  %v3908_v59 = vmul.f32 %v9304_v35, %v3907_v17  ;;  %v3889_v57 = vadd.f32 1.0, %v3888_v19  ;;  %7227 = vpow2.f32 %v3621_v62  ;;  %v9482_v17 = vpop.permute.xlu0 %2739 }
 0x30d   :  { %v9437_v42 = vpop.eup %7211  ;;  %v5263_v3 = vand.u32 2147483647, %v14242_v12  ;;  %v3905_v43 = vmul.f32 0.6931472, %v7210_v36  ;;  %v9452_v10 = vand.u32 2147483647, %v14243_v44  ;;  %v9468_v36 = vpop.permute.xlu1 %2765  ;;  %5643 = vrot.lane.b32.xlu1 %v5386_v27, %s7789_s10  ;;  %v9475_v47 = vadd.f32 %v8774_v39, %v8783_v5 }
 0x30e   :  { %v9464_v12 = vmul.f32 %v9273_v26, %v14244_v24  ;;  %v3939_v44 = vadd.f32 1.0, %v9437_v42  ;;  %14246 = vst [vmem:[#allocation67_spill] sm:$0xff] %v9468_v36  ;;  %vm9477_vm14 = vcmp.lt.f32.partialorder %v3909_v13, 0.0004427343  ;;  %v3891_v26 = vand.u32 2147483647, %v9322_v22 }
 0x30f   :  { %v7214_v60 = vpop.eup %7213  ;;  %14247 = vst [vmem:[#allocation68_spill] sm:$0xff] %v9475_v47  ;;  %v3617_v35 = vmul.f32 1.442695, %v3477_v41  ;;  %v3911_v62 = vsel %vm9477_vm14, %v3908_v59, %v3905_v43  ;;  %v3915_v27 = vmul.f32 -0.5, %v9348_v29  ;;  %v9490_v5 = vld [vmem:[%s14074_s0 + $0x40] sm:$0xff]   ;;  %v3215_v41 = vmax.f32 %v9213_v25, 0.0 }
 0x310   :  { %14245 = vst [vmem:[#allocation66_spill] sm:$0xff] %v9464_v12  ;;  %v9471_v63 = vpop.eup %7215  ;;  %v3887_v19 = vmul.f32 0.6931472, %v7214_v60  ;;  %v14250_v47 = vunpack.c.l.bf16 %v9267_v23  ;;  %v3480_v43 = vsub.f32 0.0, %v3352_v38  ;;  %v3350_v60 = vand.u32 2147483647, %v9464_v12  ;;  %v9528_v39 = vpop.permute.xlu0 %2751 }
 0x311   :  { %v9493_v24 = vpop.eup %7217  ;;  %v3213_v59 = vmax.f32 %v9229_v52, 0.0  ;;  %v3890_v8 = vmul.f32 %v9322_v22, %v3889_v57  ;;  %7229 = vlog2.f32 %v3939_v44  ;;  %v14251_v13 = vunpack.c.l.bf16 %v9457_v54  ;;  %14257 = vst [vmem:[#allocation71_spill] sm:$0xff] %v9528_v39 }
 0x312   :  { %v9499_v31 = vand.u32 2147483647, %v14250_v47  ;;  %v7220_v28 = vpop.eup %7219  ;;  %v5007_v32 = vadd.f32 %v3911_v62, %v3215_v41  ;;  %vm9509_vm0 = vcmp.lt.f32.partialorder %v3891_v26, 0.0004427343  ;;  %v3921_v47 = vadd.f32 1.0, %v9471_v63  ;;  %v9524_v26 = vpop.permute.xlu1 %2761 }
 0x313   :  { %v9507_v9 = vmul.f32 %v9232_v4, %v14251_v13  ;;  %7231 = vpow2.f32 %v3617_v35  ;;  %v9514_v38 = vpop.eup %7221  ;;  %v3849_v52 = vadd.f32 1.0, %v9493_v24  ;;  %v3893_v22 = vsel %vm9509_vm0, %v3890_v8, %v3887_v19  ;;  %14256 = vst [vmem:[#allocation70_spill] sm:$0xff] %v9524_v26 }
 0x314   :  { %v3916_v57 = vadd.f32 1.0, %v3915_v27  ;;  %v14255_v4 = vunpack.c.l.bf16 %v9490_v5  ;;  %v3918_v62 = vand.u32 2147483647, %v9348_v29  ;;  %v3897_v13 = vmul.f32 -0.5, %v9371_v7 }
 0x315   :  { %14252 = vst [vmem:[#allocation69_spill] sm:$0xff] %v9507_v9  ;;  %v3623_v35 = vmul.f32 1.442695, %v3480_v43  ;;  %v3478_v41 = vsub.f32 0.0, %v3350_v60  ;;  %v14258_v36 = vunpack.c.l.bf16 %v9285_v56  ;;  %v3914_v8 = vmul.f32 0.6931472, %v7220_v28 }
 0x316   :  { %v9522_v44 = vmul.f32 %v9245_v33, %v14255_v4  ;;  %v3355_v19 = vand.u32 2147483647, %v9507_v9  ;;  %v9538_v33 = vld [vmem:[%s14074_s0 + $0x58] sm:$0xff]   ;;  %v7224_v4 = vpop.eup %7223  ;;  %v5005_v26 = vadd.f32 %v3893_v22, %v3213_v59  ;;  %7233 = vlog2.f32 %v3921_v47 }
 0x317   :  { %v9532_v25 = vand.u32 2147483647, %v14258_v36  ;;  %v3948_v43 = vadd.f32 1.0, %v9514_v38  ;;  %v5391_v60 = vmul.f32 %v5263_v3, %v5007_v32  ;;  %v9542_v37 = vpop.eup %7225  ;;  %7235 = vlog2.f32 %v3849_v52 }
 0x318   :  { %v14259_v28 = vunpack.c.l.bf16 %v9327_v34  ;;  %v3917_v9 = vmul.f32 %v9348_v29, %v3916_v57  ;;  %v3353_v39 = vand.u32 2147483647, %v9522_v44  ;;  %vm9550_vm2 = vcmp.lt.f32.partialorder %v3918_v62, 0.0004427343 }
 0x319   :  { %v3898_v59 = vadd.f32 1.0, %v3897_v13  ;;  %7237 = vpow2.f32 %v3623_v35  ;;  %v3619_v47 = vmul.f32 1.442695, %v3478_v41  ;;  %5653 = vrot.lane.b32.xlu1 %v5391_v60, %s7789_s10  ;;  %v3483_v32 = vsub.f32 0.0, %v3355_v19  ;;  %v9560_v29 = vpop.eup %7227  ;;  %v9565_v35 = vpop.permute.xlu0 %2747  ;;  %v9572_v41 = vld [vmem:[%s14074_s0 + $0x50] sm:$0xff]  }
 0x31a   :  { %v9546_v36 = vand.u32 2147483647, %v14259_v28  ;;  %v3920_v3 = vsel %vm9550_vm2, %v3917_v9, %v3914_v8  ;;  %v3896_v52 = vmul.f32 0.6931472, %v7224_v4  ;;  %v3900_v22 = vand.u32 2147483647, %v9371_v7  ;;  %v9558_v28 = vpop.permute.xlu1 %2773 }
 0x31b   :  { %14262 = vst [vmem:[#allocation72_spill] sm:$0xff] %v9558_v28  ;;  %7239 = vlog2.f32 %v3948_v43  ;;  %v3930_v57 = vadd.f32 1.0, %v9542_v37  ;;  %v14098_v62 = vunpack.c.h.bf16 %v9457_v54  ;;  %v5389_v13 = vmul.f32 %v9452_v10, %v5005_v26 }
 0x31c   :  { %v3942_v12 = vmul.f32 -0.5, %v9437_v42  ;;  %v3216_v9 = vmax.f32 %v9241_v48, 0.0  ;;  %v9579_v19 = vsel %vm1523_vm15, %v9385_v51, %v9416_v30  ;;  %v3481_v10 = vsub.f32 0.0, %v3353_v39  ;;  %v9585_v48 = vld [vmem:[%s14074_s0 + $0x68] sm:$0xff]  }
 0x31d   :  { %v3899_v26 = vmul.f32 %v9371_v7, %v3898_v59  ;;  %7241 = vpow2.f32 %v3619_v47  ;;  %5649 = vrot.lane.b32.xlu1 %v5389_v13, %s7789_s10  ;;  %v3975_v43 = vadd.f32 1.0, %v9560_v29  ;;  %v14263_v60 = vunpack.c.h.bf16 %v9207_v16  ;;  %v9614_v39 = vpop.permute.xlu0 %2759 }
 0x31e   :  { %v5008_v51 = vadd.f32 %v3920_v3, %v3216_v9  ;;  %vm9592_vm3 = vcmp.lt.f32.partialorder %v3900_v22, 0.0004427343  ;;  %v7230_v7 = vpop.eup %7229  ;;  %v3629_v30 = vmul.f32 1.442695, %v3483_v32  ;;  %7243 = vlog2.f32 %v3930_v57  ;;  %v9609_v32 = vpop.permute.xlu1 %2769 }
 0x31f   :  { %v5264_v8 = vand.u32 2147483647, %v14263_v60  ;;  %v3902_v59 = vsel %vm9592_vm3, %v3899_v26, %v3896_v52  ;;  %v9601_v47 = vmul.f32 %v9340_v50, %v14098_v62  ;;  %v3943_v3 = vadd.f32 1.0, %v3942_v12  ;;  %14267 = vst [vmem:[#allocation73_spill] sm:$0xff] %v9609_v32 }
 0x320   :  { %v9603_v13 = vpop.eup %7231  ;;  %v14266_v22 = vunpack.c.h.bf16 %v9218_v6  ;;  %v3214_v60 = vmax.f32 %v9254_v21, 0.0  ;;  %v3852_v52 = vmul.f32 -0.5, %v9493_v24  ;;  %v3945_v57 = vand.u32 2147483647, %v9437_v42 }
 0x321   :  { %v3924_v26 = vmul.f32 -0.5, %v9471_v63  ;;  %v3625_v50 = vmul.f32 1.442695, %v3481_v10  ;;  %v3941_v62 = vmul.f32 0.6931472, %v7230_v7  ;;  %7245 = vlog2.f32 %v3975_v43 }
 0x322   :  { %v5262_v9 = vand.u32 2147483647, %v14266_v22  ;;  %v5006_v16 = vadd.f32 %v3902_v59, %v3214_v60  ;;  %v5392_v12 = vmul.f32 %v5264_v8, %v5008_v51  ;;  %v3957_v6 = vadd.f32 1.0, %v9603_v13  ;;  %v9641_v60 = vpop.permute.xlu1 %2781 }
 0x323   :  { %7247 = vpow2.f32 %v3629_v30  ;;  %v14268_v21 = vunpack.c.h.bf16 %v9267_v23  ;;  %v3356_v4 = vand.u32 2147483647, %v9601_v47  ;;  %v7234_v27 = vpop.eup %7233  ;;  %v3944_v28 = vmul.f32 %v9437_v42, %v3943_v3  ;;  %14272 = vst [vmem:[#allocation74_spill] sm:$0xff] %v9641_v60 }
 0x324   :  { %v14269_v10 = vunpack.c.l.bf16 %v9538_v33  ;;  %v3951_v43 = vmul.f32 -0.5, %v9514_v38  ;;  %5655 = vrot.lane.b32.xlu1 %v5392_v12, %s7789_s10  ;;  %v7236_v51 = vpop.eup %7235  ;;  %v3219_v23 = vmax.f32 %v9280_v40, 0.0  ;;  %vm9632_vm5 = vcmp.lt.f32.partialorder %v3945_v57, 0.0004427343 }
 0x325   :  { %v9619_v22 = vand.u32 2147483647, %v14268_v21  ;;  %v3925_v30 = vadd.f32 1.0, %v3924_v26  ;;  %7249 = vpow2.f32 %v3625_v50  ;;  %v3853_v59 = vadd.f32 1.0, %v3852_v52 }
 0x326   :  { %v9626_v32 = vmul.f32 %v9271_v46, %v14269_v10  ;;  %v9636_v42 = vpop.eup %7237  ;;  %v3947_v46 = vsel %vm9632_vm5, %v3944_v28, %v3941_v62  ;;  %v3927_v3 = vand.u32 2147483647, %v9471_v63  ;;  %v5390_v12 = vmul.f32 %v5262_v9, %v5006_v16  ;;  %v9644_v10 = vpop.permute.xlu0 %2755 }
 0x327   :  { %v3855_v21 = vand.u32 2147483647, %v9493_v24  ;;  %v3923_v40 = vmul.f32 0.6931472, %v7234_v27  ;;  %7251 = vlog2.f32 %v3957_v6  ;;  %v3484_v57 = vsub.f32 0.0, %v3356_v4  ;;  %14273 = vst [vmem:[#allocation75_spill] sm:$0xff] %v9644_v10 }
 0x328   :  { %v7240_v26 = vpop.eup %7239  ;;  %v3217_v50 = vmax.f32 %v9298_v18, 0.0  ;;  %v3359_v52 = vand.u32 2147483647, %v9626_v32  ;;  %v3952_v8 = vadd.f32 1.0, %v3951_v43  ;;  %v14274_v28 = vunpack.c.h.bf16 %v9490_v5  ;;  %5651 = vrot.lane.b32.xlu1 %v5390_v12, %s7789_s10 }
 0x329   :  { %v5011_v16 = vadd.f32 %v3947_v46, %v3219_v23  ;;  %v3926_v27 = vmul.f32 %v9471_v63, %v3925_v30  ;;  %v3933_v4 = vmul.f32 -0.5, %v9542_v37  ;;  %v3984_v9 = vadd.f32 1.0, %v9636_v42 }
 0x32a   :  { %v9651_v62 = vmul.f32 %v9379_v1, %v14274_v28  ;;  %v9657_v6 = vpop.eup %7241  ;;  %v9659_v18 = vmul.f32 0.6931472, %v7236_v51  ;;  %v9662_v43 = vmul.f32 %v9493_v24, %v3853_v59  ;;  %vm9664_vm6 = vcmp.lt.f32.partialorder %v3927_v3, 0.0004427343  ;;  %v9674_v59 = vpop.permute.xlu1 %2777 }
 0x32b   :  { %v3954_v1 = vand.u32 2147483647, %v9514_v38  ;;  %v3929_v63 = vsel %vm9664_vm6, %v3926_v27, %v3923_v40  ;;  %v3978_v23 = vmul.f32 -0.5, %v9560_v29  ;;  %v3950_v30 = vmul.f32 0.6931472, %v7240_v26  ;;  %v7244_v12 = vpop.eup %7243  ;;  %14277 = vst [vmem:[#allocation76_spill] sm:$0xff] %v9674_v59  ;;  %v9679_v27 = vpop.permute.xlu0 %2767 }
 0x32c   :  { %v3631_v46 = vmul.f32 1.442695, %v3484_v57  ;;  %v3981_v51 = vand.u32 2147483647, %v9560_v29  ;;  %v3487_v28 = vsub.f32 0.0, %v3359_v52  ;;  %v3953_v24 = vmul.f32 %v9514_v38, %v3952_v8 }
 0x32d   :  { %v3354_v3 = vand.u32 2147483647, %v9651_v62  ;;  %v3934_v60 = vadd.f32 1.0, %v3933_v4  ;;  %7253 = vlog2.f32 %v3984_v9  ;;  %v3966_v10 = vadd.f32 1.0, %v9657_v6 }
 0x32e   :  { %v5395_v40 = vmul.f32 %v9499_v31, %v5011_v16  ;;  %v5009_v26 = vadd.f32 %v3929_v63, %v3217_v50  ;;  %v14278_v57 = vunpack.c.l.bf16 %v9572_v41  ;;  %vm9686_vm7 = vcmp.lt.f32.partialorder %v3954_v1, 0.0004427343  ;;  %v7246_v52 = vpop.eup %7245 }
 0x32f   :  { %v3936_v8 = vand.u32 2147483647, %v9542_v37  ;;  %v3979_v4 = vadd.f32 1.0, %v3978_v23  ;;  %v3956_v9 = vsel %vm9686_vm7, %v3953_v24, %v3950_v30  ;;  %v3932_v31 = vmul.f32 0.6931472, %v7244_v12 }
 0x330   :  { %v9684_v7 = vmul.f32 %v9290_v14, %v14278_v57  ;;  %7255 = vpow2.f32 %v3631_v46  ;;  %5661 = vrot.lane.b32.xlu1 %v5395_v40, %s7789_s10  ;;  %v9694_v50 = vpop.eup %7247  ;;  %vm9696_vm8 = vcmp.lt.f32.partialorder %v3855_v21, 0.0004427343  ;;  %vm9700_vm9 = vcmp.lt.f32.partialorder %v3981_v51, 0.0004427343  ;;  %v9715_v57 = vpop.permute.xlu1 %2789 }
 0x331   :  { %v3220_v1 = vmax.f32 %v9313_v45, 0.0  ;;  %v3482_v63 = vsub.f32 0.0, %v3354_v3  ;;  %v14099_v23 = vunpack.c.h.bf16 %v9538_v33  ;;  %v3960_v30 = vmul.f32 -0.5, %v9603_v13  ;;  %14287 = vst [vmem:[#allocation77_spill] sm:$0xff] %v9715_v57 }
 0x332   :  { %v3637_v46 = vmul.f32 1.442695, %v3487_v28  ;;  %v3935_v12 = vmul.f32 %v9542_v37, %v3934_v60  ;;  %7257 = vlog2.f32 %v3966_v10  ;;  %v9708_v24 = vpop.eup %7249  ;;  %v3357_v21 = vand.u32 2147483647, %v9684_v7  ;;  %v9722_v60 = vpop.permute.xlu0 %2763 }
 0x333   :  { %v5012_v40 = vadd.f32 %v3956_v9, %v3220_v1  ;;  %vm9711_vm10 = vcmp.lt.f32.partialorder %v3936_v8, 0.0004427343  ;;  %v5393_v45 = vmul.f32 %v9532_v25, %v5009_v26  ;;  %v3977_v3 = vmul.f32 0.6931472, %v7246_v52 }
 0x334   :  { %v3980_v38 = vmul.f32 %v9560_v29, %v3979_v4  ;;  %v4011_v28 = vadd.f32 1.0, %v9694_v50  ;;  %v3938_v37 = vsel %vm9711_vm10, %v3935_v12, %v3932_v31  ;;  %v7252_v10 = vpop.eup %7251  ;;  %v3218_v8 = vmax.f32 %v9335_v61, 0.0 }
 0x335   :  { %v3627_v9 = vmul.f32 1.442695, %v3482_v63  ;;  %v9728_v1 = vmul.f32 %v9434_v0, %v14099_v23  ;;  %v14105_v25 = vunpack.c.h.bf16 %v9572_v41  ;;  %5657 = vrot.lane.b32.xlu1 %v5393_v45, %s7789_s10  ;;  %v3961_v29 = vadd.f32 1.0, %v3960_v30  ;;  %v9741_v23 = vpop.permute.xlu1 %2785 }
 0x336   :  { %v3963_v26 = vand.u32 2147483647, %v9603_v13  ;;  %v3993_v52 = vadd.f32 1.0, %v9708_v24  ;;  %7259 = vpow2.f32 %v3637_v46  ;;  %v3485_v4 = vsub.f32 0.0, %v3357_v21  ;;  %14289 = vst [vmem:[#allocation78_spill] sm:$0xff] %v9741_v23  ;;  %v9759_v21 = vpop.permute.xlu0 %2775 }
 0x337   :  { %v14288_v31 = vunpack.c.h.bf16 %v9285_v56  ;;  %v5010_v63 = vadd.f32 %v3938_v37, %v3218_v8  ;;  %v5396_v12 = vmul.f32 %v9619_v22, %v5012_v40  ;;  %v3983_v0 = vsel %vm9700_vm9, %v3980_v38, %v3977_v3 }
 0x338   :  { %v3959_v51 = vmul.f32 0.6931472, %v7252_v10  ;;  %7261 = vlog2.f32 %v4011_v28  ;;  %v3987_v45 = vmul.f32 -0.5, %v9636_v42  ;;  %v3223_v30 = vmax.f32 %v9345_v15, 0.0 }
 0x339   :  { %v5266_v61 = vand.u32 2147483647, %v14288_v31  ;;  %7263 = vpow2.f32 %v3627_v9  ;;  %v3360_v46 = vand.u32 2147483647, %v9728_v1  ;;  %v9747_v56 = vmul.f32 %v9482_v17, %v14105_v25  ;;  %5663 = vrot.lane.b32.xlu1 %v5396_v12, %s7789_s10  ;;  %v9782_v31 = vld [vmem:[%s14074_s0 + $0x60] sm:$0xff]  }
 0x33a   :  { %v3857_v22 = vsel %vm9696_vm8, %v9662_v43, %v9659_v18  ;;  %v3962_v16 = vmul.f32 %v9603_v13, %v3961_v29  ;;  %vm9755_vm11 = vcmp.lt.f32.partialorder %v3963_v26, 0.0004427343  ;;  %7265 = vlog2.f32 %v3993_v52  ;;  %v7254_v40 = vpop.eup %7253  ;;  %v9797_v15 = vpop.permute.xlu0 %2771 }
 0x33b   :  { %v5015_v3 = vadd.f32 %v3983_v0, %v3223_v30  ;;  %v3633_v17 = vmul.f32 1.442695, %v3485_v4  ;;  %v14292_v38 = vunpack.c.l.bf16 %v9585_v48  ;;  %v5394_v37 = vmul.f32 %v5266_v61, %v5010_v63 }
 0x33c   :  { %v3965_v18 = vsel %vm9755_vm11, %v3962_v16, %v3959_v51  ;;  %v3988_v13 = vadd.f32 1.0, %v3987_v45  ;;  %v3990_v43 = vand.u32 2147483647, %v9636_v42  ;;  %v3969_v14 = vmul.f32 -0.5, %v9657_v6  ;;  %v9788_v45 = vpop.permute.xlu1 %2797 }
 0x33d   :  { %v9764_v28 = vmul.f32 %v9308_v53, %v14292_v38  ;;  %v9770_v10 = vpop.eup %7255  ;;  %v14293_v8 = vunpack.c.l.bf16 %v9353_v11  ;;  %v3221_v29 = vmax.f32 %v9377_v2, 0.0  ;;  %v3488_v26 = vsub.f32 0.0, %v3360_v46  ;;  %5659 = vrot.lane.b32.xlu1 %v5394_v37, %s7789_s10  ;;  %14295 = vst [vmem:[#allocation79_spill] sm:$0xff] %v9788_v45  ;;  %v14298_v37 = vld [vmem:[#allocation55_spill] sm:$0xff] }
 0x33e   :  { %v3358_v53 = vand.u32 2147483647, %v9747_v56  ;;  %v14294_v52 = vmax.f32 %v9302_v49, 0.0  ;;  %v14100_v61 = vunpack.c.l.bf16 %v9782_v31  ;;  %v3986_v63 = vmul.f32 0.6931472, %v7254_v40 }
 0x33f   :  { %v5269_v9 = vand.u32 2147483647, %v14293_v8  ;;  %v1915_v12 = vmul.f32 %v8083_v20, %v9579_v19  ;;  %v7258_v2 = vpop.eup %7257  ;;  %v5013_v0 = vadd.f32 %v3965_v18, %v3221_v29  ;;  %7267 = vpow2.f32 %v3633_v17 }
 0x340   :  { %v5001_v4 = vadd.f32 %v3857_v22, %v14294_v52  ;;  %v3363_v51 = vand.u32 2147483647, %v9764_v28  ;;  %v5399_v49 = vmul.f32 %v9546_v36, %v5015_v3  ;;  %v3989_v30 = vmul.f32 %v9636_v42, %v3988_v13 }
 0x341   :  { %vm9792_vm12 = vcmp.lt.f32.partialorder %v3990_v43, 0.0004427343  ;;  %v3970_v22 = vadd.f32 1.0, %v3969_v14  ;;  %v4020_v16 = vadd.f32 1.0, %v9770_v10  ;;  %v4014_v19 = vmul.f32 -0.5, %v9694_v50 }
 0x342   :  { %v3972_v40 = vand.u32 2147483647, %v9657_v6  ;;  %v3639_v17 = vmul.f32 1.442695, %v3488_v26  ;;  %v3486_v38 = vsub.f32 0.0, %v3358_v53  ;;  %5669 = vrot.lane.b32.xlu1 %v5399_v49, %s7789_s10  ;;  %v9805_v36 = vmul.f32 %v9338_v58, %v14100_v61  ;;  %v9834_v49 = vpop.permute.xlu0 %2783 }
 0x343   :  { %v3992_v42 = vsel %vm9792_vm12, %v3989_v30, %v3986_v63  ;;  %v3968_v3 = vmul.f32 0.6931472, %v7258_v2  ;;  %v5385_v18 = vmul.f32 %v14298_v37, %v5001_v4  ;;  %v9810_v13 = vpop.eup %7259  ;;  %v3996_v43 = vmul.f32 -0.5, %v9708_v24  ;;  %14303 = vst [vmem:[#allocation80_spill] sm:$0xff] %v9834_v49 }
 0x344   :  { %v3224_v14 = vmax.f32 %v9431_v55, 0.0  ;;  %v5397_v8 = vmul.f32 %v5269_v9, %v5013_v0  ;;  %v9815_v29 = vsel %vm1924_vm4, %v1915_v12, 0.0  ;;  %v3491_v26 = vsub.f32 0.0, %v3363_v51  ;;  %v9825_v55 = vpop.permute.xlu1 %2793 }
 0x345   :  { %v14299_v58 = vunpack.c.h.bf16 %v9327_v34  ;;  %v3971_v52 = vmul.f32 %v9657_v6, %v3970_v22  ;;  %7269 = vlog2.f32 %v4020_v16  ;;  %5641 = vrot.lane.b32.xlu0 %v5385_v18, %s7789_s10  ;;  %v7262_v4 = vpop.eup %7261  ;;  %vm9821_vm1 = vcmp.lt.f32.partialorder %v3972_v40, 0.0004427343  ;;  %14302 = vst [vmem:[#allocation55_spill] sm:$0xff] %v9825_v55  ;;  %v14304_v16 = vld [vmem:[#allocation66_spill] sm:$0xff] }
 0x346   :  { %v5016_v63 = vadd.f32 %v3992_v42, %v3224_v14  ;;  %7271 = vpow2.f32 %v3639_v17  ;;  %v3635_v9 = vmul.f32 1.442695, %v3486_v38  ;;  %5665 = vrot.lane.b32.xlu1 %v5397_v8, %s7789_s10  ;;  %v9828_v12 = vpop.eup %7263  ;;  %v4015_v34 = vadd.f32 1.0, %v4014_v19  ;;  %v9842_v19 = vld [vmem:[%s14074_s0 + $0x78] sm:$0xff]  }
 0x347   :  { %v5272_v53 = vand.u32 2147483647, %v14299_v58  ;;  %v4017_v6 = vand.u32 2147483647, %v9694_v50  ;;  %v3361_v0 = vand.u32 2147483647, %v9805_v36  ;;  %v3974_v51 = vsel %vm9821_vm1, %v3971_v52, %v3968_v3  ;;  %v7266_v30 = vpop.eup %7265 }
 0x348   :  { %v3997_v46 = vadd.f32 1.0, %v3996_v43  ;;  %v3999_v22 = vand.u32 2147483647, %v9708_v24  ;;  %v3222_v40 = vmax.f32 %v14304_v16, 0.0  ;;  %v14104_v17 = vunpack.c.h.bf16 %v9585_v48 }
 0x349   :  { %v4013_v38 = vmul.f32 0.6931472, %v7262_v4  ;;  %v3645_v42 = vmul.f32 1.442695, %v3491_v26  ;;  %v14101_v37 = vunpack.c.l.bf16 %v9842_v19  ;;  %v14305_v3 = vunpack.c.h.bf16 %v9353_v11  ;;  %v9856_v11 = vpop.permute.xlu1 %2801 }
 0x34a   :  { %v5014_v14 = vadd.f32 %v3974_v51, %v3222_v40  ;;  %v4002_v43 = vadd.f32 1.0, %v9828_v12  ;;  %7273 = vpow2.f32 %v3635_v9  ;;  %v5400_v8 = vmul.f32 %v5272_v53, %v5016_v63  ;;  %14309 = vst [vmem:[#allocation66_spill] sm:$0xff] %v9856_v11  ;;  %v14310_v51 = vld [vmem:[#allocation71_spill] sm:$0xff]  ;;  %v9866_v53 = vld [vmem:[%s14074_s0 + $0x80] sm:$0xff]   ;;  %v9879_v40 = vpop.permute.xlu0 %2779 }
 0x34b   :  { %v5270_v18 = vand.u32 2147483647, %v14305_v3  ;;  %v14306_v58 = vunpack.c.l.bf16 %v9457_v54  ;;  %v3995_v4 = vmul.f32 0.6931472, %v7266_v30  ;;  %v4047_v26 = vadd.f32 1.0, %v9810_v13  ;;  %14312 = vst [vmem:[#allocation71_spill] sm:$0xff] %v9879_v40 }
 0x34c   :  { %v3489_v2 = vsub.f32 0.0, %v3361_v0  ;;  %v4016_v16 = vmul.f32 %v9694_v50, %v4015_v34  ;;  %vm9852_vm13 = vcmp.lt.f32.partialorder %v4017_v6, 0.0004427343  ;;  %v9861_v9 = vmul.f32 %v14310_v51, %v14104_v17  ;;  %5671 = vrot.lane.b32.xlu1 %v5400_v8, %s7789_s10  ;;  %v9870_v50 = vpop.eup %7267  ;;  %v14311_v6 = vld [vmem:[#allocation56_spill] sm:$0xff] }
 0x34d   :  { %v5275_v52 = vand.u32 2147483647, %v14306_v58  ;;  %v14103_v63 = vunpack.c.h.bf16 %v9866_v53  ;;  %v3998_v34 = vmul.f32 %v9708_v24, %v3997_v46  ;;  %7275 = vpow2.f32 %v3645_v42  ;;  %v14315_v24 = vld [vmem:[#allocation69_spill] sm:$0xff]  ;;  %v9924_v58 = vpop.permute.xlu1 %2859 }
 0x34e   :  { %v9876_v0 = vmul.f32 %v14311_v6, %v14101_v37  ;;  %v14102_v30 = vunpack.c.h.bf16 %v9782_v31  ;;  %v4019_v3 = vsel %vm9852_vm13, %v4016_v16, %v4013_v38  ;;  %vm9883_vm14 = vcmp.lt.f32.partialorder %v3999_v22, 0.0004427343  ;;  %14319 = vst [vmem:[#allocation56_spill] sm:$0xff] %v9924_v58 }
 0x34f   :  { %7277 = vlog2.f32 %v4002_v43  ;;  %v5398_v8 = vmul.f32 %v5270_v18, %v5014_v14  ;;  %v3227_v46 = vmax.f32 %v14315_v24, 0.0  ;;  %v4001_v42 = vsel %vm9883_vm14, %v3998_v34, %v3995_v4 }
 0x350   :  { %7279 = vlog2.f32 %v4047_v26  ;;  %v3641_v51 = vmul.f32 1.442695, %v3489_v2  ;;  %v4029_v6 = vadd.f32 1.0, %v9870_v50  ;;  %v4023_v37 = vmul.f32 -0.5, %v9770_v10 }
 0x351   :  { %v3364_v61 = vand.u32 2147483647, %v9861_v9  ;;  %v9896_v22 = vmul.f32 %v9722_v60, %v14103_v63  ;;  %5667 = vrot.lane.b32.xlu1 %v5398_v8, %s7789_s10  ;;  %v5019_v38 = vadd.f32 %v4019_v3, %v3227_v46  ;;  %v3225_v18 = vmax.f32 %v9522_v44, 0.0  ;;  %v9921_v44 = vld [vmem:[%s14074_s0 + $0x70] sm:$0xff]   ;;  %v9933_v46 = vld [vmem:[%s14074_s0 + $0x88] sm:$0xff]  }
 0x352   :  { %v3367_v14 = vand.u32 2147483647, %v9876_v0  ;;  %v9904_v43 = vmul.f32 %v9565_v35, %v14102_v30  ;;  %v7270_v4 = vpop.eup %7269  ;;  %v14316_v26 = vunpack.c.l.bf16 %v9490_v5  ;;  %v14317_v60 = vunpack.c.l.bf16 %v9538_v33 }
 0x353   :  { %v14318_v34 = vunpack.c.l.bf16 %v9572_v41  ;;  %v9926_v8 = vpop.eup %7271  ;;  %v9928_v24 = vadd.f32 %v4001_v42, %v3225_v18  ;;  %7281 = vpow2.f32 %v3641_v51  ;;  %v9939_v30 = vadd.f32 1.0, %v4023_v37 }
 0x354   :  { %v9908_v2 = vand.u32 2147483647, %v14316_v26  ;;  %v9912_v16 = vand.u32 2147483647, %v14317_v60  ;;  %7283 = vlog2.f32 %v4029_v6  ;;  %v9941_v63 = vsub.f32 0.0, %v3364_v61  ;;  %v9953_v60 = vpop.xlane.xlu1 %2280 }
 0x355   :  { %v9916_v3 = vand.u32 2147483647, %v14318_v34  ;;  %v9937_v34 = vpop.permute.xlu0 %2791  ;;  %v3370_v42 = vand.u32 2147483647, %v9896_v22  ;;  %v9944_v18 = vsub.f32 0.0, %v3367_v14  ;;  %v5403_v25 = vmul.f32 %v5275_v52, %v5019_v38  ;;  %14321 = vst [vmem:[#allocation81_spill] sm:$0xff] %v9953_v60 }
 0x356   :  { %14320 = vst [vmem:[#allocation69_spill] sm:$0xff] %v9937_v34  ;;  %v4026_v51 = vand.u32 2147483647, %v9770_v10  ;;  %v9948_v35 = vmul.f32 0.6931472, %v7270_v4  ;;  %v9951_v26 = vadd.f32 1.0, %v9926_v8  ;;  %v14322_v17 = vunpack.c.l.bf16 %v9921_v44 }
 0x357   :  { %vm42_vm15 = vcmask 7168   ;;  %v9955_v37 = vpop.eup %7273  ;;  %v9959_v61 = vmul.f32 -0.5, %v9810_v13  ;;  %v14323_v52 = vld [vmem:[#allocation61_spill] sm:$0xff]  ;;  %5677 = vrot.lane.b32.xlu1 %v5403_v25, %s7789_s10  ;;  %v7790_v4 = vmov 0.0   ;;  %v4025_v25 = vmul.f32 %v9770_v10, %v9939_v30 }
 0x358   :  { %v9965_v38 = vmul.f32 %v14323_v52, %v14322_v17  ;;  %45 = vst.msk [vmem:[#allocation2 + $0x10] sm:$0xff] %vm42_vm15, %v7790_v4  ;;  %43 = vst.msk [vmem:[#allocation2] sm:$0xff] %vm42_vm15, %v7790_v4  ;;  %v4005_v17 = vmul.f32 -0.5, %v9828_v12  ;;  %v3647_v52 = vmul.f32 1.442695, %v9941_v63  ;;  %v3498_v6 = vsub.f32 0.0, %v3370_v42 }
 0x359   :  { %44 = vst.msk [vmem:[#allocation2 + $0x8] sm:$0xff] %vm42_vm15, %v7790_v4  ;;  %46 = vst.msk [vmem:[#allocation2 + $0x18] sm:$0xff] %vm42_vm15, %v7790_v4  ;;  %v3653_v14 = vmul.f32 1.442695, %v9944_v18  ;;  %vm10233_vm0 = vcmp.lt.f32.partialorder %v4026_v51, 0.0004427343  ;;  %v10240_v40 = vpop.permute.xlu0 %2787  ;;  %7285 = vlog2.f32 %v9951_v26  ;;  %v5401_v42 = vmul.f32 %v9908_v2, %v9928_v24 }
 0x35a   :  { %47 = vst.msk [vmem:[#allocation2 + $0x20] sm:$0xff] %vm42_vm15, %v7790_v4  ;;  %48 = vst.msk [vmem:[#allocation2 + $0x28] sm:$0xff] %vm42_vm15, %v7790_v4  ;;  %v10242_v49 = vpop.eup %7275  ;;  %v4028_v63 = vsel %vm10233_vm0, %v4025_v25, %v9948_v35  ;;  %v4038_v10 = vadd.f32 1.0, %v9955_v37  ;;  %v4051_v51 = vadd.f32 1.0, %v9959_v61  ;;  %v14328_v30 = vunpack.c.h.bf16 %v9457_v54  ;;  %v5646_v25 = vpop.permute.xlu1 %5645 }
 0x35b   :  { %49 = vst.msk [vmem:[#allocation2 + $0x30] sm:$0xff] %vm42_vm15, %v7790_v4  ;;  %50 = vst.msk [vmem:[#allocation2 + $0x38] sm:$0xff] %vm42_vm15, %v7790_v4  ;;  %v3228_v58 = vmax.f32 %v9601_v47, 0.0  ;;  %v4006_v60 = vadd.f32 1.0, %v4005_v17  ;;  %v4008_v35 = vand.u32 2147483647, %v9828_v12  ;;  %7287 = vpow2.f32 %v3647_v52  ;;  %5673 = vrot.lane.b32.xlu1 %v5401_v42, %s7789_s10 }
 0x35c   :  { %51 = vst.msk [vmem:[#allocation2 + $0x40] sm:$0xff] %vm42_vm15, %v7790_v4  ;;  %52 = vst.msk [vmem:[#allocation2 + $0x48] sm:$0xff] %vm42_vm15, %v7790_v4  ;;  %v7278_v18 = vpop.eup %7277  ;;  %v3659_v26 = vmul.f32 1.442695, %v3498_v6  ;;  %v14329_v61 = vunpack.c.h.bf16 %v9842_v19  ;;  %v14106_v54 = vunpack.c.h.bf16 %v9921_v44  ;;  %v4032_v47 = vmul.f32 -0.5, %v9870_v50 }
 0x35d   :  { %53 = vst.msk [vmem:[#allocation2 + $0x50] sm:$0xff] %vm42_vm15, %v7790_v4  ;;  %54 = vst.msk [vmem:[#allocation2 + $0x58] sm:$0xff] %vm42_vm15, %v7790_v4  ;;  %v7280_v11 = vpop.eup %7279  ;;  %v5020_v2 = vadd.f32 %v4028_v63, %v3228_v58  ;;  %v4083_v17 = vadd.f32 1.0, %v10242_v49  ;;  %7289 = vlog2.f32 %v4038_v10  ;;  %v4052_v45 = vmul.f32 %v9810_v13, %v4051_v51  ;;  %v10267_v58 = vpop.permute.xlu0 %2799 }
 0x35e   :  { %55 = vst.msk [vmem:[#allocation2 + $0x60] sm:$0xff] %vm42_vm15, %v7790_v4  ;;  %56 = vst.msk [vmem:[#allocation2 + $0x68] sm:$0xff] %vm42_vm15, %v7790_v4  ;;  %v10261_v55 = vmul.f32 %v9614_v39, %v14329_v61  ;;  %v4049_v6 = vmul.f32 0.6931472, %v7280_v11  ;;  %7291 = vpow2.f32 %v3653_v14  ;;  %v4007_v42 = vmul.f32 %v9828_v12, %v4006_v60  ;;  %v14333_v14 = vld [vmem:[#allocation75_spill] sm:$0xff] }
 0x35f   :  { %57 = vst.msk [vmem:[#allocation2 + $0x70] sm:$0xff] %vm42_vm15, %v7790_v4  ;;  %58 = vst.msk [vmem:[#allocation2 + $0x78] sm:$0xff] %vm42_vm15, %v7790_v4  ;;  %v5131_v52 = vld [vmem:[#allocation2 + $0x10] sm:$0xff]  ;;  %vm10272_vm2 = vcmp.lt.f32.partialorder %v4008_v35, 0.0004427343  ;;  %7293 = vpow2.f32 %v3659_v26  ;;  %v10280_v10 = vmul.f32 %v14333_v14, %v14106_v54  ;;  %v3232_v23 = vmax.f32 %v9728_v1, 0.0  ;;  %v10373_v1 = vpop.permute.xlu1 %2863 }
 0x360   :  { %59 = vst.msk [vmem:[#allocation2 + $0x80] sm:$0xff] %vm42_vm15, %v7790_v4  ;;  %60 = vst.msk [vmem:[#allocation2 + $0x88] sm:$0xff] %vm42_vm15, %v7790_v4  ;;  %v10269_v63 = vpop.eup %7281  ;;  %v3368_v11 = vand.u32 2147483647, %v10261_v55  ;;  %v4035_v12 = vand.u32 2147483647, %v9870_v50 }
 0x361   :  { %61 = vst.msk [vmem:[#allocation2 + $0x90] sm:$0xff] %vm42_vm15, %v7790_v4  ;;  %62 = vst.msk [vmem:[#allocation2 + $0x98] sm:$0xff] %vm42_vm15, %v7790_v4  ;;  %v14334_v35 = vand.u32 2147483647, %v9810_v13 }
 0x362   :  { %63 = vst.msk [vmem:[#allocation2 + $0xa0] sm:$0xff] %vm42_vm15, %v7790_v4  ;;  %64 = vst.msk [vmem:[#allocation2 + $0xa8] sm:$0xff] %vm42_vm15, %v7790_v4  ;;  %v3496_v14 = vsub.f32 0.0, %v3368_v11  ;;  %vm10311_vm5 = vcmp.lt.f32.partialorder %v4035_v12, 0.0004427343  ;;  %v4041_v12 = vmul.f32 -0.5, %v9955_v37 }
 0x363   :  { %65 = vst.msk [vmem:[#allocation2 + $0xb0] sm:$0xff] %vm42_vm15, %v7790_v4  ;;  %66 = vst.msk [vmem:[#allocation2 + $0xb8] sm:$0xff] %vm42_vm15, %v7790_v4  ;;  %vm10288_vm3 = vcmp.lt.f32.partialorder %v14334_v35, 0.0004427343  ;;  %v3366_v35 = vand.u32 2147483647, %v10280_v10 }
 0x364   :  { %67 = vst.msk [vmem:[#allocation2 + $0xc0] sm:$0xff] %vm42_vm15, %v7790_v4  ;;  %68 = vst.msk [vmem:[#allocation2 + $0xc8] sm:$0xff] %vm42_vm15, %v7790_v4  ;;  %2283 = vadd.xlane.f32.xlu0 %v9815_v29  ;;  %v14344_v29 = vld [vmem:[#allocation67_spill] sm:$0xff] }
 0x365   :  { %69 = vst.msk [vmem:[#allocation2 + $0xd0] sm:$0xff] %vm42_vm15, %v7790_v4  ;;  %70 = vst.msk [vmem:[#allocation2 + $0xd8] sm:$0xff] %vm42_vm15, %v7790_v4 }
 0x366   :  { %71 = vst.msk [vmem:[#allocation2 + $0xe0] sm:$0xff] %vm42_vm15, %v7790_v4  ;;  %72 = vst.msk [vmem:[#allocation2 + $0xe8] sm:$0xff] %vm42_vm15, %v7790_v4 }
 0x367   :  { %73 = vst.msk [vmem:[#allocation2 + $0xf0] sm:$0xff] %vm42_vm15, %v7790_v4  ;;  %74 = vst.msk [vmem:[#allocation2 + $0xf8] sm:$0xff] %vm42_vm15, %v7790_v4 }
 0x368   :  { %75 = vst.msk [vmem:[#allocation2 + $0x100] sm:$0xff] %vm42_vm15, %v7790_v4  ;;  %76 = vst.msk [vmem:[#allocation2 + $0x108] sm:$0xff] %vm42_vm15, %v7790_v4 }
 0x369   :  { %77 = vst.msk [vmem:[#allocation2 + $0x110] sm:$0xff] %vm42_vm15, %v7790_v4  ;;  %78 = vst.msk [vmem:[#allocation2 + $0x118] sm:$0xff] %vm42_vm15, %v7790_v4 }
 0x36a   :  { %79 = vst.msk [vmem:[#allocation2 + $0x120] sm:$0xff] %vm42_vm15, %v7790_v4  ;;  %80 = vst.msk [vmem:[#allocation2 + $0x128] sm:$0xff] %vm42_vm15, %v7790_v4 }
 0x36b   :  { %81 = vst.msk [vmem:[#allocation2 + $0x130] sm:$0xff] %vm42_vm15, %v7790_v4  ;;  %82 = vst.msk [vmem:[#allocation2 + $0x138] sm:$0xff] %vm42_vm15, %v7790_v4 }
 0x36c   :  { %83 = vst.msk [vmem:[#allocation2 + $0x140] sm:$0xff] %vm42_vm15, %v7790_v4  ;;  %84 = vst.msk [vmem:[#allocation2 + $0x148] sm:$0xff] %vm42_vm15, %v7790_v4 }
 0x36d   :  { %85 = vst.msk [vmem:[#allocation2 + $0x150] sm:$0xff] %vm42_vm15, %v7790_v4  ;;  %86 = vst.msk [vmem:[#allocation2 + $0x158] sm:$0xff] %vm42_vm15, %v7790_v4 }
 0x36e   :  { %87 = vst.msk [vmem:[#allocation2 + $0x160] sm:$0xff] %vm42_vm15, %v7790_v4  ;;  %88 = vst.msk [vmem:[#allocation2 + $0x168] sm:$0xff] %vm42_vm15, %v7790_v4 }
 0x36f   :  { %89 = vst.msk [vmem:[#allocation2 + $0x170] sm:$0xff] %vm42_vm15, %v7790_v4  ;;  %90 = vst.msk [vmem:[#allocation2 + $0x178] sm:$0xff] %vm42_vm15, %v7790_v4 }
 0x370   :  { %91 = vst.msk [vmem:[#allocation2 + $0x180] sm:$0xff] %vm42_vm15, %v7790_v4  ;;  %92 = vst.msk [vmem:[#allocation2 + $0x188] sm:$0xff] %vm42_vm15, %v7790_v4 }
 0x371   :  { %93 = vst.msk [vmem:[#allocation2 + $0x190] sm:$0xff] %vm42_vm15, %v7790_v4  ;;  %94 = vst.msk [vmem:[#allocation2 + $0x198] sm:$0xff] %vm42_vm15, %v7790_v4 }
 0x372   :  { %95 = vst.msk [vmem:[#allocation2 + $0x1a0] sm:$0xff] %vm42_vm15, %v7790_v4  ;;  %96 = vst.msk [vmem:[#allocation2 + $0x1a8] sm:$0xff] %vm42_vm15, %v7790_v4 }
 0x373   :  { %97 = vst.msk [vmem:[#allocation2 + $0x1b0] sm:$0xff] %vm42_vm15, %v7790_v4  ;;  %98 = vst.msk [vmem:[#allocation2 + $0x1b8] sm:$0xff] %vm42_vm15, %v7790_v4 }
 0x374   :  { %99 = vst.msk [vmem:[#allocation2 + $0x1c0] sm:$0xff] %vm42_vm15, %v7790_v4  ;;  %100 = vst.msk [vmem:[#allocation2 + $0x1c8] sm:$0xff] %vm42_vm15, %v7790_v4 }
 0x375   :  { %101 = vst.msk [vmem:[#allocation2 + $0x1d0] sm:$0xff] %vm42_vm15, %v7790_v4  ;;  %102 = vst.msk [vmem:[#allocation2 + $0x1d8] sm:$0xff] %vm42_vm15, %v7790_v4 }
 0x376   :  { %103 = vst.msk [vmem:[#allocation2 + $0x1e0] sm:$0xff] %vm42_vm15, %v7790_v4  ;;  %104 = vst.msk [vmem:[#allocation2 + $0x1e8] sm:$0xff] %vm42_vm15, %v7790_v4 }
 0x377   :  { %105 = vst.msk [vmem:[#allocation2 + $0x1f0] sm:$0xff] %vm42_vm15, %v7790_v4  ;;  %106 = vst.msk [vmem:[#allocation2 + $0x1f8] sm:$0xff] %vm42_vm15, %v7790_v4 }
 0x378   :  { %107 = vst.msk [vmem:[#allocation2 + $0x200] sm:$0xff] %vm42_vm15, %v7790_v4  ;;  %108 = vst.msk [vmem:[#allocation2 + $0x208] sm:$0xff] %vm42_vm15, %v7790_v4 }
 0x379   :  { %109 = vst.msk [vmem:[#allocation2 + $0x210] sm:$0xff] %vm42_vm15, %v7790_v4  ;;  %110 = vst.msk [vmem:[#allocation2 + $0x218] sm:$0xff] %vm42_vm15, %v7790_v4 }
 0x37a   :  { %111 = vst.msk [vmem:[#allocation2 + $0x220] sm:$0xff] %vm42_vm15, %v7790_v4  ;;  %112 = vst.msk [vmem:[#allocation2 + $0x228] sm:$0xff] %vm42_vm15, %v7790_v4 }
 0x37b   :  { %113 = vst.msk [vmem:[#allocation2 + $0x230] sm:$0xff] %vm42_vm15, %v7790_v4  ;;  %114 = vst.msk [vmem:[#allocation2 + $0x238] sm:$0xff] %vm42_vm15, %v7790_v4 }
 0x37c   :  { %115 = vst.msk [vmem:[#allocation2 + $0x240] sm:$0xff] %vm42_vm15, %v7790_v4  ;;  %116 = vst.msk [vmem:[#allocation2 + $0x248] sm:$0xff] %vm42_vm15, %v7790_v4 }
 0x37d   :  { %117 = vst.msk [vmem:[#allocation2 + $0x250] sm:$0xff] %vm42_vm15, %v7790_v4  ;;  %118 = vst.msk [vmem:[#allocation2 + $0x258] sm:$0xff] %vm42_vm15, %v7790_v4 }
 0x37e   :  { %119 = vst.msk [vmem:[#allocation2 + $0x260] sm:$0xff] %vm42_vm15, %v7790_v4  ;;  %120 = vst.msk [vmem:[#allocation2 + $0x268] sm:$0xff] %vm42_vm15, %v7790_v4 }
 0x37f   :  { %121 = vst.msk [vmem:[#allocation2 + $0x270] sm:$0xff] %vm42_vm15, %v7790_v4  ;;  %122 = vst.msk [vmem:[#allocation2 + $0x278] sm:$0xff] %vm42_vm15, %v7790_v4 }
 0x380   :  { %123 = vst.msk [vmem:[#allocation2 + $0x280] sm:$0xff] %vm42_vm15, %v7790_v4  ;;  %124 = vst.msk [vmem:[#allocation2 + $0x288] sm:$0xff] %vm42_vm15, %v7790_v4 }
 0x381   :  { %125 = vst.msk [vmem:[#allocation2 + $0x290] sm:$0xff] %vm42_vm15, %v7790_v4  ;;  %126 = vst.msk [vmem:[#allocation2 + $0x298] sm:$0xff] %vm42_vm15, %v7790_v4 }
 0x382   :  { %127 = vst.msk [vmem:[#allocation2 + $0x2a0] sm:$0xff] %vm42_vm15, %v7790_v4  ;;  %128 = vst.msk [vmem:[#allocation2 + $0x2a8] sm:$0xff] %vm42_vm15, %v7790_v4 }
 0x383   :  { %129 = vst.msk [vmem:[#allocation2 + $0x2b0] sm:$0xff] %vm42_vm15, %v7790_v4  ;;  %130 = vst.msk [vmem:[#allocation2 + $0x2b8] sm:$0xff] %vm42_vm15, %v7790_v4 }
 0x384   :  { %131 = vst.msk [vmem:[#allocation2 + $0x2c0] sm:$0xff] %vm42_vm15, %v7790_v4  ;;  %132 = vst.msk [vmem:[#allocation2 + $0x2c8] sm:$0xff] %vm42_vm15, %v7790_v4 }
 0x385   :  { %133 = vst.msk [vmem:[#allocation2 + $0x2d0] sm:$0xff] %vm42_vm15, %v7790_v4  ;;  %134 = vst.msk [vmem:[#allocation2 + $0x2d8] sm:$0xff] %vm42_vm15, %v7790_v4 }
 0x386   :  { %135 = vst.msk [vmem:[#allocation2 + $0x2e0] sm:$0xff] %vm42_vm15, %v7790_v4  ;;  %136 = vst.msk [vmem:[#allocation2 + $0x2e8] sm:$0xff] %vm42_vm15, %v7790_v4 }
 0x387   :  { %137 = vst.msk [vmem:[#allocation2 + $0x2f0] sm:$0xff] %vm42_vm15, %v7790_v4  ;;  %138 = vst.msk [vmem:[#allocation2 + $0x2f8] sm:$0xff] %vm42_vm15, %v7790_v4 }
 0x388   :  { %139 = vst.msk [vmem:[#allocation2 + $0x300] sm:$0xff] %vm42_vm15, %v7790_v4  ;;  %140 = vst.msk [vmem:[#allocation2 + $0x308] sm:$0xff] %vm42_vm15, %v7790_v4 }
 0x389   :  { %141 = vst.msk [vmem:[#allocation2 + $0x310] sm:$0xff] %vm42_vm15, %v7790_v4  ;;  %142 = vst.msk [vmem:[#allocation2 + $0x318] sm:$0xff] %vm42_vm15, %v7790_v4 }
 0x38a   :  { %143 = vst.msk [vmem:[#allocation2 + $0x320] sm:$0xff] %vm42_vm15, %v7790_v4  ;;  %144 = vst.msk [vmem:[#allocation2 + $0x328] sm:$0xff] %vm42_vm15, %v7790_v4 }
 0x38b   :  { %145 = vst.msk [vmem:[#allocation2 + $0x330] sm:$0xff] %vm42_vm15, %v7790_v4  ;;  %146 = vst.msk [vmem:[#allocation2 + $0x338] sm:$0xff] %vm42_vm15, %v7790_v4 }
 0x38c   :  { %147 = vst.msk [vmem:[#allocation2 + $0x340] sm:$0xff] %vm42_vm15, %v7790_v4  ;;  %148 = vst.msk [vmem:[#allocation2 + $0x348] sm:$0xff] %vm42_vm15, %v7790_v4 }
 0x38d   :  { %149 = vst.msk [vmem:[#allocation2 + $0x350] sm:$0xff] %vm42_vm15, %v7790_v4  ;;  %150 = vst.msk [vmem:[#allocation2 + $0x358] sm:$0xff] %vm42_vm15, %v7790_v4 }
 0x38e   :  { %151 = vst.msk [vmem:[#allocation2 + $0x360] sm:$0xff] %vm42_vm15, %v7790_v4  ;;  %152 = vst.msk [vmem:[#allocation2 + $0x368] sm:$0xff] %vm42_vm15, %v7790_v4 }
 0x38f   :  { %153 = vst.msk [vmem:[#allocation2 + $0x370] sm:$0xff] %vm42_vm15, %v7790_v4  ;;  %154 = vst.msk [vmem:[#allocation2 + $0x378] sm:$0xff] %vm42_vm15, %v7790_v4 }
 0x390   :  { %155 = vst.msk [vmem:[#allocation2 + $0x380] sm:$0xff] %vm42_vm15, %v7790_v4  ;;  %156 = vst.msk [vmem:[#allocation2 + $0x388] sm:$0xff] %vm42_vm15, %v7790_v4 }
 0x391   :  { %157 = vst.msk [vmem:[#allocation2 + $0x390] sm:$0xff] %vm42_vm15, %v7790_v4  ;;  %158 = vst.msk [vmem:[#allocation2 + $0x398] sm:$0xff] %vm42_vm15, %v7790_v4 }
 0x392   :  { %159 = vst.msk [vmem:[#allocation2 + $0x3a0] sm:$0xff] %vm42_vm15, %v7790_v4  ;;  %160 = vst.msk [vmem:[#allocation2 + $0x3a8] sm:$0xff] %vm42_vm15, %v7790_v4 }
 0x393   :  { %161 = vst.msk [vmem:[#allocation2 + $0x3b0] sm:$0xff] %vm42_vm15, %v7790_v4  ;;  %162 = vst.msk [vmem:[#allocation2 + $0x3b8] sm:$0xff] %vm42_vm15, %v7790_v4 }
 0x394   :  { %163 = vst.msk [vmem:[#allocation2 + $0x3c0] sm:$0xff] %vm42_vm15, %v7790_v4  ;;  %164 = vst.msk [vmem:[#allocation2 + $0x3c8] sm:$0xff] %vm42_vm15, %v7790_v4 }
 0x395   :  { %165 = vst.msk [vmem:[#allocation2 + $0x3d0] sm:$0xff] %vm42_vm15, %v7790_v4  ;;  %166 = vst.msk [vmem:[#allocation2 + $0x3d8] sm:$0xff] %vm42_vm15, %v7790_v4 }
 0x396   :  { %167 = vst.msk [vmem:[#allocation2 + $0x3e0] sm:$0xff] %vm42_vm15, %v7790_v4  ;;  %168 = vst.msk [vmem:[#allocation2 + $0x3e8] sm:$0xff] %vm42_vm15, %v7790_v4 }
 0x397   :  { %169 = vst.msk [vmem:[#allocation2 + $0x3f0] sm:$0xff] %vm42_vm15, %v7790_v4  ;;  %170 = vst.msk [vmem:[#allocation2 + $0x3f8] sm:$0xff] %vm42_vm15, %v7790_v4  ;;  %v14326_v4 = vand.u32 2147483647, %v9904_v43 }
 0x398   :  { %14327 = vst [vmem:[#allocation61_spill] sm:$0xff] %v10240_v40  ;;  %v5276_v40 = vand.u32 2147483647, %v14328_v30  ;;  %v4004_v30 = vmul.f32 0.6931472, %v7278_v18  ;;  %14330 = vst [vmem:[#allocation82_spill] sm:$0xff] %v10267_v58  ;;  %v7284_v18 = vpop.eup %7283 }
 0x399   :  { %v3490_v34 = vsub.f32 0.0, %v14326_v4  ;;  %v3365_v4 = vand.u32 2147483647, %v9965_v38  ;;  %14355 = vst [vmem:[#allocation67_spill] sm:$0xff] %v10373_v1 }
 0x39a   :  { %v5404_v51 = vmul.f32 %v5276_v40, %v5020_v2  ;;  %v4010_v60 = vsel %vm10272_vm2, %v4007_v42, %v4004_v30  ;;  %v3226_v40 = vmax.f32 %v9651_v62, 0.0  ;;  %v4055_v2 = vsel %vm10288_vm3, %v4052_v45, %v4049_v6 }
 0x39b   :  { %v3643_v24 = vmul.f32 1.442695, %v3490_v34  ;;  %v6027_v34 = vadd.f32 %v5646_v25, %v5131_v52  ;;  %v3493_v39 = vsub.f32 0.0, %v3365_v4  ;;  %v4033_v4 = vadd.f32 1.0, %v4032_v47  ;;  %v14338_v52 = vld [vmem:[#allocation70_spill] sm:$0xff] }
 0x39c   :  { %v4065_v25 = vadd.f32 1.0, %v10269_v63  ;;  %5679 = vrot.lane.b32.xlu1 %v5404_v51, %s7789_s10  ;;  %v4031_v47 = vmul.f32 0.6931472, %v7284_v18  ;;  %v14339_v30 = vunpack.c.h.bf16 %v9490_v5  ;;  %v5018_v61 = vadd.f32 %v4010_v60, %v3226_v40  ;;  %v7286_v5 = vpop.eup %7285 }
 0x39d   :  { %7295 = vpow2.f32 %v3643_v24  ;;  %6156 = vst.msk [vmem:[#allocation2 + $0x10] sm:$0xff] %vm42_vm15, %v6027_v34  ;;  %v14337_v24 = vunpack.c.l.bf16 %v9866_v53  ;;  %v3649_v13 = vmul.f32 1.442695, %v3493_v39  ;;  %v3229_v62 = vmax.f32 %v9684_v7, 0.0  ;;  %v10327_v26 = vpop.eup %7287 }
 0x39e   :  { %7297 = vlog2.f32 %v4083_v17  ;;  %v4059_v17 = vmul.f32 -0.5, %v9926_v8  ;;  %v5274_v42 = vand.u32 2147483647, %v14339_v30  ;;  %v4034_v51 = vmul.f32 %v9870_v50, %v4033_v4 }
 0x39f   :  { %v10296_v34 = vmul.f32 %v14338_v52, %v14337_v24  ;;  %v10307_v24 = vpop.permute.xlu0 %2795  ;;  %v14343_v6 = vunpack.c.l.bf16 %v9933_v46  ;;  %v14345_v18 = vmax.f32 %v9626_v32, 0.0  ;;  %v4086_v60 = vmul.f32 -0.5, %v10242_v49 }
 0x3a0   :  { %14340 = vst [vmem:[#allocation75_spill] sm:$0xff] %v10307_v24  ;;  %7299 = vlog2.f32 %v4065_v25  ;;  %v4037_v50 = vsel %vm10311_vm5, %v4034_v51, %v4031_v47  ;;  %v4060_v4 = vadd.f32 1.0, %v4059_v17  ;;  %v4062_v52 = vand.u32 2147483647, %v9926_v8 }
 0x3a1   :  { %v10318_v39 = vmul.f32 %v14344_v29, %v14343_v6  ;;  %v5023_v11 = vadd.f32 %v4055_v2, %v14345_v18  ;;  %v3369_v7 = vand.u32 2147483647, %v10296_v34  ;;  %7301 = vpow2.f32 %v3649_v13  ;;  %v14346_v2 = vld [vmem:[#allocation12_spill] sm:$0xff]  ;;  %v14347_v6 = vld [vmem:[#allocation11_spill] sm:$0xff]  ;;  %v7290_v13 = vpop.eup %7289 }
 0x3a2   :  { %v3655_v40 = vmul.f32 1.442695, %v3496_v14  ;;  %v3494_v30 = vsub.f32 0.0, %v3366_v35  ;;  %v5402_v32 = vmul.f32 %v5274_v42, %v5018_v61  ;;  %v10332_v29 = vadd.f32 %v14347_v6, %v14346_v2  ;;  %v10340_v42 = vpop.eup %7291 }
 0x3a3   :  { %v4089_v25 = vand.u32 2147483647, %v10242_v49  ;;  %v3371_v45 = vand.u32 2147483647, %v10318_v39  ;;  %v4058_v47 = vmul.f32 0.6931472, %v7286_v5  ;;  %v5021_v17 = vadd.f32 %v4037_v50, %v3229_v62  ;;  %v10337_v58 = vpop.permute.xlu0 %2805  ;;  %v10345_v5 = vpop.eup %7293 }
 0x3a4   :  { %v4087_v51 = vadd.f32 1.0, %v4086_v60  ;;  %v3497_v18 = vsub.f32 0.0, %v3369_v7  ;;  %14348 = vst [vmem:[#allocation70_spill] sm:$0xff] %v10337_v58  ;;  %5675 = vrot.lane.b32.xlu1 %v5402_v32, %s7789_s10  ;;  %v4061_v61 = vmul.f32 %v9926_v8, %v4060_v4  ;;  %v4042_v14 = vadd.f32 1.0, %v4041_v12 }
 0x3a5   :  { %v4044_v35 = vand.u32 2147483647, %v9955_v37  ;;  %v4092_v2 = vadd.f32 1.0, %v10327_v26  ;;  %vm10347_vm6 = vcmp.lt.f32.partialorder %v4062_v52, 0.0004427343  ;;  %7303 = vpow2.f32 %v3655_v40 }
 0x3a6   :  { %v3651_v60 = vmul.f32 1.442695, %v3494_v30  ;;  %v5407_v7 = vmul.f32 %v9912_v16, %v5023_v11  ;;  %v4068_v32 = vmul.f32 -0.5, %v10269_v63  ;;  %v3499_v8 = vsub.f32 0.0, %v3371_v45  ;;  %v14366_v30 = vld [vmem:[#allocation15_spill] sm:$0xff] }
 0x3a7   :  { %v4064_v4 = vsel %vm10347_vm6, %v4061_v61, %v4058_v47  ;;  %v4040_v12 = vmul.f32 0.6931472, %v7290_v13  ;;  %v3657_v58 = vmul.f32 1.442695, %v3497_v18  ;;  %v14351_v52 = vunpack.c.h.bf16 %v9538_v33  ;;  %v10375_v13 = vpop.permute.xlu0 %2807 }
 0x3a8   :  { %v14352_v40 = vunpack.c.h.bf16 %v9933_v46  ;;  %5685 = vrot.lane.b32.xlu1 %v5407_v7, %s7789_s10  ;;  %v4043_v11 = vmul.f32 %v9955_v37, %v4042_v14  ;;  %vm10367_vm7 = vcmp.lt.f32.partialorder %v4044_v35, 0.0004427343  ;;  %7305 = vlog2.f32 %v4092_v2  ;;  %14356 = vst [vmem:[#allocation12_spill] sm:$0xff] %v10375_v13  ;;  %v10381_v37 = vld [vmem:[%s14074_s0 + $0x108] sm:$0xff]  }
 0x3a9   :  { %v5280_v24 = vand.u32 2147483647, %v14351_v52  ;;  %v4146_v45 = vadd.f32 1.0, %v10345_v5  ;;  %v5024_v33 = vadd.f32 %v4064_v4, %v3232_v23  ;;  %7307 = vpow2.f32 %v3651_v60 }
 0x3aa   :  { %v10352_v50 = vpop.eup %7295  ;;  %v10363_v16 = vmul.f32 %v9679_v27, %v14352_v40  ;;  %v5405_v27 = vmul.f32 %v9916_v3, %v5021_v17  ;;  %v14107_v18 = vunpack.c.l.bf16 %v10381_v37  ;;  %v4119_v14 = vadd.f32 1.0, %v10340_v42 }
 0x3ab   :  { %v7298_v54 = vpop.eup %7297  ;;  %v4074_v47 = vadd.f32 1.0, %v10352_v50  ;;  %v4046_v23 = vsel %vm10367_vm7, %v4043_v11, %v4040_v12  ;;  %vm10387_vm8 = vcmp.lt.f32.partialorder %v4089_v25, 0.0004427343  ;;  %v3661_v2 = vmul.f32 1.442695, %v3499_v8 }
 0x3ac   :  { %v4085_v61 = vmul.f32 0.6931472, %v7298_v54  ;;  %7309 = vpow2.f32 %v3657_v58  ;;  %v3230_v3 = vmax.f32 %v9747_v56, 0.0  ;;  %5681 = vrot.lane.b32.xlu1 %v5405_v27, %s7789_s10  ;;  %v4088_v62 = vmul.f32 %v10242_v49, %v4087_v51  ;;  %v10399_v58 = vpop.xlane.xlu1 %2286  ;;  %v14361_v56 = vld [vmem:[#allocation13_spill] sm:$0xff] }
 0x3ad   :  { %v7300_v17 = vpop.eup %7299  ;;  %v4069_v60 = vadd.f32 1.0, %v4068_v32  ;;  %v3372_v54 = vand.u32 2147483647, %v10363_v16  ;;  %7311 = vlog2.f32 %v4146_v45  ;;  %v14359_v25 = vunpack.c.h.bf16 %v9572_v41  ;;  %14360 = vst [vmem:[#allocation83_spill] sm:$0xff] %v10399_v58  ;;  %v14363_v32 = vld [vmem:[#allocation14_spill] sm:$0xff] }
 0x3ae   :  { %v10395_v7 = vpop.eup %7301  ;;  %v5022_v12 = vadd.f32 %v4046_v23, %v3230_v3  ;;  %7313 = vlog2.f32 %v4074_v47  ;;  %v5408_v8 = vmul.f32 %v5280_v24, %v5024_v33  ;;  %v10403_v52 = vadd.f32 %v14347_v6, %v14361_v56  ;;  %v10413_v24 = vpop.permute.xlu0 %2803  ;;  %v14369_v3 = vld [vmem:[#allocation16_spill] sm:$0xff]  ;;  %v14385_v33 = vld [vmem:[#allocation21_spill] sm:$0xff] }
 0x3af   :  { %v5278_v4 = vand.u32 2147483647, %v14359_v25  ;;  %v4091_v49 = vsel %vm10387_vm8, %v4088_v62, %v4085_v61  ;;  %v4071_v51 = vand.u32 2147483647, %v10269_v63  ;;  %7315 = vlog2.f32 %v4119_v14  ;;  %14365 = vst [vmem:[#allocation84_spill] sm:$0xff] %v10413_v24  ;;  %v14371_v62 = vld [vmem:[#allocation17_spill] sm:$0xff] }
 0x3b0   :  { %14362 = vst [vmem:[#allocation13_spill] sm:$0xff] %v10403_v52  ;;  %v10410_v40 = vadd.f32 %v14347_v6, %v14363_v32  ;;  %v3235_v41 = vmax.f32 %v9764_v28, 0.0  ;;  %v4067_v11 = vmul.f32 0.6931472, %v7300_v17  ;;  %7317 = vpow2.f32 %v3661_v2  ;;  %5687 = vrot.lane.b32.xlu1 %v5408_v8, %s7789_s10  ;;  %v14373_v8 = vld [vmem:[#allocation18_spill] sm:$0xff] }
 0x3b1   :  { %v10418_v45 = vadd.f32 %v14347_v6, %v14366_v30  ;;  %v14368_v47 = vunpack.c.l.bf16 %v9585_v48  ;;  %v3500_v61 = vsub.f32 0.0, %v3372_v54  ;;  %v4070_v23 = vmul.f32 %v10269_v63, %v4069_v60  ;;  %v14377_v63 = vld [vmem:[#allocation63_spill] sm:$0xff]  ;;  %v14381_v30 = vld [vmem:[#allocation20_spill] sm:$0xff] }
 0x3b2   :  { %14364 = vst [vmem:[#allocation14_spill] sm:$0xff] %v10410_v40  ;;  %v5027_v14 = vadd.f32 %v4091_v49, %v3235_v41  ;;  %v4101_v28 = vadd.f32 1.0, %v10395_v7  ;;  %v5406_v35 = vmul.f32 %v5278_v4, %v5022_v12  ;;  %v10425_v2 = vpop.eup %7303  ;;  %v10429_v17 = vadd.f32 %v14347_v6, %v14369_v3  ;;  %2865 = vrot.lane.b32.xlu0 %v14377_v63, %s7789_s10  ;;  %v14378_v60 = vld [vmem:[#allocation19_spill] sm:$0xff]  ;;  %v10452_v12 = vld [vmem:[%s14074_s0 + $0x118] sm:$0xff]   ;;  %v10459_v41 = vpop.xlane.xlu1 %2289 }
 0x3b3   :  { %14367 = vst [vmem:[#allocation15_spill] sm:$0xff] %v10418_v45  ;;  %v5283_v27 = vand.u32 2147483647, %v14368_v47  ;;  %v10433_v25 = vadd.f32 %v14347_v6, %v14371_v62  ;;  %v10437_v56 = vadd.f32 %v14347_v6, %v14373_v8  ;;  %vm10439_vm9 = vcmp.lt.f32.partialorder %v4071_v51, 0.0004427343  ;;  %14380 = vst [vmem:[#allocation19_spill] sm:$0xff] %v10459_v41 }
 0x3b4   :  { %14370 = vst [vmem:[#allocation16_spill] sm:$0xff] %v10429_v17  ;;  %v10447_v4 = vadd.f32 %v14347_v6, %v14378_v60  ;;  %v4073_v51 = vsel %vm10439_vm9, %v4070_v23, %v4067_v11  ;;  %v4095_v32 = vmul.f32 -0.5, %v10327_v26  ;;  %5683 = vrot.lane.b32.xlu1 %v5406_v35, %s7789_s10  ;;  %v10463_v47 = vadd.f32 %v14347_v6, %v14381_v30  ;;  %v10468_v3 = vld [vmem:[%s14074_s0 + $0x110] sm:$0xff]   ;;  %v14383_v35 = vld [vmem:[#allocation37_spill] sm:$0xff]  ;;  %v10478_v60 = vpop.permute.xlu0 %2813 }
 0x3b5   :  { %14372 = vst [vmem:[#allocation17_spill] sm:$0xff] %v10433_v25  ;;  %14374 = vst [vmem:[#allocation18_spill] sm:$0xff] %v10437_v56  ;;  %v3233_v8 = vmax.f32 %v9805_v36, 0.0  ;;  %v3663_v11 = vmul.f32 1.442695, %v3500_v61  ;;  %v7306_v23 = vpop.eup %7305  ;;  %v10475_v54 = vmul.f32 %v14383_v35, %v14107_v18  ;;  %7319 = vlog2.f32 %v4101_v28  ;;  %v14388_v35 = vld [vmem:[#allocation62_spill] sm:$0xff] }
 0x3b6   :  { %14379 = vst [vmem:[#allocation63_spill] sm:$0xff] %v10447_v4  ;;  %14382 = vst [vmem:[#allocation20_spill] sm:$0xff] %v10463_v47  ;;  %v4128_v63 = vadd.f32 1.0, %v10425_v2  ;;  %v5411_v30 = vmul.f32 %v5283_v27, %v5027_v14  ;;  %v10480_v49 = vpop.eup %7307  ;;  %v10484_v62 = vadd.f32 %v14347_v6, %v14385_v33  ;;  %v14387_v36 = vunpack.c.l.bf16 %v9782_v31  ;;  %2867 = vrot.lane.b32.xlu0 %v14388_v35, %s7789_s10  ;;  %v14389_v28 = vld [vmem:[#allocation22_spill] sm:$0xff]  ;;  %v10511_v56 = vpop.permute.xlu1 %5647 }
 0x3b7   :  { %14384 = vst [vmem:[#allocation37_spill] sm:$0xff] %v10478_v60  ;;  %v5025_v41 = vadd.f32 %v4073_v51, %v3233_v8  ;;  %v4149_v58 = vmul.f32 -0.5, %v10345_v5  ;;  %v10493_v18 = vadd.f32 %v14347_v6, %v14389_v28  ;;  %v14391_v27 = vunpack.c.l.bf16 %v10381_v37  ;;  %v14393_v8 = vld [vmem:[#allocation6_spill] sm:$0xff] }
 0x3b8   :  { %14386 = vst [vmem:[#allocation21_spill] sm:$0xff] %v10484_v62  ;;  %v5281_v61 = vand.u32 2147483647, %v14387_v36  ;;  %v4096_v25 = vadd.f32 1.0, %v4095_v32  ;;  %v4077_v33 = vmul.f32 -0.5, %v10352_v50  ;;  %5693 = vrot.lane.b32.xlu1 %v5411_v30, %s7789_s10  ;;  %v14394_v62 = vld [vmem:[#allocation46_spill] sm:$0xff]  ;;  %7321 = vpow2.f32 %v3663_v11  ;;  %v10522_v1 = vpop.permute.xlu0 %2809 }
 0x3b9   :  { %14390 = vst [vmem:[#allocation62_spill] sm:$0xff] %v10493_v18  ;;  %v10497_v14 = vand.u32 2147483647, %v14391_v27  ;;  %v10501_v36 = vpop.eup %7309  ;;  %v10506_v35 = vadd.f32 %v14394_v62, %v14393_v8  ;;  %v4098_v28 = vand.u32 2147483647, %v10327_v26  ;;  %7323 = vlog2.f32 %v4128_v63  ;;  %v14395_v4 = vld [vmem:[#allocation54_spill] sm:$0xff] }
 0x3ba   :  { %v7312_v18 = vpop.eup %7311  ;;  %v3403_v27 = vand.u32 2147483647, %v10475_v54  ;;  %v4110_v32 = vadd.f32 1.0, %v10480_v49  ;;  %v14396_v47 = vunpack.c.l.bf16 %v14395_v4  ;;  %v14397_v51 = vld [vmem:[#allocation38_spill] sm:$0xff]  ;;  %v4122_v62 = vmul.f32 -0.5, %v10340_v42  ;;  %14398 = vst [vmem:[#allocation6_spill] sm:$0xff] %v10522_v1 }
 0x3bb   :  { %14392 = vst [vmem:[#allocation22_spill] sm:$0xff] %v10497_v14  ;;  %v4094_v14 = vmul.f32 0.6931472, %v7306_v23  ;;  %v7314_v30 = vpop.eup %7313  ;;  %v4150_v40 = vadd.f32 1.0, %v4149_v58  ;;  %v5409_v60 = vmul.f32 %v5281_v61, %v5025_v41  ;;  %v4125_v45 = vand.u32 2147483647, %v10340_v42  ;;  %v10550_v41 = vpop.permute.xlu1 %5643 }
 0x3bc   :  { %v10516_v52 = vmul.f32 %v14397_v51, %v14396_v47  ;;  %v7316_v11 = vpop.eup %7315  ;;  %v4097_v23 = vmul.f32 %v10327_v26, %v4096_v25  ;;  %v4078_v63 = vadd.f32 1.0, %v4077_v33  ;;  %v4152_v17 = vand.u32 2147483647, %v10345_v5  ;;  %v10529_v47 = vld [vmem:[%s14074_s0 + $0x90] sm:$0xff]  }
 0x3bd   :  { %v10524_v13 = vpop.eup %7317  ;;  %vm10532_vm10 = vcmp.lt.f32.partialorder %v4098_v28, 0.0004427343  ;;  %v4080_v26 = vand.u32 2147483647, %v10352_v50  ;;  %v4148_v25 = vmul.f32 0.6931472, %v7312_v18  ;;  %5689 = vrot.lane.b32.xlu1 %v5409_v60, %s7789_s10  ;;  %7325 = vlog2.f32 %v4110_v32 }
 0x3be   :  { %v4137_v61 = vadd.f32 1.0, %v10501_v36  ;;  %v4100_v33 = vsel %vm10532_vm10, %v4097_v23, %v4094_v14  ;;  %v4076_v51 = vmul.f32 0.6931472, %v7314_v30  ;;  %v4123_v1 = vadd.f32 1.0, %v4122_v62 }
 0x3bf   :  { %v4104_v24 = vmul.f32 -0.5, %v10395_v7  ;;  %v3236_v28 = vmax.f32 %v9861_v9, 0.0  ;;  %v4151_v58 = vmul.f32 %v10345_v5, %v4150_v40  ;;  %v4121_v57 = vmul.f32 0.6931472, %v7316_v11  ;;  %v10568_v11 = vpop.permute.xlu0 %2815  ;;  %v10587_v62 = vpop.permute.xlu1 %5653 }
 0x3c0   :  { %v4155_v59 = vadd.f32 1.0, %v10524_v13  ;;  %v4079_v18 = vmul.f32 %v10352_v50, %v4078_v63  ;;  %vm10546_vm11 = vcmp.lt.f32.partialorder %v4152_v17, 0.0004427343  ;;  %v14403_v14 = vunpack.c.h.bf16 %v9585_v48  ;;  %v14407_v50 = vld [vmem:[#allocation73_spill] sm:$0xff] }
 0x3c1   :  { %v5028_v30 = vadd.f32 %v4100_v33, %v3236_v28  ;;  %vm10554_vm12 = vcmp.lt.f32.partialorder %v4080_v26, 0.0004427343  ;;  %v4154_v9 = vsel %vm10546_vm11, %v4151_v58, %v4148_v25  ;;  %7327 = vlog2.f32 %v4137_v61 }
 0x3c2   :  { %v5284_v32 = vand.u32 2147483647, %v14403_v14  ;;  %v14406_v5 = vunpack.c.l.bf16 %v10529_v47  ;;  %v4082_v17 = vsel %vm10554_vm12, %v4079_v18, %v4076_v51  ;;  %v3242_v48 = vmax.f32 %v9896_v22, 0.0  ;;  %v7320_v23 = vpop.eup %7319 }
 0x3c3   :  { %v3531_v63 = vsub.f32 0.0, %v3403_v27  ;;  %v4124_v26 = vmul.f32 %v10340_v42, %v4123_v1  ;;  %vm10571_vm1 = vcmp.lt.f32.partialorder %v4125_v45, 0.0004427343  ;;  %v3234_v58 = vmax.f32 %v9904_v43, 0.0 }
 0x3c4   :  { %v10563_v40 = vmul.f32 %v14407_v50, %v14406_v5  ;;  %v4105_v25 = vadd.f32 1.0, %v4104_v24  ;;  %v4131_v61 = vmul.f32 -0.5, %v10425_v2  ;;  %v14410_v28 = vunpack.c.h.bf16 %v9866_v53 }
 0x3c5   :  { %v5034_v18 = vadd.f32 %v4154_v9, %v3242_v48  ;;  %v4107_v22 = vand.u32 2147483647, %v10395_v7  ;;  %v14411_v60 = vunpack.c.h.bf16 %v9782_v31  ;;  %v5026_v14 = vadd.f32 %v4082_v17, %v3234_v58  ;;  %v10582_v1 = vpop.eup %7321  ;;  %v14413_v48 = vld [vmem:[#allocation39_spill] sm:$0xff] }
 0x3c6   :  { %v5290_v51 = vand.u32 2147483647, %v14410_v28  ;;  %v5412_v42 = vmul.f32 %v5284_v32, %v5028_v30  ;;  %v4127_v45 = vsel %vm10571_vm1, %v4124_v26, %v4121_v57  ;;  %v4103_v43 = vmul.f32 0.6931472, %v7320_v23  ;;  %v7324_v5 = vpop.eup %7323  ;;  %v10600_v26 = vpop.permute.xlu0 %2811 }
 0x3c7   :  { %v5282_v27 = vand.u32 2147483647, %v14411_v60  ;;  %7329 = vlog2.f32 %v4155_v59  ;;  %v3373_v24 = vand.u32 2147483647, %v10563_v40  ;;  %v3725_v9 = vmul.f32 1.442695, %v3531_v63 }
 0x3c8   :  { %v14412_v50 = vunpack.c.h.bf16 %v10381_v37  ;;  %v14414_v32 = vunpack.c.l.bf16 %v9842_v19  ;;  %v3239_v17 = vmax.f32 %v9876_v0, 0.0  ;;  %5695 = vrot.lane.b32.xlu1 %v5412_v42, %s7789_s10  ;;  %v4106_v59 = vmul.f32 %v10395_v7, %v4105_v25 }
 0x3c9   :  { %v4132_v57 = vadd.f32 1.0, %v4131_v61  ;;  %v4113_v23 = vmul.f32 -0.5, %v10480_v49  ;;  %v5418_v63 = vmul.f32 %v5290_v51, %v5034_v18  ;;  %vm10602_vm13 = vcmp.lt.f32.partialorder %v4107_v22, 0.0004427343  ;;  %v14418_v22 = vld [vmem:[#allocation9_spill] sm:$0xff] }
 0x3ca   :  { %v10592_v31 = vmul.f32 %v14413_v48, %v14412_v50  ;;  %v5287_v30 = vand.u32 2147483647, %v14414_v32  ;;  %v5031_v33 = vadd.f32 %v4127_v45, %v3239_v17  ;;  %v4134_v28 = vand.u32 2147483647, %v10425_v2  ;;  %v7326_v25 = vpop.eup %7325 }
 0x3cb   :  { %v5410_v60 = vmul.f32 %v5282_v27, %v5026_v14  ;;  %v4109_v0 = vsel %vm10602_vm13, %v4106_v59, %v4103_v43  ;;  %v3501_v42 = vsub.f32 0.0, %v3373_v24  ;;  %v4130_v50 = vmul.f32 0.6931472, %v7324_v5  ;;  %5707 = vrot.lane.b32.xlu0 %v5418_v63, %s7789_s10  ;;  %v10620_v14 = vpop.permute.xlu1 %5649 }
 0x3cc   :  { %v4164_v7 = vadd.f32 1.0, %v10582_v1  ;;  %v3401_v61 = vand.u32 2147483647, %v10516_v52  ;;  %v3404_v51 = vand.u32 2147483647, %v10592_v31  ;;  %v14417_v18 = vunpack.c.h.bf16 %v14395_v4  ;;  %v14428_v4 = vld [vmem:[#allocation7_spill] sm:$0xff] }
 0x3cd   :  { %v3237_v27 = vmax.f32 %v9965_v38, 0.0  ;;  %5691 = vrot.lane.b32.xlu1 %v5410_v60, %s7789_s10  ;;  %v14419_v43 = vunpack.c.l.bf16 %v9921_v44  ;;  %v4140_v5 = vmul.f32 -0.5, %v10501_v36  ;;  %v4133_v48 = vmul.f32 %v10425_v2, %v4132_v57 }
 0x3ce   :  { %v10616_v45 = vmul.f32 %v14418_v22, %v14417_v18  ;;  %v4114_v32 = vadd.f32 1.0, %v4113_v23  ;;  %vm10626_vm14 = vcmp.lt.f32.partialorder %v4134_v28, 0.0004427343  ;;  %v4116_v59 = vand.u32 2147483647, %v10480_v49  ;;  %v10633_v18 = vpop.permute.xlu0 %2821  ;;  %v7328_v22 = vpop.eup %7327 }
 0x3cf   :  { %v5285_v24 = vand.u32 2147483647, %v14419_v43  ;;  %v5029_v17 = vadd.f32 %v4109_v0, %v3237_v27  ;;  %v5415_v38 = vmul.f32 %v5287_v30, %v5031_v33  ;;  %v3665_v63 = vmul.f32 1.442695, %v3501_v42  ;;  %14422 = vst [vmem:[#allocation46_spill] sm:$0xff] %v10633_v18  ;;  %v14427_v27 = vld [vmem:[#allocation40_spill] sm:$0xff] }
 0x3d0   :  { %v4136_v58 = vsel %vm10626_vm14, %v4133_v48, %v4130_v50  ;;  %v4112_v60 = vmul.f32 0.6931472, %v7326_v25  ;;  %7331 = vlog2.f32 %v4164_v7  ;;  %v3529_v43 = vsub.f32 0.0, %v3401_v61  ;;  %v14600_v18 = vld [vmem:[#allocation56_spill] sm:$0xff] }
 0x3d1   :  { %v3532_v2 = vsub.f32 0.0, %v3404_v51  ;;  %v3402_v57 = vand.u32 2147483647, %v10616_v45  ;;  %v3240_v23 = vmax.f32 %v10261_v55, 0.0  ;;  %5701 = vrot.lane.b32.xlu1 %v5415_v38, %s7789_s10  ;;  %v4158_v28 = vmul.f32 -0.5, %v10524_v13  ;;  %v5656_v51 = vpop.permute.xlu1 %5655 }
 0x3d2   :  { %v4141_v30 = vadd.f32 1.0, %v4140_v5  ;;  %v4143_v33 = vand.u32 2147483647, %v10501_v36  ;;  %v4115_v0 = vmul.f32 %v10480_v49, %v4114_v32  ;;  %v14423_v42 = vunpack.c.h.bf16 %v9842_v19 }
 0x3d3   :  { %v5032_v7 = vadd.f32 %v4136_v58, %v3240_v23  ;;  %vm10643_vm0 = vcmp.lt.f32.partialorder %v4116_v59, 0.0004427343  ;;  %v5413_v61 = vmul.f32 %v5285_v24, %v5029_v17  ;;  %v14426_v55 = vunpack.c.l.bf16 %v10452_v12 }
 0x3d4   :  { %v5288_v50 = vand.u32 2147483647, %v14423_v42  ;;  %v4139_v5 = vmul.f32 0.6931472, %v7328_v22  ;;  %7333 = vpow2.f32 %v3665_v63  ;;  %v4118_v49 = vsel %vm10643_vm0, %v4115_v0, %v4112_v60  ;;  %v7330_v32 = vpop.eup %7329  ;;  %v10662_v22 = vpop.permute.xlu0 %2817  ;;  %v5130_v42 = vld [vmem:[#allocation2 + $0x8] sm:$0xff] }
 0x3d5   :  { %v10650_v48 = vmul.f32 %v14427_v27, %v14426_v55  ;;  %7335 = vpow2.f32 %v3725_v9  ;;  %v3721_v19 = vmul.f32 1.442695, %v3529_v43  ;;  %v10656_v59 = vmul.f32 %v14428_v4, %v10506_v35  ;;  %5697 = vrot.lane.b32.xlu1 %v5413_v61, %s7789_s10  ;;  %14429 = vst [vmem:[#allocation54_spill] sm:$0xff] %v10662_v22  ;;  %v14434_v61 = vld [vmem:[#allocation41_spill] sm:$0xff]  ;;  %v5134_v60 = vld [vmem:[#allocation2 + $0x28] sm:$0xff] }
 0x3d6   :  { %v3238_v24 = vmax.f32 %v10280_v10, 0.0  ;;  %v3727_v17 = vmul.f32 1.442695, %v3532_v2  ;;  %v4159_v38 = vadd.f32 1.0, %v4158_v28  ;;  %v4161_v58 = vand.u32 2147483647, %v10524_v13 }
 0x3d7   :  { %v4142_v63 = vmul.f32 %v10501_v36, %v4141_v30  ;;  %vm10664_vm2 = vcmp.lt.f32.partialorder %v4143_v33, 0.0004427343  ;;  %v14432_v9 = vunpack.c.h.bf16 %v9921_v44  ;;  %v5416_v0 = vmul.f32 %v5288_v50, %v5032_v7  ;;  %v5132_v10 = vld [vmem:[#allocation2 + $0x18] sm:$0xff]  ;;  %v5652_v30 = vpop.permute.xlu1 %5651  ;;  %v5154_v22 = vld [vmem:[#allocation2 + $0xc8] sm:$0xff] }
 0x3d8   :  { %v5030_v23 = vadd.f32 %v4118_v49, %v3238_v24  ;;  %v3530_v25 = vsub.f32 0.0, %v3402_v57  ;;  %v3407_v2 = vand.u32 2147483647, %v10650_v48  ;;  %v4157_v28 = vmul.f32 0.6931472, %v7330_v32  ;;  %v5135_v57 = vld [vmem:[#allocation2 + $0x30] sm:$0xff] }
 0x3d9   :  { %v5286_v43 = vand.u32 2147483647, %v14432_v9  ;;  %v4145_v36 = vsel %vm10664_vm2, %v4142_v63, %v4139_v5  ;;  %7337 = vpow2.f32 %v3721_v19  ;;  %v14433_v33 = vunpack.c.l.bf16 %v10468_v3  ;;  %5703 = vrot.lane.b32.xlu1 %v5416_v0, %s7789_s10  ;;  %v5133_v63 = vld [vmem:[#allocation2 + $0x20] sm:$0xff] }
 0x3da   :  { %v14435_v44 = vunpack.c.l.bf16 %v9866_v53  ;;  %v3241_v50 = vmax.f32 %v10296_v34, 0.0  ;;  %v4160_v7 = vmul.f32 %v10524_v13, %v4159_v38  ;;  %v4167_v49 = vmul.f32 -0.5, %v10582_v1  ;;  %v5136_v34 = vld [vmem:[#allocation2 + $0x38] sm:$0xff]  ;;  %v10692_v38 = vpop.permute.xlu0 %2823 }
 0x3db   :  { %v10676_v55 = vmul.f32 %v14434_v61, %v14433_v33  ;;  %v6028_v5 = vadd.f32 %v10511_v56, %v5132_v10  ;;  %v6026_v32 = vadd.f32 %v10550_v41, %v5130_v42  ;;  %7339 = vpow2.f32 %v3727_v17  ;;  %14438 = vst [vmem:[#allocation38_spill] sm:$0xff] %v10692_v38  ;;  %v5139_v41 = vld [vmem:[#allocation2 + $0x50] sm:$0xff]  ;;  %v5662_v61 = vpop.permute.xlu1 %5661 }
 0x3dc   :  { %v5289_v27 = vand.u32 2147483647, %v14435_v44  ;;  %vm10686_vm3 = vcmp.lt.f32.partialorder %v4161_v58, 0.0004427343  ;;  %v5033_v53 = vadd.f32 %v4145_v36, %v3241_v50  ;;  %v5414_v24 = vmul.f32 %v5286_v43, %v5030_v23  ;;  %v14440_v23 = vld [vmem:[#allocation42_spill] sm:$0xff] }
 0x3dd   :  { %v3723_v9 = vmul.f32 1.442695, %v3530_v25  ;;  %v3535_v0 = vsub.f32 0.0, %v3407_v2  ;;  %v4163_v13 = vsel %vm10686_vm3, %v4160_v7, %v4157_v28  ;;  %6157 = vst.msk [vmem:[#allocation2 + $0x18] sm:$0xff] %vm42_vm15, %v6028_v5  ;;  %6155 = vst.msk [vmem:[#allocation2 + $0x8] sm:$0xff] %vm42_vm15, %v6026_v32  ;;  %v6031_v56 = vadd.f32 %v10587_v62, %v5135_v57  ;;  %v7332_v17 = vpop.eup %7331  ;;  %v14442_v5 = vld [vmem:[#allocation23_spill] sm:$0xff] }
 0x3de   :  { %v3405_v58 = vand.u32 2147483647, %v10676_v55  ;;  %v14439_v43 = vunpack.c.h.bf16 %v10452_v12  ;;  %v14441_v42 = vunpack.c.l.bf16 %v9933_v46  ;;  %v3243_v2 = vmax.f32 %v10318_v39, 0.0  ;;  %5699 = vrot.lane.b32.xlu1 %v5414_v24, %s7789_s10  ;;  %v14444_v39 = vld [vmem:[#allocation24_spill] sm:$0xff] }
 0x3df   :  { %v4168_v28 = vadd.f32 1.0, %v4167_v49  ;;  %6160 = vst.msk [vmem:[#allocation2 + $0x30] sm:$0xff] %vm42_vm15, %v6031_v56  ;;  %v6029_v62 = vadd.f32 %v10620_v14, %v5133_v63  ;;  %v6032_v36 = vadd.f32 %v5656_v51, %v5136_v34  ;;  %v6030_v33 = vadd.f32 %v5652_v30, %v5134_v60  ;;  %v5137_v63 = vld [vmem:[#allocation2 + $0x40] sm:$0xff] }
 0x3e0   :  { %v10701_v10 = vmul.f32 %v14440_v23, %v14439_v43  ;;  %v5291_v25 = vand.u32 2147483647, %v14441_v42  ;;  %v5035_v44 = vadd.f32 %v4163_v13, %v3243_v2  ;;  %v4170_v50 = vand.u32 2147483647, %v10582_v1  ;;  %v14448_v60 = vld [vmem:[#allocation25_spill] sm:$0xff]  ;;  %v5658_v42 = vpop.permute.xlu1 %5657  ;;  %v14453_v2 = vld [vmem:[#allocation26_spill] sm:$0xff] }
 0x3e1   :  { %v5417_v57 = vmul.f32 %v5289_v27, %v5033_v53  ;;  %v6035_v7 = vadd.f32 %v5662_v61, %v5139_v41  ;;  %v10712_v32 = vadd.f32 %v14347_v6, %v14442_v5  ;;  %v10716_v19 = vadd.f32 %v14347_v6, %v14444_v39  ;;  %6158 = vst.msk [vmem:[#allocation2 + $0x20] sm:$0xff] %vm42_vm15, %v6029_v62  ;;  %v10722_v14 = vpop.eup %7333  ;;  %v10740_v41 = vpop.permute.xlu0 %2819  ;;  %v14459_v5 = vld [vmem:[#allocation28_spill] sm:$0xff] }
 0x3e2   :  { %vm1526_vm5 = vcmp.ge.f32.partialorder %v10506_v35, 0.0  ;;  %v4166_v49 = vmul.f32 0.6931472, %v7332_v17  ;;  %6161 = vst.msk [vmem:[#allocation2 + $0x38] sm:$0xff] %vm42_vm15, %v6032_v36  ;;  %6159 = vst.msk [vmem:[#allocation2 + $0x28] sm:$0xff] %vm42_vm15, %v6030_v33  ;;  %v14446_v51 = vunpack.c.h.bf16 %v10381_v37  ;;  %v3533_v27 = vsub.f32 0.0, %v3405_v58  ;;  %v10732_v34 = vpop.eup %7335 }
 0x3e3   :  { %14443 = vst [vmem:[#allocation73_spill] sm:$0xff] %v10712_v32  ;;  %14445 = vst [vmem:[#allocation39_spill] sm:$0xff] %v10716_v19  ;;  %v3408_v53 = vand.u32 2147483647, %v10701_v10  ;;  %v14108_v24 = vunpack.c.h.bf16 %v10529_v47  ;;  %5705 = vrot.lane.b32.xlu1 %v5417_v57, %s7789_s10  ;;  %v10736_v13 = vadd.f32 %v14347_v6, %v14448_v60  ;;  %7341 = vpow2.f32 %v3723_v9  ;;  %v5142_v32 = vld [vmem:[#allocation2 + $0x68] sm:$0xff] }
 0x3e4   :  { %v10726_v30 = vand.u32 2147483647, %v14446_v51  ;;  %6164 = vst.msk [vmem:[#allocation2 + $0x50] sm:$0xff] %vm42_vm15, %v6035_v7  ;;  %v14109_v37 = vunpack.c.h.bf16 %v10468_v3  ;;  %v4169_v56 = vmul.f32 %v10582_v1, %v4168_v28  ;;  %14450 = vst [vmem:[#allocation7_spill] sm:$0xff] %v10740_v41  ;;  %v3733_v17 = vmul.f32 1.442695, %v3535_v0 }
 0x3e5   :  { %14449 = vst [vmem:[#allocation40_spill] sm:$0xff] %v10736_v13  ;;  %vm10742_vm6 = vcmp.lt.f32.partialorder %v4170_v50, 0.0004427343  ;;  %v5419_v43 = vmul.f32 %v5291_v25, %v5035_v44  ;;  %v1786_v23 = vsel %vm1526_vm5, %v10506_v35, %v10656_v59  ;;  %v10752_v9 = vadd.f32 %v14347_v6, %v14453_v2  ;;  %v14455_v59 = vld [vmem:[#allocation27_spill] sm:$0xff]  ;;  %v10783_v7 = vpop.xlane.xlu0 %2277 }
 0x3e6   :  { %14447 = vst [vmem:[#allocation9_spill] sm:$0xff] %v10726_v30  ;;  %v4173_v1 = vadd.f32 1.0, %v10722_v14  ;;  %v4172_v0 = vsel %vm10742_vm6, %v4169_v56, %v4166_v49  ;;  %v6033_v28 = vadd.f32 %v5658_v42, %v5137_v63  ;;  %v3729_v62 = vmul.f32 1.442695, %v3533_v27  ;;  %v10764_v35 = vpop.eup %7337  ;;  %v14457_v44 = vld [vmem:[#allocation43_spill] sm:$0xff]  ;;  %14458 = vst [vmem:[#allocation23_spill] sm:$0xff] %v10783_v7 }
 0x3e7   :  { %14454 = vst [vmem:[#allocation41_spill] sm:$0xff] %v10752_v9  ;;  %v3536_v36 = vsub.f32 0.0, %v3408_v53  ;;  %v3244_v25 = vmax.f32 %v10363_v16, 0.0  ;;  %v10761_v33 = vmul.f32 %v9797_v15, %v14108_v24  ;;  %5709 = vrot.lane.b32.xlu1 %v5419_v43, %s7789_s10  ;;  %v10768_v61 = vadd.f32 %v14347_v6, %v14455_v59  ;;  %v10778_v16 = vld [vmem:[%s14074_s0 + $0x128] sm:$0xff]   ;;  %v5664_v53 = vpop.permute.xlu1 %5663  ;;  %v5140_v63 = vld [vmem:[#allocation2 + $0x58] sm:$0xff] }
 0x3e8   :  { %v10773_v50 = vmul.f32 %v14457_v44, %v14109_v37  ;;  %v2515_v15 = vunpack.c.l.bf16 %v10778_v16  ;;  %v1918_v57 = vmul.f32 %v8083_v20, %v1786_v23  ;;  %6162 = vst.msk [vmem:[#allocation2 + $0x40] sm:$0xff] %vm42_vm15, %v6033_v28  ;;  %v10787_v39 = vadd.f32 %v14347_v6, %v14459_v5  ;;  %v10791_v60 = vpop.eup %7339  ;;  %v14462_v56 = vld [vmem:[#allocation29_spill] sm:$0xff]  ;;  %v5138_v28 = vld [vmem:[#allocation2 + $0x48] sm:$0xff]  ;;  %v14465_v59 = vld [vmem:[#allocation44_spill] sm:$0xff] }
 0x3e9   :  { %14456 = vst [vmem:[#allocation42_spill] sm:$0xff] %v10768_v61  ;;  %7343 = vpow2.f32 %v3733_v17  ;;  %v14461_v49 = vunpack.c.h.bf16 %v9933_v46  ;;  %v5036_v27 = vadd.f32 %v4172_v0, %v3244_v25  ;;  %v10795_v58 = vadd.f32 %v14347_v6, %v14462_v56  ;;  %v10801_v23 = vld [vmem:[%s14074_s0 + $0x120] sm:$0xff]   ;;  %v14464_v0 = vld [vmem:[#allocation60_spill] sm:$0xff] }
 0x3ea   :  { %14460 = vst [vmem:[#allocation24_spill] sm:$0xff] %v10787_v39  ;;  %v4443_v43 = vadd.f32 1.0, %v10732_v34  ;;  %7345 = vlog2.f32 %v4173_v1  ;;  %v4425_v46 = vadd.f32 1.0, %v10764_v35  ;;  %v3735_v42 = vmul.f32 1.442695, %v3536_v36  ;;  %v14466_v56 = vld [vmem:[#allocation30_spill] sm:$0xff] }
 0x3eb   :  { %v5292_v51 = vand.u32 2147483647, %v14461_v49  ;;  %14463 = vst [vmem:[#allocation25_spill] sm:$0xff] %v10795_v58  ;;  %7347 = vpow2.f32 %v3729_v62  ;;  %v3374_v2 = vand.u32 2147483647, %v10761_v33  ;;  %2869 = vrot.lane.b32.xlu1 %v14464_v0, %s7789_s10  ;;  %v10810_v44 = vmul.f32 %v14465_v59, %v2515_v15  ;;  %v14468_v62 = vld [vmem:[#allocation31_spill] sm:$0xff]  ;;  %v5660_v17 = vpop.permute.xlu1 %5659 }
 0x3ec   :  { %v3406_v25 = vand.u32 2147483647, %v10773_v50  ;;  %v2291_v5 = vsel %vm1924_vm4, %v1918_v57, 0.0  ;;  %v6036_v49 = vadd.f32 %v5664_v53, %v5140_v63  ;;  %v10815_v1 = vadd.f32 %v14347_v6, %v14466_v56  ;;  %v14472_v59 = vld [vmem:[#allocation32_spill] sm:$0xff]  ;;  %v10834_v63 = vpop.permute.xlu0 %2861  ;;  %v5141_v58 = vld [vmem:[#allocation2 + $0x60] sm:$0xff] }
 0x3ed   :  { %v10819_v36 = vadd.f32 %v14347_v6, %v14468_v62  ;;  %v14470_v24 = vunpack.c.l.bf16 %v10452_v12  ;;  %v5420_v37 = vmul.f32 %v5292_v51, %v5036_v27  ;;  %2292 = vadd.xlane.f32.xlu0 %v2291_v5  ;;  %v10827_v30 = vadd.f32 %v14347_v6, %v14472_v59  ;;  %14476 = vst [vmem:[#allocation60_spill] sm:$0xff] %v10834_v63  ;;  %v14477_v62 = vld [vmem:[#allocation33_spill] sm:$0xff]  ;;  %v14479_v51 = vld [vmem:[#allocation34_spill] sm:$0xff] }
 0x3ee   :  { %14467 = vst [vmem:[#allocation26_spill] sm:$0xff] %v10815_v1  ;;  %7349 = vlog2.f32 %v4443_v43  ;;  %v14474_v57 = vunpack.c.l.bf16 %v10468_v3  ;;  %6165 = vst.msk [vmem:[#allocation2 + $0x58] sm:$0xff] %vm42_vm15, %v6036_v49  ;;  %v6034_v56 = vadd.f32 %v5660_v17, %v5138_v28  ;;  %v10842_v27 = vadd.f32 %v14347_v6, %v14479_v51  ;;  %v5143_v43 = vld [vmem:[#allocation2 + $0x70] sm:$0xff]  ;;  %v14482_v17 = vld [vmem:[#allocation45_spill] sm:$0xff] }
 0x3ef   :  { %14469 = vst [vmem:[#allocation27_spill] sm:$0xff] %v10819_v36  ;;  %v10823_v0 = vand.u32 2147483647, %v14470_v24  ;;  %14473 = vst [vmem:[#allocation28_spill] sm:$0xff] %v10827_v30  ;;  %v10838_v24 = vadd.f32 %v14347_v6, %v14477_v62  ;;  %7351 = vlog2.f32 %v4425_v46  ;;  %v3502_v5 = vsub.f32 0.0, %v3374_v2  ;;  %5711 = vrot.lane.b32.xlu1 %v5420_v37, %s7789_s10  ;;  %v14483_v51 = vld [vmem:[#allocation35_spill] sm:$0xff] }
 0x3f0   :  { %v10831_v53 = vand.u32 2147483647, %v14474_v57  ;;  %14480 = vst [vmem:[#allocation30_spill] sm:$0xff] %v10842_v27  ;;  %7353 = vpow2.f32 %v3735_v42  ;;  %v3534_v59 = vsub.f32 0.0, %v3406_v25  ;;  %v3411_v49 = vand.u32 2147483647, %v10810_v44  ;;  %v10852_v62 = vpop.eup %7341 }
 0x3f1   :  { %14471 = vst [vmem:[#allocation43_spill] sm:$0xff] %v10823_v0  ;;  %14478 = vst [vmem:[#allocation44_spill] sm:$0xff] %v10838_v24  ;;  %v14481_v57 = vunpack.c.l.bf16 %v10801_v23  ;;  %v10856_v46 = vadd.f32 %v14347_v6, %v14483_v51  ;;  %v14485_v2 = vld [vmem:[#allocation36_spill] sm:$0xff]  ;;  %v4452_v42 = vadd.f32 1.0, %v10791_v60  ;;  %v2516_v25 = vunpack.c.h.bf16 %v10778_v16  ;;  %v5670_v24 = vpop.permute.xlu1 %5669  ;;  %v5129_v27 = vld [vmem:[#allocation2] sm:$0xff] }
 0x3f2   :  { %14475 = vst [vmem:[#allocation29_spill] sm:$0xff] %v10831_v53  ;;  %6163 = vst.msk [vmem:[#allocation2 + $0x48] sm:$0xff] %vm42_vm15, %v6034_v56  ;;  %v10860_v37 = vadd.f32 %v14347_v6, %v14485_v2  ;;  %v14487_v0 = vld [vmem:[#allocation8_spill] sm:$0xff]  ;;  %v14489_v56 = vunpack.c.h.bf16 %v10452_v12  ;;  %v14491_v51 = vunpack.c.h.bf16 %v10468_v3  ;;  %v6039_v2 = vadd.f32 %v5670_v24, %v5143_v43  ;;  %v14494_v24 = vld [vmem:[#allocation10_spill] sm:$0xff] }
 0x3f3   :  { %v10849_v28 = vmul.f32 %v14482_v17, %v14481_v57  ;;  %14484 = vst [vmem:[#allocation31_spill] sm:$0xff] %v10856_v46  ;;  %v10866_v57 = vadd.f32 %v14347_v6, %v14487_v0  ;;  %v10877_v7 = vand.u32 2147483647, %v2515_v15  ;;  %v3731_v0 = vmul.f32 1.442695, %v3534_v59  ;;  %v14497_v16 = vld [vmem:[#allocation48_spill] sm:$0xff] }
 0x3f4   :  { %14486 = vst [vmem:[#allocation32_spill] sm:$0xff] %v10860_v37  ;;  %v10870_v17 = vand.u32 2147483647, %v14489_v56  ;;  %v10874_v53 = vand.u32 2147483647, %v14491_v51  ;;  %v4176_v56 = vmul.f32 -0.5, %v10722_v14  ;;  %7355 = vlog2.f32 %v4452_v42 }
 0x3f5   :  { %14488 = vst [vmem:[#allocation33_spill] sm:$0xff] %v10866_v57  ;;  %14493 = vst [vmem:[#allocation35_spill] sm:$0xff] %v10877_v7  ;;  %v3667_v37 = vmul.f32 1.442695, %v3502_v5  ;;  %v3539_v57 = vsub.f32 0.0, %v3411_v49  ;;  %v4434_v3 = vadd.f32 1.0, %v10852_v62  ;;  %v10885_v43 = vmul.f32 %v14494_v24, %v2516_v25  ;;  %v5666_v51 = vpop.permute.xlu1 %5665 }
 0x3f6   :  { %14490 = vst [vmem:[#allocation34_spill] sm:$0xff] %v10870_v17  ;;  %14492 = vst [vmem:[#allocation45_spill] sm:$0xff] %v10874_v53  ;;  %v3409_v12 = vand.u32 2147483647, %v10849_v28  ;;  %v5642_v17 = vpop.permute.xlu0 %5641  ;;  %v10887_v46 = vpop.eup %7343  ;;  %v14495_v59 = vunpack.c.l.bf16 %v10801_v23  ;;  %v10896_v7 = vadd.f32 %v14497_v16, %v14393_v8  ;;  %v6037_v42 = vadd.f32 %v5666_v51, %v5141_v58  ;;  %v5144_v6 = vld [vmem:[#allocation2 + $0x78] sm:$0xff] }
 0x3f7   :  { %6168 = vst.msk [vmem:[#allocation2 + $0x70] sm:$0xff] %vm42_vm15, %v6039_v2  ;;  %v6025_v15 = vadd.f32 %v5642_v17, %v5129_v27  ;;  %v7346_v2 = vpop.eup %7345  ;;  %v4446_v53 = vmul.f32 -0.5, %v10732_v34  ;;  %v10903_v27 = vld [vmem:[%s14074_s0 + $0x138] sm:$0xff]   ;;  %7357 = vpow2.f32 %v3667_v37  ;;  %v3741_v16 = vmul.f32 1.442695, %v3539_v57 }
 0x3f8   :  { %v10892_v49 = vand.u32 2147483647, %v14495_v59  ;;  %v10907_v59 = vpop.eup %7347  ;;  %7359 = vpow2.f32 %v3731_v0  ;;  %v3537_v58 = vsub.f32 0.0, %v3409_v12  ;;  %v4177_v51 = vadd.f32 1.0, %v4176_v56  ;;  %6166 = vst.msk [vmem:[#allocation2 + $0x60] sm:$0xff] %vm42_vm15, %v6037_v42 }
 0x3f9   :  { %6154 = vst.msk [vmem:[#allocation2] sm:$0xff] %vm42_vm15, %v6025_v15  ;;  %v4428_v24 = vmul.f32 -0.5, %v10764_v35  ;;  %7361 = vlog2.f32 %v4434_v3  ;;  %v3412_v5 = vand.u32 2147483647, %v10885_v43  ;;  %v4479_v15 = vadd.f32 1.0, %v10887_v46  ;;  %v10923_v3 = vld [vmem:[%s14074_s0 + $0x98] sm:$0xff]   ;;  %v5672_v37 = vpop.permute.xlu1 %5671 }
 0x3fa   :  { %14496 = vst [vmem:[#allocation36_spill] sm:$0xff] %v10892_v49  ;;  %v4179_v49 = vand.u32 2147483647, %v10722_v14  ;;  %v10915_v17 = vand.u32 2147483647, %v2516_v25  ;;  %v4461_v42 = vadd.f32 1.0, %v10907_v59  ;;  %7363 = vpow2.f32 %v3741_v16 }
 0x3fb   :  { %v4175_v0 = vmul.f32 0.6931472, %v7346_v2  ;;  %v7350_v57 = vpop.eup %7349  ;;  %v4449_v12 = vand.u32 2147483647, %v10732_v34  ;;  %v4431_v56 = vand.u32 2147483647, %v10764_v35  ;;  %v4178_v2 = vmul.f32 %v10722_v14, %v4177_v51 }
 0x3fc   :  { %14498 = vst [vmem:[#allocation8_spill] sm:$0xff] %v10915_v17  ;;  %v7352_v36 = vpop.eup %7351  ;;  %v3737_v25 = vmul.f32 1.442695, %v3537_v58  ;;  %v6040_v17 = vadd.f32 %v5672_v37, %v5144_v6  ;;  %v4447_v13 = vadd.f32 1.0, %v4446_v53  ;;  %v4429_v9 = vadd.f32 1.0, %v4428_v24  ;;  %v14502_v53 = vld [vmem:[#allocation72_spill] sm:$0xff] }
 0x3fd   :  { %v10927_v30 = vpop.eup %7353  ;;  %v3540_v61 = vsub.f32 0.0, %v3412_v5  ;;  %vm10929_vm7 = vcmp.lt.f32.partialorder %v4179_v49, 0.0004427343  ;;  %v4455_v63 = vmul.f32 -0.5, %v10791_v60  ;;  %v4458_v1 = vand.u32 2147483647, %v10791_v60  ;;  %v5668_v24 = vpop.permute.xlu1 %5667 }
 0x3fe   :  { %7365 = vlog2.f32 %v4479_v15  ;;  %v4181_v16 = vsel %vm10929_vm7, %v4178_v2, %v4175_v0  ;;  %6169 = vst.msk [vmem:[#allocation2 + $0x78] sm:$0xff] %vm42_vm15, %v6040_v17  ;;  %v4445_v6 = vmul.f32 0.6931472, %v7350_v57  ;;  %v14501_v14 = vunpack.c.l.bf16 %v10923_v3  ;;  %v14504_v15 = vld [vmem:[#allocation47_spill] sm:$0xff] }
 0x3ff   :  { %7367 = vlog2.f32 %v4461_v42  ;;  %v3245_v49 = vmax.f32 %v10563_v40, 0.0  ;;  %v4427_v58 = vmul.f32 0.6931472, %v7352_v36  ;;  %v4488_v51 = vadd.f32 1.0, %v10927_v30 }
 0x400   :  { %v10941_v5 = vmul.f32 %v14502_v53, %v14501_v14  ;;  %7369 = vpow2.f32 %v3737_v25  ;;  %vm1527_vm8 = vcmp.ge.f32.partialorder %v10896_v7, 0.0  ;;  %v6038_v39 = vadd.f32 %v5668_v24, %v5142_v32 }
 0x401   :  { %v3743_v37 = vmul.f32 1.442695, %v3540_v61  ;;  %v14503_v17 = vunpack.c.h.bf16 %v10801_v23  ;;  %v14505_v57 = vunpack.c.l.bf16 %v10529_v47  ;;  %v5037_v2 = vadd.f32 %v4181_v16, %v3245_v49  ;;  %v7356_v14 = vpop.eup %7355 }
 0x402   :  { %v4448_v40 = vmul.f32 %v10732_v34, %v4447_v13  ;;  %v4430_v36 = vmul.f32 %v10764_v35, %v4429_v9  ;;  %v4456_v53 = vadd.f32 1.0, %v4455_v63  ;;  %v4437_v25 = vmul.f32 -0.5, %v10852_v62  ;;  %6167 = vst.msk [vmem:[#allocation2 + $0x68] sm:$0xff] %vm42_vm15, %v6038_v39  ;;  %v14510_v13 = vld [vmem:[#allocation59_spill] sm:$0xff] }
 0x403   :  { %v10949_v0 = vmul.f32 %v14504_v15, %v14503_v17  ;;  %v5293_v42 = vand.u32 2147483647, %v14505_v57  ;;  %vm10957_vm9 = vcmp.lt.f32.partialorder %v4449_v12, 0.0004427343  ;;  %vm10961_vm10 = vcmp.lt.f32.partialorder %v4431_v56, 0.0004427343  ;;  %2871 = vrot.lane.b32.xlu0 %v14510_v13, %s7789_s10 }
 0x404   :  { %v1659_v16 = vmul.f32 %v14428_v4, %v10896_v7  ;;  %v3375_v34 = vand.u32 2147483647, %v10941_v5  ;;  %v10970_v9 = vpop.eup %7357  ;;  %v4451_v35 = vsel %vm10957_vm9, %v4448_v40, %v4445_v6  ;;  %v4433_v63 = vsel %vm10961_vm10, %v4430_v36, %v4427_v58  ;;  %v5147_v56 = vld [vmem:[#allocation2 + $0x90] sm:$0xff]  ;;  %v5678_v58 = vpop.permute.xlu1 %5677 }
 0x405   :  { %vm10976_vm11 = vcmp.lt.f32.partialorder %v4458_v1, 0.0004427343  ;;  %7371 = vlog2.f32 %v4488_v51  ;;  %v10980_v49 = vpop.eup %7359  ;;  %v4454_v24 = vmul.f32 0.6931472, %v7356_v14  ;;  %v3410_v39 = vand.u32 2147483647, %v10949_v0 }
 0x406   :  { %7373 = vpow2.f32 %v3743_v37  ;;  %v5421_v17 = vmul.f32 %v5293_v42, %v5037_v2  ;;  %v7362_v15 = vpop.eup %7361  ;;  %v4457_v57 = vmul.f32 %v10791_v60, %v4456_v53  ;;  %v4438_v6 = vadd.f32 1.0, %v4437_v25 }
 0x407   :  { %v4440_v40 = vand.u32 2147483647, %v10852_v62  ;;  %v4482_v36 = vmul.f32 -0.5, %v10887_v46  ;;  %v3503_v51 = vsub.f32 0.0, %v3375_v34  ;;  %v4182_v32 = vadd.f32 1.0, %v10970_v9  ;;  %v10999_v61 = vpop.eup %7363 }
 0x408   :  { %5713 = vrot.lane.b32.xlu0 %v5421_v17, %s7789_s10  ;;  %v6043_v37 = vadd.f32 %v5678_v58, %v5147_v56  ;;  %v14513_v14 = vmax.f32 %v10475_v54, 0.0  ;;  %v14515_v60 = vmax.f32 %v10516_v52, 0.0  ;;  %v4470_v25 = vadd.f32 1.0, %v10980_v49  ;;  %v5145_v54 = vld [vmem:[#allocation2 + $0x80] sm:$0xff] }
 0x409   :  { %v4460_v34 = vsel %vm10976_vm11, %v4457_v57, %v4454_v24  ;;  %v4436_v13 = vmul.f32 0.6931472, %v7362_v15  ;;  %v4464_v56 = vmul.f32 -0.5, %v10907_v59  ;;  %v3538_v17 = vsub.f32 0.0, %v3410_v39 }
 0x40a   :  { %v10991_v42 = vadd.f32 %v4451_v35, %v14513_v14  ;;  %v10995_v2 = vadd.f32 %v4433_v63, %v14515_v60  ;;  %6172 = vst.msk [vmem:[#allocation2 + $0x90] sm:$0xff] %vm42_vm15, %v6043_v37  ;;  %v4439_v52 = vmul.f32 %v10852_v62, %v4438_v6  ;;  %vm11006_vm12 = vcmp.lt.f32.partialorder %v4440_v40, 0.0004427343  ;;  %v14520_v14 = vld [vmem:[#allocation49_spill] sm:$0xff]  ;;  %v5674_v62 = vpop.permute.xlu1 %5673 }
 0x40b   :  { %v4485_v63 = vand.u32 2147483647, %v10887_v46  ;;  %v14519_v58 = vunpack.c.l.bf16 %v10903_v27  ;;  %v7366_v24 = vpop.eup %7365  ;;  %v4483_v15 = vadd.f32 1.0, %v4482_v36  ;;  %v3669_v57 = vmul.f32 1.442695, %v3503_v51 }
 0x40c   :  { %14514 = vst [vmem:[#allocation10_spill] sm:$0xff] %v10991_v42  ;;  %14516 = vst [vmem:[#allocation48_spill] sm:$0xff] %v10995_v2  ;;  %7375 = vlog2.f32 %v4182_v32  ;;  %v1787_v39 = vsel %vm1527_vm8, %v10896_v7, %v1659_v16  ;;  %v7368_v6 = vpop.eup %7367  ;;  %v4467_v40 = vand.u32 2147483647, %v10907_v59  ;;  %v4515_v37 = vadd.f32 1.0, %v10999_v61  ;;  %v11029_v7 = vpop.f32.mrf.mxu1 }
 0x40d   :  { %v11014_v12 = vmul.f32 %v14520_v14, %v14519_v58  ;;  %7377 = vlog2.f32 %v4470_v25  ;;  %v6041_v60 = vadd.f32 %v5674_v62, %v5145_v54  ;;  %v11021_v53 = vpop.eup %7369  ;;  %v14521_v58 = vmax.f32 %v10592_v31, 0.0  ;;  %v11036_v54 = vld [vmem:[%s14074_s0 + $0x130] sm:$0xff]   ;;  %v14529_v62 = vld [vmem:[#allocation50_spill] sm:$0xff] }
 0x40e   :  { %v4442_v36 = vsel %vm11006_vm12, %v4439_v52, %v4436_v13  ;;  %v4465_v51 = vadd.f32 1.0, %v4464_v56  ;;  %v3739_v32 = vmul.f32 1.442695, %v3538_v17  ;;  %v4491_v16 = vmul.f32 -0.5, %v10927_v30 }
 0x40f   :  { %v11025_v14 = vadd.f32 %v4460_v34, %v14521_v58  ;;  %v3415_v25 = vand.u32 2147483647, %v11014_v12  ;;  %v14111_v31 = vunpack.c.l.bf16 %v11036_v54  ;;  %v1919_v34 = vmul.f32 %v8083_v20, %v1787_v39  ;;  %6170 = vst.msk [vmem:[#allocation2 + $0x80] sm:$0xff] %vm42_vm15, %v6041_v60  ;;  %v5148_v58 = vld [vmem:[#allocation2 + $0x98] sm:$0xff] }
 0x410   :  { %v4481_v13 = vmul.f32 0.6931472, %v7366_v24  ;;  %v4484_v56 = vmul.f32 %v10887_v46, %v4483_v15  ;;  %vm11042_vm1 = vcmp.lt.f32.partialorder %v4485_v63, 0.0004427343  ;;  %7379 = vpow2.f32 %v3669_v57  ;;  %v1389_v15 = vpop.f32.mrf.mxu1 }
 0x411   :  { %14522 = vst [vmem:[#allocation72_spill] sm:$0xff] %v11025_v14  ;;  %v4463_v52 = vmul.f32 0.6931472, %v7368_v6  ;;  %vm11046_vm13 = vcmp.lt.f32.partialorder %v4467_v40, 0.0004427343  ;;  %7381 = vlog2.f32 %v4515_v37  ;;  %v14527_v60 = vmax.f32 %v10616_v45, 0.0  ;;  %v5680_v45 = vpop.permute.xlu1 %5679 }
 0x412   :  { %v7372_v39 = vpop.eup %7371  ;;  %v4466_v46 = vmul.f32 %v10907_v59, %v4465_v51  ;;  %v4497_v63 = vadd.f32 1.0, %v11021_v53  ;;  %7383 = vpow2.f32 %v3739_v32  ;;  %v4492_v6 = vadd.f32 1.0, %v4491_v16 }
 0x413   :  { %v11053_v24 = vadd.f32 %v4442_v36, %v14527_v60  ;;  %v11057_v57 = vpop.eup %7373  ;;  %v3543_v40 = vsub.f32 0.0, %v3415_v25  ;;  %v11062_v37 = vmul.f32 %v14529_v62, %v14111_v31  ;;  %v2294_v1 = vsel %vm1924_vm4, %v1919_v34, 0.0 }
 0x414   :  { %v4487_v36 = vsel %vm11042_vm1, %v4484_v56, %v4481_v13  ;;  %v4494_v59 = vand.u32 2147483647, %v10927_v30  ;;  %2295 = vadd.xlane.f32.xlu1 %v2294_v1  ;;  %v6044_v32 = vadd.f32 %v5680_v45, %v5148_v58  ;;  %v4469_v16 = vsel %vm11046_vm13, %v4466_v46, %v4463_v52  ;;  %v11082_v52 = vld [vmem:[%s14074_s0 + $0xa8] sm:$0xff]  }
 0x415   :  { %14528 = vst [vmem:[#allocation47_spill] sm:$0xff] %v11053_v24  ;;  %v4490_v25 = vmul.f32 0.6931472, %v7372_v39  ;;  %v4473_v60 = vmul.f32 -0.5, %v10980_v49  ;;  %v1390_v62 = vadd.f32 %v1389_v15, %v14393_v8  ;;  %v4518_v34 = vmul.f32 -0.5, %v10999_v61 }
 0x416   :  { %7385 = vlog2.f32 %v4497_v63  ;;  %v4524_v17 = vadd.f32 1.0, %v11057_v57  ;;  %v4185_v13 = vmul.f32 -0.5, %v10970_v9  ;;  %6173 = vst.msk [vmem:[#allocation2 + $0x98] sm:$0xff] %vm42_vm15, %v6044_v32  ;;  %v4493_v1 = vmul.f32 %v10927_v30, %v4492_v6  ;;  %v5676_v63 = vpop.permute.xlu1 %5675 }
 0x417   :  { %v3749_v56 = vmul.f32 1.442695, %v3543_v40  ;;  %v3413_v35 = vand.u32 2147483647, %v11062_v37  ;;  %v14530_v39 = vmax.f32 %v10650_v48, 0.0  ;;  %v14534_v40 = vmax.f32 %v10676_v55, 0.0 }
 0x418   :  { %vm11089_vm14 = vcmp.lt.f32.partialorder %v4494_v59, 0.0004427343  ;;  %v4476_v30 = vand.u32 2147483647, %v10980_v49  ;;  %v4474_v31 = vadd.f32 1.0, %v4473_v60  ;;  %v1660_v48 = vmul.f32 %v14428_v4, %v1390_v62 }
 0x419   :  { %v11087_v46 = vadd.f32 %v4487_v36, %v14530_v39  ;;  %v7376_v6 = vpop.eup %7375  ;;  %v11097_v45 = vadd.f32 %v4469_v16, %v14534_v40  ;;  %v4496_v32 = vsel %vm11089_vm14, %v4493_v1, %v4490_v25  ;;  %v5146_v36 = vld [vmem:[#allocation2 + $0x88] sm:$0xff]  ;;  %v4519_v39 = vadd.f32 1.0, %v4518_v34 }
 0x41a   :  { %v7378_v59 = vpop.eup %7377  ;;  %7387 = vlog2.f32 %v4524_v17  ;;  %v4186_v51 = vadd.f32 1.0, %v4185_v13  ;;  %vm1528_vm0 = vcmp.ge.f32.partialorder %v1390_v62, 0.0  ;;  %v3541_v58 = vsub.f32 0.0, %v3413_v35 }
 0x41b   :  { %14531 = vst [vmem:[#allocation59_spill] sm:$0xff] %v11087_v46  ;;  %14535 = vst [vmem:[#allocation49_spill] sm:$0xff] %v11097_v45  ;;  %7389 = vpow2.f32 %v3749_v56  ;;  %v14536_v15 = vunpack.c.l.bf16 %v11082_v52  ;;  %v14537_v46 = vld [vmem:[#allocation74_spill] sm:$0xff]  ;;  %v4188_v16 = vand.u32 2147483647, %v10970_v9  ;;  %v6042_v17 = vadd.f32 %v5676_v63, %v5146_v36 }
 0x41c   :  { %vm11108_vm2 = vcmp.lt.f32.partialorder %v4476_v30, 0.0004427343  ;;  %v4184_v34 = vmul.f32 0.6931472, %v7376_v6  ;;  %v4472_v1 = vmul.f32 0.6931472, %v7378_v59  ;;  %v4475_v56 = vmul.f32 %v10980_v49, %v4474_v31 }
 0x41d   :  { %v11105_v55 = vmul.f32 %v14537_v46, %v14536_v15  ;;  %v11113_v13 = vpop.eup %7379  ;;  %v14112_v35 = vunpack.c.h.bf16 %v10923_v3  ;;  %v1788_v46 = vsel %vm1528_vm0, %v1390_v62, %v1660_v48  ;;  %v5151_v15 = vld [vmem:[#allocation2 + $0xb0] sm:$0xff]  ;;  %v14540_v45 = vmax.f32 %v10701_v10, 0.0  ;;  %6171 = vst.msk [vmem:[#allocation2 + $0x88] sm:$0xff] %vm42_vm15, %v6042_v17  ;;  %v5686_v10 = vpop.permute.xlu1 %5685 }
 0x41e   :  { %v7382_v40 = vpop.eup %7381  ;;  %v4521_v14 = vand.u32 2147483647, %v10999_v61  ;;  %v4500_v60 = vmul.f32 -0.5, %v11021_v53  ;;  %v4187_v6 = vmul.f32 %v10970_v9, %v4186_v51  ;;  %v4520_v49 = vmul.f32 %v10999_v61, %v4519_v39 }
 0x41f   :  { %v11119_v30 = vadd.f32 %v4496_v32, %v14540_v45  ;;  %v11125_v36 = vpop.eup %7383  ;;  %v3745_v31 = vmul.f32 1.442695, %v3541_v58  ;;  %v3379_v62 = vand.u32 2147483647, %v11105_v55  ;;  %vm11129_vm3 = vcmp.lt.f32.partialorder %v4188_v16, 0.0004427343 }
 0x420   :  { %v4191_v45 = vadd.f32 1.0, %v11113_v13  ;;  %v4190_v32 = vsel %vm11129_vm3, %v4187_v6, %v4184_v34  ;;  %v1920_v9 = vmul.f32 %v8083_v20, %v1788_v46  ;;  %v6047_v51 = vadd.f32 %v5686_v10, %v5151_v15  ;;  %v5149_v16 = vld [vmem:[#allocation2 + $0xa0] sm:$0xff] }
 0x421   :  { %14541 = vst [vmem:[#allocation50_spill] sm:$0xff] %v11119_v30  ;;  %v4478_v59 = vsel %vm11108_vm2, %v4475_v56, %v4472_v1  ;;  %v4503_v61 = vand.u32 2147483647, %v11021_v53  ;;  %v11143_v58 = vmul.f32 %v9759_v21, %v14112_v35  ;;  %v3246_v39 = vmax.f32 %v10761_v33, 0.0  ;;  %v5682_v6 = vpop.permute.xlu1 %5681  ;;  %v5156_v30 = vld [vmem:[#allocation2 + $0xd8] sm:$0xff] }
 0x422   :  { %v4517_v63 = vmul.f32 0.6931472, %v7382_v40  ;;  %v4501_v17 = vadd.f32 1.0, %v4500_v60  ;;  %v4527_v34 = vmul.f32 -0.5, %v11057_v57  ;;  %v4506_v46 = vadd.f32 1.0, %v11125_v36  ;;  %6176 = vst.msk [vmem:[#allocation2 + $0xb0] sm:$0xff] %vm42_vm15, %v6047_v51 }
 0x423   :  { %v7386_v25 = vpop.eup %7385  ;;  %7391 = vpow2.f32 %v3745_v31  ;;  %v14114_v1 = vunpack.c.h.bf16 %v10903_v27  ;;  %v14544_v56 = vunpack.c.h.bf16 %v10529_v47  ;;  %v5038_v21 = vadd.f32 %v4190_v32, %v3246_v39 }
 0x424   :  { %7393 = vlog2.f32 %v4191_v45  ;;  %v3507_v33 = vsub.f32 0.0, %v3379_v62  ;;  %v2297_v40 = vsel %vm1924_vm4, %v1920_v9, 0.0  ;;  %v6045_v60 = vadd.f32 %v5682_v6, %v5149_v16  ;;  %v5152_v45 = vld [vmem:[#allocation2 + $0xb8] sm:$0xff] }
 0x425   :  { %v5294_v15 = vand.u32 2147483647, %v14544_v56  ;;  %v14545_v48 = vmax.f32 %v10773_v50, 0.0  ;;  %vm11157_vm5 = vcmp.lt.f32.partialorder %v4521_v14, 0.0004427343  ;;  %v3284_v31 = vmax.f32 %v10885_v43, 0.0  ;;  %2873 = vrot.lane.b32.xlu1 %v10332_v29, %s7789_s10  ;;  %v5688_v16 = vpop.permute.xlu1 %5687 }
 0x426   :  { %v3376_v47 = vand.u32 2147483647, %v11143_v58  ;;  %v4523_v62 = vsel %vm11157_vm5, %v4520_v49, %v4517_v63  ;;  %v4499_v32 = vmul.f32 0.6931472, %v7386_v25  ;;  %vm11167_vm6 = vcmp.lt.f32.partialorder %v4503_v61, 0.0004427343 }
 0x427   :  { %v11155_v10 = vadd.f32 %v4478_v59, %v14545_v48  ;;  %7395 = vlog2.f32 %v4506_v46  ;;  %6174 = vst.msk [vmem:[#allocation2 + $0xa0] sm:$0xff] %vm42_vm15, %v6045_v60  ;;  %v7388_v14 = vpop.eup %7387  ;;  %v4530_v9 = vand.u32 2147483647, %v11057_v57  ;;  %v14551_v59 = vld [vmem:[#allocation51_spill] sm:$0xff]  ;;  %v11181_v29 = vld [vmem:[%s14074_s0 + $0xa0] sm:$0xff]   ;;  %v5422_v61 = vmul.f32 %v5294_v15, %v5038_v21  ;;  %2298 = vadd.xlane.f32.xlu0 %v2297_v40 }
 0x428   :  { %v11176_v39 = vmul.f32 %v14551_v59, %v14114_v1  ;;  %v14113_v49 = vunpack.c.l.bf16 %v11181_v29  ;;  %v11184_v63 = vpop.eup %7389  ;;  %v4502_v46 = vmul.f32 %v11021_v53, %v4501_v17  ;;  %v4528_v25 = vadd.f32 1.0, %v4527_v34  ;;  %v5150_v21 = vld [vmem:[#allocation2 + $0xa8] sm:$0xff] }
 0x429   :  { %14546 = vst [vmem:[#allocation74_spill] sm:$0xff] %v11155_v10  ;;  %v3677_v56 = vmul.f32 1.442695, %v3507_v33  ;;  %v6048_v6 = vadd.f32 %v5688_v16, %v5152_v45  ;;  %v14553_v60 = vmax.f32 %v10810_v44, 0.0  ;;  %v14555_v51 = vunpack.c.h.bf16 %v10801_v23  ;;  %5715 = vrot.lane.b32.xlu1 %v5422_v61, %s7789_s10  ;;  %v14561_v45 = vld [vmem:[#allocation76_spill] sm:$0xff]  ;;  %v11271_v43 = vld [vmem:[%s14074_s0 + $0xc8] sm:$0xff]  }
 0x42a   :  { %14552 = vst [vmem:[#allocation51_spill] sm:$0xff] %v11176_v39  ;;  %v3504_v15 = vsub.f32 0.0, %v3376_v47  ;;  %v4505_v53 = vsel %vm11167_vm6, %v4502_v46, %v4499_v32  ;;  %v4526_v17 = vmul.f32 0.6931472, %v7388_v14  ;;  %v4509_v34 = vmul.f32 -0.5, %v11125_v36  ;;  %v5684_v32 = vpop.permute.xlu1 %5683 }
 0x42b   :  { %v11189_v48 = vadd.f32 %v4523_v62, %v14553_v60  ;;  %v11193_v59 = vand.u32 2147483647, %v14555_v51  ;;  %v14557_v44 = vunpack.c.l.bf16 %v10903_v27  ;;  %6177 = vst.msk [vmem:[#allocation2 + $0xb8] sm:$0xff] %vm42_vm15, %v6048_v6  ;;  %vm11205_vm7 = vcmp.lt.f32.partialorder %v4530_v9, 0.0004427343 }
 0x42c   :  { %v4551_v40 = vadd.f32 1.0, %v11184_v63  ;;  %v3416_v47 = vand.u32 2147483647, %v11176_v39  ;;  %v11214_v62 = vmul.f32 %v14561_v45, %v14113_v49  ;;  %v4529_v50 = vmul.f32 %v11057_v57, %v4528_v25 }
 0x42d   :  { %14554 = vst [vmem:[#allocation85_spill] sm:$0xff] %v11189_v48  ;;  %14556 = vst [vmem:[#allocation86_spill] sm:$0xff] %v11193_v59  ;;  %v11202_v33 = vand.u32 2147483647, %v14557_v44  ;;  %v14562_v14 = vunpack.c.l.bf16 %v10923_v3  ;;  %7397 = vpow2.f32 %v3677_v56  ;;  %v6046_v9 = vadd.f32 %v5684_v32, %v5150_v21  ;;  %v5155_v44 = vld [vmem:[#allocation2 + $0xd0] sm:$0xff] }
 0x42e   :  { %v14563_v16 = vmax.f32 %v10849_v28, 0.0  ;;  %v4512_v6 = vand.u32 2147483647, %v11125_v36  ;;  %v3671_v51 = vmul.f32 1.442695, %v3504_v15  ;;  %v4532_v45 = vsel %vm11205_vm7, %v4529_v50, %v4526_v17  ;;  %v11239_v15 = vld [vmem:[%s14074_s0 + $0xb8] sm:$0xff]   ;;  %v11242_v17 = vpop.xlane.xlu0 %2283 }
 0x42f   :  { %14558 = vst [vmem:[#allocation87_spill] sm:$0xff] %v11202_v33  ;;  %v11219_v61 = vand.u32 2147483647, %v14562_v14  ;;  %v4510_v57 = vadd.f32 1.0, %v4509_v34  ;;  %v4194_v25 = vmul.f32 -0.5, %v11113_v13  ;;  %v14565_v14 = vunpack.c.l.bf16 %v11036_v54  ;;  %6175 = vst.msk [vmem:[#allocation2 + $0xa8] sm:$0xff] %vm42_vm15, %v6046_v9  ;;  %v5694_v34 = vpop.permute.xlu1 %5693 }
 0x430   :  { %v11223_v46 = vadd.f32 %v4505_v53, %v14563_v16  ;;  %7399 = vlog2.f32 %v4551_v40  ;;  %v3544_v28 = vsub.f32 0.0, %v3416_v47  ;;  %v3377_v21 = vand.u32 2147483647, %v11214_v62  ;;  %14567 = vst [vmem:[#allocation89_spill] sm:$0xff] %v11242_v17  ;;  %v11244_v23 = vpop.eup %7391  ;;  %v11251_v40 = vld [vmem:[%s14074_s0 + $0xb0] sm:$0xff]   ;;  %v14573_v17 = vld [vmem:[#allocation78_spill] sm:$0xff] }
 0x431   :  { %v11232_v56 = vand.u32 2147483647, %v14565_v14  ;;  %v14115_v53 = vunpack.c.l.bf16 %v11239_v15  ;;  %v3247_v32 = vmax.f32 %v10941_v5, 0.0  ;;  %v14116_v47 = vunpack.c.l.bf16 %v11251_v40  ;;  %v7394_v16 = vpop.eup %7393 }
 0x432   :  { %14564 = vst [vmem:[#allocation76_spill] sm:$0xff] %v11223_v46  ;;  %v6051_v9 = vadd.f32 %v5694_v34, %v5155_v44  ;;  %v11256_v14 = vadd.f32 %v4532_v45, %v3284_v31  ;;  %vm11258_vm8 = vcmp.lt.f32.partialorder %v4512_v6, 0.0004427343  ;;  %v4554_v5 = vmul.f32 -0.5, %v11184_v63  ;;  %v5153_v6 = vld [vmem:[#allocation2 + $0xc0] sm:$0xff] }
 0x433   :  { %14566 = vst [vmem:[#allocation88_spill] sm:$0xff] %v11232_v56  ;;  %7401 = vpow2.f32 %v3671_v51  ;;  %v4511_v50 = vmul.f32 %v11125_v36, %v4510_v57  ;;  %v4195_v35 = vadd.f32 1.0, %v4194_v25  ;;  %v14571_v49 = vunpack.c.l.bf16 %v11082_v52  ;;  %v14572_v57 = vld [vmem:[#allocation77_spill] sm:$0xff] }
 0x434   :  { %14568 = vst [vmem:[#allocation90_spill] sm:$0xff] %v11256_v14  ;;  %6180 = vst.msk [vmem:[#allocation2 + $0xd0] sm:$0xff] %vm42_vm15, %v6051_v9  ;;  %v7396_v44 = vpop.eup %7395  ;;  %v4197_v51 = vand.u32 2147483647, %v11113_v13  ;;  %v3751_v45 = vmul.f32 1.442695, %v3544_v28  ;;  %v11285_v31 = vmul.f32 %v14573_v17, %v14116_v47  ;;  %v11300_v17 = vpop.permute.xlu0 %2865  ;;  %v14575_v28 = vunpack.c.l.bf16 %v11271_v43 }
 0x435   :  { %v11266_v1 = vand.u32 2147483647, %v14571_v49  ;;  %v3505_v36 = vsub.f32 0.0, %v3377_v21  ;;  %v11279_v49 = vmul.f32 %v14572_v57, %v14115_v53  ;;  %v4193_v25 = vmul.f32 0.6931472, %v7394_v16  ;;  %v11290_v9 = vld [vmem:[%s14074_s0 + $0xc0] sm:$0xff]   ;;  %v5690_v21 = vpop.permute.xlu1 %5689  ;;  %v11309_v57 = vpop.f32.mrf.mxu1 }
 0x436   :  { %v4533_v34 = vadd.f32 1.0, %v11244_v23  ;;  %v4555_v33 = vadd.f32 1.0, %v4554_v5  ;;  %v11297_v16 = vld [vmem:[%s14074_s0 + $0xd0] sm:$0xff]   ;;  %14574 = vst [vmem:[#allocation77_spill] sm:$0xff] %v11300_v17  ;;  %v6049_v47 = vadd.f32 %v5690_v21, %v5153_v6  ;;  %v4508_v56 = vmul.f32 0.6931472, %v7396_v44 }
 0x437   :  { %v4557_v14 = vand.u32 2147483647, %v11184_v63  ;;  %v4196_v48 = vmul.f32 %v11113_v13, %v4195_v35  ;;  %v14576_v5 = vld [vmem:[#allocation79_spill] sm:$0xff]  ;;  %vm11311_vm9 = vcmp.lt.f32.partialorder %v4197_v51, 0.0004427343  ;;  %7403 = vpow2.f32 %v3751_v45 }
 0x438   :  { %v11307_v59 = vmul.f32 %v14576_v5, %v14575_v28  ;;  %v3673_v53 = vmul.f32 1.442695, %v3505_v36  ;;  %v3383_v6 = vand.u32 2147483647, %v11279_v49  ;;  %6178 = vst.msk [vmem:[#allocation2 + $0xc0] sm:$0xff] %vm42_vm15, %v6049_v47  ;;  %7405 = vlog2.f32 %v4533_v34  ;;  %v14580_v28 = vld [vmem:[#allocation55_spill] sm:$0xff] }
 0x439   :  { %v4199_v13 = vsel %vm11311_vm9, %v4196_v48, %v4193_v25  ;;  %v3381_v35 = vand.u32 2147483647, %v11285_v31  ;;  %v14579_v44 = vunpack.c.l.bf16 %v11290_v9  ;;  %v11328_v45 = vmul.f32 %v11184_v63, %v4555_v33  ;;  %v14584_v47 = vld [vmem:[#allocation66_spill] sm:$0xff] }
 0x43a   :  { %v11325_v51 = vpop.eup %7397  ;;  %v14581_v36 = vunpack.c.h.bf16 %v10903_v27  ;;  %v14583_v48 = vunpack.c.l.bf16 %v11297_v16  ;;  %v4514_v34 = vsel %vm11258_vm8, %v4511_v50, %v4508_v56  ;;  %v11346_v63 = vld [vmem:[%s14074_s0 + $0x140] sm:$0xff]   ;;  %v3387_v33 = vand.u32 2147483647, %v11307_v59  ;;  %v11354_v56 = vpop.permute.xlu0 %2867  ;;  %v14595_v27 = vld [vmem:[#allocation68_spill] sm:$0xff]  ;;  %v5162_v17 = vld [vmem:[#allocation2 + $0x108] sm:$0xff] }
 0x43b   :  { %v11323_v21 = vmul.f32 %v14580_v28, %v14579_v44  ;;  %14585 = vst [vmem:[#allocation79_spill] sm:$0xff] %v11346_v63  ;;  %v1392_v28 = vpop.f32.mrf.mxu1  ;;  %v14586_v46 = vunpack.c.l.bf16 %v11181_v29  ;;  %7407 = vpow2.f32 %v3673_v53  ;;  %v3511_v60 = vsub.f32 0.0, %v3383_v6  ;;  %14587 = vst [vmem:[#allocation55_spill] sm:$0xff] %v11354_v56  ;;  %v14593_v6 = vld [vmem:[#allocation52_spill] sm:$0xff] }
 0x43c   :  { %v11332_v5 = vand.u32 2147483647, %v14581_v36  ;;  %v11338_v25 = vmul.f32 %v14584_v47, %v14583_v48  ;;  %v5039_v36 = vadd.f32 %v4199_v13, %v3247_v32  ;;  %v4227_v47 = vadd.f32 1.0, %v11325_v51 }
 0x43d   :  { %v11352_v48 = vand.u32 2147483647, %v14586_v46  ;;  %v7400_v50 = vpop.eup %7399  ;;  %v3509_v44 = vsub.f32 0.0, %v3381_v35  ;;  %v14588_v10 = vmax.f32 %v10949_v0, 0.0  ;;  %vm11363_vm10 = vcmp.lt.f32.partialorder %v4557_v14, 0.0004427343  ;;  %2875 = vrot.lane.b32.xlu0 %v14595_v27, %s7789_s10 }
 0x43e   :  { %14582 = vst [vmem:[#allocation78_spill] sm:$0xff] %v11332_v5  ;;  %v3385_v5 = vand.u32 2147483647, %v11323_v21  ;;  %v14592_v53 = vunpack.c.h.bf16 %v11036_v54  ;;  %v3389_v35 = vand.u32 2147483647, %v11338_v25  ;;  %v1393_v42 = vadd.f32 %v1392_v28, %v14393_v8 }
 0x43f   :  { %v11361_v32 = vadd.f32 %v4514_v34, %v14588_v10  ;;  %v4536_v0 = vmul.f32 -0.5, %v11244_v23  ;;  %v4539_v10 = vand.u32 2147483647, %v11244_v23  ;;  %v14596_v14 = vunpack.c.l.bf16 %v11346_v63  ;;  %v14597_v34 = vld [vmem:[#allocation53_spill] sm:$0xff] }
 0x440   :  { %v11370_v46 = vmul.f32 %v14593_v6, %v14592_v53  ;;  %v11376_v24 = vpop.eup %7401  ;;  %v3515_v53 = vsub.f32 0.0, %v3387_v33  ;;  %v5696_v6 = vpop.permute.xlu1 %5695  ;;  %v4553_v2 = vmul.f32 0.6931472, %v7400_v50  ;;  %v3685_v39 = vmul.f32 1.442695, %v3511_v60 }
 0x441   :  { %14589 = vst [vmem:[#allocation66_spill] sm:$0xff] %v11361_v32  ;;  %v11383_v32 = vmul.f32 %v14597_v34, %v14596_v14  ;;  %v5423_v28 = vmul.f32 %v11219_v61, %v5039_v36  ;;  %v6052_v56 = vadd.f32 %v5696_v6, %v5156_v30  ;;  %7409 = vlog2.f32 %v4227_v47  ;;  %v5708_v30 = vpop.permute.xlu0 %5707 }
 0x442   :  { %14594 = vst [vmem:[#allocation52_spill] sm:$0xff] %v11370_v46  ;;  %v3681_v27 = vmul.f32 1.442695, %v3509_v44  ;;  %v3513_v19 = vsub.f32 0.0, %v3385_v5  ;;  %v14599_v38 = vunpack.c.h.bf16 %v11346_v63  ;;  %v3414_v14 = vand.u32 2147483647, %v11370_v46 }
 0x443   :  { %14598 = vst [vmem:[#allocation68_spill] sm:$0xff] %v11383_v32  ;;  %v3517_v34 = vsub.f32 0.0, %v3389_v35  ;;  %v4200_v33 = vadd.f32 1.0, %v11376_v24  ;;  %v1661_v60 = vmul.f32 %v14428_v4, %v1393_v42  ;;  %5717 = vrot.lane.b32.xlu0 %v5423_v28, %s7789_s10  ;;  %6181 = vst.msk [vmem:[#allocation2 + $0xd8] sm:$0xff] %vm42_vm15, %v6052_v56  ;;  %v3417_v61 = vand.u32 2147483647, %v11383_v32 }
 0x444   :  { %v11389_v41 = vmul.f32 %v14600_v18, %v14599_v38  ;;  %v3693_v5 = vmul.f32 1.442695, %v3515_v53  ;;  %vm1529_vm11 = vcmp.ge.f32.partialorder %v1393_v42, 0.0  ;;  %v6058_v44 = vadd.f32 %v5708_v30, %v5162_v17  ;;  %v5692_v18 = vpop.permute.xlu1 %5691  ;;  %v11402_v47 = vpop.eup %7403  ;;  %v5159_v53 = vld [vmem:[#allocation2 + $0xf0] sm:$0xff] }
 0x445   :  { %vm11397_vm12 = vcmp.lt.f32.partialorder %v4539_v10, 0.0004427343  ;;  %7411 = vpow2.f32 %v3685_v39  ;;  %v6050_v50 = vadd.f32 %v5692_v18, %v5154_v22  ;;  %v4537_v35 = vadd.f32 1.0, %v4536_v0  ;;  %v7406_v17 = vpop.eup %7405  ;;  %v5163_v63 = vld [vmem:[#allocation2 + $0x110] sm:$0xff] }
 0x446   :  { %14601 = vst [vmem:[#allocation53_spill] sm:$0xff] %v11389_v41  ;;  %7413 = vpow2.f32 %v3681_v27  ;;  %v3689_v56 = vmul.f32 1.442695, %v3513_v19  ;;  %v3418_v6 = vand.u32 2147483647, %v11389_v41  ;;  %6187 = vst.msk [vmem:[#allocation2 + $0x108] sm:$0xff] %vm42_vm15, %v6058_v44  ;;  %v1789_v30 = vsel %vm1529_vm11, %v1393_v42, %v1661_v60 }
 0x447   :  { %v3542_v28 = vsub.f32 0.0, %v3414_v14  ;;  %v3697_v10 = vmul.f32 1.442695, %v3517_v34  ;;  %7415 = vlog2.f32 %v4200_v33  ;;  %6179 = vst.msk [vmem:[#allocation2 + $0xc8] sm:$0xff] %vm42_vm15, %v6050_v50  ;;  %v4559_v22 = vsel %vm11363_vm10, %v11328_v45, %v4553_v2  ;;  %v5157_v2 = vld [vmem:[#allocation2 + $0xe0] sm:$0xff] }
 0x448   :  { %v4230_v39 = vmul.f32 -0.5, %v11325_v51  ;;  %v3545_v19 = vsub.f32 0.0, %v3417_v61  ;;  %7417 = vpow2.f32 %v3693_v5  ;;  %v5702_v0 = vpop.permute.xlu1 %5701  ;;  %v4233_v27 = vand.u32 2147483647, %v11325_v51  ;;  %v11415_v33 = vpop.eup %7407 }
 0x449   :  { %v4560_v44 = vadd.f32 1.0, %v11402_v47  ;;  %v14118_v14 = vunpack.c.h.bf16 %v11082_v52  ;;  %v6055_v34 = vadd.f32 %v5702_v0, %v5159_v53  ;;  %v4535_v18 = vmul.f32 0.6931472, %v7406_v17 }
 0x44a   :  { %7419 = vpow2.f32 %v3689_v56  ;;  %v3546_v42 = vsub.f32 0.0, %v3418_v6  ;;  %v1921_v13 = vmul.f32 %v8083_v20, %v1789_v30  ;;  %v4538_v45 = vmul.f32 %v11244_v23, %v4537_v35  ;;  %v14610_v35 = vld [vmem:[#allocation80_spill] sm:$0xff] }
 0x44b   :  { %v4563_v60 = vmul.f32 -0.5, %v11402_v47  ;;  %v3747_v61 = vmul.f32 1.442695, %v3542_v28  ;;  %7421 = vpow2.f32 %v3697_v10  ;;  %6184 = vst.msk [vmem:[#allocation2 + $0xf0] sm:$0xff] %vm42_vm15, %v6055_v34  ;;  %v14604_v5 = vmax.f32 %v11014_v12, 0.0 }
 0x44c   :  { %v4231_v53 = vadd.f32 1.0, %v4230_v39  ;;  %v14606_v17 = vunpack.c.l.bf16 %v11239_v15  ;;  %v3753_v6 = vmul.f32 1.442695, %v3545_v19  ;;  %v5698_v30 = vpop.permute.xlu1 %5697  ;;  %vm11429_vm1 = vcmp.lt.f32.partialorder %v4233_v27, 0.0004427343  ;;  %v5160_v27 = vld [vmem:[#allocation2 + $0xf8] sm:$0xff] }
 0x44d   :  { %v11423_v50 = vadd.f32 %v4559_v22, %v14604_v5  ;;  %7423 = vlog2.f32 %v4560_v44  ;;  %v11437_v12 = vmul.f32 %v14610_v35, %v14118_v14  ;;  %v6053_v28 = vadd.f32 %v5698_v30, %v5157_v2 }
 0x44e   :  { %v11427_v56 = vand.u32 2147483647, %v14606_v17  ;;  %v4541_v10 = vsel %vm11397_vm12, %v4538_v45, %v4535_v18  ;;  %v4212_v22 = vmul.f32 -0.5, %v11415_v33  ;;  %v3755_v39 = vmul.f32 1.442695, %v3546_v42  ;;  %v7410_v34 = vpop.eup %7409 }
 0x44f   :  { %14605 = vst [vmem:[#allocation56_spill] sm:$0xff] %v11423_v50  ;;  %v2300_v19 = vsel %vm1924_vm4, %v1921_v13, 0.0  ;;  %v4564_v5 = vadd.f32 1.0, %v4563_v60  ;;  %v4209_v44 = vadd.f32 1.0, %v11415_v33  ;;  %v14611_v17 = vunpack.c.h.bf16 %v11036_v54  ;;  %6182 = vst.msk [vmem:[#allocation2 + $0xe0] sm:$0xff] %vm42_vm15, %v6053_v28  ;;  %v5158_v28 = vld [vmem:[#allocation2 + $0xe8] sm:$0xff] }
 0x450   :  { %14607 = vst [vmem:[#allocation91_spill] sm:$0xff] %v11427_v56  ;;  %7425 = vpow2.f32 %v3747_v61  ;;  %2301 = vadd.xlane.f32.xlu1 %v2300_v19  ;;  %v11450_v38 = vmul.f32 %v11325_v51, %v4231_v53  ;;  %v4566_v18 = vand.u32 2147483647, %v11402_v47  ;;  %v5704_v13 = vpop.permute.xlu1 %5703  ;;  %v14613_v2 = vmax.f32 %v11062_v37, 0.0 }
 0x451   :  { %v11446_v23 = vand.u32 2147483647, %v14611_v17  ;;  %7427 = vpow2.f32 %v3753_v6  ;;  %v4203_v54 = vmul.f32 -0.5, %v11376_v24  ;;  %v3380_v60 = vand.u32 2147483647, %v11437_v12 }
 0x452   :  { %v11456_v45 = vadd.f32 %v4541_v10, %v14613_v2  ;;  %v6056_v61 = vadd.f32 %v5704_v13, %v5160_v27  ;;  %v11460_v30 = vpop.eup %7411  ;;  %v4229_v35 = vmul.f32 0.6931472, %v7410_v34  ;;  %v4213_v51 = vadd.f32 1.0, %v4212_v22 }
 0x453   :  { %14612 = vst [vmem:[#allocation80_spill] sm:$0xff] %v11446_v23  ;;  %7429 = vpow2.f32 %v3755_v39  ;;  %v1398_v53 = vadd.f32 %v11029_v7, %v14393_v8  ;;  %v11464_v6 = vpop.eup %7413  ;;  %v11467_v37 = vmul.f32 %v11402_v47, %v4564_v5  ;;  %v14616_v10 = vunpack.c.l.bf16 %v11251_v40  ;;  %v5161_v7 = vld [vmem:[#allocation2 + $0x100] sm:$0xff] }
 0x454   :  { %14614 = vst [vmem:[#allocation92_spill] sm:$0xff] %v11456_v45  ;;  %7431 = vlog2.f32 %v4209_v44  ;;  %6185 = vst.msk [vmem:[#allocation2 + $0xf8] sm:$0xff] %vm42_vm15, %v6056_v61  ;;  %v7416_v22 = vpop.eup %7415  ;;  %v4215_v39 = vand.u32 2147483647, %v11415_v33  ;;  %v5700_v47 = vpop.permute.xlu1 %5699  ;;  %v4263_v44 = vadd.f32 1.0, %v11460_v30  ;;  %v4204_v13 = vadd.f32 1.0, %v4203_v54 }
 0x455   :  { %14615 = vst [vmem:[#allocation93_spill] sm:$0xff] %v11467_v37  ;;  %v11471_v19 = vand.u32 2147483647, %v14616_v10  ;;  %v11479_v5 = vpop.eup %7417  ;;  %v3508_v2 = vsub.f32 0.0, %v3380_v60  ;;  %v6054_v10 = vadd.f32 %v5700_v47, %v5158_v28  ;;  %v4235_v61 = vsel %vm11429_vm1, %v11450_v38, %v4229_v35  ;;  %v14619_v60 = vld [vmem:[#allocation61_spill] sm:$0xff] }
 0x456   :  { %v11486_v42 = vmul.f32 %v11415_v33, %v4213_v51  ;;  %v4206_v14 = vand.u32 2147483647, %v11376_v24  ;;  %v1662_v34 = vmul.f32 %v14428_v4, %v1398_v53  ;;  %v4245_v17 = vadd.f32 1.0, %v11464_v6 }
 0x457   :  { %14617 = vst [vmem:[#allocation94_spill] sm:$0xff] %v11471_v19  ;;  %v11490_v36 = vpop.eup %7419  ;;  %v4202_v27 = vmul.f32 0.6931472, %v7416_v22  ;;  %v14618_v54 = vunpack.c.h.bf16 %v11251_v40  ;;  %vm1530_vm13 = vcmp.ge.f32.partialorder %v1398_v53, 0.0  ;;  %6183 = vst.msk [vmem:[#allocation2 + $0xe8] sm:$0xff] %vm42_vm15, %v6054_v10  ;;  %v14620_v0 = vmov 0 }
 0x458   :  { %v11499_v33 = vpop.eup %7421  ;;  %vm11501_vm14 = vcmp.lt.f32.partialorder %v4566_v18, 0.0004427343  ;;  %v4266_v38 = vmul.f32 -0.5, %v11460_v30  ;;  %v14623_v35 = vunpack.c.l.bf16 %v11271_v43  ;;  %v4299_v22 = vadd.f32 1.0, %v11479_v5  ;;  %v5706_v10 = vpop.permute.xlu1 %5705  ;;  %v14652_v19 = vld [vmem:[#allocation82_spill] sm:$0xff] }
 0x459   :  { %v11496_v28 = vmul.f32 %v14619_v60, %v14618_v54  ;;  %v14621_v0 = vsel %vm11501_vm14, 4294967295, %v14620_v0  ;;  %v14625_v47 = vunpack.c.h.bf16 %v11181_v29  ;;  %v14626_v54 = vld [vmem:[#allocation71_spill] sm:$0xff]  ;;  %7433 = vlog2.f32 %v4263_v44 }
 0x45a   :  { %14622 = vst [vmem:[#allocation61_spill] sm:$0xff] %v14621_v0  ;;  %v11508_v51 = vand.u32 2147483647, %v14623_v35  ;;  %v4205_v18 = vmul.f32 %v11376_v24, %v4204_v13  ;;  %v3679_v23 = vmul.f32 1.442695, %v3508_v2  ;;  %v6057_v50 = vadd.f32 %v5706_v10, %v5161_v7  ;;  %v7424_v45 = vpop.eup %7423 }
 0x45b   :  { %v11514_v60 = vmul.f32 %v14626_v54, %v14625_v47  ;;  %v4281_v32 = vadd.f32 1.0, %v11490_v36  ;;  %vm11518_vm0 = vcmp.lt.f32.partialorder %v4206_v14, 0.0004427343  ;;  %v14123_v35 = vunpack.c.h.bf16 %v11239_v15 }
 0x45c   :  { %14624 = vst [vmem:[#allocation95_spill] sm:$0xff] %v11508_v51  ;;  %v1790_v51 = vsel %vm1530_vm13, %v1398_v53, %v1662_v34  ;;  %7435 = vlog2.f32 %v4245_v17  ;;  %v4317_v47 = vadd.f32 1.0, %v11499_v33  ;;  %v4208_v24 = vsel %vm11518_vm0, %v4205_v18, %v4202_v27  ;;  %6186 = vst.msk [vmem:[#allocation2 + $0x100] sm:$0xff] %vm42_vm15, %v6057_v50  ;;  %v5710_v34 = vpop.permute.xlu1 %5709 }
 0x45d   :  { %v3382_v7 = vand.u32 2147483647, %v11496_v28  ;;  %v11529_v44 = vpop.eup %7425  ;;  %v14630_v14 = vmax.f32 %v11105_v55, 0.0  ;;  %7437 = vlog2.f32 %v4299_v22  ;;  %v3248_v2 = vmax.f32 %v11143_v58, 0.0  ;;  %v14635_v22 = vld [vmem:[#allocation69_spill] sm:$0xff] }
 0x45e   :  { %14629 = vst [vmem:[#allocation71_spill] sm:$0xff] %v11529_v44  ;;  %v3378_v53 = vand.u32 2147483647, %v11514_v60  ;;  %v11537_v17 = vpop.eup %7427  ;;  %v11539_v46 = vmul.f32 0.6931472, %v7424_v45  ;;  %7439 = vpow2.f32 %v3679_v23  ;;  %v6059_v27 = vadd.f32 %v5710_v34, %v5163_v63 }
 0x45f   :  { %v11533_v13 = vadd.f32 %v4235_v61, %v14630_v14  ;;  %v1922_v50 = vmul.f32 %v8083_v20, %v1790_v51  ;;  %vm11542_vm2 = vcmp.lt.f32.partialorder %v4215_v39, 0.0004427343  ;;  %7441 = vlog2.f32 %v4281_v32  ;;  %v14637_v14 = vld [vmem:[#allocation65_spill] sm:$0xff] }
 0x460   :  { %14631 = vst [vmem:[#allocation96_spill] sm:$0xff] %v11539_v46  ;;  %v14634_v55 = vunpack.c.h.bf16 %v10923_v3  ;;  %v5040_v58 = vadd.f32 %v4208_v24, %v3248_v2  ;;  %v11551_v10 = vmul.f32 %v14635_v22, %v14123_v35  ;;  %v11553_v45 = vpop.eup %7429  ;;  %v4267_v23 = vadd.f32 1.0, %v4266_v38  ;;  %6188 = vst.msk [vmem:[#allocation2 + $0x110] sm:$0xff] %vm42_vm15, %v6059_v27  ;;  %v11562_v2 = vpop.permute.xlu1 %2869  ;;  %v5164_v35 = vld [vmem:[#allocation2 + $0x118] sm:$0xff] }
 0x461   :  { %14636 = vst [vmem:[#allocation69_spill] sm:$0xff] %v11553_v45  ;;  %v4542_v63 = vadd.f32 1.0, %v11529_v44  ;;  %7443 = vlog2.f32 %v4317_v47  ;;  %v3510_v39 = vsub.f32 0.0, %v3382_v7  ;;  %v7432_v51 = vpop.eup %7431  ;;  %v4269_v32 = vand.u32 2147483647, %v11460_v30  ;;  %2877 = vrot.lane.b32.xlu1 %v14637_v14, %s7789_s10  ;;  %14638 = vst [vmem:[#allocation65_spill] sm:$0xff] %v11562_v2 }
 0x462   :  { %v5296_v61 = vand.u32 2147483647, %v14634_v55  ;;  %v4569_v3 = vadd.f32 1.0, %v11537_v17  ;;  %v3506_v24 = vsub.f32 0.0, %v3378_v53  ;;  %v4545_v47 = vmul.f32 -0.5, %v11529_v44 }
 0x463   :  { %v14639_v7 = vunpack.c.l.bf16 %v11290_v9  ;;  %v2303_v27 = vsel %vm1924_vm4, %v1922_v50, 0.0  ;;  %v4578_v53 = vadd.f32 1.0, %v11553_v45  ;;  %v3384_v55 = vand.u32 2147483647, %v11551_v10 }
 0x464   :  { %v5424_v14 = vmul.f32 %v5296_v61, %v5040_v58  ;;  %2304 = vadd.xlane.f32.xlu0 %v2303_v27  ;;  %v4211_v18 = vmul.f32 0.6931472, %v7432_v51  ;;  %v11578_v38 = vmul.f32 %v11460_v30, %v4267_v23  ;;  %7445 = vlog2.f32 %v4542_v63  ;;  %v5712_v0 = vpop.permute.xlu1 %5711 }
 0x465   :  { %v11571_v34 = vand.u32 2147483647, %v14639_v7  ;;  %v3683_v46 = vmul.f32 1.442695, %v3510_v39  ;;  %v4248_v7 = vmul.f32 -0.5, %v11464_v6  ;;  %7447 = vlog2.f32 %v4569_v3 }
 0x466   :  { %v4251_v37 = vand.u32 2147483647, %v11464_v6  ;;  %v3675_v50 = vmul.f32 1.442695, %v3506_v24  ;;  %5719 = vrot.lane.b32.xlu1 %v5424_v14, %s7789_s10  ;;  %v4302_v61 = vmul.f32 -0.5, %v11479_v5  ;;  %v6060_v51 = vadd.f32 %v5712_v0, %v5164_v35  ;;  %v7434_v30 = vpop.eup %7433  ;;  %v14644_v24 = vld [vmem:[#allocation75_spill] sm:$0xff] }
 0x467   :  { %14640 = vst [vmem:[#allocation97_spill] sm:$0xff] %v11571_v34  ;;  %vm11586_vm3 = vcmp.lt.f32.partialorder %v4269_v32, 0.0004427343  ;;  %v4546_v63 = vadd.f32 1.0, %v4545_v47  ;;  %7449 = vlog2.f32 %v4578_v53  ;;  %v3512_v39 = vsub.f32 0.0, %v3384_v55 }
 0x468   :  { %v14643_v3 = vunpack.c.h.bf16 %v11290_v9  ;;  %v4217_v14 = vsel %vm11542_vm2, %v11486_v42, %v4211_v18  ;;  %v14645_v22 = vunpack.c.l.bf16 %v11297_v16  ;;  %7451 = vpow2.f32 %v3683_v46  ;;  %6189 = vst.msk [vmem:[#allocation2 + $0x118] sm:$0xff] %vm42_vm15, %v6060_v51 }
 0x469   :  { %v7436_v32 = vpop.eup %7435  ;;  %v4249_v47 = vadd.f32 1.0, %v4248_v7  ;;  %vm11604_vm5 = vcmp.lt.f32.partialorder %v4251_v37, 0.0004427343  ;;  %v4284_v55 = vmul.f32 -0.5, %v11490_v36  ;;  %7453 = vpow2.f32 %v3675_v50 }
 0x46a   :  { %v11593_v27 = vmul.f32 %v14644_v24, %v14643_v3  ;;  %v11600_v0 = vand.u32 2147483647, %v14645_v22  ;;  %v7438_v54 = vpop.eup %7437  ;;  %v4572_v42 = vmul.f32 -0.5, %v11537_v17  ;;  %v4303_v18 = vadd.f32 1.0, %v4302_v61 }
 0x46b   :  { %v4320_v22 = vmul.f32 -0.5, %v11499_v33  ;;  %v11612_v46 = vpop.eup %7439  ;;  %v14649_v51 = vmax.f32 %v11214_v62, 0.0  ;;  %v3687_v24 = vmul.f32 1.442695, %v3512_v39  ;;  %v4265_v58 = vmul.f32 0.6931472, %v7434_v30 }
 0x46c   :  { %14646 = vst [vmem:[#allocation75_spill] sm:$0xff] %v11600_v0  ;;  %v3386_v35 = vand.u32 2147483647, %v11593_v27  ;;  %v7442_v50 = vpop.eup %7441  ;;  %v11621_v2 = vmul.f32 %v11529_v44, %v4546_v63  ;;  %v4247_v61 = vmul.f32 0.6931472, %v7436_v32  ;;  %v4250_v34 = vmul.f32 %v11464_v6, %v4249_v47 }
 0x46d   :  { %v11616_v7 = vadd.f32 %v4217_v14, %v14649_v51  ;;  %v4305_v0 = vand.u32 2147483647, %v11479_v5  ;;  %v4301_v56 = vmul.f32 0.6931472, %v7438_v54  ;;  %v4285_v62 = vadd.f32 1.0, %v4284_v55 }
 0x46e   :  { %14650 = vst [vmem:[#allocation98_spill] sm:$0xff] %v11621_v2  ;;  %v7444_v3 = vpop.eup %7443  ;;  %v4287_v14 = vand.u32 2147483647, %v11490_v36  ;;  %v4304_v51 = vmul.f32 %v11479_v5, %v4303_v18  ;;  %v4321_v39 = vadd.f32 1.0, %v4320_v22  ;;  %v4236_v37 = vadd.f32 1.0, %v11612_v46 }
 0x46f   :  { %v14651_v30 = vunpack.c.h.bf16 %v11271_v43  ;;  %v4283_v32 = vmul.f32 0.6931472, %v7442_v50  ;;  %v4323_v2 = vand.u32 2147483647, %v11499_v33  ;;  %7455 = vpow2.f32 %v3687_v24 }
 0x470   :  { %v3514_v44 = vsub.f32 0.0, %v3386_v35  ;;  %v4271_v6 = vsel %vm11586_vm3, %v11578_v38, %v4265_v58  ;;  %v4573_v47 = vadd.f32 1.0, %v4572_v42  ;;  %vm11637_vm6 = vcmp.lt.f32.partialorder %v4305_v0, 0.0004427343  ;;  %v14668_v35 = vld [vmem:[#allocation84_spill] sm:$0xff] }
 0x471   :  { %v11631_v63 = vmul.f32 %v14652_v19, %v14651_v30  ;;  %v4319_v55 = vmul.f32 0.6931472, %v7444_v3  ;;  %v7446_v54 = vpop.eup %7445  ;;  %v4253_v19 = vsel %vm11604_vm5, %v4250_v34, %v4247_v61  ;;  %v4307_v18 = vsel %vm11637_vm6, %v4304_v51, %v4301_v56 }
 0x472   :  { %v4286_v22 = vmul.f32 %v11490_v36, %v4285_v62  ;;  %vm11646_vm7 = vcmp.lt.f32.partialorder %v4287_v14, 0.0004427343  ;;  %v7448_v38 = vpop.eup %7447  ;;  %v4322_v58 = vmul.f32 %v11499_v33, %v4321_v39  ;;  %v4581_v23 = vmul.f32 -0.5, %v11553_v45  ;;  %v14684_v45 = vld [vmem:[#allocation6_spill] sm:$0xff] }
 0x473   :  { %7457 = vlog2.f32 %v4236_v37  ;;  %v3388_v0 = vand.u32 2147483647, %v11631_v63  ;;  %v14657_v53 = vmax.f32 %v11279_v49, 0.0  ;;  %vm11659_vm8 = vcmp.lt.f32.partialorder %v4323_v2, 0.0004427343 }
 0x474   :  { %v4289_v56 = vsel %vm11646_vm7, %v4286_v22, %v4283_v32  ;;  %v3691_v42 = vmul.f32 1.442695, %v3514_v44  ;;  %v7450_v3 = vpop.eup %7449  ;;  %v11663_v24 = vmul.f32 0.6931472, %v7446_v54  ;;  %v11666_v33 = vmul.f32 %v11537_v17, %v4573_v47  ;;  %v11702_v54 = vld [vmem:[%s14074_s0 + $0xd8] sm:$0xff]  }
 0x475   :  { %v11655_v34 = vadd.f32 %v4271_v6, %v14657_v53  ;;  %v4325_v37 = vsel %vm11659_vm8, %v4322_v58, %v4319_v55  ;;  %v14129_v49 = vunpack.c.h.bf16 %v11297_v16  ;;  %v11671_v50 = vpop.eup %7451  ;;  %v14661_v61 = vmax.f32 %v11285_v31, 0.0 }
 0x476   :  { %14660 = vst [vmem:[#allocation82_spill] sm:$0xff] %v11666_v33  ;;  %v11677_v62 = vmul.f32 0.6931472, %v7448_v38  ;;  %v14663_v44 = vmax.f32 %v11307_v59, 0.0  ;;  %v11684_v39 = vpop.eup %7453  ;;  %v14664_v30 = vmax.f32 %v11323_v21, 0.0  ;;  %v11690_v6 = vadd.f32 1.0, %v4581_v23 }
 0x477   :  { %v11675_v2 = vadd.f32 %v4253_v19, %v14661_v61  ;;  %v3516_v47 = vsub.f32 0.0, %v3388_v0  ;;  %v14665_v5 = vmax.f32 %v11338_v25, 0.0  ;;  %v11697_v59 = vmul.f32 0.6931472, %v7450_v3  ;;  %v11732_v61 = vpop.xlane.xlu0 %2292 }
 0x478   :  { %14662 = vst [vmem:[#allocation99_spill] sm:$0xff] %v11677_v62  ;;  %v11681_v14 = vadd.f32 %v4307_v18, %v14663_v44  ;;  %v11688_v32 = vadd.f32 %v4289_v56, %v14664_v30  ;;  %7459 = vpow2.f32 %v3691_v42  ;;  %v14130_v21 = vunpack.c.l.bf16 %v11702_v54  ;;  %v14670_v56 = vld [vmem:[#allocation64_spill] sm:$0xff]  ;;  %14672 = vst [vmem:[#allocation84_spill] sm:$0xff] %v11732_v61 }
 0x479   :  { %v11695_v55 = vadd.f32 %v4325_v37, %v14665_v5  ;;  %14666 = vst [vmem:[#allocation100_spill] sm:$0xff] %v11697_v59  ;;  %v14667_v19 = vunpack.c.h.bf16 %v11082_v52  ;;  %v4254_v25 = vadd.f32 1.0, %v11671_v50  ;;  %v11714_v38 = vmul.f32 %v14668_v35, %v14129_v49  ;;  %v14676_v49 = vld [vmem:[#allocation12_spill] sm:$0xff] }
 0x47a   :  { %v14669_v58 = vunpack.c.h.bf16 %v11181_v29  ;;  %v4218_v53 = vadd.f32 1.0, %v11684_v39  ;;  %v1401_v52 = vadd.f32 %v11309_v57, %v14393_v8  ;;  %2879 = vrot.lane.b32.xlu0 %v14670_v56, %s7789_s10  ;;  %v4239_v36 = vmul.f32 -0.5, %v11612_v46  ;;  %v14674_v8 = vld [vmem:[#allocation70_spill] sm:$0xff]  ;;  %v6287_v61 = vld [vmem:[#allocation2 + $0x10] sm:$0xff] }
 0x47b   :  { %v11707_v18 = vand.u32 2147483647, %v14667_v19  ;;  %v14671_v42 = vunpack.c.h.bf16 %v11239_v15  ;;  %v3695_v37 = vmul.f32 1.442695, %v3516_v47  ;;  %v14673_v44 = vunpack.c.h.bf16 %v11251_v40 }
 0x47c   :  { %v11718_v23 = vand.u32 2147483647, %v14669_v58  ;;  %v11741_v57 = vmul.f32 %v14674_v8, %v14130_v21  ;;  %v14131_v5 = vunpack.c.h.bf16 %v11702_v54  ;;  %v5425_v15 = vmul.f32 %v11352_v48, %v11616_v7  ;;  %v11746_v19 = vpop.eup %7455  ;;  %v6285_v58 = vld [vmem:[#allocation2] sm:$0xff] }
 0x47d   :  { %v11729_v3 = vand.u32 2147483647, %v14671_v42  ;;  %v11736_v30 = vand.u32 2147483647, %v14673_v44  ;;  %v4242_v47 = vand.u32 2147483647, %v11612_v46  ;;  %7461 = vlog2.f32 %v4254_v25 }
 0x47e   :  { %v3390_v40 = vand.u32 2147483647, %v11714_v38  ;;  %7463 = vlog2.f32 %v4218_v53  ;;  %v14675_v56 = vunpack.c.h.bf16 %v11271_v43  ;;  %v11758_v44 = vld [vmem:[%s14074_s0 + $0x148] sm:$0xff]   ;;  %v1663_v7 = vmul.f32 %v14428_v4, %v1401_v52  ;;  %5721 = vrot.lane.b32.xlu0 %v5425_v15, %s7789_s10  ;;  %v11764_v43 = vpop.permute.xlu0 %2871  ;;  %v11785_v21 = vld [vmem:[%s14074_s0 + $0xe0] sm:$0xff]  }
 0x47f   :  { %v14133_v48 = vunpack.c.h.bf16 %v11758_v44  ;;  %v4240_v25 = vadd.f32 1.0, %v4239_v36  ;;  %7465 = vpow2.f32 %v3695_v37  ;;  %v6286_v53 = vld [vmem:[#allocation2 + $0x8] sm:$0xff]  ;;  %vm1531_vm9 = vcmp.ge.f32.partialorder %v1401_v52, 0.0 }
 0x480   :  { %v11753_v42 = vand.u32 2147483647, %v14675_v56  ;;  %v7458_v56 = vpop.eup %7457  ;;  %v4272_v51 = vadd.f32 1.0, %v11746_v19  ;;  %v3391_v31 = vand.u32 2147483647, %v11741_v57  ;;  %v11771_v29 = vmul.f32 %v14676_v49, %v14131_v5  ;;  %v5165_v49 = vld [vmem:[#allocation2 + $0x120] sm:$0xff] }
 0x481   :  { %v6413_v4 = vsel %vm42_vm15, %v6285_v58, 0.0  ;;  %vm11774_vm10 = vcmp.lt.f32.partialorder %v4242_v47, 0.0004427343  ;;  %v14679_v37 = vunpack.c.h.bf16 %v11290_v9  ;;  %v3518_v8 = vsub.f32 0.0, %v3390_v40  ;;  %v14680_v47 = vld [vmem:[#allocation67_spill] sm:$0xff] }
 0x482   :  { %v4221_v5 = vmul.f32 -0.5, %v11684_v39  ;;  %v11792_v58 = vmul.f32 %v14680_v47, %v14133_v48  ;;  %v6414_v9 = vsel %vm42_vm15, %v6286_v53, 0.0  ;;  %v1791_v40 = vsel %vm1531_vm9, %v1401_v52, %v1663_v7  ;;  %v5714_v59 = vpop.permute.xlu0 %5713 }
 0x483   :  { %v11780_v15 = vand.u32 2147483647, %v14679_v37  ;;  %v14682_v37 = vld [vmem:[#allocation16_spill] sm:$0xff]  ;;  %v4238_v35 = vmul.f32 0.6931472, %v7458_v56  ;;  %v4241_v22 = vmul.f32 %v11612_v46, %v4240_v25  ;;  %v6415_v41 = vadd.f32 %v6414_v9, %v6413_v4 }
 0x484   :  { %14681 = vst [vmem:[#allocation64_spill] sm:$0xff] %v11792_v58  ;;  %2881 = vrot.lane.b32.xlu0 %v14682_v37, %s7789_s10  ;;  %v4224_v0 = vand.u32 2147483647, %v11684_v39  ;;  %7467 = vlog2.f32 %v4272_v51  ;;  %v3519_v33 = vsub.f32 0.0, %v3391_v31  ;;  %v3392_v47 = vand.u32 2147483647, %v11771_v29 }
 0x485   :  { %v6061_v48 = vadd.f32 %v5714_v59, %v5165_v49  ;;  %v11801_v62 = vpop.eup %7459  ;;  %v3699_v53 = vmul.f32 1.442695, %v3518_v8  ;;  %v14683_v37 = vunpack.c.l.bf16 %v11785_v21  ;;  %v14136_v46 = vunpack.c.h.bf16 %v11785_v21  ;;  %v14685_v59 = vld [vmem:[#allocation15_spill] sm:$0xff] }
 0x486   :  { %v1923_v7 = vmul.f32 %v8083_v20, %v1791_v40  ;;  %v4222_v25 = vadd.f32 1.0, %v4221_v5  ;;  %v6416_v56 = vsel %vm42_vm15, %v6287_v61, 0.0  ;;  %v3420_v31 = vand.u32 2147483647, %v11792_v58  ;;  %v11822_v20 = vld [vmem:[%s14074_s0 + $0xe8] sm:$0xff]   ;;  %v6288_v5 = vld [vmem:[#allocation2 + $0x18] sm:$0xff] }
 0x487   :  { %v11806_v52 = vmul.f32 %v14684_v45, %v14683_v37  ;;  %6190 = vst.msk [vmem:[#allocation2 + $0x120] sm:$0xff] %vm42_vm15, %v6061_v48  ;;  %v4244_v45 = vsel %vm11774_vm10, %v4241_v22, %v4238_v35  ;;  %v4257_v8 = vmul.f32 -0.5, %v11671_v50  ;;  %v6417_v4 = vadd.f32 %v6416_v56, %v6415_v41 }
 0x488   :  { %2883 = vrot.lane.b32.xlu0 %v14685_v59, %s7789_s10  ;;  %v4290_v49 = vadd.f32 1.0, %v11801_v62  ;;  %v3701_v48 = vmul.f32 1.442695, %v3519_v33  ;;  %v3520_v9 = vsub.f32 0.0, %v3392_v47  ;;  %v5427_v40 = vmul.f32 %v11266_v1, %v11533_v13  ;;  %v6289_v59 = vld [vmem:[#allocation2 + $0x20] sm:$0xff] }
 0x489   :  { %vm11828_vm11 = vcmp.lt.f32.partialorder %v4224_v0, 0.0004427343  ;;  %7469 = vpow2.f32 %v3699_v53  ;;  %v3393_v35 = vand.u32 2147483647, %v11806_v52  ;;  %v11836_v36 = vmul.f32 %v10600_v26, %v14136_v46 }
 0x48a   :  { %v2306_v41 = vsel %vm1924_vm4, %v1923_v7, 0.0  ;;  %v7462_v37 = vpop.eup %7461  ;;  %v4275_v33 = vmul.f32 -0.5, %v11746_v19  ;;  %v6418_v13 = vsel %vm42_vm15, %v6288_v5, 0.0  ;;  %v4258_v53 = vadd.f32 1.0, %v4257_v8  ;;  %v14690_v5 = vld [vmem:[#allocation37_spill] sm:$0xff] }
 0x48b   :  { %2307 = vadd.xlane.f32.xlu1 %v2306_v41  ;;  %v7464_v0 = vpop.eup %7463  ;;  %v4260_v56 = vand.u32 2147483647, %v11671_v50  ;;  %v3548_v26 = vsub.f32 0.0, %v3420_v31  ;;  %v6419_v46 = vadd.f32 %v6418_v13, %v6417_v4  ;;  %v14688_v51 = vmax.f32 %v11437_v12, 0.0 }
 0x48c   :  { %5725 = vrot.lane.b32.xlu0 %v5427_v40, %s7789_s10  ;;  %v11845_v7 = vpop.eup %7465  ;;  %7471 = vpow2.f32 %v3701_v48  ;;  %v3703_v47 = vmul.f32 1.442695, %v3520_v9  ;;  %v14689_v1 = vunpack.c.l.bf16 %v11822_v20  ;;  %v4256_v40 = vmul.f32 0.6931472, %v7462_v37 }
 0x48d   :  { %v5044_v61 = vadd.f32 %v4244_v45, %v14688_v51  ;;  %7473 = vlog2.f32 %v4290_v49  ;;  %v3521_v8 = vsub.f32 0.0, %v3393_v35  ;;  %v3394_v58 = vand.u32 2147483647, %v11836_v36  ;;  %v14692_v45 = vld [vmem:[#allocation14_spill] sm:$0xff]  ;;  %v11868_v49 = vld [vmem:[%s14074_s0 + $0xf0] sm:$0xff]  }
 0x48e   :  { %v11852_v41 = vmul.f32 %v14690_v5, %v14689_v1  ;;  %v4220_v31 = vmul.f32 0.6931472, %v7464_v0  ;;  %v4223_v4 = vmul.f32 %v11684_v39, %v4222_v25  ;;  %v14691_v13 = vunpack.c.h.bf16 %v11822_v20  ;;  %v6290_v25 = vld [vmem:[#allocation2 + $0x28] sm:$0xff] }
 0x48f   :  { %v6420_v51 = vsel %vm42_vm15, %v6289_v59, 0.0  ;;  %v4259_v48 = vmul.f32 %v11671_v50, %v4258_v53  ;;  %v3759_v9 = vmul.f32 1.442695, %v3548_v26  ;;  %v14141_v39 = vunpack.c.l.bf16 %v11868_v49 }
 0x490   :  { %v11859_v12 = vmul.f32 %v10568_v11, %v14691_v13  ;;  %2885 = vrot.lane.b32.xlu0 %v14692_v45, %s7789_s10  ;;  %v6421_v35 = vadd.f32 %v6420_v51, %v6419_v46  ;;  %vm11871_vm4 = vcmp.lt.f32.partialorder %v4260_v56, 0.0004427343  ;;  %v4308_v37 = vadd.f32 1.0, %v11845_v7 }
 0x491   :  { %v3395_v1 = vand.u32 2147483647, %v11852_v41  ;;  %v5428_v50 = vmul.f32 %v11707_v18, %v5044_v61  ;;  %v7468_v0 = vpop.eup %7467  ;;  %v4262_v53 = vsel %vm11871_vm4, %v4259_v48, %v4256_v40  ;;  %7475 = vpow2.f32 %v3703_v47  ;;  %v14695_v18 = vld [vmem:[#allocation54_spill] sm:$0xff]  ;;  %v6291_v40 = vld [vmem:[#allocation2 + $0x30] sm:$0xff] }
 0x492   :  { %v3705_v26 = vmul.f32 1.442695, %v3521_v8  ;;  %v3522_v59 = vsub.f32 0.0, %v3394_v58  ;;  %v4226_v46 = vsel %vm11828_vm11, %v4223_v4, %v4220_v31  ;;  %v4276_v56 = vadd.f32 1.0, %v4275_v33  ;;  %v14697_v31 = vld [vmem:[#allocation94_spill] sm:$0xff] }
 0x493   :  { %v3396_v5 = vand.u32 2147483647, %v11859_v12  ;;  %v6422_v13 = vsel %vm42_vm15, %v6290_v25, 0.0  ;;  %7477 = vpow2.f32 %v3759_v9  ;;  %v11888_v61 = vmul.f32 %v14695_v18, %v14141_v39 }
 0x494   :  { %5727 = vrot.lane.b32.xlu0 %v5428_v50, %s7789_s10  ;;  %v14140_v47 = vunpack.c.h.bf16 %v11868_v49  ;;  %v6423_v58 = vadd.f32 %v6422_v13, %v6421_v35  ;;  %v14696_v22 = vmax.f32 %v11496_v28, 0.0  ;;  %7479 = vlog2.f32 %v4308_v37  ;;  %v11903_v28 = vld [vmem:[%s14074_s0 + $0xf8] sm:$0xff]  }
 0x495   :  { %v3523_v33 = vsub.f32 0.0, %v3395_v1  ;;  %v5429_v4 = vmul.f32 %v14697_v31, %v11675_v2  ;;  %v14698_v51 = vmax.f32 %v11514_v60, 0.0  ;;  %v4274_v48 = vmul.f32 0.6931472, %v7468_v0  ;;  %v14699_v1 = vld [vmem:[#allocation7_spill] sm:$0xff] }
 0x496   :  { %v5046_v8 = vadd.f32 %v4262_v53, %v14696_v22  ;;  %7481 = vpow2.f32 %v3705_v26  ;;  %v3707_v9 = vmul.f32 1.442695, %v3522_v59  ;;  %v11897_v25 = vpop.eup %7469  ;;  %v4277_v11 = vmul.f32 %v11746_v19, %v4276_v56  ;;  %v6292_v53 = vld [vmem:[#allocation2 + $0x38] sm:$0xff] }
 0x497   :  { %v5042_v45 = vadd.f32 %v4226_v46, %v14698_v51  ;;  %v3524_v50 = vsub.f32 0.0, %v3396_v5  ;;  %v14139_v35 = vunpack.c.l.bf16 %v11903_v28  ;;  %v6424_v2 = vsel %vm42_vm15, %v6291_v40, 0.0 }
 0x498   :  { %5729 = vrot.lane.b32.xlu0 %v5429_v4, %s7789_s10  ;;  %v4293_v60 = vmul.f32 -0.5, %v11801_v62  ;;  %v3397_v37 = vand.u32 2147483647, %v11888_v61  ;;  %v11913_v0 = vmul.f32 %v14699_v1, %v14140_v47  ;;  %v6425_v26 = vadd.f32 %v6424_v2, %v6423_v58  ;;  %v14704_v2 = vld [vmem:[#allocation46_spill] sm:$0xff] }
 0x499   :  { %v14700_v59 = vand.u32 2147483647, %v11746_v19  ;;  %v14703_v56 = vunpack.c.l.bf16 %v11702_v54  ;;  %v3709_v13 = vmul.f32 1.442695, %v3523_v33  ;;  %v5430_v18 = vmul.f32 %v11736_v30, %v5046_v8  ;;  %v11926_v40 = vpop.eup %7471 }
 0x49a   :  { %v4326_v58 = vadd.f32 1.0, %v11897_v25  ;;  %7483 = vpow2.f32 %v3707_v9  ;;  %v5426_v19 = vmul.f32 %v11718_v23, %v5042_v45  ;;  %v7474_v31 = vpop.eup %7473  ;;  %v3263_v4 = vmax.f32 %v11741_v57, 0.0  ;;  %v6293_v9 = vld [vmem:[#allocation2 + $0x40] sm:$0xff] }
 0x49b   :  { %vm11917_vm12 = vcmp.lt.f32.partialorder %v14700_v59, 0.0004427343  ;;  %v11923_v5 = vand.u32 2147483647, %v14703_v56  ;;  %v3711_v51 = vmul.f32 1.442695, %v3524_v50  ;;  %v11936_v33 = vmul.f32 %v14704_v2, %v14139_v35 }
 0x49c   :  { %v4280_v22 = vsel %vm11917_vm12, %v4277_v11, %v4274_v48  ;;  %v6426_v30 = vsel %vm42_vm15, %v6292_v53, 0.0  ;;  %5731 = vrot.lane.b32.xlu0 %v5430_v18, %s7789_s10  ;;  %v4294_v8 = vadd.f32 1.0, %v4293_v60  ;;  %v3525_v48 = vsub.f32 0.0, %v3397_v37  ;;  %5723 = vrot.lane.b32.xlu1 %v5426_v19, %s7789_s10  ;;  %v14706_v59 = vld [vmem:[#allocation91_spill] sm:$0xff] }
 0x49d   :  { %v3398_v11 = vand.u32 2147483647, %v11913_v0  ;;  %v6427_v1 = vadd.f32 %v6426_v30, %v6425_v26  ;;  %v14705_v23 = vmax.f32 %v11551_v10, 0.0  ;;  %v4296_v50 = vand.u32 2147483647, %v11801_v62  ;;  %v6294_v19 = vld [vmem:[#allocation2 + $0x48] sm:$0xff] }
 0x49e   :  { %7485 = vpow2.f32 %v3709_v13  ;;  %v5431_v46 = vmul.f32 %v14706_v59, %v11655_v34  ;;  %v4292_v53 = vmul.f32 0.6931472, %v7474_v31  ;;  %v4335_v56 = vadd.f32 1.0, %v11926_v40  ;;  %v11949_v37 = vpop.eup %7475  ;;  %v11978_v59 = vpop.xlane.xlu1 %2295  ;;  %v5166_v35 = vld [vmem:[#allocation2 + $0x128] sm:$0xff] }
 0x49f   :  { %v5048_v45 = vadd.f32 %v4280_v22, %v14705_v23  ;;  %7487 = vlog2.f32 %v4326_v58  ;;  %v14138_v60 = vunpack.c.h.bf16 %v11903_v28  ;;  %v4311_v26 = vmul.f32 -0.5, %v11845_v7  ;;  %v14707_v58 = vld [vmem:[#allocation13_spill] sm:$0xff] }
 0x4a0   :  { %7489 = vpow2.f32 %v3711_v51  ;;  %v3399_v10 = vand.u32 2147483647, %v11936_v33  ;;  %v6428_v18 = vsel %vm42_vm15, %v6293_v9, 0.0  ;;  %5733 = vrot.lane.b32.xlu0 %v5431_v46, %s7789_s10  ;;  %v4295_v13 = vmul.f32 %v11801_v62, %v4294_v8  ;;  %2887 = vrot.lane.b32.xlu1 %v14707_v58, %s7789_s10  ;;  %v11958_v2 = vpop.eup %7477  ;;  %v6295_v58 = vld [vmem:[#allocation2 + $0x50] sm:$0xff] }
 0x4a1   :  { %v3713_v34 = vmul.f32 1.442695, %v3525_v48  ;;  %v3526_v22 = vsub.f32 0.0, %v3398_v11  ;;  %v6429_v31 = vadd.f32 %v6428_v18, %v6427_v1  ;;  %v4314_v30 = vand.u32 2147483647, %v11845_v7  ;;  %v7480_v8 = vpop.eup %7479  ;;  %v14711_v1 = vld [vmem:[#allocation38_spill] sm:$0xff] }
 0x4a2   :  { %vm11961_vm1 = vcmp.lt.f32.partialorder %v4296_v50, 0.0004427343  ;;  %v14710_v9 = vunpack.c.h.bf16 %v11702_v54  ;;  %v5432_v62 = vmul.f32 %v11729_v3, %v5048_v45  ;;  %7491 = vlog2.f32 %v4335_v56 }
 0x4a3   :  { %v4298_v48 = vsel %vm11961_vm1, %v4295_v13, %v4292_v53  ;;  %v4344_v11 = vadd.f32 1.0, %v11949_v37  ;;  %v11976_v50 = vmul.f32 %v14711_v1, %v14138_v60  ;;  %v11980_v46 = vpop.eup %7481  ;;  %v3264_v54 = vmax.f32 %v11771_v29, 0.0  ;;  %v14719_v60 = vld [vmem:[#allocation63_spill] sm:$0xff] }
 0x4a4   :  { %v11967_v23 = vand.u32 2147483647, %v14710_v9  ;;  %v14712_v3 = vunpack.c.h.bf16 %v11297_v16  ;;  %v3527_v18 = vsub.f32 0.0, %v3399_v10  ;;  %v6430_v53 = vsel %vm42_vm15, %v6294_v19, 0.0  ;;  %5735 = vrot.lane.b32.xlu0 %v5432_v62, %s7789_s10  ;;  %v14713_v9 = vld [vmem:[#allocation20_spill] sm:$0xff]  ;;  %v14717_v19 = vld [vmem:[#allocation97_spill] sm:$0xff] }
 0x4a5   :  { %v4312_v56 = vadd.f32 1.0, %v4311_v26  ;;  %7493 = vpow2.f32 %v3713_v34  ;;  %v3715_v13 = vmul.f32 1.442695, %v3526_v22  ;;  %v6431_v51 = vadd.f32 %v6430_v53, %v6429_v31  ;;  %2889 = vrot.lane.b32.xlu1 %v14713_v9, %s7789_s10  ;;  %v12002_v31 = vpop.permute.xlu1 %2873 }
 0x4a6   :  { %v11985_v45 = vand.u32 2147483647, %v14712_v3  ;;  %vm11991_vm13 = vcmp.lt.f32.partialorder %v4314_v30, 0.0004427343  ;;  %v14716_v16 = vmax.f32 %v11593_v27, 0.0  ;;  %v4596_v10 = vadd.f32 1.0, %v11958_v2 }
 0x4a7   :  { %v5433_v62 = vmul.f32 %v14717_v19, %v11688_v32  ;;  %v4310_v26 = vmul.f32 0.6931472, %v7480_v8  ;;  %7495 = vlog2.f32 %v4344_v11  ;;  %v4353_v34 = vadd.f32 1.0, %v11980_v46  ;;  %v12004_v30 = vpop.eup %7483  ;;  %v6296_v11 = vld [vmem:[#allocation2 + $0x58] sm:$0xff] }
 0x4a8   :  { %v5050_v3 = vadd.f32 %v4298_v48, %v14716_v16  ;;  %v3400_v22 = vand.u32 2147483647, %v11976_v50  ;;  %v3262_v53 = vmax.f32 %v11714_v38, 0.0  ;;  %v14718_v27 = vunpack.c.l.bf16 %v11822_v20 }
 0x4a9   :  { %v3717_v9 = vmul.f32 1.442695, %v3527_v18  ;;  %v6432_v16 = vsel %vm42_vm15, %v6295_v58, 0.0  ;;  %5737 = vrot.lane.b32.xlu0 %v5433_v62, %s7789_s10  ;;  %v4313_v32 = vmul.f32 %v11845_v7, %v4312_v56  ;;  %v4329_v8 = vmul.f32 -0.5, %v11897_v25  ;;  %2891 = vrot.lane.b32.xlu1 %v14719_v60, %s7789_s10 }
 0x4aa   :  { %v12009_v48 = vand.u32 2147483647, %v14718_v27  ;;  %7497 = vpow2.f32 %v3715_v13  ;;  %v6433_v19 = vadd.f32 %v6432_v16, %v6431_v51  ;;  %v4338_v27 = vmul.f32 -0.5, %v11926_v40  ;;  %v5716_v51 = vpop.permute.xlu1 %5715 }
 0x4ab   :  { %7499 = vlog2.f32 %v4596_v10  ;;  %v5434_v58 = vmul.f32 %v11780_v15, %v5050_v3  ;;  %v12020_v47 = vpop.eup %7485  ;;  %v4316_v7 = vsel %vm11991_vm13, %v4313_v32, %v4310_v26  ;;  %v4362_v56 = vadd.f32 1.0, %v12004_v30  ;;  %v14721_v32 = vld [vmem:[#allocation18_spill] sm:$0xff] }
 0x4ac   :  { %7501 = vlog2.f32 %v4353_v34  ;;  %v3528_v13 = vsub.f32 0.0, %v3400_v22  ;;  %v7488_v62 = vpop.eup %7487  ;;  %v14720_v60 = vunpack.c.l.bf16 %v11785_v21  ;;  %v6434_v16 = vsel %vm42_vm15, %v6296_v11, 0.0  ;;  %v6297_v22 = vld [vmem:[#allocation2 + $0x60] sm:$0xff] }
 0x4ad   :  { %7503 = vpow2.f32 %v3717_v9  ;;  %v6062_v18 = vadd.f32 %v5716_v51, %v5166_v35  ;;  %5739 = vrot.lane.b32.xlu0 %v5434_v58, %s7789_s10  ;;  %v12031_v15 = vpop.eup %7489  ;;  %v4341_v1 = vand.u32 2147483647, %v11926_v40  ;;  %v4330_v3 = vadd.f32 1.0, %v4329_v8  ;;  %2893 = vrot.lane.b32.xlu1 %v14721_v32, %s7789_s10  ;;  %v14723_v58 = vld [vmem:[#allocation95_spill] sm:$0xff] }
 0x4ae   :  { %v12027_v10 = vand.u32 2147483647, %v14720_v60  ;;  %v6435_v34 = vadd.f32 %v6434_v16, %v6433_v19  ;;  %v14722_v60 = vmax.f32 %v11631_v63, 0.0  ;;  %v4332_v11 = vand.u32 2147483647, %v11897_v25 }
 0x4af   :  { %v4371_v35 = vadd.f32 1.0, %v12020_v47  ;;  %6191 = vst.msk [vmem:[#allocation2 + $0x128] sm:$0xff] %vm42_vm15, %v6062_v18  ;;  %v5435_v51 = vmul.f32 %v14723_v58, %v11681_v14  ;;  %v4339_v8 = vadd.f32 1.0, %v4338_v27  ;;  %v4328_v39 = vmul.f32 0.6931472, %v7488_v62  ;;  %v7492_v16 = vpop.eup %7491 }
 0x4b0   :  { %v5052_v9 = vadd.f32 %v4316_v7, %v14722_v60  ;;  %7505 = vlog2.f32 %v4362_v56  ;;  %v3719_v19 = vmul.f32 1.442695, %v3528_v13  ;;  %v4347_v26 = vmul.f32 -0.5, %v11949_v37  ;;  %v6298_v13 = vld [vmem:[#allocation2 + $0x68] sm:$0xff] }
 0x4b1   :  { %v14724_v32 = vunpack.c.h.bf16 %v11822_v20  ;;  %v4380_v7 = vadd.f32 1.0, %v12031_v15  ;;  %v6436_v60 = vsel %vm42_vm15, %v6297_v22, 0.0  ;;  %5741 = vrot.lane.b32.xlu0 %v5435_v51, %s7789_s10  ;;  %vm12052_vm0 = vcmp.lt.f32.partialorder %v4341_v1, 0.0004427343  ;;  %v14727_v20 = vld [vmem:[#allocation17_spill] sm:$0xff] }
 0x4b2   :  { %v4331_v14 = vmul.f32 %v11897_v25, %v4330_v3  ;;  %v6437_v56 = vadd.f32 %v6436_v60, %v6435_v34  ;;  %2895 = vrot.lane.b32.xlu1 %v14727_v20, %s7789_s10  ;;  %v12060_v62 = vpop.eup %7493  ;;  %v4350_v58 = vand.u32 2147483647, %v11949_v37  ;;  %vm12063_vm2 = vcmp.lt.f32.partialorder %v4332_v11, 0.0004427343 }
 0x4b3   :  { %v12047_v63 = vand.u32 2147483647, %v14724_v32  ;;  %7507 = vlog2.f32 %v4371_v35  ;;  %v5436_v1 = vmul.f32 %v11753_v42, %v5052_v9  ;;  %v4337_v51 = vmul.f32 0.6931472, %v7492_v16  ;;  %v6299_v9 = vld [vmem:[#allocation2 + $0x70] sm:$0xff] }
 0x4b4   :  { %v4340_v25 = vmul.f32 %v11926_v40, %v4339_v8  ;;  %v4334_v3 = vsel %vm12063_vm2, %v4331_v14, %v4328_v39  ;;  %7509 = vpow2.f32 %v3719_v19  ;;  %v7496_v34 = vpop.eup %7495  ;;  %v4348_v32 = vadd.f32 1.0, %v4347_v26  ;;  %v14731_v8 = vld [vmem:[#allocation39_spill] sm:$0xff] }
 0x4b5   :  { %v4356_v60 = vmul.f32 -0.5, %v11980_v46  ;;  %7511 = vlog2.f32 %v4380_v7  ;;  %v6438_v11 = vsel %vm42_vm15, %v6298_v13, 0.0  ;;  %5743 = vrot.lane.b32.xlu0 %v5436_v1, %s7789_s10  ;;  %v14730_v35 = vunpack.c.h.bf16 %v11785_v21  ;;  %v12091_v7 = vpop.xlane.xlu0 %2298  ;;  %v14734_v14 = vld [vmem:[#allocation75_spill] sm:$0xff] }
 0x4b6   :  { %v4389_v42 = vadd.f32 1.0, %v12060_v62  ;;  %v14142_v40 = vunpack.c.l.bf16 %v11758_v44  ;;  %v6439_v39 = vadd.f32 %v6438_v11, %v6437_v56  ;;  %2897 = vrot.lane.b32.xlu1 %v14731_v8, %s7789_s10  ;;  %vm12084_vm3 = vcmp.lt.f32.partialorder %v4350_v58, 0.0004427343 }
 0x4b7   :  { %v12076_v20 = vand.u32 2147483647, %v14730_v35  ;;  %v12082_v26 = vpop.eup %7497  ;;  %v5054_v21 = vadd.f32 %v4334_v3, %v3262_v53  ;;  %v5437_v13 = vmul.f32 %v14734_v14, %v11695_v55  ;;  %v4343_v22 = vsel %vm12052_vm0, %v4340_v25, %v4337_v51  ;;  %v14735_v51 = vld [vmem:[#allocation60_spill] sm:$0xff] }
 0x4b8   :  { %v12095_v56 = vpop.eup %7499  ;;  %v4346_v1 = vmul.f32 0.6931472, %v7496_v34  ;;  %v4374_v58 = vmul.f32 -0.5, %v12020_v47  ;;  %v4359_v11 = vand.u32 2147483647, %v11980_v46  ;;  %v4349_v38 = vmul.f32 %v11949_v37, %v4348_v32  ;;  %v6300_v34 = vld [vmem:[#allocation2 + $0x78] sm:$0xff] }
 0x4b9   :  { %v7502_v35 = vpop.eup %7501  ;;  %v4357_v53 = vadd.f32 1.0, %v4356_v60  ;;  %v4365_v3 = vmul.f32 -0.5, %v12004_v30  ;;  %v6440_v8 = vsel %vm42_vm15, %v6299_v9, 0.0  ;;  %5745 = vrot.lane.b32.xlu0 %v5437_v13, %s7789_s10  ;;  %7513 = vlog2.f32 %v4389_v42  ;;  %v14736_v37 = vld [vmem:[#allocation73_spill] sm:$0xff]  ;;  %v12119_v42 = vpop.permute.xlu0 %2875 }
 0x4ba   :  { %v12105_v55 = vpop.eup %7503  ;;  %v4398_v18 = vadd.f32 1.0, %v12082_v26  ;;  %v12111_v25 = vmul.f32 %v14735_v51, %v14142_v40  ;;  %v6441_v14 = vadd.f32 %v6440_v8, %v6439_v39  ;;  %2899 = vrot.lane.b32.xlu1 %v14736_v37, %s7789_s10  ;;  %v5055_v32 = vadd.f32 %v4343_v22, %v3263_v4 }
 0x4bb   :  { %v4377_v60 = vand.u32 2147483647, %v12020_v47  ;;  %v5438_v13 = vmul.f32 %v11985_v45, %v5054_v21  ;;  %v4352_v51 = vsel %vm12084_vm3, %v4349_v38, %v4346_v1  ;;  %v4375_v40 = vadd.f32 1.0, %v4374_v58  ;;  %v5167_v45 = vld [vmem:[#allocation2 + $0x130] sm:$0xff]  ;;  %v6301_v58 = vld [vmem:[#allocation2 + $0x80] sm:$0xff] }
 0x4bc   :  { %v4355_v27 = vmul.f32 0.6931472, %v7502_v35  ;;  %vm12124_vm5 = vcmp.lt.f32.partialorder %v4359_v11, 0.0004427343  ;;  %v4358_v57 = vmul.f32 %v11980_v46, %v4357_v53  ;;  %v4383_v4 = vmul.f32 -0.5, %v12031_v15  ;;  %v14739_v11 = vld [vmem:[#allocation62_spill] sm:$0xff] }
 0x4bd   :  { %v7506_v8 = vpop.eup %7505  ;;  %v4407_v22 = vadd.f32 1.0, %v12105_v55  ;;  %v6442_v37 = vsel %vm42_vm15, %v6300_v34, 0.0  ;;  %5747 = vrot.lane.b32.xlu0 %v5438_v13, %s7789_s10  ;;  %v4366_v19 = vadd.f32 1.0, %v4365_v3  ;;  %7515 = vlog2.f32 %v4398_v18  ;;  %v12146_v53 = vld [vmem:[%s14074_s0 + $0x150] sm:$0xff]   ;;  %v5718_v18 = vpop.permute.xlu0 %5717 }
 0x4be   :  { %v3419_v21 = vand.u32 2147483647, %v12111_v25  ;;  %v6443_v1 = vadd.f32 %v6442_v37, %v6441_v14  ;;  %2901 = vrot.lane.b32.xlu1 %v14739_v11, %s7789_s10  ;;  %v5056_v46 = vadd.f32 %v4352_v51, %v3264_v54  ;;  %vm12138_vm6 = vcmp.lt.f32.partialorder %v4377_v60, 0.0004427343 }
 0x4bf   :  { %v4368_v38 = vand.u32 2147483647, %v12004_v30  ;;  %v2525_v3 = vunpack.c.l.bf16 %v12146_v53  ;;  %v5439_v34 = vmul.f32 %v11923_v5, %v5055_v32  ;;  %v4361_v29 = vsel %vm12124_vm5, %v4358_v57, %v4355_v27 }
 0x4c0   :  { %v7508_v14 = vpop.eup %7507  ;;  %v4364_v54 = vmul.f32 0.6931472, %v7506_v8  ;;  %v14742_v60 = vunpack.c.l.bf16 %v11868_v49  ;;  %v6063_v51 = vadd.f32 %v5718_v18, %v5167_v45  ;;  %v4384_v11 = vadd.f32 1.0, %v4383_v4  ;;  %v6302_v8 = vld [vmem:[#allocation2 + $0x88] sm:$0xff]  ;;  %v14743_v45 = vld [vmem:[#allocation21_spill] sm:$0xff] }
 0x4c1   :  { %v12156_v37 = vpop.eup %7509  ;;  %v4386_v9 = vand.u32 2147483647, %v12031_v15  ;;  %7517 = vlog2.f32 %v4407_v22  ;;  %v6444_v16 = vsel %vm42_vm15, %v6301_v58, 0.0  ;;  %5749 = vrot.lane.b32.xlu0 %v5439_v34, %s7789_s10  ;;  %v4367_v32 = vmul.f32 %v12004_v30, %v4366_v19  ;;  %v14747_v30 = vld [vmem:[#allocation77_spill] sm:$0xff] }
 0x4c2   :  { %v12154_v13 = vand.u32 2147483647, %v14742_v60  ;;  %v7512_v5 = vpop.eup %7511  ;;  %v3547_v27 = vsub.f32 0.0, %v3419_v21  ;;  %v6445_v39 = vadd.f32 %v6444_v16, %v6443_v1  ;;  %v2526_v57 = vunpack.c.h.bf16 %v12146_v53  ;;  %2903 = vrot.lane.b32.xlu1 %v14743_v45, %s7789_s10  ;;  %6192 = vst.msk [vmem:[#allocation2 + $0x130] sm:$0xff] %vm42_vm15, %v6063_v51  ;;  %v14750_v51 = vld [vmem:[#allocation55_spill] sm:$0xff]  ;;  %v14829_v53 = vld [vmem:[#allocation29_spill] sm:$0xff] }
 0x4c3   :  { %v14744_v4 = vmax.f32 %v11806_v52, 0.0  ;;  %vm12168_vm7 = vcmp.lt.f32.partialorder %v4368_v38, 0.0004427343  ;;  %v12175_v19 = vmul.f32 %v14747_v30, %v2525_v3  ;;  %v5440_v16 = vmul.f32 %v11967_v23, %v5056_v46 }
 0x4c4   :  { %v4373_v21 = vmul.f32 0.6931472, %v7508_v14  ;;  %v4370_v1 = vsel %vm12168_vm7, %v4367_v32, %v4364_v54  ;;  %v4392_v18 = vmul.f32 -0.5, %v12060_v62  ;;  %v4416_v52 = vadd.f32 1.0, %v12156_v37  ;;  %v6303_v14 = vld [vmem:[#allocation2 + $0x90] sm:$0xff] }
 0x4c5   :  { %v5057_v22 = vadd.f32 %v4361_v29, %v14744_v4  ;;  %v4376_v38 = vmul.f32 %v12020_v47, %v4375_v40  ;;  %v4382_v34 = vmul.f32 0.6931472, %v7512_v5  ;;  %vm12183_vm8 = vcmp.lt.f32.partialorder %v4386_v9, 0.0004427343  ;;  %5751 = vrot.lane.b32.xlu0 %v5440_v16, %s7789_s10  ;;  %v14751_v47 = vld [vmem:[#allocation24_spill] sm:$0xff] }
 0x4c6   :  { %v6446_v60 = vsel %vm42_vm15, %v6302_v8, 0.0  ;;  %v4385_v23 = vmul.f32 %v12031_v15, %v4384_v11  ;;  %v3757_v46 = vmul.f32 1.442695, %v3547_v27  ;;  %v12193_v32 = vmul.f32 %v14750_v51, %v2526_v57  ;;  %2905 = vrot.lane.b32.xlu1 %v14751_v47, %s7789_s10  ;;  %v7514_v40 = vpop.eup %7513  ;;  %v12203_v15 = vld [vmem:[%s14074_s0 + $0x158] sm:$0xff]   ;;  %v6305_v47 = vld [vmem:[#allocation2 + $0xa0] sm:$0xff] }
 0x4c7   :  { %v6447_v54 = vadd.f32 %v6446_v60, %v6445_v39  ;;  %v14752_v9 = vmax.f32 %v11836_v36, 0.0  ;;  %v3421_v8 = vand.u32 2147483647, %v12175_v19  ;;  %v2527_v11 = vunpack.c.l.bf16 %v12203_v15 }
 0x4c8   :  { %v5441_v27 = vmul.f32 %v12027_v10, %v5057_v22  ;;  %v4379_v39 = vsel %vm12138_vm6, %v4376_v38, %v4373_v21  ;;  %v4393_v45 = vadd.f32 1.0, %v4392_v18  ;;  %v4395_v4 = vand.u32 2147483647, %v12060_v62  ;;  %v6304_v10 = vld [vmem:[#allocation2 + $0x98] sm:$0xff]  ;;  %v14753_v21 = vld [vmem:[#allocation42_spill] sm:$0xff] }
 0x4c9   :  { %v5058_v5 = vadd.f32 %v4370_v1, %v14752_v9  ;;  %7519 = vlog2.f32 %v4416_v52  ;;  %v4388_v36 = vsel %vm12183_vm8, %v4385_v23, %v4382_v34  ;;  %v3269_v58 = vmax.f32 %v11888_v61, 0.0  ;;  %v14755_v34 = vld [vmem:[#allocation65_spill] sm:$0xff]  ;;  %v14756_v23 = vld [vmem:[#allocation71_spill] sm:$0xff] }
 0x4ca   :  { %v4401_v30 = vmul.f32 -0.5, %v12082_v26  ;;  %v6448_v16 = vsel %vm42_vm15, %v6303_v14, 0.0  ;;  %5753 = vrot.lane.b32.xlu0 %v5441_v27, %s7789_s10  ;;  %v4391_v1 = vmul.f32 0.6931472, %v7514_v40  ;;  %7521 = vpow2.f32 %v3757_v46  ;;  %2907 = vrot.lane.b32.xlu1 %v14753_v21, %s7789_s10  ;;  %v7516_v18 = vpop.eup %7515 }
 0x4cb   :  { %v6449_v35 = vadd.f32 %v6448_v16, %v6447_v54  ;;  %v3422_v22 = vand.u32 2147483647, %v12193_v32  ;;  %v14754_v52 = vmax.f32 %v11852_v41, 0.0  ;;  %v3549_v61 = vsub.f32 0.0, %v3421_v8  ;;  %v6306_v16 = vld [vmem:[#allocation2 + $0xa8] sm:$0xff] }
 0x4cc   :  { %v12224_v29 = vmul.f32 %v14755_v34, %v2527_v11  ;;  %v5442_v60 = vmul.f32 %v12076_v20, %v5058_v5  ;;  %v14757_v46 = vand.u32 2147483647, %v14756_v23  ;;  %v4410_v54 = vmul.f32 -0.5, %v12105_v55 }
 0x4cd   :  { %v5059_v38 = vadd.f32 %v4379_v39, %v14754_v52  ;;  %v4394_v51 = vmul.f32 %v12060_v62, %v4393_v45  ;;  %vm12235_vm10 = vcmp.lt.f32.partialorder %v4395_v4, 0.0004427343  ;;  %v14146_v40 = vunpack.c.h.bf16 %v12203_v15  ;;  %v14763_v52 = vld [vmem:[#allocation41_spill] sm:$0xff] }
 0x4ce   :  { %vm12229_vm9 = vcmp.lt.f32.partialorder %v14757_v46, 0.0004427343  ;;  %v14762_v9 = vmax.f32 %v11859_v12, 0.0  ;;  %v4402_v5 = vadd.f32 1.0, %v4401_v30  ;;  %v4404_v8 = vand.u32 2147483647, %v12082_v26  ;;  %5755 = vrot.lane.b32.xlu0 %v5442_v60, %s7789_s10  ;;  %v7518_v39 = vpop.eup %7517  ;;  %2909 = vrot.lane.b32.xlu1 %v14763_v52, %s7789_s10 }
 0x4cf   :  { %v6450_v27 = vsel %vm42_vm15, %v6304_v10, 0.0  ;;  %v4397_v62 = vsel %vm12235_vm10, %v4394_v51, %v4391_v1  ;;  %v4400_v45 = vmul.f32 0.6931472, %v7516_v18  ;;  %v3550_v21 = vsub.f32 0.0, %v3422_v22 }
 0x4d0   :  { %v5060_v20 = vadd.f32 %v4388_v36, %v14762_v9  ;;  %v6451_v4 = vadd.f32 %v6450_v27, %v6449_v35  ;;  %v6452_v12 = vsel %vm42_vm15, %v6305_v47, 0.0  ;;  %v3761_v36 = vmul.f32 1.442695, %v3549_v61  ;;  %v6307_v9 = vld [vmem:[#allocation2 + $0xb0] sm:$0xff]  ;;  %v12283_v27 = vld [vmem:[%s14074_s0 + $0x160] sm:$0xff]  }
 0x4d1   :  { %v3423_v30 = vand.u32 2147483647, %v12224_v29  ;;  %v5443_v10 = vmul.f32 %v12009_v48, %v5059_v38  ;;  %v4411_v34 = vadd.f32 1.0, %v4410_v54  ;;  %v4413_v60 = vand.u32 2147483647, %v12105_v55  ;;  %v14766_v54 = vld [vmem:[#allocation40_spill] sm:$0xff] }
 0x4d2   :  { %v3270_v23 = vmax.f32 %v11913_v0, 0.0  ;;  %v12257_v1 = vmul.f32 %v11764_v43, %v14146_v40  ;;  %v4409_v35 = vmul.f32 0.6931472, %v7518_v39  ;;  %v4419_v22 = vmul.f32 -0.5, %v12156_v37  ;;  %2911 = vrot.lane.b32.xlu1 %v14766_v54, %s7789_s10  ;;  %v6309_v38 = vld [vmem:[#allocation2 + $0xc0] sm:$0xff]  ;;  %v14849_v40 = vld [vmem:[#allocation87_spill] sm:$0xff] }
 0x4d3   :  { %v4403_v18 = vmul.f32 %v12082_v26, %v4402_v5  ;;  %v6454_v61 = vsel %vm42_vm15, %v6306_v16, 0.0  ;;  %5757 = vrot.lane.b32.xlu0 %v5443_v10, %s7789_s10  ;;  %v5061_v48 = vadd.f32 %v4397_v62, %v3269_v58  ;;  %vm12263_vm11 = vcmp.lt.f32.partialorder %v4404_v8, 0.0004427343 }
 0x4d4   :  { %v6453_v0 = vadd.f32 %v6452_v12, %v6451_v4  ;;  %v3763_v46 = vmul.f32 1.442695, %v3550_v21  ;;  %7523 = vpow2.f32 %v3761_v36  ;;  %v3551_v51 = vsub.f32 0.0, %v3423_v30  ;;  %v14774_v12 = vld [vmem:[#allocation28_spill] sm:$0xff] }
 0x4d5   :  { %v4406_v43 = vsel %vm12263_vm11, %v4403_v18, %v4400_v45  ;;  %v5444_v26 = vmul.f32 %v12047_v63, %v5060_v20  ;;  %v14767_v41 = vand.u32 2147483647, %v11537_v17  ;;  %v4412_v47 = vmul.f32 %v12105_v55, %v4411_v34  ;;  %v14770_v17 = vld [vmem:[#allocation98_spill] sm:$0xff]  ;;  %v6308_v18 = vld [vmem:[#allocation2 + $0xb8] sm:$0xff] }
 0x4d6   :  { %v6455_v5 = vadd.f32 %v6454_v61, %v6453_v0  ;;  %v3424_v8 = vand.u32 2147483647, %v12257_v1  ;;  %v14145_v39 = vunpack.c.l.bf16 %v12283_v27  ;;  %v7520_v63 = vpop.eup %7519  ;;  %v4550_v20 = vsel %vm12229_vm9, %v14770_v17, %v11663_v24  ;;  %2913 = vrot.lane.b32.xlu1 %v14774_v12, %s7789_s10 }
 0x4d7   :  { %vm12274_vm4 = vcmp.lt.f32.partialorder %v14767_v41, 0.0004427343  ;;  %vm12290_vm12 = vcmp.lt.f32.partialorder %v4413_v60, 0.0004427343  ;;  %v4422_v55 = vand.u32 2147483647, %v12156_v37  ;;  %v14773_v45 = vunpack.c.h.bf16 %v11868_v49  ;;  %5759 = vrot.lane.b32.xlu0 %v5444_v26, %s7789_s10  ;;  %v12302_v36 = vpop.eup %7521 }
 0x4d8   :  { %v4415_v16 = vsel %vm12290_vm12, %v4412_v47, %v4409_v35  ;;  %v4420_v21 = vadd.f32 1.0, %v4419_v22  ;;  %v5062_v52 = vadd.f32 %v4406_v43, %v3270_v23  ;;  %7525 = vpow2.f32 %v3763_v46  ;;  %v14775_v22 = vld [vmem:[#allocation69_spill] sm:$0xff]  ;;  %v6310_v41 = vld [vmem:[#allocation2 + $0xc8] sm:$0xff] }
 0x4d9   :  { %v5318_v4 = vand.u32 2147483647, %v14773_v45  ;;  %v6456_v30 = vsel %vm42_vm15, %v6307_v9, 0.0  ;;  %v3765_v10 = vmul.f32 1.442695, %v3551_v51  ;;  %v14144_v34 = vunpack.c.h.bf16 %v12283_v27  ;;  %v14782_v45 = vld [vmem:[#allocation82_spill] sm:$0xff]  ;;  %v12350_v12 = vpop.xlane.xlu1 %2301 }
 0x4da   :  { %v5445_v49 = vmul.f32 %v12154_v13, %v5061_v48  ;;  %v4418_v60 = vmul.f32 0.6931472, %v7520_v63  ;;  %v6457_v61 = vadd.f32 %v6456_v30, %v6455_v5  ;;  %v3552_v35 = vsub.f32 0.0, %v3424_v8  ;;  %v14786_v30 = vld [vmem:[#allocation100_spill] sm:$0xff] }
 0x4db   :  { %v12310_v23 = vmul.f32 %v12002_v31, %v14145_v39  ;;  %v4583_v0 = vmul.f32 %v14775_v22, %v11690_v6  ;;  %v4599_v46 = vmul.f32 -0.5, %v11958_v2  ;;  %v14776_v54 = vunpack.c.l.bf16 %v11903_v28  ;;  %v14780_v6 = vld [vmem:[#allocation27_spill] sm:$0xff] }
 0x4dc   :  { %vm12317_vm1 = vcmp.lt.f32.partialorder %v4422_v55, 0.0004427343  ;;  %5761 = vrot.lane.b32.xlu0 %v5445_v49, %s7789_s10  ;;  %v14779_v48 = vmax.f32 %v11936_v33, 0.0  ;;  %v4421_v31 = vmul.f32 %v12156_v37, %v4420_v21  ;;  %v4587_v26 = vadd.f32 1.0, %v12302_v36  ;;  %2915 = vrot.lane.b32.xlu1 %v14780_v6, %s7789_s10  ;;  %v14781_v55 = vld [vmem:[#allocation99_spill] sm:$0xff]  ;;  %v14793_v6 = vld [vmem:[#allocation96_spill] sm:$0xff] }
 0x4dd   :  { %v5319_v43 = vand.u32 2147483647, %v14776_v54  ;;  %v5446_v47 = vmul.f32 %v5318_v4, %v5062_v52  ;;  %v6458_v9 = vsel %vm42_vm15, %v6308_v18, 0.0  ;;  %v6460_v5 = vsel %vm42_vm15, %v6309_v38, 0.0  ;;  %v6311_v13 = vld [vmem:[#allocation2 + $0xd0] sm:$0xff] }
 0x4de   :  { %v5063_v51 = vadd.f32 %v4415_v16, %v14779_v48  ;;  %7527 = vpow2.f32 %v3765_v10  ;;  %v12333_v8 = vmul.f32 %v12119_v42, %v14144_v34  ;;  %v4424_v33 = vsel %vm12317_vm1, %v4421_v31, %v4418_v60  ;;  %v14787_v60 = vld [vmem:[#allocation26_spill] sm:$0xff]  ;;  %v14844_v34 = vld [vmem:[#allocation8_spill] sm:$0xff] }
 0x4df   :  { %v6459_v37 = vadd.f32 %v6458_v9, %v6457_v61  ;;  %v3767_v63 = vmul.f32 1.442695, %v3552_v35  ;;  %v3425_v62 = vand.u32 2147483647, %v12310_v23  ;;  %v4577_v4 = vsel %vm12274_vm4, %v14782_v45, %v14781_v55  ;;  %v14795_v9 = vld [vmem:[#allocation79_spill] sm:$0xff] }
 0x4e0   :  { %v14783_v16 = vand.u32 2147483647, %v14775_v22  ;;  %v3272_v42 = vmax.f32 %v11976_v50, 0.0  ;;  %v6462_v52 = vsel %vm42_vm15, %v6310_v41, 0.0  ;;  %5763 = vrot.lane.b32.xlu0 %v5446_v47, %s7789_s10  ;;  %v4600_v58 = vadd.f32 1.0, %v4599_v46  ;;  %2917 = vrot.lane.b32.xlu1 %v14787_v60, %s7789_s10  ;;  %v14789_v46 = vld [vmem:[#allocation51_spill] sm:$0xff] }
 0x4e1   :  { %7529 = vlog2.f32 %v4587_v26  ;;  %v6461_v49 = vadd.f32 %v6460_v5, %v6459_v37  ;;  %v14788_v18 = vunpack.c.h.bf16 %v11903_v28  ;;  %v3426_v38 = vand.u32 2147483647, %v12333_v8  ;;  %v12361_v22 = vpop.eup %7523  ;;  %v14792_v41 = vld [vmem:[#allocation93_spill] sm:$0xff] }
 0x4e2   :  { %vm12344_vm13 = vcmp.lt.f32.partialorder %v14783_v16, 0.0004427343  ;;  %v5064_v50 = vadd.f32 %v4424_v33, %v3272_v42  ;;  %v5447_v35 = vmul.f32 %v5319_v43, %v5063_v51  ;;  %v4602_v54 = vand.u32 2147483647, %v11958_v2  ;;  %v14800_v16 = vld [vmem:[#allocation68_spill] sm:$0xff]  ;;  %v14804_v60 = vld [vmem:[#allocation25_spill] sm:$0xff] }
 0x4e3   :  { %v4586_v10 = vsel %vm12344_vm13, %v4583_v0, %v14786_v30  ;;  %v5320_v61 = vand.u32 2147483647, %v14788_v18  ;;  %v6463_v48 = vadd.f32 %v6462_v52, %v6461_v49  ;;  %7531 = vpow2.f32 %v3767_v63  ;;  %v2878_v63 = vpop.permute.xlu1 %2877  ;;  %v14802_v52 = vld [vmem:[#allocation53_spill] sm:$0xff] }
 0x4e4   :  { %v3553_v0 = vsub.f32 0.0, %v3425_v62  ;;  %v14790_v31 = vmax.f32 %v14789_v46, 0.0  ;;  %v14794_v28 = vsel %vm11501_vm14, %v14792_v41, %v14793_v6  ;;  %v14796_v5 = vunpack.c.l.bf16 %v14795_v9  ;;  %5765 = vrot.lane.b32.xlu0 %v5447_v35, %s7789_s10  ;;  %v14798_v62 = vld [vmem:[#allocation52_spill] sm:$0xff]  ;;  %2919 = vrot.lane.b32.xlu1 %v14804_v60, %s7789_s10  ;;  %v14807_v26 = vld [vmem:[#allocation81_spill] sm:$0xff]  ;;  %v14808_v41 = vld [vmem:[#allocation11_spill] sm:$0xff] }
 0x4e5   :  { %v14797_v51 = vunpack.c.h.bf16 %v14795_v9  ;;  %v4598_v37 = vmul.f32 0.6931472, %v12095_v56  ;;  %v14799_v55 = vmax.f32 %v14798_v62, 0.0  ;;  %v14801_v21 = vmax.f32 %v14800_v16, 0.0  ;;  %v12403_v18 = vpop.eup %7525  ;;  %v14810_v6 = vld [vmem:[#allocation64_spill] sm:$0xff]  ;;  %v14813_v16 = vld [vmem:[#allocation57_spill] sm:$0xff] }
 0x4e6   :  { %v12371_v47 = vadd.f32 %v14794_v28, %v14790_v31  ;;  %v12375_v43 = vand.u32 2147483647, %v14796_v5  ;;  %v14803_v30 = vmax.f32 %v14802_v52, 0.0  ;;  %v4601_v56 = vmul.f32 %v11958_v2, %v4600_v58  ;;  %v6313_v31 = vld [vmem:[#allocation2 + $0xe0] sm:$0xff]  ;;  %v12414_v58 = vld [vmem:[%s14074_s0 + $0x168] sm:$0xff]   ;;  %v14811_v62 = vld [vmem:[#allocation32_spill] sm:$0xff] }
 0x4e7   :  { %v12379_v33 = vand.u32 2147483647, %v14797_v51  ;;  %v12390_v45 = vadd.f32 %v4550_v20, %v14799_v55  ;;  %v12394_v42 = vadd.f32 %v4577_v4, %v14801_v21  ;;  %v6464_v14 = vsel %vm42_vm15, %v6311_v13, 0.0  ;;  %v5168_v20 = vld [vmem:[#allocation2 + $0x138] sm:$0xff]  ;;  %v6314_v5 = vld [vmem:[#allocation2 + $0xe8] sm:$0xff] }
 0x4e8   :  { %v12398_v49 = vadd.f32 %v4586_v10, %v14803_v30  ;;  %v4605_v24 = vadd.f32 1.0, %v12361_v22  ;;  %v3554_v17 = vsub.f32 0.0, %v3426_v38  ;;  %v5448_v35 = vmul.f32 %v5320_v61, %v5064_v50  ;;  %v6312_v10 = vld [vmem:[#allocation2 + $0xd8] sm:$0xff]  ;;  %2921 = vrot.lane.b32.xlu1 %v14811_v62, %s7789_s10 }
 0x4e9   :  { %vm12407_vm14 = vcmp.lt.f32.partialorder %v4602_v54, 0.0004427343  ;;  %v6465_v46 = vadd.f32 %v6464_v14, %v6463_v48  ;;  %v3769_v2 = vmul.f32 1.442695, %v3553_v0  ;;  %v14143_v13 = vunpack.c.l.bf16 %v12414_v58  ;;  %v5720_v0 = vpop.permute.xlu1 %5719  ;;  %v14812_v55 = vld [vmem:[#allocation48_spill] sm:$0xff] }
 0x4ea   :  { %v12419_v38 = vadd.f32 %v14808_v41, %v14807_v26  ;;  %v14809_v61 = vunpack.c.h.bf16 %v11758_v44  ;;  %v4604_v54 = vsel %vm12407_vm14, %v4601_v56, %v4598_v37  ;;  %v4590_v48 = vmul.f32 -0.5, %v12302_v36  ;;  %5767 = vrot.lane.b32.xlu0 %v5448_v35, %s7789_s10  ;;  %v14814_v35 = vld [vmem:[#allocation83_spill] sm:$0xff] }
 0x4eb   :  { %v3292_v28 = vmax.f32 %v14810_v6, 0.0  ;;  %v4614_v9 = vadd.f32 1.0, %v12403_v18  ;;  %v6064_v51 = vadd.f32 %v5720_v0, %v5168_v20  ;;  %v5449_v21 = vmul.f32 %v14813_v16, %v14812_v55  ;;  %v12437_v56 = vpop.eup %7527  ;;  %v6315_v55 = vld [vmem:[#allocation2 + $0xf0] sm:$0xff] }
 0x4ec   :  { %v12423_v50 = vand.u32 2147483647, %v14809_v61  ;;  %7533 = vlog2.f32 %v4605_v24  ;;  %v6466_v37 = vsel %vm42_vm15, %v6312_v10, 0.0  ;;  %v6468_v52 = vsel %vm42_vm15, %v6313_v31, 0.0  ;;  %v14815_v31 = vld [vmem:[#allocation19_spill] sm:$0xff] }
 0x4ed   :  { %v3771_v30 = vmul.f32 1.442695, %v3554_v17  ;;  %v12439_v60 = vadd.f32 %v4604_v54, %v3292_v28  ;;  %v6467_v14 = vadd.f32 %v6466_v37, %v6465_v46  ;;  %7535 = vpow2.f32 %v3769_v2  ;;  %6193 = vst.msk [vmem:[#allocation2 + $0x138] sm:$0xff] %vm42_vm15, %v6064_v51  ;;  %v14816_v2 = vld [vmem:[#allocation23_spill] sm:$0xff] }
 0x4ee   :  { %v12443_v20 = vmul.f32 %v2878_v63, %v14143_v13  ;;  %v12448_v24 = vadd.f32 %v14808_v41, %v14814_v35  ;;  %v4591_v4 = vadd.f32 1.0, %v4590_v48  ;;  %v4593_v10 = vand.u32 2147483647, %v12302_v36  ;;  %5769 = vrot.lane.b32.xlu0 %v5449_v21, %s7789_s10  ;;  %v14817_v61 = vld [vmem:[#allocation31_spill] sm:$0xff]  ;;  %v7530_v54 = vpop.eup %7529  ;;  %v14824_v35 = vld [vmem:[#allocation10_spill] sm:$0xff] }
 0x4ef   :  { %v6470_v17 = vsel %vm42_vm15, %v6314_v5, 0.0  ;;  %v12455_v46 = vadd.f32 %v14808_v41, %v14815_v31  ;;  %v12459_v63 = vadd.f32 %v14808_v41, %v14816_v2  ;;  %7537 = vlog2.f32 %v4614_v9  ;;  %2923 = vrot.lane.b32.xlu1 %v14817_v61, %s7789_s10  ;;  %v14819_v28 = vld [vmem:[#allocation47_spill] sm:$0xff]  ;;  %v14820_v5 = vld [vmem:[#allocation58_spill] sm:$0xff]  ;;  %v14828_v2 = vld [vmem:[#allocation49_spill] sm:$0xff] }
 0x4f0   :  { %v6469_v26 = vadd.f32 %v6468_v52, %v6467_v14  ;;  %v14818_v48 = vunpack.c.l.bf16 %v11758_v44  ;;  %v4623_v6 = vadd.f32 1.0, %v12437_v56  ;;  %7539 = vpow2.f32 %v3771_v30  ;;  %v12476_v37 = vpop.eup %7531  ;;  %v14823_v14 = vld [vmem:[#allocation30_spill] sm:$0xff]  ;;  %v14831_v61 = vld [vmem:[#allocation45_spill] sm:$0xff]  ;;  %v14851_v52 = vld [vmem:[#allocation80_spill] sm:$0xff] }
 0x4f1   :  { %v5450_v51 = vmul.f32 %v14820_v5, %v14819_v28  ;;  %v3291_v62 = vmax.f32 %v12111_v25, 0.0  ;;  %v12473_v9 = vand.u32 2147483647, %v2525_v3  ;;  %v3427_v21 = vand.u32 2147483647, %v12443_v20  ;;  %v14833_v28 = vld [vmem:[#allocation43_spill] sm:$0xff] }
 0x4f2   :  { %v12465_v0 = vand.u32 2147483647, %v14818_v48  ;;  %v6471_v16 = vadd.f32 %v6470_v17, %v6469_v26  ;;  %v4592_v44 = vmul.f32 %v12302_v36, %v4591_v4  ;;  %vm12479_vm0 = vcmp.lt.f32.partialorder %v4593_v10, 0.0004427343  ;;  %v14825_v36 = vld [vmem:[#allocation22_spill] sm:$0xff]  ;;  %v14826_v10 = vld [vmem:[#allocation72_spill] sm:$0xff] }
 0x4f3   :  { %v12485_v30 = vand.u32 2147483647, %v2526_v57  ;;  %v12489_v25 = vand.u32 2147483647, %v2527_v11  ;;  %5771 = vrot.lane.b32.xlu0 %v5450_v51, %s7789_s10  ;;  %v4589_v3 = vmul.f32 0.6931472, %v7530_v54  ;;  %2925 = vrot.lane.b32.xlu1 %v14823_v14, %s7789_s10  ;;  %v5451_v4 = vmul.f32 %v14825_v36, %v14824_v35 }
 0x4f4   :  { %v14827_v17 = vld [vmem:[#allocation9_spill] sm:$0xff]  ;;  %v5453_v57 = vmul.f32 %v14829_v53, %v14828_v2  ;;  %v6472_v26 = vsel %vm42_vm15, %v6315_v55, 0.0  ;;  %7541 = vlog2.f32 %v4623_v6  ;;  %v14830_v11 = vld [vmem:[#allocation74_spill] sm:$0xff]  ;;  %v14832_v54 = vld [vmem:[#allocation59_spill] sm:$0xff]  ;;  %v4632_v35 = vadd.f32 1.0, %v12476_v37 }
 0x4f5   :  { %v5452_v31 = vmul.f32 %v14827_v17, %v14826_v10  ;;  %v12503_v48 = vmul.f32 %v14831_v61, %v14830_v11  ;;  %v12507_v5 = vmul.f32 %v14833_v28, %v14832_v54  ;;  %v6316_v51 = vld [vmem:[#allocation2 + $0xf8] sm:$0xff]  ;;  %v6473_v14 = vadd.f32 %v6472_v26, %v6471_v16  ;;  %v12510_v10 = vpop.xlane.xlu0 %2304  ;;  %v14835_v17 = vld [vmem:[#allocation50_spill] sm:$0xff]  ;;  %v14842_v26 = vld [vmem:[#allocation35_spill] sm:$0xff] }
 0x4f6   :  { %v3555_v36 = vsub.f32 0.0, %v3427_v21  ;;  %14834 = vst [vmem:[#allocation70_spill] sm:$0xff] %v12510_v10  ;;  %v14836_v2 = vld [vmem:[#allocation34_spill] sm:$0xff]  ;;  %v14837_v6 = vld [vmem:[#allocation76_spill] sm:$0xff]  ;;  %v14841_v16 = vld [vmem:[#allocation85_spill] sm:$0xff]  ;;  %7543 = vlog2.f32 %v4632_v35 }
 0x4f7   :  { %v12514_v53 = vmul.f32 %v14836_v2, %v14835_v17  ;;  %5773 = vrot.lane.b32.xlu0 %v5451_v4, %s7789_s10  ;;  %v14838_v55 = vld [vmem:[#allocation36_spill] sm:$0xff]  ;;  %v14839_v61 = vld [vmem:[#allocation66_spill] sm:$0xff]  ;;  %v12527_v13 = vmul.f32 %v14842_v26, %v14841_v16  ;;  %v4595_v17 = vsel %vm12479_vm0, %v4592_v44, %v4589_v3  ;;  %v4608_v4 = vmul.f32 -0.5, %v12361_v22  ;;  %v14856_v35 = vld [vmem:[#allocation89_spill] sm:$0xff] }
 0x4f8   :  { %v12519_v11 = vmul.f32 %v14838_v55, %v14837_v6  ;;  %v14840_v54 = vld [vmem:[#allocation86_spill] sm:$0xff]  ;;  %v14845_v2 = vld [vmem:[#allocation44_spill] sm:$0xff]  ;;  %v4617_v26 = vmul.f32 -0.5, %v12403_v18  ;;  %v12550_v44 = vmul.f32 %v12375_v43, %v12394_v42  ;;  %v12554_v3 = vmul.f32 %v14851_v52, %v12390_v45 }
 0x4f9   :  { %v12523_v28 = vmul.f32 %v14840_v54, %v14839_v61  ;;  %v14843_v21 = vld [vmem:[#allocation90_spill] sm:$0xff]  ;;  %2927 = vrot.lane.b32.xlu1 %v14845_v2, %s7789_s10  ;;  %v14846_v6 = vld [vmem:[#allocation92_spill] sm:$0xff]  ;;  %v2880_v10 = vpop.permute.xlu0 %2879  ;;  %v14854_v43 = vunpack.c.h.bf16 %v12203_v15  ;;  %v14858_v15 = vld [vmem:[#allocation33_spill] sm:$0xff] }
 0x4fa   :  { %v12531_v39 = vmul.f32 %v14844_v34, %v14843_v21  ;;  %v14847_v55 = vld [vmem:[#allocation88_spill] sm:$0xff]  ;;  %v6474_v34 = vsel %vm42_vm15, %v6316_v51, 0.0  ;;  %v7534_v21 = vpop.eup %7533  ;;  %v12562_v51 = vadd.f32 %v4595_v17, %v3291_v62  ;;  %v14857_v62 = vunpack.c.l.bf16 %v12283_v27 }
 0x4fb   :  { %v12540_v61 = vmul.f32 %v14847_v55, %v14846_v6  ;;  %v14848_v54 = vld [vmem:[#allocation56_spill] sm:$0xff]  ;;  %v6475_v2 = vadd.f32 %v6474_v34, %v6473_v14  ;;  %v6317_v6 = vld [vmem:[#allocation2 + $0x100] sm:$0xff]  ;;  %v3773_v55 = vmul.f32 1.442695, %v3555_v36  ;;  %v12566_v42 = vand.u32 2147483647, %v14854_v43  ;;  %5775 = vrot.lane.b32.xlu0 %v5452_v31, %s7789_s10 }
 0x4fc   :  { %v12544_v16 = vmul.f32 %v14849_v40, %v14848_v54  ;;  %v14852_v40 = vld [vmem:[#allocation78_spill] sm:$0xff]  ;;  %v12572_v14 = vmul.f32 %v12379_v33, %v12398_v49  ;;  %v4609_v36 = vadd.f32 1.0, %v4608_v4  ;;  %v12580_v17 = vand.u32 2147483647, %v14857_v62 }
 0x4fd   :  { %v12558_v54 = vmul.f32 %v14852_v40, %v12371_v47  ;;  %v12576_v47 = vadd.f32 %v14808_v41, %v14856_v35  ;;  %2929 = vrot.lane.b32.xlu1 %v14858_v15, %s7789_s10  ;;  %v5169_v34 = vld [vmem:[#allocation2 + $0x140] sm:$0xff]  ;;  %v12586_v31 = vmul.f32 %v12423_v50, %v12439_v60  ;;  %v4611_v33 = vand.u32 2147483647, %v12361_v22  ;;  %v6318_v62 = vld [vmem:[#allocation2 + $0x108] sm:$0xff] }
 0x4fe   :  { %14850 = vst [vmem:[#allocation12_spill] sm:$0xff] %v12544_v16  ;;  %v12560_v16 = vpop.eup %7535  ;;  %14855 = vst [vmem:[#allocation16_spill] sm:$0xff] %v12572_v14  ;;  %v4618_v49 = vadd.f32 1.0, %v4617_v26  ;;  %v4620_v40 = vand.u32 2147483647, %v12403_v18  ;;  %v6476_v4 = vsel %vm42_vm15, %v6317_v6, 0.0  ;;  %7545 = vpow2.f32 %v3773_v55  ;;  %v5722_v14 = vpop.permute.xlu0 %5721 }
 0x4ff   :  { %14853 = vst [vmem:[#allocation67_spill] sm:$0xff] %v12558_v54  ;;  %14859 = vst [vmem:[#allocation6_spill] sm:$0xff] %v12586_v31  ;;  %v7538_v52 = vpop.eup %7537  ;;  %v4607_v35 = vmul.f32 0.6931472, %v7534_v21  ;;  %v6477_v45 = vadd.f32 %v6476_v4, %v6475_v2  ;;  %v4641_v15 = vadd.f32 1.0, %v12560_v16  ;;  %v4626_v50 = vmul.f32 -0.5, %v12437_v56  ;;  %5777 = vrot.lane.b32.xlu0 %v5453_v57, %s7789_s10 }
 0x500   :  { %v12591_v43 = vpop.eup %7539  ;;  %v14860_v60 = vunpack.c.h.bf16 %v12414_v58  ;;  %v6065_v26 = vadd.f32 %v5722_v14, %v5169_v34  ;;  %v12603_v6 = vld [vmem:[%s14074_s0 + $0x170] sm:$0xff]   ;;  %v3293_v2 = vmax.f32 %v12175_v19, 0.0  ;;  %v4610_v55 = vmul.f32 %v12361_v22, %v4609_v36 }
 0x501   :  { %v14147_v21 = vunpack.c.l.bf16 %v12603_v6  ;;  %v3294_v4 = vmax.f32 %v12193_v32, 0.0  ;;  %v4616_v54 = vmul.f32 0.6931472, %v7538_v52  ;;  %2931 = vrot.lane.b32.xlu1 %v12459_v63, %s7789_s10  ;;  %vm12611_vm2 = vcmp.lt.f32.partialorder %v4611_v33, 0.0004427343  ;;  %v7542_v22 = vpop.eup %7541  ;;  %v6319_v34 = vld [vmem:[#allocation2 + $0x110] sm:$0xff] }
 0x502   :  { %v12597_v31 = vmul.f32 %v2880_v10, %v14860_v60  ;;  %vm12615_vm3 = vcmp.lt.f32.partialorder %v4620_v40, 0.0004427343  ;;  %v6478_v14 = vsel %vm42_vm15, %v6318_v62, 0.0  ;;  %v4650_v19 = vadd.f32 1.0, %v12591_v43  ;;  %6194 = vst.msk [vmem:[#allocation2 + $0x140] sm:$0xff] %vm42_vm15, %v6065_v26  ;;  %v2882_v52 = vpop.permute.xlu0 %2881  ;;  %v6320_v40 = vld [vmem:[#allocation2 + $0x118] sm:$0xff] }
 0x503   :  { %v4613_v32 = vsel %vm12611_vm2, %v4610_v55, %v4607_v35  ;;  %v4619_v63 = vmul.f32 %v12403_v18, %v4618_v49  ;;  %v6479_v36 = vadd.f32 %v6478_v14, %v6477_v45  ;;  %7547 = vlog2.f32 %v4641_v15  ;;  %5779 = vrot.lane.b32.xlu0 %v12503_v48, %s7789_s10 }
 0x504   :  { %v4627_v33 = vadd.f32 1.0, %v4626_v50  ;;  %v3428_v60 = vand.u32 2147483647, %v12597_v31  ;;  %v12628_v62 = vmul.f32 %v2882_v52, %v14147_v21  ;;  %v2534_v26 = vunpack.c.h.bf16 %v12603_v6  ;;  %v7544_v52 = vpop.eup %7543 }
 0x505   :  { %v4622_v18 = vsel %vm12615_vm3, %v4619_v63, %v4616_v54  ;;  %v4629_v45 = vand.u32 2147483647, %v12437_v56  ;;  %v4635_v49 = vmul.f32 -0.5, %v12476_v37  ;;  %v14865_v35 = vunpack.c.h.bf16 %v12283_v27  ;;  %2933 = vrot.lane.b32.xlu1 %v12419_v38, %s7789_s10  ;;  %v6321_v38 = vld [vmem:[#allocation2 + $0x120] sm:$0xff] }
 0x506   :  { %v6480_v50 = vsel %vm42_vm15, %v6319_v34, 0.0  ;;  %v4625_v55 = vmul.f32 0.6931472, %v7542_v22  ;;  %7549 = vlog2.f32 %v4650_v19  ;;  %v3429_v48 = vand.u32 2147483647, %v12628_v62  ;;  %v2884_v27 = vpop.permute.xlu0 %2883 }
 0x507   :  { %v12639_v15 = vand.u32 2147483647, %v14865_v35  ;;  %v12645_v10 = vadd.f32 %v4613_v32, %v3293_v2  ;;  %v6481_v54 = vadd.f32 %v6480_v50, %v6479_v36  ;;  %v6482_v57 = vsel %vm42_vm15, %v6320_v40, 0.0  ;;  %5781 = vrot.lane.b32.xlu0 %v12507_v5, %s7789_s10 }
 0x508   :  { %v14866_v14 = vunpack.c.l.bf16 %v12414_v58  ;;  %v4628_v35 = vmul.f32 %v12437_v56, %v4627_v33  ;;  %v3556_v21 = vsub.f32 0.0, %v3428_v60  ;;  %v3557_v34 = vsub.f32 0.0, %v3429_v48  ;;  %v5171_v56 = vld [vmem:[#allocation2 + $0x150] sm:$0xff] }
 0x509   :  { %v12655_v19 = vmul.f32 %v2884_v27, %v2534_v26  ;;  %v12659_v2 = vadd.f32 %v4622_v18, %v3294_v4  ;;  %v3295_v22 = vmax.f32 %v12224_v29, 0.0  ;;  %vm12662_vm5 = vcmp.lt.f32.partialorder %v4629_v45, 0.0004427343  ;;  %2935 = vrot.lane.b32.xlu1 %v12576_v47, %s7789_s10  ;;  %v14869_v60 = vld [vmem:[#allocation84_spill] sm:$0xff] }
 0x50a   :  { %v12650_v63 = vand.u32 2147483647, %v14866_v14  ;;  %v4636_v36 = vadd.f32 1.0, %v4635_v49  ;;  %v4631_v33 = vsel %vm12662_vm5, %v4628_v35, %v4625_v55  ;;  %v6483_v40 = vadd.f32 %v6482_v57, %v6481_v54  ;;  %v5726_v49 = vpop.permute.xlu0 %5725  ;;  %v12683_v55 = vld [vmem:[%s14074_s0 + $0x178] sm:$0xff]  }
 0x50b   :  { %v2435_v5 = vadd.f32 %v14808_v41, %v14869_v60  ;;  %v4638_v4 = vand.u32 2147483647, %v12476_v37  ;;  %v3296_v29 = vmax.f32 %v12257_v1, 0.0  ;;  %v4634_v18 = vmul.f32 0.6931472, %v7544_v52  ;;  %v12675_v48 = vpop.eup %7545  ;;  %5783 = vrot.lane.b32.xlu0 %v12514_v53, %s7789_s10 }
 0x50c   :  { %v6484_v45 = vsel %vm42_vm15, %v6321_v38, 0.0  ;;  %v3777_v50 = vmul.f32 1.442695, %v3557_v34  ;;  %v3775_v47 = vmul.f32 1.442695, %v3556_v21  ;;  %v6067_v27 = vadd.f32 %v5726_v49, %v5171_v56  ;;  %v6322_v34 = vld [vmem:[#allocation2 + $0x128] sm:$0xff] }
 0x50d   :  { %v3430_v14 = vand.u32 2147483647, %v12655_v19  ;;  %v2535_v1 = vunpack.c.l.bf16 %v12683_v55  ;;  %v12686_v54 = vadd.f32 %v4631_v33, %v3295_v22  ;;  %v4637_v57 = vmul.f32 %v12476_v37, %v4636_v36  ;;  %2937 = vrot.lane.b32.xlu1 %v12448_v24, %s7789_s10 }
 0x50e   :  { %v4644_v52 = vmul.f32 -0.5, %v12560_v16  ;;  %v14870_v21 = vunpack.c.h.bf16 %v12414_v58  ;;  %vm12696_vm6 = vcmp.lt.f32.partialorder %v4638_v4, 0.0004427343  ;;  %v6485_v38 = vadd.f32 %v6484_v45, %v6483_v40  ;;  %6196 = vst.msk [vmem:[#allocation2 + $0x150] sm:$0xff] %vm42_vm15, %v6067_v27  ;;  %v2886_v56 = vpop.permute.xlu0 %2885 }
 0x50f   :  { %v14873_v22 = vunpack.c.l.bf16 %v12603_v6  ;;  %v12707_v58 = vmul.f32 %v12465_v0, %v12562_v51  ;;  %v4640_v37 = vsel %vm12696_vm6, %v4637_v57, %v4634_v18  ;;  %v2436_v24 = vadd.f32 %v14808_v41, %v11978_v59  ;;  %5785 = vrot.lane.b32.xlu0 %v12519_v11, %s7789_s10  ;;  %v5172_v18 = vld [vmem:[#allocation2 + $0x158] sm:$0xff] }
 0x510   :  { %v12692_v35 = vand.u32 2147483647, %v14870_v21  ;;  %v4659_v36 = vadd.f32 1.0, %v12675_v48  ;;  %7551 = vpow2.f32 %v3777_v50  ;;  %v7548_v33 = vpop.eup %7547  ;;  %v4653_v40 = vmul.f32 -0.5, %v12591_v43 }
 0x511   :  { %v12702_v32 = vand.u32 2147483647, %v14873_v22  ;;  %7553 = vpow2.f32 %v3775_v47  ;;  %v3558_v60 = vsub.f32 0.0, %v3430_v14  ;;  %v12715_v4 = vmul.f32 %v2886_v56, %v2535_v1  ;;  %2939 = vrot.lane.b32.xlu1 %v12455_v46, %s7789_s10 }
 0x512   :  { %v4645_v0 = vadd.f32 1.0, %v4644_v52  ;;  %v6486_v51 = vsel %vm42_vm15, %v6322_v34, 0.0  ;;  %v12722_v59 = vand.u32 2147483647, %v2534_v26  ;;  %v2536_v45 = vunpack.c.h.bf16 %v12683_v55  ;;  %v5728_v26 = vpop.permute.xlu0 %5727 }
 0x513   :  { %v12727_v50 = vadd.f32 %v4640_v37, %v3296_v29  ;;  %v3297_v49 = vmax.f32 %v12310_v23, 0.0  ;;  %v4647_v47 = vand.u32 2147483647, %v12560_v16  ;;  %v12731_v11 = vand.u32 2147483647, %v2535_v1  ;;  %v7550_v14 = vpop.eup %7549  ;;  %v6323_v29 = vld [vmem:[#allocation2 + $0x130] sm:$0xff]  ;;  %5787 = vrot.lane.b32.xlu0 %v12523_v28, %s7789_s10 }
 0x514   :  { %v4643_v27 = vmul.f32 0.6931472, %v7548_v33  ;;  %7555 = vlog2.f32 %v4659_v36  ;;  %v3431_v6 = vand.u32 2147483647, %v12715_v4  ;;  %v12736_v46 = vand.u32 2147483647, %v2536_v45 }
 0x515   :  { %v6487_v57 = vadd.f32 %v6486_v51, %v6485_v38  ;;  %v4654_v52 = vadd.f32 1.0, %v4653_v40  ;;  %v3779_v21 = vmul.f32 1.442695, %v3558_v60  ;;  %v6068_v53 = vadd.f32 %v5728_v26, %v5172_v18  ;;  %2941 = vrot.lane.b32.xlu1 %v2435_v5, %s7789_s10  ;;  %v5173_v37 = vld [vmem:[#allocation2 + $0x160] sm:$0xff]  ;;  %v5170_v18 = vld [vmem:[#allocation2 + $0x148] sm:$0xff] }
 0x516   :  { %v4646_v23 = vmul.f32 %v12560_v16, %v4645_v0  ;;  %v2437_v1 = vadd.f32 %v14808_v41, %v12091_v7  ;;  %v4656_v34 = vand.u32 2147483647, %v12591_v43  ;;  %v3559_v22 = vsub.f32 0.0, %v3431_v6  ;;  %v12754_v28 = vld [vmem:[%s14074_s0 + $0x180] sm:$0xff]   ;;  %v5730_v40 = vpop.permute.xlu0 %5729 }
 0x517   :  { %vm12745_vm7 = vcmp.lt.f32.partialorder %v4647_v47, 0.0004427343  ;;  %v3298_v36 = vmax.f32 %v12333_v8, 0.0  ;;  %v4652_v56 = vmul.f32 0.6931472, %v7550_v14  ;;  %6197 = vst.msk [vmem:[#allocation2 + $0x158] sm:$0xff] %vm42_vm15, %v6068_v53  ;;  %v14154_v7 = vunpack.c.l.bf16 %v12754_v28  ;;  %5789 = vrot.lane.b32.xlu0 %v12527_v13, %s7789_s10 }
 0x518   :  { %v4649_v16 = vsel %vm12745_vm7, %v4646_v23, %v4643_v27  ;;  %v6488_v5 = vsel %vm42_vm15, %v6323_v29, 0.0  ;;  %v3781_v33 = vmul.f32 1.442695, %v3559_v22  ;;  %v12762_v8 = vmul.f32 %v12473_v9, %v12645_v10  ;;  %v5174_v9 = vld [vmem:[#allocation2 + $0x168] sm:$0xff]  ;;  %v6324_v23 = vld [vmem:[#allocation2 + $0x138] sm:$0xff] }
 0x519   :  { %v4655_v60 = vmul.f32 %v12591_v43, %v4654_v52  ;;  %7557 = vpow2.f32 %v3779_v21  ;;  %v6069_v0 = vadd.f32 %v5730_v40, %v5173_v37  ;;  %v12769_v51 = vand.u32 2147483647, %v14154_v7  ;;  %2943 = vrot.lane.b32.xlu1 %v2436_v24, %s7789_s10  ;;  %v12780_v43 = vld [vmem:[%s14074_s0 + $0x188] sm:$0xff]   ;;  %v12790_v24 = vld [vmem:[%s14074_s0 + $0x190] sm:$0xff]   ;;  %v6325_v7 = vld [vmem:[#allocation2 + $0x140] sm:$0xff] }
 0x51a   :  { %vm12771_vm8 = vcmp.lt.f32.partialorder %v4656_v34, 0.0004427343  ;;  %7559 = vpow2.f32 %v3781_v33  ;;  %v14153_v10 = vunpack.c.h.bf16 %v12754_v28  ;;  %v14152_v13 = vunpack.c.l.bf16 %v12780_v43  ;;  %v5732_v52 = vpop.permute.xlu0 %5731 }
 0x51b   :  { %v5089_v47 = vadd.f32 %v4649_v16, %v3297_v49  ;;  %v4658_v14 = vsel %vm12771_vm8, %v4655_v60, %v4652_v56  ;;  %6198 = vst.msk [vmem:[#allocation2 + $0x160] sm:$0xff] %vm42_vm15, %v6069_v0  ;;  %v14151_v27 = vunpack.c.h.bf16 %v12780_v43  ;;  %v14150_v6 = vunpack.c.l.bf16 %v12790_v24  ;;  %5791 = vrot.lane.b32.xlu0 %v12531_v39, %s7789_s10  ;;  %v12823_v16 = vpop.xlane.xlu1 %2307  ;;  %v5175_v39 = vld [vmem:[#allocation2 + $0x170] sm:$0xff] }
 0x51c   :  { %v6489_v26 = vadd.f32 %v6488_v5, %v6487_v57  ;;  %v12795_v29 = vand.u32 2147483647, %v14153_v10  ;;  %v12799_v49 = vand.u32 2147483647, %v14152_v13  ;;  %v12803_v21 = vmul.f32 %v12485_v30, %v12659_v2  ;;  %v12829_v5 = vld [vmem:[%s14074_s0 + $0x198] sm:$0xff]  }
 0x51d   :  { %v12805_v53 = vpop.eup %7551  ;;  %v6070_v34 = vadd.f32 %v5732_v52, %v5174_v9  ;;  %v12811_v57 = vand.u32 2147483647, %v14151_v27  ;;  %v12815_v22 = vand.u32 2147483647, %v14150_v6  ;;  %v14149_v37 = vunpack.c.h.bf16 %v12790_v24  ;;  %2945 = vrot.lane.b32.xlu1 %v2437_v1, %s7789_s10 }
 0x51e   :  { %v12818_v38 = vpop.eup %7553  ;;  %v5090_v30 = vadd.f32 %v4658_v14, %v3298_v36  ;;  %v2438_v2 = vadd.f32 %v14808_v41, %v12350_v12  ;;  %v4662_v56 = vmul.f32 -0.5, %v12675_v48  ;;  %v14148_v33 = vunpack.c.l.bf16 %v12829_v5  ;;  %v5734_v9 = vpop.permute.xlu0 %5733 }
 0x51f   :  { %v3299_v40 = vmax.f32 %v12443_v20, 0.0  ;;  %6199 = vst.msk [vmem:[#allocation2 + $0x168] sm:$0xff] %vm42_vm15, %v6070_v34  ;;  %v12836_v12 = vmul.f32 %v12489_v25, %v12686_v54  ;;  %v12840_v36 = vand.u32 2147483647, %v14149_v37  ;;  %v12843_v1 = vmul.f32 %v12580_v17, %v5089_v47  ;;  %5793 = vrot.lane.b32.xlu0 %v12540_v61, %s7789_s10  ;;  %v12862_v47 = vld [vmem:[%s14074_s0 + $0x1a0] sm:$0xff]   ;;  %v5724_v6 = vpop.permute.xlu1 %5723 }
 0x520   :  { %v6490_v60 = vsel %vm42_vm15, %v6324_v23, 0.0  ;;  %v4677_v0 = vadd.f32 1.0, %v12805_v53  ;;  %v12849_v14 = vand.u32 2147483647, %v14148_v33  ;;  %v14155_v25 = vunpack.c.h.bf16 %v12829_v5 }
 0x521   :  { %v7556_v54 = vpop.eup %7555  ;;  %v4668_v52 = vadd.f32 1.0, %v12818_v38  ;;  %v6071_v34 = vadd.f32 %v5734_v9, %v5175_v39  ;;  %v12857_v17 = vmul.f32 %v12566_v42, %v12727_v50  ;;  %v14158_v23 = vunpack.c.l.bf16 %v12862_v47  ;;  %2947 = vrot.lane.b32.xlu1 %v2438_v2, %s7789_s10  ;;  %v5176_v39 = vld [vmem:[#allocation2 + $0x178] sm:$0xff]  ;;  %v14879_v2 = vld [vmem:[#allocation70_spill] sm:$0xff] }
 0x522   :  { %v4663_v33 = vadd.f32 1.0, %v4662_v56  ;;  %v4665_v37 = vand.u32 2147483647, %v12675_v48  ;;  %v12869_v61 = vand.u32 2147483647, %v14155_v25  ;;  %v12872_v42 = vmul.f32 %v12639_v15, %v5090_v30  ;;  %v5736_v25 = vpop.permute.xlu0 %5735  ;;  %v12885_v15 = vld [vmem:[%s14074_s0 + $0x1a8] sm:$0xff]  }
 0x523   :  { %v6491_v50 = vadd.f32 %v6490_v60, %v6489_v26  ;;  %v6066_v9 = vadd.f32 %v5724_v6, %v5170_v18  ;;  %6200 = vst.msk [vmem:[#allocation2 + $0x170] sm:$0xff] %vm42_vm15, %v6071_v34  ;;  %v12877_v56 = vand.u32 2147483647, %v14158_v23  ;;  %v14157_v27 = vunpack.c.h.bf16 %v12862_v47  ;;  %v14880_v60 = vld [vmem:[#allocation12_spill] sm:$0xff] }
 0x524   :  { %v4661_v13 = vmul.f32 0.6931472, %v7556_v54  ;;  %v2439_v10 = vadd.f32 %v14808_v41, %v14879_v2  ;;  %7561 = vlog2.f32 %v4677_v0  ;;  %v14156_v6 = vunpack.c.l.bf16 %v12885_v15  ;;  %5797 = vrot.lane.b32.xlu0 %v14880_v60, %s7789_s10  ;;  %v2888_v2 = vpop.permute.xlu1 %2887 }
 0x525   :  { %14878 = vst [vmem:[#allocation15_spill] sm:$0xff] %v12877_v56  ;;  %7563 = vlog2.f32 %v4668_v52  ;;  %6195 = vst.msk [vmem:[#allocation2 + $0x148] sm:$0xff] %vm42_vm15, %v6066_v9  ;;  %v6072_v30 = vadd.f32 %v5736_v25, %v5176_v39  ;;  %v12894_v0 = vand.u32 2147483647, %v14157_v27  ;;  %v4664_v54 = vmul.f32 %v12675_v48, %v4663_v33  ;;  %v5177_v52 = vld [vmem:[#allocation2 + $0x180] sm:$0xff] }
 0x526   :  { %v12896_v18 = vpop.eup %7557  ;;  %vm12899_vm9 = vcmp.lt.f32.partialorder %v4665_v37, 0.0004427343  ;;  %2949 = vrot.lane.b32.xlu1 %v2439_v10, %s7789_s10  ;;  %v12906_v25 = vand.u32 2147483647, %v14156_v6  ;;  %v14159_v39 = vunpack.c.h.bf16 %v12885_v15  ;;  %v6492_v60 = vsel %vm42_vm15, %v6325_v7, 0.0  ;;  %v12921_v10 = vld [vmem:[%s14074_s0 + $0x1b0] sm:$0xff]   ;;  %v5738_v55 = vpop.permute.xlu0 %5737 }
 0x527   :  { %v12909_v9 = vpop.eup %7559  ;;  %v12915_v37 = vmul.f32 %v2888_v2, %v2536_v45  ;;  %6201 = vst.msk [vmem:[#allocation2 + $0x178] sm:$0xff] %vm42_vm15, %v6072_v30  ;;  %v14160_v33 = vunpack.c.l.bf16 %v12921_v10  ;;  %v4667_v6 = vsel %vm12899_vm9, %v4664_v54, %v4661_v13  ;;  %v2440_v27 = vadd.f32 %v14808_v41, %v12823_v16 }
 0x528   :  { %14883 = vst [vmem:[#allocation37_spill] sm:$0xff] %v12906_v25  ;;  %v4695_v7 = vadd.f32 1.0, %v12909_v9  ;;  %v14161_v45 = vunpack.c.h.bf16 %v12921_v10  ;;  %v4671_v30 = vmul.f32 -0.5, %v12818_v38  ;;  %v4686_v2 = vadd.f32 1.0, %v12896_v18  ;;  %5801 = vrot.lane.b32.xlu0 %v12550_v44, %s7789_s10  ;;  %v2890_v54 = vpop.permute.xlu1 %2889 }
 0x529   :  { %v3432_v23 = vand.u32 2147483647, %v12915_v37  ;;  %v6073_v26 = vadd.f32 %v5738_v55, %v5177_v52  ;;  %v12939_v41 = vand.u32 2147483647, %v14159_v39  ;;  %v12943_v16 = vand.u32 2147483647, %v14160_v33 }
 0x52a   :  { %7565 = vlog2.f32 %v4695_v7  ;;  %2951 = vrot.lane.b32.xlu1 %v2440_v27, %s7789_s10  ;;  %v5091_v34 = vadd.f32 %v4667_v6, %v3299_v40  ;;  %v14886_v44 = vunpack.c.l.bf16 %v12754_v28  ;;  %v5178_v7 = vld [vmem:[#allocation2 + $0x188] sm:$0xff]  ;;  %v12954_v27 = vand.u32 2147483647, %v14161_v45 }
 0x52b   :  { %14884 = vst [vmem:[#allocation14_spill] sm:$0xff] %v12939_v41  ;;  %14885 = vst [vmem:[#allocation54_spill] sm:$0xff] %v12943_v16  ;;  %v3560_v52 = vsub.f32 0.0, %v3432_v23  ;;  %v4674_v39 = vand.u32 2147483647, %v12818_v38  ;;  %v6493_v13 = vadd.f32 %v6492_v60, %v6491_v50  ;;  %v4680_v33 = vmul.f32 -0.5, %v12805_v53  ;;  %v5740_v23 = vpop.permute.xlu0 %5739 }
 0x52c   :  { %v12949_v55 = vmul.f32 %v2890_v54, %v14886_v44  ;;  %6202 = vst.msk [vmem:[#allocation2 + $0x180] sm:$0xff] %vm42_vm15, %v6073_v26  ;;  %14887 = vst [vmem:[#allocation94_spill] sm:$0xff] %v12954_v27  ;;  %v6326_v40 = vld [vmem:[#allocation2 + $0x148] sm:$0xff]  ;;  %v4672_v6 = vadd.f32 1.0, %v4671_v30  ;;  %7567 = vlog2.f32 %v4686_v2  ;;  %5805 = vrot.lane.b32.xlu0 %v12707_v58, %s7789_s10  ;;  %v6327_v26 = vld [vmem:[#allocation2 + $0x150] sm:$0xff]  ;;  %v2892_v27 = vpop.permute.xlu1 %2891  ;;  %v6074_v50 = vadd.f32 %v5740_v23, %v5178_v7 }
 0x52d   :  { %v6494_v54 = vsel %vm42_vm15, %v6326_v40, 0.0  ;;  %v3783_v44 = vmul.f32 1.442695, %v3560_v52  ;;  %v5179_v60 = vld [vmem:[#allocation2 + $0x190] sm:$0xff]  ;;  %v12968_v30 = vld [vmem:[%s14074_s0 + $0x1b8] sm:$0xff]   ;;  %v14888_v58 = vunpack.c.h.bf16 %v12754_v28  ;;  %v12977_v40 = vmul.f32 %v12650_v63, %v5091_v34 }
 0x52e   :  { %v6495_v45 = vadd.f32 %v6494_v54, %v6493_v13  ;;  %v3433_v48 = vand.u32 2147483647, %v12949_v55  ;;  %5795 = vrot.lane.b32.xlu1 %v12554_v3, %s7789_s10  ;;  %v14162_v2 = vunpack.c.l.bf16 %v12968_v30  ;;  %v4683_v52 = vand.u32 2147483647, %v12805_v53  ;;  %6203 = vst.msk [vmem:[#allocation2 + $0x188] sm:$0xff] %vm42_vm15, %v6074_v50  ;;  %v14892_v28 = vld [vmem:[#allocation67_spill] sm:$0xff] }
 0x52f   :  { %7569 = vpow2.f32 %v3783_v44  ;;  %v12974_v13 = vmul.f32 %v2892_v27, %v14888_v58  ;;  %vm12979_vm10 = vcmp.lt.f32.partialorder %v4674_v39, 0.0004427343  ;;  %v4681_v7 = vadd.f32 1.0, %v4680_v33  ;;  %v5742_v54 = vpop.permute.xlu0 %5741  ;;  %v6328_v39 = vld [vmem:[#allocation2 + $0x158] sm:$0xff]  ;;  %v14903_v3 = vld [vmem:[#allocation6_spill] sm:$0xff] }
 0x530   :  { %v3561_v23 = vsub.f32 0.0, %v3433_v48  ;;  %v12986_v20 = vand.u32 2147483647, %v14162_v2  ;;  %v12990_v44 = vmul.f32 %v12818_v38, %v4672_v6  ;;  %v6496_v63 = vsel %vm42_vm15, %v6327_v26, 0.0  ;;  %5809 = vrot.lane.b32.xlu0 %v12762_v8, %s7789_s10  ;;  %v5180_v38 = vld [vmem:[#allocation2 + $0x198] sm:$0xff] }
 0x531   :  { %v7562_v27 = vpop.eup %7561  ;;  %v3434_v34 = vand.u32 2147483647, %v12974_v13  ;;  %v6075_v33 = vadd.f32 %v5742_v54, %v5179_v60  ;;  %v4698_v50 = vmul.f32 -0.5, %v12909_v9  ;;  %v6497_v58 = vadd.f32 %v6496_v63, %v6495_v45  ;;  %v13015_v45 = vld [vmem:[%s14074_s0 + $0x1c0] sm:$0xff]  }
 0x532   :  { %14891 = vst [vmem:[#allocation7_spill] sm:$0xff] %v12986_v20  ;;  %v7564_v48 = vpop.eup %7563  ;;  %v3785_v2 = vmul.f32 1.442695, %v3561_v23  ;;  %v2894_v20 = vpop.permute.xlu1 %2893  ;;  %5799 = vrot.lane.b32.xlu1 %v14892_v28, %s7789_s10  ;;  %v14893_v6 = vunpack.c.h.bf16 %v12968_v30  ;;  %vm13003_vm11 = vcmp.lt.f32.partialorder %v4683_v52, 0.0004427343  ;;  %v14897_v8 = vunpack.c.l.bf16 %v12780_v43 }
 0x533   :  { %v3562_v60 = vsub.f32 0.0, %v3434_v34  ;;  %6204 = vst.msk [vmem:[#allocation2 + $0x190] sm:$0xff] %vm42_vm15, %v6075_v33  ;;  %v4679_v28 = vmul.f32 0.6931472, %v7562_v27  ;;  %v4682_v52 = vmul.f32 %v12805_v53, %v4681_v7  ;;  %v6498_v63 = vsel %vm42_vm15, %v6328_v39, 0.0  ;;  %v5744_v34 = vpop.permute.xlu0 %5743  ;;  %v14898_v7 = vld [vmem:[#allocation16_spill] sm:$0xff] }
 0x534   :  { %v13001_v26 = vand.u32 2147483647, %v14893_v6  ;;  %v13009_v54 = vmul.f32 %v2894_v20, %v14897_v8  ;;  %v6329_v6 = vld [vmem:[#allocation2 + $0x160] sm:$0xff]  ;;  %7571 = vpow2.f32 %v3785_v2  ;;  %v6076_v33 = vadd.f32 %v5744_v34, %v5180_v38  ;;  %5813 = vrot.lane.b32.xlu0 %v12836_v12, %s7789_s10 }
 0x535   :  { %v3787_v20 = vmul.f32 1.442695, %v3562_v60  ;;  %v4689_v41 = vmul.f32 -0.5, %v12896_v18  ;;  %v4692_v23 = vand.u32 2147483647, %v12896_v18  ;;  %v4699_v27 = vadd.f32 1.0, %v4698_v50 }
 0x536   :  { %14894 = vst [vmem:[#allocation46_spill] sm:$0xff] %v13001_v26  ;;  %v4670_v26 = vmul.f32 0.6931472, %v7564_v48  ;;  %v3435_v8 = vand.u32 2147483647, %v13009_v54  ;;  %v6499_v25 = vadd.f32 %v6498_v63, %v6497_v58  ;;  %v2896_v53 = vpop.permute.xlu1 %2895  ;;  %5803 = vrot.lane.b32.xlu1 %v14898_v7, %s7789_s10  ;;  %v5181_v2 = vld [vmem:[#allocation2 + $0x1a0] sm:$0xff]  ;;  %v14899_v38 = vunpack.c.h.bf16 %v12780_v43 }
 0x537   :  { %v7566_v39 = vpop.eup %7565  ;;  %v4701_v48 = vand.u32 2147483647, %v12909_v9  ;;  %7573 = vpow2.f32 %v3787_v20  ;;  %6205 = vst.msk [vmem:[#allocation2 + $0x198] sm:$0xff] %vm42_vm15, %v6076_v33  ;;  %v4685_v12 = vsel %vm13003_vm11, %v4682_v52, %v4679_v28  ;;  %v6500_v58 = vsel %vm42_vm15, %v6329_v6, 0.0  ;;  %v5746_v63 = vpop.permute.xlu0 %5745  ;;  %v6330_v33 = vld [vmem:[#allocation2 + $0x168] sm:$0xff] }
 0x538   :  { %v3563_v60 = vsub.f32 0.0, %v3435_v8  ;;  %v13030_v34 = vmul.f32 %v2896_v53, %v14899_v38  ;;  %v4697_v50 = vmul.f32 0.6931472, %v7566_v39  ;;  %v14900_v7 = vunpack.c.l.bf16 %v13015_v45  ;;  %5817 = vrot.lane.b32.xlu0 %v12843_v1, %s7789_s10 }
 0x539   :  { %v4676_v20 = vsel %vm12979_vm10, %v12990_v44, %v4670_v26  ;;  %v6077_v53 = vadd.f32 %v5746_v63, %v5181_v2  ;;  %v7568_v16 = vpop.eup %7567  ;;  %v4690_v28 = vadd.f32 1.0, %v4689_v41  ;;  %vm13046_vm4 = vcmp.lt.f32.partialorder %v4692_v23, 0.0004427343  ;;  %v5182_v41 = vld [vmem:[#allocation2 + $0x1a8] sm:$0xff] }
 0x53a   :  { %v13038_v56 = vand.u32 2147483647, %v14900_v7  ;;  %v3789_v43 = vmul.f32 1.442695, %v3563_v60  ;;  %v3436_v8 = vand.u32 2147483647, %v13030_v34  ;;  %v4700_v6 = vmul.f32 %v12909_v9, %v4699_v27  ;;  %v2898_v38 = vpop.permute.xlu1 %2897  ;;  %5807 = vrot.lane.b32.xlu1 %v14903_v3, %s7789_s10 }
 0x53b   :  { %v6501_v39 = vadd.f32 %v6500_v58, %v6499_v25  ;;  %v14904_v44 = vmax.f32 %v12628_v62, 0.0  ;;  %vm13055_vm12 = vcmp.lt.f32.partialorder %v4701_v48, 0.0004427343  ;;  %6206 = vst.msk [vmem:[#allocation2 + $0x1a0] sm:$0xff] %vm42_vm15, %v6077_v53  ;;  %v14166_v23 = vunpack.c.h.bf16 %v13015_v45  ;;  %v6331_v53 = vld [vmem:[#allocation2 + $0x170] sm:$0xff] }
 0x53c   :  { %v3564_v1 = vsub.f32 0.0, %v3436_v8  ;;  %v13061_v9 = vpop.eup %7569  ;;  %v14907_v25 = vmax.f32 %v12597_v31, 0.0  ;;  %v4703_v60 = vsel %vm13055_vm12, %v4700_v6, %v4697_v50  ;;  %7575 = vpow2.f32 %v3789_v43  ;;  %5821 = vrot.lane.b32.xlu0 %v12977_v40, %s7789_s10 }
 0x53d   :  { %v5093_v26 = vadd.f32 %v4685_v12, %v14904_v44  ;;  %v14908_v62 = vunpack.c.l.bf16 %v12790_v24  ;;  %v5748_v12 = vpop.permute.xlu0 %5747  ;;  %v4688_v58 = vmul.f32 0.6931472, %v7568_v16  ;;  %v6502_v63 = vsel %vm42_vm15, %v6330_v33, 0.0  ;;  %v5183_v16 = vld [vmem:[#allocation2 + $0x1b0] sm:$0xff] }
 0x53e   :  { %v5092_v27 = vadd.f32 %v4676_v20, %v14907_v25  ;;  %v4704_v7 = vadd.f32 1.0, %v13061_v9  ;;  %v3791_v8 = vmul.f32 1.442695, %v3564_v1  ;;  %v4691_v31 = vmul.f32 %v12896_v18, %v4690_v28  ;;  %v2900_v43 = vpop.permute.xlu1 %2899  ;;  %5811 = vrot.lane.b32.xlu1 %v12803_v21, %s7789_s10 }
 0x53f   :  { %v13069_v48 = vmul.f32 %v2898_v38, %v14908_v62  ;;  %v6503_v20 = vadd.f32 %v6502_v63, %v6501_v39  ;;  %v6078_v6 = vadd.f32 %v5748_v12, %v5182_v41  ;;  %v14909_v33 = vmax.f32 %v12715_v4, 0.0  ;;  %v13094_v4 = vld [vmem:[%s14074_s0 + $0x1c8] sm:$0xff]  }
 0x540   :  { %7577 = vlog2.f32 %v4704_v7  ;;  %v5477_v3 = vmul.f32 %v12702_v32, %v5093_v26  ;;  %v13084_v40 = vand.u32 2147483647, %v14166_v23  ;;  %v14910_v28 = vunpack.c.h.bf16 %v12790_v24  ;;  %v6332_v24 = vld [vmem:[#allocation2 + $0x178] sm:$0xff] }
 0x541   :  { %v3437_v50 = vand.u32 2147483647, %v13069_v48  ;;  %v5095_v38 = vadd.f32 %v4703_v60, %v14909_v33  ;;  %7579 = vpow2.f32 %v3791_v8  ;;  %6207 = vst.msk [vmem:[#allocation2 + $0x1a8] sm:$0xff] %vm42_vm15, %v6078_v6  ;;  %v5750_v21 = vpop.permute.xlu0 %5749  ;;  %v14165_v32 = vunpack.c.l.bf16 %v13094_v4  ;;  %v13097_v44 = vpop.eup %7571  ;;  %v5184_v7 = vld [vmem:[#allocation2 + $0x1b8] sm:$0xff]  ;;  %v6334_v33 = vld [vmem:[#allocation2 + $0x188] sm:$0xff] }
 0x542   :  { %v13088_v39 = vmul.f32 %v2900_v43, %v14910_v28  ;;  %v4694_v26 = vsel %vm13046_vm4, %v4691_v31, %v4688_v58  ;;  %v6504_v2 = vsel %vm42_vm15, %v6331_v53, 0.0  ;;  %v6079_v1 = vadd.f32 %v5750_v21, %v5183_v16  ;;  %5825 = vrot.lane.b32.xlu0 %v5477_v3, %s7789_s10  ;;  %v2902_v12 = vpop.permute.xlu1 %2901  ;;  %5815 = vrot.lane.b32.xlu1 %v12857_v17, %s7789_s10 }
 0x543   :  { %v3565_v18 = vsub.f32 0.0, %v3437_v50  ;;  %v5476_v41 = vmul.f32 %v12692_v35, %v5092_v27  ;;  %v6505_v25 = vadd.f32 %v6504_v2, %v6503_v20  ;;  %v4713_v62 = vadd.f32 1.0, %v13097_v44  ;;  %v6333_v50 = vld [vmem:[#allocation2 + $0x180] sm:$0xff] }
 0x544   :  { %v13110_v52 = vand.u32 2147483647, %v14165_v32  ;;  %v3438_v63 = vand.u32 2147483647, %v13088_v39  ;;  %6208 = vst.msk [vmem:[#allocation2 + $0x1b0] sm:$0xff] %vm42_vm15, %v6079_v1  ;;  %v5479_v35 = vmul.f32 %v12731_v11, %v5095_v38  ;;  %v14164_v27 = vunpack.c.h.bf16 %v13094_v4  ;;  %v13116_v8 = vpop.eup %7573 }
 0x545   :  { %v3793_v58 = vmul.f32 1.442695, %v3565_v18  ;;  %v14912_v31 = vmax.f32 %v12655_v19, 0.0  ;;  %v6506_v17 = vsel %vm42_vm15, %v6332_v24, 0.0  ;;  %7581 = vlog2.f32 %v4713_v62  ;;  %v5752_v43 = vpop.permute.xlu0 %5751  ;;  %v13140_v24 = vld [vmem:[%s14074_s0 + $0x1d0] sm:$0xff]  }
 0x546   :  { %14911 = vst [vmem:[#allocation91_spill] sm:$0xff] %v13110_v52  ;;  %v4707_v6 = vmul.f32 -0.5, %v13061_v9  ;;  %v4722_v16 = vadd.f32 1.0, %v13116_v8  ;;  %5829 = vrot.lane.b32.xlu0 %v5479_v35, %s7789_s10  ;;  %v13127_v11 = vand.u32 2147483647, %v14164_v27  ;;  %v6507_v19 = vadd.f32 %v6506_v17, %v6505_v25  ;;  %v2904_v28 = vpop.permute.xlu1 %2903  ;;  %5819 = vrot.lane.b32.xlu1 %v12872_v42, %s7789_s10  ;;  %v6335_v25 = vld [vmem:[#allocation2 + $0x190] sm:$0xff] }
 0x547   :  { %v5094_v20 = vadd.f32 %v4694_v26, %v14912_v31  ;;  %7583 = vpow2.f32 %v3793_v58  ;;  %v3566_v38 = vsub.f32 0.0, %v3438_v63  ;;  %v14914_v3 = vunpack.c.l.bf16 %v12829_v5 }
 0x548   :  { %14913 = vst [vmem:[#allocation13_spill] sm:$0xff] %v13127_v11  ;;  %v6080_v21 = vadd.f32 %v5752_v43, %v5184_v7  ;;  %v6508_v26 = vsel %vm42_vm15, %v6333_v50, 0.0  ;;  %7585 = vlog2.f32 %v4722_v16  ;;  %v14163_v1 = vunpack.c.l.bf16 %v13140_v24  ;;  %v5189_v11 = vld [vmem:[#allocation2 + $0x1e0] sm:$0xff] }
 0x549   :  { %v13131_v18 = vmul.f32 %v2902_v12, %v14914_v3  ;;  %v3795_v62 = vmul.f32 1.442695, %v3566_v38  ;;  %v14915_v58 = vunpack.c.h.bf16 %v12829_v5  ;;  %v5754_v63 = vpop.permute.xlu0 %5753  ;;  %v5478_v7 = vmul.f32 %v12722_v59, %v5094_v20  ;;  %v13150_v35 = vpop.eup %7575  ;;  %v5185_v59 = vld [vmem:[#allocation2 + $0x1c0] sm:$0xff]  ;;  %v5186_v20 = vld [vmem:[#allocation2 + $0x1c8] sm:$0xff] }
 0x54a   :  { %6209 = vst.msk [vmem:[#allocation2 + $0x1b8] sm:$0xff] %vm42_vm15, %v6080_v21  ;;  %v4708_v31 = vadd.f32 1.0, %v4707_v6  ;;  %v6510_v17 = vsel %vm42_vm15, %v6334_v33, 0.0  ;;  %v13156_v43 = vand.u32 2147483647, %v14163_v1  ;;  %v6509_v16 = vadd.f32 %v6508_v26, %v6507_v19  ;;  %v2906_v3 = vpop.permute.xlu1 %2905  ;;  %5823 = vrot.lane.b32.xlu1 %v5476_v41, %s7789_s10 }
 0x54b   :  { %v3439_v12 = vand.u32 2147483647, %v13131_v18  ;;  %v13146_v42 = vmul.f32 %v2904_v28, %v14915_v58  ;;  %v4710_v5 = vand.u32 2147483647, %v13061_v9  ;;  %7587 = vpow2.f32 %v3795_v62 }
 0x54c   :  { %14916 = vst [vmem:[#allocation38_spill] sm:$0xff] %v13156_v43  ;;  %v4716_v6 = vmul.f32 -0.5, %v13097_v44  ;;  %v6512_v33 = vsel %vm42_vm15, %v6335_v25, 0.0  ;;  %v4731_v1 = vadd.f32 1.0, %v13150_v35  ;;  %v14917_v26 = vunpack.c.l.bf16 %v12862_v47 }
 0x54d   :  { %v3567_v38 = vsub.f32 0.0, %v3439_v12  ;;  %v7578_v58 = vpop.eup %7577  ;;  %v3440_v19 = vand.u32 2147483647, %v13146_v42  ;;  %v5756_v41 = vpop.permute.xlu0 %5755  ;;  %v4709_v25 = vmul.f32 %v13061_v9, %v4708_v31  ;;  %v6081_v23 = vadd.f32 %v5754_v63, %v5185_v59 }
 0x54e   :  { %v13168_v62 = vmul.f32 %v2906_v3, %v14917_v26  ;;  %v13170_v12 = vpop.eup %7579  ;;  %v4706_v32 = vmul.f32 0.6931472, %v7578_v58  ;;  %v6082_v28 = vadd.f32 %v5756_v41, %v5186_v20  ;;  %vm4711_vm1 = vcmp.lt.f32.partialorder %v4710_v5, 0.0004427343  ;;  %5827 = vrot.lane.b32.xlu1 %v5478_v7, %s7789_s10  ;;  %v6336_v26 = vld [vmem:[#allocation2 + $0x198] sm:$0xff] }
 0x54f   :  { %v3797_v27 = vmul.f32 1.442695, %v3567_v38  ;;  %v6511_v50 = vadd.f32 %v6510_v17, %v6509_v16  ;;  %v4740_v2 = vadd.f32 1.0, %v13170_v12  ;;  %v2908_v38 = vpop.permute.xlu1 %2907  ;;  %v4725_v3 = vmul.f32 -0.5, %v13116_v8  ;;  %6210 = vst.msk [vmem:[#allocation2 + $0x1c0] sm:$0xff] %vm42_vm15, %v6081_v23 }
 0x550   :  { %v4712_v53 = vsel %vm4711_vm1, %v4709_v25, %v4706_v32  ;;  %v3568_v21 = vsub.f32 0.0, %v3440_v19  ;;  %v3441_v60 = vand.u32 2147483647, %v13168_v62  ;;  %6211 = vst.msk [vmem:[#allocation2 + $0x1c8] sm:$0xff] %vm42_vm15, %v6082_v28  ;;  %v14918_v9 = vmax.f32 %v12915_v37, 0.0  ;;  %v6337_v37 = vld [vmem:[#allocation2 + $0x1a0] sm:$0xff] }
 0x551   :  { %7589 = vpow2.f32 %v3797_v27  ;;  %v4717_v31 = vadd.f32 1.0, %v4716_v6  ;;  %v4719_v27 = vand.u32 2147483647, %v13097_v44  ;;  %v5758_v17 = vpop.permute.xlu0 %5757  ;;  %v14919_v16 = vunpack.c.h.bf16 %v12862_v47 }
 0x552   :  { %v5096_v63 = vadd.f32 %v4712_v53, %v14918_v9  ;;  %7591 = vlog2.f32 %v4731_v1  ;;  %v7582_v7 = vpop.eup %7581  ;;  %v3799_v32 = vmul.f32 1.442695, %v3568_v21  ;;  %v3569_v5 = vsub.f32 0.0, %v3441_v60 }
 0x553   :  { %7593 = vlog2.f32 %v4740_v2  ;;  %v13184_v59 = vmul.f32 %v2908_v38, %v14919_v16  ;;  %v4715_v23 = vmul.f32 0.6931472, %v7582_v7  ;;  %v6514_v28 = vsel %vm42_vm15, %v6336_v26, 0.0  ;;  %v2910_v53 = vpop.permute.xlu1 %2909 }
 0x554   :  { %v13186_v20 = vpop.eup %7583  ;;  %v5480_v6 = vmul.f32 %v12736_v46, %v5096_v63  ;;  %v14920_v1 = vunpack.c.h.bf16 %v13140_v24  ;;  %v4726_v2 = vadd.f32 1.0, %v4725_v3  ;;  %v6513_v21 = vadd.f32 %v6512_v33, %v6511_v50  ;;  %v6338_v33 = vld [vmem:[#allocation2 + $0x1a8] sm:$0xff] }
 0x555   :  { %v4749_v60 = vadd.f32 1.0, %v13186_v20  ;;  %7595 = vpow2.f32 %v3799_v32  ;;  %v7586_v47 = vpop.eup %7585  ;;  %v4718_v19 = vmul.f32 %v13097_v44, %v4717_v31  ;;  %v4728_v41 = vand.u32 2147483647, %v13116_v8  ;;  %v5760_v46 = vpop.permute.xlu0 %5759 }
 0x556   :  { %v13192_v58 = vand.u32 2147483647, %v14920_v1  ;;  %v3801_v25 = vmul.f32 1.442695, %v3569_v5  ;;  %v3442_v38 = vand.u32 2147483647, %v13184_v59  ;;  %5831 = vrot.lane.b32.xlu1 %v5480_v6, %s7789_s10  ;;  %v14924_v63 = vunpack.c.l.bf16 %v12885_v15 }
 0x557   :  { %vm13199_vm13 = vcmp.lt.f32.partialorder %v4719_v27, 0.0004427343  ;;  %v4724_v3 = vmul.f32 0.6931472, %v7586_v47  ;;  %7597 = vlog2.f32 %v4749_v60  ;;  %v6516_v50 = vsel %vm42_vm15, %v6337_v37, 0.0  ;;  %v2912_v7 = vpop.permute.xlu1 %2911  ;;  %v5187_v60 = vld [vmem:[#allocation2 + $0x1d0] sm:$0xff] }
 0x558   :  { %14921 = vst [vmem:[#allocation20_spill] sm:$0xff] %v13192_v58  ;;  %v4721_v44 = vsel %vm13199_vm13, %v4718_v19, %v4715_v23  ;;  %7599 = vpow2.f32 %v3801_v25  ;;  %v3570_v9 = vsub.f32 0.0, %v3442_v38  ;;  %v13208_v31 = vmul.f32 %v2910_v53, %v14924_v63  ;;  %v13210_v32 = vpop.eup %7587  ;;  %v5188_v6 = vld [vmem:[#allocation2 + $0x1d8] sm:$0xff] }
 0x559   :  { %v4727_v27 = vmul.f32 %v13116_v8, %v4726_v2  ;;  %v6515_v5 = vadd.f32 %v6514_v28, %v6513_v21  ;;  %vm13215_vm14 = vcmp.lt.f32.partialorder %v4728_v41, 0.0004427343  ;;  %v4734_v23 = vmul.f32 -0.5, %v13150_v35  ;;  %v13222_v47 = vpop.permute.xlu0 %5761 }
 0x55a   :  { %v4758_v1 = vadd.f32 1.0, %v13210_v32  ;;  %v6518_v53 = vsel %vm42_vm15, %v6338_v33, 0.0  ;;  %v14927_v8 = vmax.f32 %v12949_v55, 0.0  ;;  %v3803_v19 = vmul.f32 1.442695, %v3570_v9  ;;  %v6339_v55 = vld [vmem:[#allocation2 + $0x1b0] sm:$0xff] }
 0x55b   :  { %v4730_v2 = vsel %vm13215_vm14, %v4727_v27, %v4724_v3  ;;  %v6517_v21 = vadd.f32 %v6516_v50, %v6515_v5  ;;  %v4737_v41 = vand.u32 2147483647, %v13150_v35  ;;  %v3443_v38 = vand.u32 2147483647, %v13208_v31  ;;  %v2914_v26 = vpop.permute.xlu1 %2913 }
 0x55c   :  { %v5097_v28 = vadd.f32 %v4721_v44, %v14927_v8  ;;  %7601 = vlog2.f32 %v4758_v1  ;;  %v4743_v63 = vmul.f32 -0.5, %v13170_v12  ;;  %v6083_v44 = vadd.f32 %v5758_v17, %v5187_v60  ;;  %v6340_v1 = vld [vmem:[#allocation2 + $0x1b8] sm:$0xff] }
 0x55d   :  { %v6519_v37 = vadd.f32 %v6518_v53, %v6517_v21  ;;  %7603 = vpow2.f32 %v3803_v19  ;;  %v14928_v3 = vmax.f32 %v12974_v13, 0.0  ;;  %v4735_v9 = vadd.f32 1.0, %v4734_v23  ;;  %v13238_v8 = vpop.permute.xlu0 %5763 }
 0x55e   :  { %v13231_v33 = vpop.eup %7589  ;;  %v4752_v27 = vmul.f32 -0.5, %v13186_v20  ;;  %v3571_v58 = vsub.f32 0.0, %v3443_v38  ;;  %6212 = vst.msk [vmem:[#allocation2 + $0x1d0] sm:$0xff] %vm42_vm15, %v6083_v44  ;;  %v14929_v17 = vunpack.c.h.bf16 %v12885_v15  ;;  %v5481_v13 = vmul.f32 %v12769_v51, %v5097_v28 }
 0x55f   :  { %v5098_v50 = vadd.f32 %v4730_v2, %v14928_v3  ;;  %v7592_v25 = vpop.eup %7591  ;;  %v4767_v16 = vadd.f32 1.0, %v13231_v33  ;;  %vm13247_vm0 = vcmp.lt.f32.partialorder %v4737_v41, 0.0004427343  ;;  %v4746_v2 = vand.u32 2147483647, %v13170_v12  ;;  %v2916_v3 = vpop.permute.xlu1 %2915 }
 0x560   :  { %v13244_v53 = vmul.f32 %v2912_v7, %v14929_v17  ;;  %v7594_v23 = vpop.eup %7593  ;;  %v6520_v21 = vsel %vm42_vm15, %v6339_v55, 0.0  ;;  %v6084_v19 = vadd.f32 %v5760_v46, %v5188_v6  ;;  %v4744_v38 = vadd.f32 1.0, %v4743_v63  ;;  %5833 = vrot.lane.b32.xlu0 %v5481_v13, %s7789_s10 }
 0x561   :  { %v6522_v44 = vsel %vm42_vm15, %v6340_v1, 0.0  ;;  %v3805_v5 = vmul.f32 1.442695, %v3571_v58  ;;  %v14932_v15 = vunpack.c.l.bf16 %v12921_v10  ;;  %v4753_v28 = vadd.f32 1.0, %v4752_v27  ;;  %v13265_v63 = vpop.permute.xlu0 %5765 }
 0x562   :  { %v13259_v7 = vpop.eup %7595  ;;  %v4755_v41 = vand.u32 2147483647, %v13186_v20  ;;  %v3444_v17 = vand.u32 2147483647, %v13244_v53  ;;  %6213 = vst.msk [vmem:[#allocation2 + $0x1d8] sm:$0xff] %vm42_vm15, %v6084_v19  ;;  %v5482_v46 = vmul.f32 %v12795_v29, %v5098_v50  ;;  %v4761_v6 = vmul.f32 -0.5, %v13210_v32 }
 0x563   :  { %v13257_v51 = vmul.f32 %v2914_v26, %v14932_v15  ;;  %v4733_v58 = vmul.f32 0.6931472, %v7592_v25  ;;  %v4742_v55 = vmul.f32 0.6931472, %v7594_v23  ;;  %7605 = vlog2.f32 %v4767_v16  ;;  %v2918_v15 = vpop.permute.xlu1 %2917 }
 0x564   :  { %v7598_v26 = vpop.eup %7597  ;;  %v4776_v1 = vadd.f32 1.0, %v13259_v7  ;;  %7607 = vpow2.f32 %v3805_v5  ;;  %v3572_v27 = vsub.f32 0.0, %v3444_v17  ;;  %5835 = vrot.lane.b32.xlu1 %v5482_v46, %s7789_s10  ;;  %v4736_v29 = vmul.f32 %v13150_v35, %v4735_v9 }
 0x565   :  { %v3445_v13 = vand.u32 2147483647, %v13257_v51  ;;  %v13271_v19 = vpop.eup %7599  ;;  %v4751_v50 = vmul.f32 0.6931472, %v7598_v26  ;;  %v6521_v25 = vadd.f32 %v6520_v21, %v6519_v37  ;;  %v3313_v23 = vmax.f32 %v13168_v62, 0.0  ;;  %v13281_v46 = vpop.permute.xlu0 %5767 }
 0x566   :  { %v4745_v16 = vmul.f32 %v13170_v12, %v4744_v38  ;;  %vm13276_vm2 = vcmp.lt.f32.partialorder %v4746_v2, 0.0004427343  ;;  %v4785_v5 = vadd.f32 1.0, %v13271_v19  ;;  %v4739_v52 = vsel %vm13247_vm0, %v4736_v29, %v4733_v58 }
 0x567   :  { %v3573_v17 = vsub.f32 0.0, %v3445_v13  ;;  %v4754_v35 = vmul.f32 %v13186_v20, %v4753_v28  ;;  %v13286_v37 = vadd.f32 %v6522_v44, %v6521_v25  ;;  %v3807_v9 = vmul.f32 1.442695, %v3572_v27  ;;  %v2920_v38 = vpop.permute.xlu1 %2919 }
 0x568   :  { %v4748_v12 = vsel %vm13276_vm2, %v4745_v16, %v4742_v55  ;;  %vm13290_vm3 = vcmp.lt.f32.partialorder %v4755_v41, 0.0004427343  ;;  %v4762_v21 = vadd.f32 1.0, %v4761_v6  ;;  %7609 = vlog2.f32 %v4776_v1  ;;  %v6341_v55 = vld [vmem:[#allocation2 + $0x1c0] sm:$0xff]  ;;  %v6342_v6 = vld [vmem:[#allocation2 + $0x1c8] sm:$0xff] }
 0x569   :  { %v7602_v26 = vpop.eup %7601  ;;  %v4757_v60 = vsel %vm13290_vm3, %v4754_v35, %v4751_v50  ;;  %7611 = vpow2.f32 %v3807_v9  ;;  %v3809_v58 = vmul.f32 1.442695, %v3573_v17  ;;  %v6085_v20 = vadd.f32 %v13222_v47, %v5189_v11  ;;  %v13306_v13 = vpop.permute.xlu0 %5769 }
 0x56a   :  { %v13297_v44 = vpop.eup %7603  ;;  %v14937_v43 = vmax.f32 %v13009_v54, 0.0  ;;  %v4764_v41 = vand.u32 2147483647, %v13210_v32  ;;  %7613 = vlog2.f32 %v4785_v5  ;;  %v14938_v1 = vunpack.c.h.bf16 %v12921_v10  ;;  %v5191_v5 = vld [vmem:[#allocation2 + $0x1f0] sm:$0xff] }
 0x56b   :  { %v14939_v29 = vmax.f32 %v13030_v34, 0.0  ;;  %v4760_v11 = vmul.f32 0.6931472, %v7602_v26  ;;  %v3314_v47 = vmax.f32 %v13184_v59, 0.0  ;;  %v4794_v54 = vadd.f32 1.0, %v13297_v44  ;;  %6214 = vst.msk [vmem:[#allocation2 + $0x1e0] sm:$0xff] %vm42_vm15, %v6085_v20  ;;  %v13317_v17 = vpop.permute.xlu1 %2921 }
 0x56c   :  { %v5099_v28 = vadd.f32 %v4739_v52, %v14937_v43  ;;  %v13304_v27 = vmul.f32 %v2916_v3, %v14938_v1  ;;  %v5190_v52 = vld [vmem:[#allocation2 + $0x1e8] sm:$0xff]  ;;  %v14940_v25 = vmax.f32 %v13069_v48, 0.0  ;;  %v4770_v10 = vmul.f32 -0.5, %v13231_v33 }
 0x56d   :  { %v5100_v50 = vadd.f32 %v4748_v12, %v14939_v29  ;;  %7615 = vpow2.f32 %v3809_v58  ;;  %v4763_v34 = vmul.f32 %v13210_v32, %v4762_v21  ;;  %v6524_v35 = vsel %vm42_vm15, %v6341_v55, 0.0  ;;  %v13330_v58 = vpop.permute.xlu0 %5771 }
 0x56e   :  { %v5101_v16 = vadd.f32 %v4757_v60, %v14940_v25  ;;  %v3446_v3 = vand.u32 2147483647, %v13304_v27  ;;  %7617 = vlog2.f32 %v4794_v54  ;;  %v13322_v9 = vsel %vm42_vm15, %v6342_v6, 0.0  ;;  %v5192_v60 = vld [vmem:[#allocation2 + $0x1f8] sm:$0xff] }
 0x56f   :  { %vm13324_vm5 = vcmp.lt.f32.partialorder %v4764_v41, 0.0004427343  ;;  %v5483_v2 = vmul.f32 %v12799_v49, %v5099_v28  ;;  %v6086_v26 = vadd.f32 %v13238_v8, %v5190_v52  ;;  %v14943_v21 = vunpack.c.l.bf16 %v12968_v30  ;;  %v13344_v1 = vpop.permute.xlu1 %2923 }
 0x570   :  { %v3574_v48 = vsub.f32 0.0, %v3446_v3  ;;  %v4766_v32 = vsel %vm13324_vm5, %v4763_v34, %v4760_v11  ;;  %v5484_v43 = vmul.f32 %v12811_v57, %v5100_v50  ;;  %v6087_v41 = vadd.f32 %v13265_v63, %v5191_v5  ;;  %v7606_v55 = vpop.eup %7605 }
 0x571   :  { %v13336_v20 = vmul.f32 %v2918_v15, %v14943_v21  ;;  %v4771_v6 = vadd.f32 1.0, %v4770_v10  ;;  %v4773_v49 = vand.u32 2147483647, %v13231_v33  ;;  %5837 = vrot.lane.b32.xlu0 %v5483_v2, %s7789_s10  ;;  %6215 = vst.msk [vmem:[#allocation2 + $0x1e8] sm:$0xff] %vm42_vm15, %v6086_v26  ;;  %v5485_v8 = vmul.f32 %v12815_v22, %v5101_v16  ;;  %v13346_v29 = vpop.eup %7607  ;;  %v13361_v16 = vpop.permute.xlu0 %5773 }
 0x572   :  { %v3811_v28 = vmul.f32 1.442695, %v3574_v48  ;;  %v4779_v15 = vmul.f32 -0.5, %v13259_v7  ;;  %5839 = vrot.lane.b32.xlu1 %v5484_v43, %s7789_s10  ;;  %6216 = vst.msk [vmem:[#allocation2 + $0x1f0] sm:$0xff] %vm42_vm15, %v6087_v41  ;;  %v14944_v63 = vunpack.c.h.bf16 %v12968_v30  ;;  %v6088_v11 = vadd.f32 %v13281_v46, %v5192_v60 }
 0x573   :  { %v3447_v57 = vand.u32 2147483647, %v13336_v20  ;;  %v14945_v22 = vmax.f32 %v13088_v39, 0.0  ;;  %v4782_v52 = vand.u32 2147483647, %v13259_v7  ;;  %v4803_v25 = vadd.f32 1.0, %v13346_v29  ;;  %v13375_v34 = vpop.permute.xlu1 %2925 }
 0x574   :  { %v13354_v50 = vmul.f32 %v2920_v38, %v14944_v63  ;;  %7619 = vpow2.f32 %v3811_v28  ;;  %v4788_v10 = vmul.f32 -0.5, %v13271_v19  ;;  %v13365_v3 = vadd.f32 %v6524_v35, %v13286_v37  ;;  %6217 = vst.msk [vmem:[#allocation2 + $0x1f8] sm:$0xff] %vm42_vm15, %v6088_v11 }
 0x575   :  { %v5102_v54 = vadd.f32 %v4766_v32, %v14945_v22  ;;  %v3315_v30 = vmax.f32 %v13208_v31, 0.0  ;;  %v3575_v38 = vsub.f32 0.0, %v3447_v57  ;;  %v4769_v46 = vmul.f32 0.6931472, %v7606_v55  ;;  %5841 = vrot.lane.b32.xlu0 %v5485_v8, %s7789_s10  ;;  %v7610_v12 = vpop.eup %7609  ;;  %v13388_v41 = vpop.permute.xlu0 %5775 }
 0x576   :  { %vm13369_vm6 = vcmp.lt.f32.partialorder %v4773_v49, 0.0004427343  ;;  %v4797_v5 = vmul.f32 -0.5, %v13297_v44  ;;  %7621 = vlog2.f32 %v4803_v25  ;;  %v4772_v37 = vmul.f32 %v13231_v33, %v4771_v6  ;;  %v13380_v26 = vpop.eup %7611 }
 0x577   :  { %v3316_v35 = vmax.f32 %v13244_v53, 0.0  ;;  %v3813_v48 = vmul.f32 1.442695, %v3575_v38  ;;  %v3448_v2 = vand.u32 2147483647, %v13354_v50  ;;  %v4780_v60 = vadd.f32 1.0, %v4779_v15  ;;  %v7614_v55 = vpop.eup %7613  ;;  %v13396_v63 = vpop.permute.xlu1 %2927 }
 0x578   :  { %vm13382_vm7 = vcmp.lt.f32.partialorder %v4782_v52, 0.0004427343  ;;  %v4791_v21 = vand.u32 2147483647, %v13271_v19  ;;  %v5486_v43 = vmul.f32 %v12840_v36, %v5102_v54  ;;  %v4789_v33 = vadd.f32 1.0, %v4788_v10 }
 0x579   :  { %v4800_v6 = vand.u32 2147483647, %v13297_v44  ;;  %v4812_v49 = vadd.f32 1.0, %v13380_v26  ;;  %7623 = vpow2.f32 %v3813_v48  ;;  %v4775_v28 = vsel %vm13369_vm6, %v4772_v37, %v4769_v46 }
 0x57a   :  { %v4798_v8 = vadd.f32 1.0, %v4797_v5  ;;  %v4806_v15 = vmul.f32 -0.5, %v13346_v29  ;;  %v3576_v57 = vsub.f32 0.0, %v3448_v2  ;;  %5843 = vrot.lane.b32.xlu1 %v5486_v43, %s7789_s10  ;;  %v13398_v36 = vpop.eup %7615  ;;  %v4778_v11 = vmul.f32 0.6931472, %v7610_v12  ;;  %v13412_v5 = vpop.permute.xlu0 %5777  ;;  %v5193_v43 = vld [vmem:[#allocation2 + $0x200] sm:$0xff] }
 0x57b   :  { %v4809_v22 = vand.u32 2147483647, %v13346_v29  ;;  %7625 = vlog2.f32 %v4812_v49  ;;  %v14950_v54 = vunpack.c.l.bf16 %v13015_v45  ;;  %v7618_v25 = vpop.eup %7617  ;;  %v4781_v10 = vmul.f32 %v13259_v7, %v4780_v60 }
 0x57c   :  { %v4787_v38 = vmul.f32 0.6931472, %v7614_v55  ;;  %vm13407_vm8 = vcmp.lt.f32.partialorder %v4791_v21, 0.0004427343  ;;  %v4821_v39 = vadd.f32 1.0, %v13398_v36  ;;  %v14953_v12 = vmax.f32 %v13131_v18, 0.0  ;;  %v13422_v55 = vpop.permute.xlu1 %2929 }
 0x57d   :  { %v13404_v52 = vmul.f32 %v13317_v17, %v14950_v54  ;;  %v4790_v48 = vmul.f32 %v13271_v19, %v4789_v33  ;;  %v4796_v2 = vmul.f32 0.6931472, %v7618_v25  ;;  %v3815_v17 = vmul.f32 1.442695, %v3576_v57  ;;  %v5194_v21 = vld [vmem:[#allocation2 + $0x208] sm:$0xff] }
 0x57e   :  { %v5103_v37 = vadd.f32 %v4775_v28, %v14953_v12  ;;  %v4799_v49 = vmul.f32 %v13297_v44, %v4798_v8  ;;  %vm13418_vm9 = vcmp.lt.f32.partialorder %v4800_v6, 0.0004427343  ;;  %v4807_v60 = vadd.f32 1.0, %v4806_v15  ;;  %v13437_v15 = vpop.permute.xlu0 %5779 }
 0x57f   :  { %7627 = vlog2.f32 %v4821_v39  ;;  %v4784_v18 = vsel %vm13382_vm7, %v4781_v10, %v4778_v11  ;;  %vm13426_vm10 = vcmp.lt.f32.partialorder %v4809_v22, 0.0004427343  ;;  %v3449_v19 = vand.u32 2147483647, %v13404_v52 }
 0x580   :  { %7629 = vpow2.f32 %v3815_v17  ;;  %v4793_v44 = vsel %vm13407_vm8, %v4790_v48, %v4787_v38  ;;  %v4802_v33 = vsel %vm13418_vm9, %v4799_v49, %v4796_v2  ;;  %v4815_v6 = vmul.f32 -0.5, %v13380_v26  ;;  %v13454_v12 = vpop.permute.xlu1 %2931 }
 0x581   :  { %v6089_v8 = vadd.f32 %v13306_v13, %v5193_v43  ;;  %v13439_v32 = vpop.eup %7619  ;;  %v3577_v57 = vsub.f32 0.0, %v3449_v19  ;;  %v14958_v11 = vunpack.c.h.bf16 %v13015_v45  ;;  %v5487_v54 = vmul.f32 %v12849_v14, %v5103_v37 }
 0x582   :  { %v6090_v25 = vadd.f32 %v13330_v58, %v5194_v21  ;;  %v14959_v10 = vmax.f32 %v13146_v42, 0.0  ;;  %v4808_v46 = vmul.f32 %v13346_v29, %v4807_v60  ;;  %v4818_v13 = vand.u32 2147483647, %v13380_v26  ;;  %v5195_v29 = vld [vmem:[#allocation2 + $0x210] sm:$0xff]  ;;  %v13469_v43 = vpop.permute.xlu0 %5781 }
 0x583   :  { %v13444_v22 = vmul.f32 %v13344_v1, %v14958_v11  ;;  %v4830_v39 = vadd.f32 1.0, %v13439_v32  ;;  %6218 = vst.msk [vmem:[#allocation2 + $0x200] sm:$0xff] %vm42_vm15, %v6089_v8  ;;  %v7622_v45 = vpop.eup %7621  ;;  %v4824_v1 = vmul.f32 -0.5, %v13398_v36  ;;  %v3817_v48 = vmul.f32 1.442695, %v3577_v57  ;;  %5845 = vrot.lane.b32.xlu0 %v5487_v54, %s7789_s10 }
 0x584   :  { %v5104_v38 = vadd.f32 %v4784_v18, %v14959_v10  ;;  %6219 = vst.msk [vmem:[#allocation2 + $0x208] sm:$0xff] %vm42_vm15, %v6090_v25  ;;  %v14960_v42 = vunpack.c.l.bf16 %v13094_v4  ;;  %v5105_v37 = vadd.f32 %v4793_v44, %v3313_v23  ;;  %v5106_v2 = vadd.f32 %v4802_v33, %v3314_v47  ;;  %v13482_v47 = vpop.permute.xlu1 %2933  ;;  %v14964_v25 = vld [vmem:[#allocation37_spill] sm:$0xff] }
 0x585   :  { %v3450_v14 = vand.u32 2147483647, %v13444_v22  ;;  %v4805_v17 = vmul.f32 0.6931472, %v7622_v45  ;;  %7631 = vlog2.f32 %v4830_v39  ;;  %v4816_v49 = vadd.f32 1.0, %v4815_v6 }
 0x586   :  { %v13463_v58 = vmul.f32 %v13375_v34, %v14960_v42  ;;  %7633 = vpow2.f32 %v3817_v48  ;;  %v13472_v21 = vpop.eup %7623  ;;  %vm13476_vm11 = vcmp.lt.f32.partialorder %v4818_v13, 0.0004427343  ;;  %v5488_v59 = vmul.f32 %v12869_v61, %v5104_v38  ;;  %v14963_v61 = vld [vmem:[#allocation15_spill] sm:$0xff]  ;;  %v13492_v11 = vpop.permute.xlu0 %5783 }
 0x587   :  { %v3578_v7 = vsub.f32 0.0, %v3450_v14  ;;  %v4811_v34 = vsel %vm13426_vm10, %v4808_v46, %v4805_v17  ;;  %v6091_v23 = vadd.f32 %v13361_v16, %v5195_v29  ;;  %v4825_v19 = vadd.f32 1.0, %v4824_v1  ;;  %v6343_v38 = vld [vmem:[#allocation2 + $0x1d0] sm:$0xff]  ;;  %v5196_v14 = vld [vmem:[#allocation2 + $0x218] sm:$0xff] }
 0x588   :  { %v3451_v60 = vand.u32 2147483647, %v13463_v58  ;;  %v5107_v18 = vadd.f32 %v4811_v34, %v3315_v30  ;;  %v4827_v44 = vand.u32 2147483647, %v13398_v36  ;;  %v4839_v33 = vadd.f32 1.0, %v13472_v21  ;;  %v7626_v28 = vpop.eup %7625  ;;  %5847 = vrot.lane.b32.xlu1 %v5488_v59, %s7789_s10  ;;  %v13503_v39 = vpop.permute.xlu1 %2935  ;;  %v6344_v34 = vld [vmem:[#allocation2 + $0x1d8] sm:$0xff] }
 0x589   :  { %v5490_v6 = vmul.f32 %v12894_v0, %v5106_v2  ;;  %v3819_v8 = vmul.f32 1.442695, %v3578_v7  ;;  %6220 = vst.msk [vmem:[#allocation2 + $0x210] sm:$0xff] %vm42_vm15, %v6091_v23  ;;  %v5489_v16 = vmul.f32 %v14963_v61, %v5105_v37  ;;  %v4814_v31 = vmul.f32 0.6931472, %v7626_v28  ;;  %v14966_v7 = vld [vmem:[#allocation14_spill] sm:$0xff] }
 0x58a   :  { %v3579_v57 = vsub.f32 0.0, %v3451_v60  ;;  %v4817_v30 = vmul.f32 %v13380_v26, %v4816_v49  ;;  %v4833_v54 = vmul.f32 -0.5, %v13439_v32  ;;  %7635 = vlog2.f32 %v4839_v33  ;;  %v5197_v49 = vld [vmem:[#allocation2 + $0x220] sm:$0xff] }
 0x58b   :  { %v5491_v10 = vmul.f32 %v14964_v25, %v5107_v18  ;;  %7637 = vpow2.f32 %v3819_v8  ;;  %v14965_v46 = vunpack.c.h.bf16 %v13094_v4  ;;  %5849 = vrot.lane.b32.xlu0 %v5489_v16, %s7789_s10  ;;  %v6527_v26 = vadd.f32 %v13322_v9, %v13365_v3  ;;  %v13513_v4 = vld [vmem:[%s14074_s0 + $0x1d8] sm:$0xff]   ;;  %v14968_v16 = vld [vmem:[#allocation54_spill] sm:$0xff] }
 0x58c   :  { %v3821_v0 = vmul.f32 1.442695, %v3579_v57  ;;  %v7628_v45 = vpop.eup %7627  ;;  %v4820_v1 = vsel %vm13476_vm11, %v4817_v30, %v4814_v31  ;;  %v3317_v48 = vmax.f32 %v13257_v51, 0.0  ;;  %v4826_v9 = vmul.f32 %v13398_v36, %v4825_v19  ;;  %5851 = vrot.lane.b32.xlu1 %v5490_v6, %s7789_s10  ;;  %v13522_v51 = vpop.permute.xlu0 %5785  ;;  %v5198_v19 = vld [vmem:[#allocation2 + $0x228] sm:$0xff] }
 0x58d   :  { %v13500_v13 = vmul.f32 %v13396_v63, %v14965_v46  ;;  %v2559_v63 = vunpack.c.l.bf16 %v13513_v4  ;;  %v13516_v42 = vpop.eup %7629  ;;  %v5108_v29 = vadd.f32 %v4820_v1, %v3316_v35  ;;  %v4823_v37 = vmul.f32 0.6931472, %v7628_v45  ;;  %v13530_v62 = vpop.permute.xlu1 %2937  ;;  %v5199_v45 = vld [vmem:[#allocation2 + $0x230] sm:$0xff] }
 0x58e   :  { %7639 = vpow2.f32 %v3821_v0  ;;  %v6528_v3 = vsel %vm42_vm15, %v6343_v38, 0.0  ;;  %vm4828_vm4 = vcmp.lt.f32.partialorder %v4827_v44, 0.0004427343  ;;  %v4834_v2 = vadd.f32 1.0, %v4833_v54 }
 0x58f   :  { %v4848_v17 = vadd.f32 1.0, %v13516_v42  ;;  %v5492_v60 = vmul.f32 %v14966_v7, %v5108_v29  ;;  %v4829_v53 = vsel %vm4828_vm4, %v4826_v9, %v4823_v37  ;;  %v3452_v35 = vand.u32 2147483647, %v13500_v13  ;;  %5853 = vrot.lane.b32.xlu0 %v5491_v10, %s7789_s10  ;;  %v6345_v10 = vld [vmem:[#allocation2 + $0x1e0] sm:$0xff] }
 0x590   :  { %v6092_v36 = vadd.f32 %v13388_v41, %v5196_v14  ;;  %v5109_v59 = vadd.f32 %v4829_v53, %v3317_v48  ;;  %v4836_v23 = vand.u32 2147483647, %v13439_v32  ;;  %v4842_v18 = vmul.f32 -0.5, %v13472_v21  ;;  %v13542_v8 = vpop.permute.xlu0 %5787 }
 0x591   :  { %7641 = vlog2.f32 %v4848_v17  ;;  %v6529_v44 = vadd.f32 %v6528_v3, %v6527_v26  ;;  %v3580_v33 = vsub.f32 0.0, %v3452_v35  ;;  %v14967_v28 = vunpack.c.l.bf16 %v13140_v24  ;;  %5855 = vrot.lane.b32.xlu1 %v5492_v60, %s7789_s10  ;;  %v13557_v26 = vpop.permute.xlu1 %2939 }
 0x592   :  { %6221 = vst.msk [vmem:[#allocation2 + $0x218] sm:$0xff] %vm42_vm15, %v6092_v36  ;;  %v6093_v41 = vadd.f32 %v13412_v5, %v5197_v49  ;;  %v7632_v57 = vpop.eup %7631  ;;  %v6530_v61 = vsel %vm42_vm15, %v6344_v34, 0.0  ;;  %v5493_v31 = vmul.f32 %v14968_v16, %v5109_v59  ;;  %v3318_v30 = vmax.f32 %v13304_v27, 0.0  ;;  %v14970_v34 = vld [vmem:[#allocation94_spill] sm:$0xff] }
 0x593   :  { %v13538_v6 = vmul.f32 %v13422_v55, %v14967_v28  ;;  %v14969_v54 = vunpack.c.h.bf16 %v13140_v24  ;;  %v13552_v55 = vpop.eup %7633  ;;  %v4832_v5 = vmul.f32 0.6931472, %v7632_v57  ;;  %v4835_v38 = vmul.f32 %v13439_v32, %v4834_v2 }
 0x594   :  { %v3823_v0 = vmul.f32 1.442695, %v3580_v33  ;;  %6222 = vst.msk [vmem:[#allocation2 + $0x220] sm:$0xff] %vm42_vm15, %v6093_v41  ;;  %v6094_v46 = vadd.f32 %v13437_v15, %v5198_v19  ;;  %vm4837_vm12 = vcmp.lt.f32.partialorder %v4836_v23, 0.0004427343  ;;  %v4843_v27 = vadd.f32 1.0, %v4842_v18  ;;  %5857 = vrot.lane.b32.xlu0 %v5493_v31, %s7789_s10  ;;  %v13565_v15 = vpop.permute.xlu0 %5789 }
 0x595   :  { %v13550_v25 = vmul.f32 %v13454_v12, %v14969_v54  ;;  %v4857_v24 = vadd.f32 1.0, %v13552_v55  ;;  %v3453_v12 = vand.u32 2147483647, %v13538_v6  ;;  %v4838_v1 = vsel %vm4837_vm12, %v4835_v38, %v4832_v5  ;;  %v13570_v7 = vpop.permute.xlu1 %2941  ;;  %v6346_v33 = vld [vmem:[#allocation2 + $0x1e8] sm:$0xff] }
 0x596   :  { %v4845_v48 = vand.u32 2147483647, %v13472_v21  ;;  %7643 = vpow2.f32 %v3823_v0  ;;  %6223 = vst.msk [vmem:[#allocation2 + $0x228] sm:$0xff] %vm42_vm15, %v6094_v46  ;;  %v6532_v14 = vsel %vm42_vm15, %v6345_v10, 0.0  ;;  %v5110_v29 = vadd.f32 %v4838_v1, %v3318_v30  ;;  %v14971_v0 = vld [vmem:[#allocation7_spill] sm:$0xff]  ;;  %v5200_v1 = vld [vmem:[#allocation2 + $0x238] sm:$0xff] }
 0x597   :  { %v3454_v32 = vand.u32 2147483647, %v13550_v25  ;;  %v4851_v37 = vmul.f32 -0.5, %v13516_v42  ;;  %7645 = vlog2.f32 %v4857_v24  ;;  %v7636_v9 = vpop.eup %7635  ;;  %v6531_v3 = vadd.f32 %v6530_v61, %v6529_v44  ;;  %v6347_v61 = vld [vmem:[#allocation2 + $0x1f0] sm:$0xff] }
 0x598   :  { %v3581_v2 = vsub.f32 0.0, %v3453_v12  ;;  %v6095_v49 = vadd.f32 %v13469_v43, %v5199_v45  ;;  %v13572_v60 = vpop.eup %7637  ;;  %v5494_v53 = vmul.f32 %v14970_v34, %v5110_v29  ;;  %v3319_v35 = vmax.f32 %v13336_v20, 0.0  ;;  %v13580_v43 = vpop.permute.xlu0 %5791 }
 0x599   :  { %v3582_v17 = vsub.f32 0.0, %v3454_v32  ;;  %v4841_v36 = vmul.f32 0.6931472, %v7636_v9  ;;  %v4844_v59 = vmul.f32 %v13472_v21, %v4843_v27  ;;  %v6533_v23 = vadd.f32 %v6532_v14, %v6531_v3  ;;  %v13591_v31 = vpop.permute.xlu1 %2943 }
 0x59a   :  { %vm4846_vm1 = vcmp.lt.f32.partialorder %v4845_v48, 0.0004427343  ;;  %v3320_v18 = vmax.f32 %v13354_v50, 0.0  ;;  %v4866_v19 = vadd.f32 1.0, %v13572_v60  ;;  %6224 = vst.msk [vmem:[#allocation2 + $0x230] sm:$0xff] %vm42_vm15, %v6095_v49  ;;  %v4852_v41 = vadd.f32 1.0, %v4851_v37  ;;  %5859 = vrot.lane.b32.xlu1 %v5494_v53, %s7789_s10 }
 0x59b   :  { %v13582_v44 = vpop.eup %7639  ;;  %v4847_v28 = vsel %vm4846_vm1, %v4844_v59, %v4841_v36  ;;  %v3825_v57 = vmul.f32 1.442695, %v3581_v2  ;;  %v3827_v20 = vmul.f32 1.442695, %v3582_v17  ;;  %v4854_v16 = vand.u32 2147483647, %v13516_v42 }
 0x59c   :  { %v5111_v21 = vadd.f32 %v4847_v28, %v3319_v35  ;;  %7647 = vlog2.f32 %v4866_v19  ;;  %v13589_v50 = vmul.f32 %v13482_v47, %v2559_v63  ;;  %v4860_v30 = vmul.f32 -0.5, %v13552_v55  ;;  %v13599_v27 = vpop.permute.xlu0 %5793  ;;  %v6348_v37 = vld [vmem:[#allocation2 + $0x1f8] sm:$0xff]  ;;  %v13622_v59 = vld [vmem:[%s14074_s0 + $0x1e0] sm:$0xff]   ;;  %v6350_v28 = vld [vmem:[#allocation2 + $0x208] sm:$0xff] }
 0x59d   :  { %v4875_v54 = vadd.f32 1.0, %v13582_v44  ;;  %7649 = vpow2.f32 %v3825_v57  ;;  %v2560_v10 = vunpack.c.h.bf16 %v13513_v4  ;;  %v6534_v38 = vsel %vm42_vm15, %v6346_v33, 0.0  ;;  %v13606_v14 = vpop.permute.xlu1 %2945 }
 0x59e   :  { %v7642_v5 = vpop.eup %7641  ;;  %v5495_v46 = vmul.f32 %v14971_v0, %v5111_v21  ;;  %v3321_v45 = vmax.f32 %v13404_v52, 0.0  ;;  %7651 = vpow2.f32 %v3827_v20  ;;  %v6536_v47 = vsel %vm42_vm15, %v6347_v61, 0.0  ;;  %v5202_v0 = vld [vmem:[#allocation2 + $0x248] sm:$0xff] }
 0x59f   :  { %v4850_v24 = vmul.f32 0.6931472, %v7642_v5  ;;  %v4853_v12 = vmul.f32 %v13516_v42, %v4852_v41  ;;  %7653 = vlog2.f32 %v4875_v54  ;;  %vm4855_vm13 = vcmp.lt.f32.partialorder %v4854_v16, 0.0004427343 }
 0x5a0   :  { %v4863_v48 = vand.u32 2147483647, %v13552_v55  ;;  %v3455_v32 = vand.u32 2147483647, %v13589_v50  ;;  %5861 = vrot.lane.b32.xlu0 %v5495_v46, %s7789_s10  ;;  %v6535_v52 = vadd.f32 %v6534_v38, %v6533_v23  ;;  %v4861_v9 = vadd.f32 1.0, %v4860_v30  ;;  %v5201_v30 = vld [vmem:[#allocation2 + $0x240] sm:$0xff] }
 0x5a1   :  { %v4856_v29 = vsel %vm4855_vm13, %v4853_v12, %v4850_v24  ;;  %v13611_v3 = vmul.f32 %v13503_v39, %v2560_v10  ;;  %v4869_v2 = vmul.f32 -0.5, %v13572_v60  ;;  %v4878_v17 = vmul.f32 -0.5, %v13582_v44  ;;  %v13632_v57 = vpop.permute.xlu1 %2947 }
 0x5a2   :  { %v5112_v42 = vadd.f32 %v4856_v29, %v3320_v18  ;;  %v3583_v49 = vsub.f32 0.0, %v3455_v32  ;;  %v6537_v53 = vadd.f32 %v6536_v47, %v6535_v52  ;;  %v6096_v36 = vadd.f32 %v13492_v11, %v5200_v1  ;;  %v14972_v18 = vld [vmem:[#allocation46_spill] sm:$0xff]  ;;  %v13634_v11 = vpop.permute.xlu0 %5797 }
 0x5a3   :  { %v13615_v34 = vpop.eup %7643  ;;  %v3456_v35 = vand.u32 2147483647, %v13611_v3  ;;  %v2561_v39 = vunpack.c.l.bf16 %v13622_v59  ;;  %v6538_v33 = vsel %vm42_vm15, %v6348_v37, 0.0  ;;  %vm13627_vm14 = vcmp.lt.f32.partialorder %v4863_v48, 0.0004427343  ;;  %v6349_v1 = vld [vmem:[#allocation2 + $0x200] sm:$0xff] }
 0x5a4   :  { %v7646_v23 = vpop.eup %7645  ;;  %v5496_v19 = vmul.f32 %v14972_v18, %v5112_v42  ;;  %v4884_v41 = vadd.f32 1.0, %v13615_v34  ;;  %v4862_v21 = vmul.f32 %v13552_v55, %v4861_v9  ;;  %v3829_v61 = vmul.f32 1.442695, %v3583_v49  ;;  %6225 = vst.msk [vmem:[#allocation2 + $0x238] sm:$0xff] %vm42_vm15, %v6096_v36 }
 0x5a5   :  { %v4859_v20 = vmul.f32 0.6931472, %v7646_v23  ;;  %v3584_v16 = vsub.f32 0.0, %v3456_v35  ;;  %v4870_v54 = vadd.f32 1.0, %v4869_v2  ;;  %v4872_v5 = vand.u32 2147483647, %v13572_v60  ;;  %v13649_v52 = vpop.permute.xlu1 %2949 }
 0x5a6   :  { %v4879_v38 = vadd.f32 1.0, %v4878_v17  ;;  %7655 = vlog2.f32 %v4884_v41  ;;  %5863 = vrot.lane.b32.xlu1 %v5496_v19, %s7789_s10  ;;  %v13645_v55 = vmul.f32 %v13530_v62, %v2561_v39  ;;  %v6539_v24 = vadd.f32 %v6538_v33, %v6537_v53 }
 0x5a7   :  { %v4865_v46 = vsel %vm13627_vm14, %v4862_v21, %v4859_v20  ;;  %7657 = vpow2.f32 %v3829_v61  ;;  %v3831_v47 = vmul.f32 1.442695, %v3584_v16  ;;  %v3322_v48 = vmax.f32 %v13444_v22, 0.0  ;;  %v5203_v61 = vld [vmem:[#allocation2 + $0x250] sm:$0xff] }
 0x5a8   :  { %v5113_v12 = vadd.f32 %v4865_v46, %v3321_v45  ;;  %v6097_v32 = vadd.f32 %v13522_v51, %v5201_v30  ;;  %v3457_v37 = vand.u32 2147483647, %v13645_v55  ;;  %v2562_v9 = vunpack.c.h.bf16 %v13622_v59  ;;  %v13660_v51 = vpop.permute.xlu0 %5801 }
 0x5a9   :  { %v7648_v29 = vpop.eup %7647  ;;  %7659 = vpow2.f32 %v3831_v47  ;;  %v6098_v42 = vadd.f32 %v13542_v8, %v5202_v0  ;;  %v4871_v17 = vmul.f32 %v13572_v60, %v4870_v54  ;;  %v4881_v22 = vand.u32 2147483647, %v13582_v44  ;;  %v13671_v19 = vpop.permute.xlu1 %2951 }
 0x5aa   :  { %v13654_v2 = vpop.eup %7649  ;;  %v5497_v62 = vmul.f32 %v13038_v56, %v5113_v12  ;;  %v4868_v45 = vmul.f32 0.6931472, %v7648_v29  ;;  %6226 = vst.msk [vmem:[#allocation2 + $0x240] sm:$0xff] %vm42_vm15, %v6097_v32  ;;  %v6540_v53 = vsel %vm42_vm15, %v6349_v1, 0.0  ;;  %vm4873_vm0 = vcmp.lt.f32.partialorder %v4872_v5, 0.0004427343 }
 0x5ab   :  { %v13662_v49 = vpop.eup %7651  ;;  %v4880_v8 = vmul.f32 %v13582_v44, %v4879_v38  ;;  %v4893_v35 = vadd.f32 1.0, %v13654_v2  ;;  %6227 = vst.msk [vmem:[#allocation2 + $0x248] sm:$0xff] %vm42_vm15, %v6098_v42  ;;  %v4887_v60 = vmul.f32 -0.5, %v13615_v34  ;;  %v3585_v18 = vsub.f32 0.0, %v3457_v37  ;;  %v6351_v5 = vld [vmem:[#allocation2 + $0x210] sm:$0xff] }
 0x5ac   :  { %v7654_v56 = vpop.eup %7653  ;;  %v4874_v36 = vsel %vm4873_vm0, %v4871_v17, %v4868_v45  ;;  %v4902_v23 = vadd.f32 1.0, %v13662_v49  ;;  %5865 = vrot.lane.b32.xlu0 %v5497_v62, %s7789_s10  ;;  %v13676_v44 = vmul.f32 %v13557_v26, %v2562_v9  ;;  %v3323_v20 = vmax.f32 %v13463_v58, 0.0  ;;  %v13686_v58 = vpop.permute.xlu0 %5805  ;;  %v14975_v32 = vld [vmem:[#allocation91_spill] sm:$0xff] }
 0x5ad   :  { %v5114_v33 = vadd.f32 %v4874_v36, %v3322_v48  ;;  %v4877_v41 = vmul.f32 0.6931472, %v7654_v56  ;;  %7661 = vlog2.f32 %v4893_v35  ;;  %vm4882_vm2 = vcmp.lt.f32.partialorder %v4881_v22, 0.0004427343  ;;  %v13688_v12 = vpop.permute.xlu1 %5795 }
 0x5ae   :  { %7663 = vlog2.f32 %v4902_v23  ;;  %v13681_v21 = vand.u32 2147483647, %v2559_v63  ;;  %v6541_v16 = vadd.f32 %v6540_v53, %v6539_v24  ;;  %v4890_v38 = vand.u32 2147483647, %v13615_v34 }
 0x5af   :  { %v5498_v30 = vmul.f32 %v13084_v40, %v5114_v33  ;;  %v4883_v54 = vsel %vm4882_vm2, %v4880_v8, %v4877_v41  ;;  %v6542_v0 = vsel %vm42_vm15, %v6350_v28, 0.0  ;;  %v4888_v46 = vadd.f32 1.0, %v4887_v60  ;;  %v13695_v40 = vld [vmem:[%s14074_s0 + $0x1e8] sm:$0xff]   ;;  %v6352_v41 = vld [vmem:[#allocation2 + $0x218] sm:$0xff] }
 0x5b0   :  { %v5115_v26 = vadd.f32 %v4883_v54, %v3323_v20  ;;  %v3833_v47 = vmul.f32 1.442695, %v3585_v18  ;;  %v3324_v63 = vmax.f32 %v13500_v13, 0.0  ;;  %v3458_v1 = vand.u32 2147483647, %v13676_v44  ;;  %v6353_v20 = vld [vmem:[#allocation2 + $0x220] sm:$0xff] }
 0x5b1   :  { %v2563_v24 = vunpack.c.l.bf16 %v13695_v40  ;;  %v6099_v48 = vadd.f32 %v13565_v15, %v5203_v61  ;;  %5867 = vrot.lane.b32.xlu1 %v5498_v30, %s7789_s10  ;;  %v6544_v37 = vsel %vm42_vm15, %v6351_v5, 0.0  ;;  %v2564_v13 = vunpack.c.h.bf16 %v13695_v40  ;;  %v13719_v36 = vpop.permute.xlu1 %5799  ;;  %v13734_v30 = vpop.permute.xlu0 %5809 }
 0x5b2   :  { %v5499_v29 = vmul.f32 %v14975_v32, %v5115_v26  ;;  %7665 = vpow2.f32 %v3833_v47  ;;  %v6543_v62 = vadd.f32 %v6542_v0, %v6541_v16  ;;  %vm13703_vm3 = vcmp.lt.f32.partialorder %v4890_v38, 0.0004427343  ;;  %v5204_v47 = vld [vmem:[#allocation2 + $0x258] sm:$0xff] }
 0x5b3   :  { %v7656_v42 = vpop.eup %7655  ;;  %v4896_v17 = vmul.f32 -0.5, %v13654_v2  ;;  %v3586_v22 = vsub.f32 0.0, %v3458_v1  ;;  %6228 = vst.msk [vmem:[#allocation2 + $0x250] sm:$0xff] %vm42_vm15, %v6099_v48  ;;  %v4889_v8 = vmul.f32 %v13615_v34, %v4888_v46  ;;  %v4905_v35 = vmul.f32 -0.5, %v13662_v49  ;;  %v14978_v48 = vld [vmem:[#allocation13_spill] sm:$0xff] }
 0x5b4   :  { %v13709_v15 = vpop.eup %7657  ;;  %v4886_v53 = vmul.f32 0.6931472, %v7656_v42  ;;  %v13716_v56 = vmul.f32 %v13570_v7, %v2563_v24  ;;  %5869 = vrot.lane.b32.xlu0 %v5499_v29, %s7789_s10  ;;  %v6545_v60 = vadd.f32 %v6544_v37, %v6543_v62  ;;  %v4899_v23 = vand.u32 2147483647, %v13654_v2  ;;  %v5205_v37 = vld [vmem:[#allocation2 + $0x260] sm:$0xff] }
 0x5b5   :  { %v4911_v18 = vadd.f32 1.0, %v13709_v15  ;;  %v3835_v33 = vmul.f32 1.442695, %v3586_v22  ;;  %v4908_v7 = vand.u32 2147483647, %v13662_v49  ;;  %v13732_v16 = vmul.f32 %v13591_v31, %v2564_v13  ;;  %v13739_v1 = vpop.permute.xlu1 %5803 }
 0x5b6   :  { %v13723_v28 = vpop.eup %7659  ;;  %v4892_v34 = vsel %vm13703_vm3, %v4889_v8, %v4886_v53  ;;  %v3459_v61 = vand.u32 2147483647, %v13716_v56  ;;  %v3325_v5 = vmax.f32 %v13538_v6, 0.0  ;;  %v4897_v38 = vadd.f32 1.0, %v4896_v17 }
 0x5b7   :  { %v5116_v54 = vadd.f32 %v4892_v34, %v3324_v63  ;;  %7667 = vlog2.f32 %v4911_v18  ;;  %v3326_v0 = vmax.f32 %v13550_v25, 0.0  ;;  %v4906_v26 = vadd.f32 1.0, %v4905_v35  ;;  %v5207_v34 = vld [vmem:[#allocation2 + $0x270] sm:$0xff] }
 0x5b8   :  { %v4920_v46 = vadd.f32 1.0, %v13723_v28  ;;  %7669 = vpow2.f32 %v3835_v33  ;;  %v6546_v31 = vsel %vm42_vm15, %v6352_v41, 0.0  ;;  %v6548_v29 = vsel %vm42_vm15, %v6353_v20, 0.0  ;;  %v13758_v41 = vpop.permute.xlu0 %5813 }
 0x5b9   :  { %v5500_v32 = vmul.f32 %v14978_v48, %v5116_v54  ;;  %v3587_v63 = vsub.f32 0.0, %v3459_v61  ;;  %vm13744_vm5 = vcmp.lt.f32.partialorder %v4899_v23, 0.0004427343  ;;  %vm13748_vm6 = vcmp.lt.f32.partialorder %v4908_v7, 0.0004427343  ;;  %v13760_v20 = vpop.permute.xlu1 %5807 }
 0x5ba   :  { %v7662_v6 = vpop.eup %7661  ;;  %7671 = vlog2.f32 %v4920_v46  ;;  %v3460_v62 = vand.u32 2147483647, %v13732_v16  ;;  %v4898_v22 = vmul.f32 %v13654_v2, %v4897_v38  ;;  %v6100_v8 = vadd.f32 %v13580_v43, %v5204_v47  ;;  %v6354_v2 = vld [vmem:[#allocation2 + $0x228] sm:$0xff]  ;;  %v13768_v43 = vld [vmem:[%s14074_s0 + $0x1f0] sm:$0xff]  }
 0x5bb   :  { %v7664_v45 = vpop.eup %7663  ;;  %v4895_v17 = vmul.f32 0.6931472, %v7662_v6  ;;  %v3837_v53 = vmul.f32 1.442695, %v3587_v63  ;;  %5871 = vrot.lane.b32.xlu1 %v5500_v32, %s7789_s10  ;;  %v4907_v23 = vmul.f32 %v13662_v49, %v4906_v26  ;;  %v4914_v18 = vmul.f32 -0.5, %v13709_v15 }
 0x5bc   :  { %v4904_v35 = vmul.f32 0.6931472, %v7664_v45  ;;  %v3588_v33 = vsub.f32 0.0, %v3460_v62  ;;  %6229 = vst.msk [vmem:[#allocation2 + $0x258] sm:$0xff] %vm42_vm15, %v6100_v8  ;;  %v2565_v49 = vunpack.c.l.bf16 %v13768_v43  ;;  %v6101_v61 = vadd.f32 %v13599_v27, %v5205_v37  ;;  %v14983_v37 = vld [vmem:[#allocation38_spill] sm:$0xff]  ;;  %v14984_v45 = vld [vmem:[#allocation20_spill] sm:$0xff] }
 0x5bd   :  { %v4901_v7 = vsel %vm13744_vm5, %v4898_v22, %v4895_v17  ;;  %7673 = vpow2.f32 %v3837_v53  ;;  %v4923_v26 = vmul.f32 -0.5, %v13723_v28  ;;  %v2566_v63 = vunpack.c.h.bf16 %v13768_v43  ;;  %v5209_v62 = vld [vmem:[#allocation2 + $0x280] sm:$0xff]  ;;  %v6355_v22 = vld [vmem:[#allocation2 + $0x230] sm:$0xff] }
 0x5be   :  { %v5117_v54 = vadd.f32 %v4901_v7, %v3325_v5  ;;  %v4910_v38 = vsel %vm13748_vm6, %v4907_v23, %v4904_v35  ;;  %v3839_v46 = vmul.f32 1.442695, %v3588_v33  ;;  %v13780_v32 = vmul.f32 %v13606_v14, %v2565_v49  ;;  %6230 = vst.msk [vmem:[#allocation2 + $0x260] sm:$0xff] %vm42_vm15, %v6101_v61  ;;  %v13795_v23 = vpop.permute.xlu0 %5817 }
 0x5bf   :  { %v13775_v47 = vpop.eup %7665  ;;  %v5118_v48 = vadd.f32 %v4910_v38, %v3326_v0  ;;  %v6103_v27 = vadd.f32 %v13634_v11, %v5207_v34  ;;  %v6547_v5 = vadd.f32 %v6546_v31, %v6545_v60  ;;  %v6550_v42 = vsel %vm42_vm15, %v6354_v2, 0.0  ;;  %v13788_v0 = vpop.permute.xlu1 %5811  ;;  %v5211_v11 = vld [vmem:[#allocation2 + $0x290] sm:$0xff]  ;;  %v5206_v60 = vld [vmem:[#allocation2 + $0x268] sm:$0xff] }
 0x5c0   :  { %v5501_v6 = vmul.f32 %v14983_v37, %v5117_v54  ;;  %v4929_v25 = vadd.f32 1.0, %v13775_v47  ;;  %v4915_v14 = vadd.f32 1.0, %v4914_v18  ;;  %7675 = vpow2.f32 %v3839_v46 }
 0x5c1   :  { %v5502_v17 = vmul.f32 %v14984_v45, %v5118_v48  ;;  %v3461_v53 = vand.u32 2147483647, %v13780_v32  ;;  %6232 = vst.msk [vmem:[#allocation2 + $0x270] sm:$0xff] %vm42_vm15, %v6103_v27  ;;  %v6549_v31 = vadd.f32 %v6548_v29, %v6547_v5  ;;  %v4917_v8 = vand.u32 2147483647, %v13709_v15 }
 0x5c2   :  { %v4924_v35 = vadd.f32 1.0, %v4923_v26  ;;  %7677 = vlog2.f32 %v4929_v25  ;;  %5873 = vrot.lane.b32.xlu0 %v5501_v6, %s7789_s10  ;;  %v3327_v33 = vmax.f32 %v13589_v50, 0.0  ;;  %v13801_v34 = vmul.f32 %v13632_v57, %v2566_v63  ;;  %v13824_v6 = vld [vmem:[%s14074_s0 + $0x1f8] sm:$0xff]   ;;  %v13828_v45 = vpop.permute.xlu0 %5821  ;;  %s7791_s0 = smov [#allocation3]  }
 0x5c3   :  { %v3589_v18 = vsub.f32 0.0, %v3461_v53  ;;  %v6105_v7 = vadd.f32 %v13660_v51, %v5209_v62  ;;  %5875 = vrot.lane.b32.xlu1 %v5502_v17, %s7789_s10  ;;  %v6551_v2 = vadd.f32 %v6550_v42, %v6549_v31  ;;  %v6552_v61 = vsel %vm42_vm15, %v6355_v22, 0.0  ;;  %v13808_v26 = vpop.permute.xlu1 %5815 }
 0x5c4   :  { %v7668_v29 = vpop.eup %7667  ;;  %v6107_v54 = vadd.f32 %v13686_v58, %v5211_v11  ;;  %v6102_v38 = vadd.f32 %v13688_v12, %v5206_v60  ;;  %v4916_v57 = vmul.f32 %v13709_v15, %v4915_v14  ;;  %v4926_v48 = vand.u32 2147483647, %v13723_v28 }
 0x5c5   :  { %v13810_v50 = vpop.eup %7669  ;;  %v4913_v46 = vmul.f32 0.6931472, %v7668_v29  ;;  %v3841_v51 = vmul.f32 1.442695, %v3589_v18  ;;  %6234 = vst.msk [vmem:[#allocation2 + $0x280] sm:$0xff] %vm42_vm15, %v6105_v7  ;;  %v4925_v27 = vmul.f32 %v13723_v28, %v4924_v35  ;;  %v4932_v5 = vmul.f32 -0.5, %v13775_v47 }
 0x5c6   :  { %vm4918_vm7 = vcmp.lt.f32.partialorder %v4917_v8, 0.0004427343  ;;  %v4938_v58 = vadd.f32 1.0, %v13810_v50  ;;  %6236 = vst.msk [vmem:[#allocation2 + $0x290] sm:$0xff] %vm42_vm15, %v6107_v54  ;;  %6231 = vst.msk [vmem:[#allocation2 + $0x268] sm:$0xff] %vm42_vm15, %v6102_v38  ;;  %v2567_v28 = vunpack.c.l.bf16 %v13824_v6  ;;  %v2568_v62 = vunpack.c.h.bf16 %v13824_v6  ;;  %v5232_v6 = vld [vmem:[#allocation2 + $0x338] sm:$0xff] }
 0x5c7   :  { %v7672_v12 = vpop.eup %7671  ;;  %v4919_v37 = vsel %vm4918_vm7, %v4916_v57, %v4913_v46  ;;  %7679 = vpow2.f32 %v3841_v51  ;;  %v3462_v15 = vand.u32 2147483647, %v13801_v34  ;;  %v13830_v17 = vpop.permute.xlu1 %5819  ;;  %v5376_v14 = vand.u32 2147483647, %v2560_v10 }
 0x5c8   :  { %v5119_v42 = vadd.f32 %v4919_v37, %v3327_v33  ;;  %v4922_v25 = vmul.f32 0.6931472, %v7672_v12  ;;  %7681 = vlog2.f32 %v4938_v58  ;;  %v3328_v22 = vmax.f32 %v13611_v3, 0.0  ;;  %v6356_v33 = vld [vmem:[#allocation2 + $0x238] sm:$0xff]  ;;  %v6357_v3 = vld [vmem:[#allocation2 + $0x240] sm:$0xff]  ;;  %v13869_v57 = vpop.permute.xlu0 %5825 }
 0x5c9   :  { %vm4927_vm8 = vcmp.lt.f32.partialorder %v4926_v48, 0.0004427343  ;;  %v3590_v53 = vsub.f32 0.0, %v3462_v15  ;;  %v13838_v31 = vadd.f32 %v6552_v61, %v6551_v2  ;;  %v5377_v18 = vand.u32 2147483647, %v2561_v39  ;;  %v5208_v58 = vld [vmem:[#allocation2 + $0x278] sm:$0xff] }
 0x5ca   :  { %v13835_v11 = vpop.eup %7673  ;;  %v5503_v60 = vmul.f32 %v13681_v21, %v5119_v42  ;;  %v4928_v8 = vsel %vm4927_vm8, %v4925_v27, %v4922_v25  ;;  %v3329_v7 = vmax.f32 %v13645_v55, 0.0  ;;  %v4933_v10 = vadd.f32 1.0, %v4932_v5  ;;  %v5213_v5 = vld [vmem:[#allocation2 + $0x2a0] sm:$0xff]  ;;  %v5215_v25 = vld [vmem:[#allocation2 + $0x2b0] sm:$0xff] }
 0x5cb   :  { %v5120_v35 = vadd.f32 %v4928_v8, %v3328_v22  ;;  %v4947_v4 = vadd.f32 1.0, %v13835_v11  ;;  %v3843_v29 = vmul.f32 1.442695, %v3590_v53  ;;  %v13847_v54 = vmul.f32 %v13649_v52, %v2567_v28  ;;  %v13855_v39 = vpop.permute.xlu1 %5823 }
 0x5cc   :  { %v13852_v21 = vmul.f32 %v13671_v19, %v2568_v62  ;;  %5877 = vrot.lane.b32.xlu0 %v5503_v60, %s7789_s10  ;;  %v4935_v2 = vand.u32 2147483647, %v13775_v47  ;;  %v13860_v61 = vand.u32 2147483647, %v2562_v9  ;;  %v13865_v52 = vsel %vm42_vm15, %v6356_v33, 0.0 }
 0x5cd   :  { %v5504_v55 = vmul.f32 %v5376_v14, %v5120_v35  ;;  %7683 = vlog2.f32 %v4947_v4  ;;  %v13862_v38 = vpop.eup %7675  ;;  %v4941_v19 = vmul.f32 -0.5, %v13810_v50  ;;  %v3463_v46 = vand.u32 2147483647, %v13847_v54 }
 0x5ce   :  { %7685 = vpow2.f32 %v3843_v29  ;;  %v13872_v51 = vsel %vm42_vm15, %v6357_v3, 0.0  ;;  %v3330_v59 = vmax.f32 %v13676_v44, 0.0  ;;  %v4950_v9 = vmul.f32 -0.5, %v13835_v11  ;;  %v5210_v29 = vld [vmem:[#allocation2 + $0x288] sm:$0xff] }
 0x5cf   :  { %v7678_v48 = vpop.eup %7677  ;;  %v4956_v27 = vadd.f32 1.0, %v13862_v38  ;;  %5879 = vrot.lane.b32.xlu1 %v5504_v55, %s7789_s10  ;;  %v4934_v37 = vmul.f32 %v13775_v47, %v4933_v10  ;;  %v3591_v15 = vsub.f32 0.0, %v3463_v46  ;;  %v3464_v42 = vand.u32 2147483647, %v13852_v21  ;;  %v13880_v14 = vpop.permute.xlu1 %5827 }
 0x5d0   :  { %v4931_v12 = vmul.f32 0.6931472, %v7678_v48  ;;  %vm4936_vm9 = vcmp.lt.f32.partialorder %v4935_v2, 0.0004427343  ;;  %v4944_v22 = vand.u32 2147483647, %v13810_v50  ;;  %v6109_v3 = vadd.f32 %v13734_v30, %v5213_v5 }
 0x5d1   :  { %v13885_v53 = vand.u32 2147483647, %v2563_v24  ;;  %7687 = vlog2.f32 %v4956_v27  ;;  %v4942_v8 = vadd.f32 1.0, %v4941_v19  ;;  %v3845_v35 = vmul.f32 1.442695, %v3591_v15  ;;  %v5217_v48 = vld [vmem:[#allocation2 + $0x2c0] sm:$0xff]  ;;  %v5830_v19 = vpop.permute.xlu0 %5829 }
 0x5d2   :  { %v4937_v60 = vsel %vm4936_vm9, %v4934_v37, %v4931_v12  ;;  %v3592_v33 = vsub.f32 0.0, %v3464_v42  ;;  %v3331_v47 = vmax.f32 %v13716_v56, 0.0  ;;  %v4951_v10 = vadd.f32 1.0, %v4950_v9  ;;  %v5212_v27 = vld [vmem:[#allocation2 + $0x298] sm:$0xff]  ;;  %6238 = vst.msk [vmem:[#allocation2 + $0x2a0] sm:$0xff] %vm42_vm15, %v6109_v3  ;;  %v5219_v5 = vld [vmem:[#allocation2 + $0x2d0] sm:$0xff] }
 0x5d3   :  { %v5121_v4 = vadd.f32 %v4937_v60, %v3329_v7  ;;  %7689 = vpow2.f32 %v3845_v35  ;;  %v6104_v46 = vadd.f32 %v13719_v36, %v5208_v58  ;;  %v6111_v24 = vadd.f32 %v13758_v41, %v5215_v25  ;;  %v5832_v12 = vpop.permute.xlu1 %5831  ;;  %v5214_v36 = vld [vmem:[#allocation2 + $0x2a8] sm:$0xff]  ;;  %v5221_v42 = vld [vmem:[#allocation2 + $0x2e0] sm:$0xff]  ;;  %v5216_v25 = vld [vmem:[#allocation2 + $0x2b8] sm:$0xff] }
 0x5d4   :  { %v13889_v55 = vpop.eup %7679  ;;  %v3847_v2 = vmul.f32 1.442695, %v3592_v33  ;;  %vm13893_vm10 = vcmp.lt.f32.partialorder %v4944_v22, 0.0004427343  ;;  %v4959_v30 = vmul.f32 -0.5, %v13862_v38  ;;  %v4943_v41 = vmul.f32 %v13810_v50, %v4942_v8  ;;  %v5223_v22 = vld [vmem:[#allocation2 + $0x2f0] sm:$0xff] }
 0x5d5   :  { %v7682_v37 = vpop.eup %7681  ;;  %v5505_v7 = vmul.f32 %v5377_v18, %v5121_v4  ;;  %v4965_v9 = vadd.f32 1.0, %v13889_v55  ;;  %6233 = vst.msk [vmem:[#allocation2 + $0x278] sm:$0xff] %vm42_vm15, %v6104_v46  ;;  %6240 = vst.msk [vmem:[#allocation2 + $0x2b0] sm:$0xff] %vm42_vm15, %v6111_v24  ;;  %v6106_v18 = vadd.f32 %v13739_v1, %v5210_v29  ;;  %v4952_v60 = vmul.f32 %v13835_v11, %v4951_v10  ;;  %v5218_v50 = vld [vmem:[#allocation2 + $0x2c8] sm:$0xff]  ;;  %v5220_v8 = vld [vmem:[#allocation2 + $0x2d8] sm:$0xff] }
 0x5d6   :  { %v4940_v58 = vmul.f32 0.6931472, %v7682_v37  ;;  %7691 = vpow2.f32 %v3847_v2  ;;  %v4953_v35 = vand.u32 2147483647, %v13835_v11  ;;  %v6113_v33 = vadd.f32 %v13795_v23, %v5217_v48  ;;  %v5222_v4 = vld [vmem:[#allocation2 + $0x2e8] sm:$0xff]  ;;  %v5834_v11 = vpop.permute.xlu0 %5833  ;;  %v5225_v2 = vld [vmem:[#allocation2 + $0x300] sm:$0xff] }
 0x5d7   :  { %7693 = vlog2.f32 %v4965_v9  ;;  %5881 = vrot.lane.b32.xlu0 %v5505_v7, %s7789_s10  ;;  %6235 = vst.msk [vmem:[#allocation2 + $0x288] sm:$0xff] %vm42_vm15, %v6106_v18  ;;  %v6108_v1 = vadd.f32 %v13760_v20, %v5212_v27  ;;  %v6115_v29 = vadd.f32 %v13828_v45, %v5219_v5  ;;  %v6110_v10 = vadd.f32 %v13788_v0, %v5214_v36  ;;  %v5224_v46 = vld [vmem:[#allocation2 + $0x2f8] sm:$0xff]  ;;  %v5226_v7 = vld [vmem:[#allocation2 + $0x308] sm:$0xff] }
 0x5d8   :  { %v4946_v3 = vsel %vm13893_vm10, %v4943_v41, %v4940_v58  ;;  %v4960_v24 = vadd.f32 1.0, %v4959_v30  ;;  %6242 = vst.msk [vmem:[#allocation2 + $0x2c0] sm:$0xff] %vm42_vm15, %v6113_v33  ;;  %v6117_v48 = vadd.f32 %v13869_v57, %v5221_v42  ;;  %v6112_v37 = vadd.f32 %v13808_v26, %v5216_v25  ;;  %v6358_v5 = vld [vmem:[#allocation2 + $0x248] sm:$0xff]  ;;  %v6359_v41 = vld [vmem:[#allocation2 + $0x250] sm:$0xff]  ;;  %v6360_v56 = vld [vmem:[#allocation2 + $0x258] sm:$0xff] }
 0x5d9   :  { %v5122_v23 = vadd.f32 %v4946_v3, %v3330_v59  ;;  %6237 = vst.msk [vmem:[#allocation2 + $0x298] sm:$0xff] %vm42_vm15, %v6108_v1  ;;  %6244 = vst.msk [vmem:[#allocation2 + $0x2d0] sm:$0xff] %vm42_vm15, %v6115_v29  ;;  %v6119_v20 = vadd.f32 %v5830_v19, %v5223_v22  ;;  %v6114_v0 = vadd.f32 %v13830_v17, %v5218_v50  ;;  %v5836_v59 = vpop.permute.xlu1 %5835  ;;  %vm4954_vm11 = vcmp.lt.f32.partialorder %v4953_v35, 0.0004427343 }
 0x5da   :  { %v7684_v15 = vpop.eup %7683  ;;  %6239 = vst.msk [vmem:[#allocation2 + $0x2a8] sm:$0xff] %vm42_vm15, %v6110_v10  ;;  %v6116_v44 = vadd.f32 %v13855_v39, %v5220_v8  ;;  %v6118_v45 = vadd.f32 %v13880_v14, %v5222_v4  ;;  %6246 = vst.msk [vmem:[#allocation2 + $0x2e0] sm:$0xff] %vm42_vm15, %v6117_v48  ;;  %v6121_v30 = vadd.f32 %v5834_v11, %v5225_v2  ;;  %v4962_v17 = vand.u32 2147483647, %v13862_v38  ;;  %v6362_v10 = vld [vmem:[#allocation2 + $0x268] sm:$0xff] }
 0x5db   :  { %v13925_v27 = vpop.eup %7685  ;;  %v5506_v26 = vmul.f32 %v13860_v61, %v5122_v23  ;;  %v4949_v57 = vmul.f32 0.6931472, %v7684_v15  ;;  %6241 = vst.msk [vmem:[#allocation2 + $0x2b8] sm:$0xff] %vm42_vm15, %v6112_v37  ;;  %v6120_v9 = vadd.f32 %v5832_v12, %v5224_v46  ;;  %6248 = vst.msk [vmem:[#allocation2 + $0x2f0] sm:$0xff] %vm42_vm15, %v6119_v20  ;;  %v6122_v61 = vadd.f32 %v5836_v59, %v5226_v7 }
 0x5dc   :  { %v4974_v39 = vadd.f32 1.0, %v13925_v27  ;;  %6243 = vst.msk [vmem:[#allocation2 + $0x2c8] sm:$0xff] %vm42_vm15, %v6114_v0  ;;  %6245 = vst.msk [vmem:[#allocation2 + $0x2d8] sm:$0xff] %vm42_vm15, %v6116_v44  ;;  %v6555_v14 = vadd.f32 %v13865_v52, %v13838_v31  ;;  %v4968_v12 = vmul.f32 -0.5, %v13889_v55  ;;  %v6558_v31 = vsel %vm42_vm15, %v6358_v5, 0.0 }
 0x5dd   :  { %6247 = vst.msk [vmem:[#allocation2 + $0x2e8] sm:$0xff] %vm42_vm15, %v6118_v45  ;;  %v4955_v19 = vsel %vm4954_vm11, %v4952_v60, %v4949_v57  ;;  %5883 = vrot.lane.b32.xlu1 %v5506_v26, %s7789_s10  ;;  %6250 = vst.msk [vmem:[#allocation2 + $0x300] sm:$0xff] %vm42_vm15, %v6121_v30  ;;  %v4961_v42 = vmul.f32 %v13862_v38, %v4960_v24  ;;  %v5380_v22 = vand.u32 2147483647, %v2564_v13  ;;  %v3332_v60 = vmax.f32 %v13732_v16, 0.0  ;;  %v6361_v38 = vld [vmem:[#allocation2 + $0x260] sm:$0xff] }
 0x5de   :  { %6249 = vst.msk [vmem:[#allocation2 + $0x2f8] sm:$0xff] %vm42_vm15, %v6120_v9  ;;  %v7688_v36 = vpop.eup %7687  ;;  %v5123_v58 = vadd.f32 %v4955_v19, %v3331_v47  ;;  %7695 = vlog2.f32 %v4974_v39  ;;  %6251 = vst.msk [vmem:[#allocation2 + $0x308] sm:$0xff] %vm42_vm15, %v6122_v61  ;;  %v6557_v18 = vadd.f32 %v13872_v51, %v6555_v14  ;;  %vm4963_vm4 = vcmp.lt.f32.partialorder %v4962_v17, 0.0004427343  ;;  %v5227_v45 = vld [vmem:[#allocation2 + $0x310] sm:$0xff]  ;;  %v5228_v26 = vld [vmem:[#allocation2 + $0x318] sm:$0xff] }
 0x5df   :  { %v4958_v52 = vmul.f32 0.6931472, %v7688_v36  ;;  %v6560_v35 = vsel %vm42_vm15, %v6359_v41, 0.0  ;;  %v4969_v51 = vadd.f32 1.0, %v4968_v12  ;;  %v4971_v4 = vand.u32 2147483647, %v13889_v55 }
 0x5e0   :  { %v5507_v25 = vmul.f32 %v13885_v53, %v5123_v58  ;;  %v13952_v47 = vpop.eup %7689  ;;  %v6559_v50 = vadd.f32 %v6558_v31, %v6557_v18  ;;  %v6562_v13 = vsel %vm42_vm15, %v6360_v56, 0.0  ;;  %v4977_v29 = vmul.f32 -0.5, %v13925_v27  ;;  %v5229_v57 = vld [vmem:[#allocation2 + $0x320] sm:$0xff]  ;;  %v6363_v9 = vld [vmem:[#allocation2 + $0x270] sm:$0xff]  ;;  %v6364_v41 = vld [vmem:[#allocation2 + $0x278] sm:$0xff] }
 0x5e1   :  { %v4964_v33 = vsel %vm4963_vm4, %v4961_v42, %v4958_v52  ;;  %v4983_v53 = vadd.f32 1.0, %v13952_v47  ;;  %v4970_v2 = vmul.f32 %v13889_v55, %v4969_v51  ;;  %v6564_v46 = vsel %vm42_vm15, %v6361_v38, 0.0  ;;  %v5230_v18 = vld [vmem:[#allocation2 + $0x328] sm:$0xff] }
 0x5e2   :  { %v5124_v8 = vadd.f32 %v4964_v33, %v3332_v60  ;;  %5885 = vrot.lane.b32.xlu0 %v5507_v25, %s7789_s10  ;;  %v6561_v3 = vadd.f32 %v6560_v35, %v6559_v50  ;;  %v5381_v48 = vand.u32 2147483647, %v2565_v49  ;;  %v3333_v37 = vmax.f32 %v13780_v32, 0.0 }
 0x5e3   :  { %v13958_v40 = vpop.eup %7691  ;;  %7697 = vlog2.f32 %v4983_v53  ;;  %vm4972_vm12 = vcmp.lt.f32.partialorder %v4971_v4, 0.0004427343  ;;  %v5838_v7 = vpop.permute.xlu0 %5837  ;;  %v6566_v20 = vsel %vm42_vm15, %v6362_v10, 0.0  ;;  %v4978_v44 = vadd.f32 1.0, %v4977_v29  ;;  %v6365_v4 = vld [vmem:[#allocation2 + $0x280] sm:$0xff]  ;;  %v6366_v29 = vld [vmem:[#allocation2 + $0x288] sm:$0xff] }
 0x5e4   :  { %v7694_v16 = vpop.eup %7693  ;;  %v5508_v1 = vmul.f32 %v5380_v22, %v5124_v8  ;;  %v4992_v23 = vadd.f32 1.0, %v13958_v40  ;;  %v6563_v24 = vadd.f32 %v6562_v13, %v6561_v3  ;;  %v5840_v59 = vpop.permute.xlu1 %5839  ;;  %v4980_v30 = vand.u32 2147483647, %v13925_v27 }
 0x5e5   :  { %v4967_v11 = vmul.f32 0.6931472, %v7694_v16  ;;  %v4986_v32 = vmul.f32 -0.5, %v13952_v47  ;;  %v6123_v61 = vadd.f32 %v5838_v7, %v5227_v45  ;;  %v6124_v14 = vadd.f32 %v5840_v59, %v5228_v26 }
 0x5e6   :  { %5887 = vrot.lane.b32.xlu1 %v5508_v1, %s7789_s10  ;;  %7699 = vlog2.f32 %v4992_v23  ;;  %v6565_v55 = vadd.f32 %v6564_v46, %v6563_v24  ;;  %v5382_v12 = vand.u32 2147483647, %v2566_v63  ;;  %v4979_v58 = vmul.f32 %v13925_v27, %v4978_v44  ;;  %v5231_v46 = vld [vmem:[#allocation2 + $0x330] sm:$0xff]  ;;  %v5233_v44 = vld [vmem:[#allocation2 + $0x340] sm:$0xff] }
 0x5e7   :  { %v4973_v15 = vsel %vm4972_vm12, %v4970_v2, %v4967_v11  ;;  %v5842_v17 = vpop.permute.xlu0 %5841  ;;  %v3334_v31 = vmax.f32 %v13801_v34, 0.0  ;;  %vm4981_vm1 = vcmp.lt.f32.partialorder %v4980_v30, 0.0004427343  ;;  %v6568_v52 = vsel %vm42_vm15, %v6363_v9, 0.0  ;;  %6252 = vst.msk [vmem:[#allocation2 + $0x310] sm:$0xff] %vm42_vm15, %v6123_v61  ;;  %6253 = vst.msk [vmem:[#allocation2 + $0x318] sm:$0xff] %vm42_vm15, %v6124_v14 }
 0x5e8   :  { %v5125_v0 = vadd.f32 %v4973_v15, %v3333_v37  ;;  %v6567_v5 = vadd.f32 %v6566_v20, %v6565_v55  ;;  %v6125_v19 = vadd.f32 %v5842_v17, %v5229_v57  ;;  %v4995_v42 = vmul.f32 -0.5, %v13958_v40  ;;  %v6367_v55 = vld [vmem:[#allocation2 + $0x290] sm:$0xff]  ;;  %v5234_v30 = vld [vmem:[#allocation2 + $0x348] sm:$0xff] }
 0x5e9   :  { %v4987_v63 = vadd.f32 1.0, %v4986_v32  ;;  %v4989_v60 = vand.u32 2147483647, %v13952_v47  ;;  %v6570_v34 = vsel %vm42_vm15, %v6364_v41, 0.0  ;;  %v4998_v38 = vand.u32 2147483647, %v13958_v40 }
 0x5ea   :  { %v5509_v49 = vmul.f32 %v5381_v48, %v5125_v0  ;;  %6254 = vst.msk [vmem:[#allocation2 + $0x320] sm:$0xff] %vm42_vm15, %v6125_v19  ;;  %v6569_v27 = vadd.f32 %v6568_v52, %v6567_v5  ;;  %v4996_v51 = vadd.f32 1.0, %v4995_v42  ;;  %v5383_v13 = vand.u32 2147483647, %v2567_v28  ;;  %v5235_v5 = vld [vmem:[#allocation2 + $0x350] sm:$0xff]  ;;  %v5236_v19 = vld [vmem:[#allocation2 + $0x358] sm:$0xff] }
 0x5eb   :  { %v7696_v39 = vpop.eup %7695  ;;  %v4988_v8 = vmul.f32 %v13952_v47, %v4987_v63  ;;  %v3335_v16 = vmax.f32 %v13847_v54, 0.0  ;;  %vm4990_vm13 = vcmp.lt.f32.partialorder %v4989_v60, 0.0004427343  ;;  %v6572_v11 = vsel %vm42_vm15, %v6365_v4, 0.0  ;;  %v6372_v60 = vld [vmem:[#allocation2 + $0x2b8] sm:$0xff] }
 0x5ec   :  { %v4976_v36 = vmul.f32 0.6931472, %v7696_v39  ;;  %5889 = vrot.lane.b32.xlu0 %v5509_v49, %s7789_s10  ;;  %v5844_v25 = vpop.permute.xlu1 %5843  ;;  %v6571_v53 = vadd.f32 %v6570_v34, %v6569_v27  ;;  %v4997_v47 = vmul.f32 %v13958_v40, %v4996_v51  ;;  %v5384_v23 = vand.u32 2147483647, %v2568_v62  ;;  %v6368_v62 = vld [vmem:[#allocation2 + $0x298] sm:$0xff]  ;;  %v6369_v39 = vld [vmem:[#allocation2 + $0x2a0] sm:$0xff] }
 0x5ed   :  { %v6126_v56 = vadd.f32 %v5844_v25, %v5230_v18  ;;  %v3336_v28 = vmax.f32 %v13852_v21, 0.0  ;;  %vm4999_vm14 = vcmp.lt.f32.partialorder %v4998_v38, 0.0004427343  ;;  %v6574_v37 = vsel %vm42_vm15, %v6366_v29, 0.0  ;;  %v6371_v27 = vld [vmem:[#allocation2 + $0x2b0] sm:$0xff] }
 0x5ee   :  { %v4982_v43 = vsel %vm4981_vm1, %v4979_v58, %v4976_v36  ;;  %v6573_v54 = vadd.f32 %v6572_v11, %v6571_v53  ;;  %v6576_v45 = vsel %vm42_vm15, %v6367_v55, 0.0  ;;  %v6578_v49 = vsel %vm42_vm15, %v6368_v62, 0.0  ;;  %v6370_v36 = vld [vmem:[#allocation2 + $0x2a8] sm:$0xff] }
 0x5ef   :  { %v5126_v22 = vadd.f32 %v4982_v43, %v3334_v31  ;;  %6255 = vst.msk [vmem:[#allocation2 + $0x328] sm:$0xff] %vm42_vm15, %v6126_v56  ;;  %v6580_v41 = vsel %vm42_vm15, %v6369_v39, 0.0  ;;  %v5237_v31 = vld [vmem:[#allocation2 + $0x360] sm:$0xff]  ;;  %v6582_v42 = vsel %vm42_vm15, %v6370_v36, 0.0  ;;  %v6584_v34 = vsel %vm42_vm15, %v6371_v27, 0.0  ;;  %v6378_v55 = vld [vmem:[#allocation2 + $0x2e8] sm:$0xff] }
 0x5f0   :  { %v7698_v35 = vpop.eup %7697  ;;  %v6575_v40 = vadd.f32 %v6574_v37, %v6573_v54  ;;  %v6586_v51 = vsel %vm42_vm15, %v6372_v60, 0.0  ;;  %v6382_v36 = vld [vmem:[#allocation2 + $0x308] sm:$0xff]  ;;  %v6383_v27 = vld [vmem:[#allocation2 + $0x310] sm:$0xff]  ;;  %vm6678_vm0 = vcmask 0  }
 0x5f1   :  { %v5510_v33 = vmul.f32 %v5382_v12, %v5126_v22  ;;  %v4985_v50 = vmul.f32 0.6931472, %v7698_v35  ;;  %v5238_v22 = vld [vmem:[#allocation2 + $0x368] sm:$0xff]  ;;  %v6608_v60 = vsel %vm42_vm15, %v6383_v27, 0.0 }
 0x5f2   :  { %v6577_v26 = vadd.f32 %v6576_v45, %v6575_v40  ;;  %v6598_v45 = vsel %vm42_vm15, %v6378_v55, 0.0 }
 0x5f3   :  { %5891 = vrot.lane.b32.xlu1 %v5510_v33, %s7789_s10  ;;  %v7700_v3 = vpop.eup %7699  ;;  %v4991_v1 = vsel %vm4990_vm13, %v4988_v8, %v4985_v50  ;;  %v5239_v50 = vld [vmem:[#allocation2 + $0x370] sm:$0xff]  ;;  %v6373_v8 = vld [vmem:[#allocation2 + $0x2c0] sm:$0xff] }
 0x5f4   :  { %v5127_v10 = vadd.f32 %v4991_v1, %v3335_v16  ;;  %v4994_v2 = vmul.f32 0.6931472, %v7700_v3  ;;  %v6579_v61 = vadd.f32 %v6578_v49, %v6577_v26  ;;  %v6588_v16 = vsel %vm42_vm15, %v6373_v8, 0.0  ;;  %v5240_v1 = vld [vmem:[#allocation2 + $0x378] sm:$0xff]  ;;  %v6379_v26 = vld [vmem:[#allocation2 + $0x2f0] sm:$0xff] }
 0x5f5   :  { %v5846_v7 = vpop.permute.xlu0 %5845  ;;  %v6380_v49 = vld [vmem:[#allocation2 + $0x2f8] sm:$0xff] }
 0x5f6   :  { %v5511_v24 = vmul.f32 %v5383_v13, %v5127_v10  ;;  %v5000_v48 = vsel %vm4999_vm14, %v4997_v47, %v4994_v2  ;;  %v6127_v20 = vadd.f32 %v5846_v7, %v5231_v46  ;;  %v6581_v52 = vadd.f32 %v6580_v41, %v6579_v61  ;;  %v6374_v13 = vld [vmem:[#allocation2 + $0x2c8] sm:$0xff]  ;;  %v6375_v2 = vld [vmem:[#allocation2 + $0x2d0] sm:$0xff]  ;;  %v6376_v46 = vld [vmem:[#allocation2 + $0x2d8] sm:$0xff] }
 0x5f7   :  { %v5128_v15 = vadd.f32 %v5000_v48, %v3336_v28  ;;  %v6590_v29 = vsel %vm42_vm15, %v6374_v13, 0.0  ;;  %v6592_v28 = vsel %vm42_vm15, %v6375_v2, 0.0  ;;  %v6594_v48 = vsel %vm42_vm15, %v6376_v46, 0.0  ;;  %v5242_v7 = vld [vmem:[#allocation2 + $0x388] sm:$0xff]  ;;  %v6381_v61 = vld [vmem:[#allocation2 + $0x300] sm:$0xff] }
 0x5f8   :  { %5893 = vrot.lane.b32.xlu0 %v5511_v24, %s7789_s10  ;;  %6256 = vst.msk [vmem:[#allocation2 + $0x330] sm:$0xff] %vm42_vm15, %v6127_v20  ;;  %v6583_v25 = vadd.f32 %v6582_v42, %v6581_v52  ;;  %v6602_v39 = vsel %vm42_vm15, %v6380_v49, 0.0  ;;  %v6604_v41 = vsel %vm42_vm15, %v6381_v61, 0.0  ;;  %v6386_v8 = vld [vmem:[#allocation2 + $0x328] sm:$0xff]  ;;  %v5249_v46 = vld [vmem:[#allocation2 + $0x3c0] sm:$0xff] }
 0x5f9   :  { %v5512_v0 = vmul.f32 %v5384_v23, %v5128_v15  ;;  %v5241_v23 = vld [vmem:[#allocation2 + $0x380] sm:$0xff] }
 0x5fa   :  { %v5848_v21 = vpop.permute.xlu1 %5847  ;;  %v6585_v35 = vadd.f32 %v6584_v34, %v6583_v25  ;;  %v6377_v15 = vld [vmem:[#allocation2 + $0x2e0] sm:$0xff]  ;;  %v6384_v25 = vld [vmem:[#allocation2 + $0x318] sm:$0xff] }
 0x5fb   :  { %5895 = vrot.lane.b32.xlu1 %v5512_v0, %s7789_s10  ;;  %v6128_v59 = vadd.f32 %v5848_v21, %v5232_v6  ;;  %v5243_v6 = vld [vmem:[#allocation2 + $0x390] sm:$0xff]  ;;  %v6596_v62 = vsel %vm42_vm15, %v6377_v15, 0.0  ;;  %s6686_s10 = sshll.u32 %s7791_s0, 4  ;;  %s6687_s10 = int_to_ptr.vmem [resolvable:$true] %s6686_s10 }
 0x5fc   :  { %v6587_v4 = vadd.f32 %v6586_v51, %v6585_v35  ;;  %s7766_s4 = scalar_lea.vmem %s6687_s10, 16  ;;  %s7770_s5 = scalar_lea.vmem %s6687_s10, 32 }
 0x5fd   :  { %v5850_v57 = vpop.permute.xlu0 %5849  ;;  %6257 = vst.msk [vmem:[#allocation2 + $0x338] sm:$0xff] %vm42_vm15, %v6128_v59  ;;  %p7767_p0 = scmp.ne.s32.totalorder %s6687_s10, %s7766_s4  ;;  %p7771_p1 = scmp.lt.s32.totalorder %s6687_s10, %s6687_s10 }
 0x5fe   :  { %v6129_v9 = vadd.f32 %v5850_v57, %v5233_v44  ;;  %v5852_v32 = vpop.permute.xlu1 %5851  ;;  %v6589_v3 = vadd.f32 %v6588_v16, %v6587_v4  ;;  %p7772_p2 = scmp.lt.s32.totalorder %s7770_s5, %s7766_s4 }
 0x5ff   :  { %v6130_v17 = vadd.f32 %v5852_v32, %v5234_v30  ;;  %v5244_v30 = vld [vmem:[#allocation2 + $0x398] sm:$0xff]  ;;  %v6387_v13 = vld [vmem:[#allocation2 + $0x330] sm:$0xff] }
 0x600   :  { %6258 = vst.msk [vmem:[#allocation2 + $0x340] sm:$0xff] %vm42_vm15, %v6129_v9  ;;  %v6591_v47 = vadd.f32 %v6590_v29, %v6589_v3  ;;  %v6600_v9 = vsel %vm42_vm15, %v6379_v26, 0.0  ;;  %v6614_v3 = vsel %vm42_vm15, %v6386_v8, 0.0  ;;  %p7773_p3 = por %p7772_p2, %p7771_p1 }
 0x601   :  { %v5854_v14 = vpop.permute.xlu0 %5853  ;;  %6259 = vst.msk [vmem:[#allocation2 + $0x348] sm:$0xff] %vm42_vm15, %v6130_v17 }
 0x602   :  { %v6131_v12 = vadd.f32 %v5854_v14, %v5235_v5  ;;  %v6593_v54 = vadd.f32 %v6592_v28, %v6591_v47  ;;  %p7774_p4 = pnand %p7773_p3, %p7767_p0 }
 0x603   :  { %v5856_v58 = vpop.permute.xlu1 %5855 }
 0x604   :  { %6260 = vst.msk [vmem:[#allocation2 + $0x350] sm:$0xff] %vm42_vm15, %v6131_v12  ;;  %v6132_v18 = vadd.f32 %v5856_v58, %v5236_v19  ;;  %v6595_v20 = vadd.f32 %v6594_v48, %v6593_v54  ;;  %v5245_v19 = vld [vmem:[#allocation2 + $0x3a0] sm:$0xff]  ;;  %v5246_v12 = vld [vmem:[#allocation2 + $0x3a8] sm:$0xff]  ;;  %v6388_v29 = vld [vmem:[#allocation2 + $0x338] sm:$0xff] }
 0x605   :  { %v6618_v47 = vsel %vm42_vm15, %v6388_v29, 0.0 }
 0x606   :  { %6261 = vst.msk [vmem:[#allocation2 + $0x358] sm:$0xff] %vm42_vm15, %v6132_v18  ;;  %v5858_v43 = vpop.permute.xlu0 %5857  ;;  %v6597_v21 = vadd.f32 %v6596_v62, %v6595_v20 }
 0x607   :  { %v6133_v63 = vadd.f32 %v5858_v43, %v5237_v31  ;;  %v6606_v43 = vsel %vm42_vm15, %v6382_v36, 0.0  ;;  %v6389_v2 = vld [vmem:[#allocation2 + $0x340] sm:$0xff] }
 0x608   :  { %v6599_v57 = vadd.f32 %v6598_v45, %v6597_v21  ;;  %v6390_v28 = vld [vmem:[#allocation2 + $0x348] sm:$0xff]  ;;  %v6620_v54 = vsel %vm42_vm15, %v6389_v2, 0.0 }
 0x609   :  { %6262 = vst.msk [vmem:[#allocation2 + $0x360] sm:$0xff] %vm42_vm15, %v6133_v63  ;;  %v6622_v15 = vsel %vm42_vm15, %v6390_v28, 0.0 }
 0x60a   :  { %v6601_v5 = vadd.f32 %v6600_v9, %v6599_v57  ;;  %v5251_v9 = vld [vmem:[#allocation2 + $0x3d0] sm:$0xff] }
 0x60c   :  { %v5860_v56 = vpop.permute.xlu1 %5859  ;;  %v6603_v14 = vadd.f32 %v6602_v39, %v6601_v5 }
 0x60d   :  { %v6134_v33 = vadd.f32 %v5860_v56, %v5238_v22  ;;  %v5247_v22 = vld [vmem:[#allocation2 + $0x3b0] sm:$0xff]  ;;  %v6385_v56 = vld [vmem:[#allocation2 + $0x320] sm:$0xff] }
 0x60e   :  { %v6605_v52 = vadd.f32 %v6604_v41, %v6603_v14  ;;  %v6612_v4 = vsel %vm42_vm15, %v6385_v56, 0.0 }
 0x60f   :  { %6263 = vst.msk [vmem:[#allocation2 + $0x368] sm:$0xff] %vm42_vm15, %v6134_v33  ;;  %v6610_v33 = vsel %vm42_vm15, %v6384_v25, 0.0  ;;  %v5253_v25 = vld [vmem:[#allocation2 + $0x3e0] sm:$0xff] }
 0x610   :  { %v6607_v63 = vadd.f32 %v6606_v43, %v6605_v52  ;;  %v6393_v62 = vld [vmem:[#allocation2 + $0x360] sm:$0xff] }
 0x611   :  { %v6628_v57 = vsel %vm42_vm15, %v6393_v62, 0.0 }
 0x612   :  { %v5862_v38 = vpop.permute.xlu0 %5861  ;;  %v6609_v34 = vadd.f32 %v6608_v60, %v6607_v63 }
 0x613   :  { %v6135_v53 = vadd.f32 %v5862_v38, %v5239_v50  ;;  %v5248_v50 = vld [vmem:[#allocation2 + $0x3b8] sm:$0xff] }
 0x615   :  { %6264 = vst.msk [vmem:[#allocation2 + $0x370] sm:$0xff] %vm42_vm15, %v6135_v53  ;;  %v6611_v53 = vadd.f32 %v6610_v33, %v6609_v34 }
 0x618   :  { %v5864_v10 = vpop.permute.xlu1 %5863 }
 0x619   :  { %v6136_v11 = vadd.f32 %v5864_v10, %v5240_v1  ;;  %v6613_v1 = vadd.f32 %v6612_v4, %v6611_v53  ;;  %v6616_v10 = vsel %vm42_vm15, %v6387_v13, 0.0 }
 0x61b   :  { %6265 = vst.msk [vmem:[#allocation2 + $0x378] sm:$0xff] %vm42_vm15, %v6136_v11  ;;  %v6615_v11 = vadd.f32 %v6614_v3, %v6613_v1 }
 0x61c   :  { %v6395_v49 = vld [vmem:[#allocation2 + $0x370] sm:$0xff] }
 0x61d   :  { %v6632_v61 = vsel %vm42_vm15, %v6395_v49, 0.0 }
 0x61e   :  { %v5866_v24 = vpop.permute.xlu0 %5865 }
 0x61f   :  { %v6137_v37 = vadd.f32 %v5866_v24, %v5241_v23  ;;  %v6617_v23 = vadd.f32 %v6616_v10, %v6615_v11 }
 0x621   :  { %6266 = vst.msk [vmem:[#allocation2 + $0x380] sm:$0xff] %vm42_vm15, %v6137_v37  ;;  %v6619_v48 = vadd.f32 %v6618_v47, %v6617_v23  ;;  %v6391_v37 = vld [vmem:[#allocation2 + $0x350] sm:$0xff] }
 0x622   :  { %v6624_v55 = vsel %vm42_vm15, %v6391_v37, 0.0 }
 0x623   :  { %v5868_v0 = vpop.permute.xlu1 %5867  ;;  %v6621_v20 = vadd.f32 %v6620_v54, %v6619_v48 }
 0x624   :  { %v6138_v40 = vadd.f32 %v5868_v0, %v5242_v7  ;;  %v6392_v0 = vld [vmem:[#allocation2 + $0x358] sm:$0xff] }
 0x625   :  { %v6626_v21 = vsel %vm42_vm15, %v6392_v0, 0.0 }
 0x626   :  { %6267 = vst.msk [vmem:[#allocation2 + $0x388] sm:$0xff] %vm42_vm15, %v6138_v40  ;;  %v5870_v44 = vpop.permute.xlu0 %5869  ;;  %v5250_v40 = vld [vmem:[#allocation2 + $0x3c8] sm:$0xff] }
 0x627   :  { %v6139_v59 = vadd.f32 %v5870_v44, %v5243_v6  ;;  %v6623_v6 = vadd.f32 %v6622_v15, %v6621_v20 }
 0x628   :  { %v6397_v36 = vld [vmem:[#allocation2 + $0x380] sm:$0xff] }
 0x629   :  { %6268 = vst.msk [vmem:[#allocation2 + $0x390] sm:$0xff] %vm42_vm15, %v6139_v59  ;;  %v6625_v45 = vadd.f32 %v6624_v55, %v6623_v6  ;;  %v6394_v59 = vld [vmem:[#allocation2 + $0x368] sm:$0xff]  ;;  %v5256_v55 = vld [vmem:[#allocation2 + $0x3f8] sm:$0xff] }
 0x62d   :  { %v5872_v32 = vpop.permute.xlu1 %5871 }
 0x62e   :  { %v6140_v17 = vadd.f32 %v5872_v32, %v5244_v30  ;;  %v6627_v30 = vadd.f32 %v6626_v21, %v6625_v45  ;;  %v6630_v32 = vsel %vm42_vm15, %v6394_v59, 0.0 }
 0x630   :  { %6269 = vst.msk [vmem:[#allocation2 + $0x398] sm:$0xff] %vm42_vm15, %v6140_v17  ;;  %v6629_v5 = vadd.f32 %v6628_v57, %v6627_v30  ;;  %v6396_v17 = vld [vmem:[#allocation2 + $0x378] sm:$0xff]  ;;  %v6399_v43 = vld [vmem:[#allocation2 + $0x390] sm:$0xff] }
 0x631   :  { %v6640_v34 = vsel %vm42_vm15, %v6399_v43, 0.0 }
 0x634   :  { %v5874_v58 = vpop.permute.xlu0 %5873 }
 0x635   :  { %v6141_v18 = vadd.f32 %v5874_v58, %v5245_v19  ;;  %v5876_v31 = vpop.permute.xlu1 %5875  ;;  %v6631_v19 = vadd.f32 %v6630_v32, %v6629_v5  ;;  %v6634_v58 = vsel %vm42_vm15, %v6396_v17, 0.0 }
 0x636   :  { %v6142_v42 = vadd.f32 %v5876_v31, %v5246_v12  ;;  %v5252_v12 = vld [vmem:[#allocation2 + $0x3d8] sm:$0xff] }
 0x637   :  { %6270 = vst.msk [vmem:[#allocation2 + $0x3a0] sm:$0xff] %vm42_vm15, %v6141_v18  ;;  %v6398_v18 = vld [vmem:[#allocation2 + $0x388] sm:$0xff]  ;;  %v6633_v31 = vadd.f32 %v6632_v61, %v6631_v19 }
 0x638   :  { %6271 = vst.msk [vmem:[#allocation2 + $0x3a8] sm:$0xff] %vm42_vm15, %v6142_v42  ;;  %v6636_v42 = vsel %vm42_vm15, %v6397_v36, 0.0  ;;  %v6638_v27 = vsel %vm42_vm15, %v6398_v18, 0.0 }
 0x639   :  { %v6635_v63 = vadd.f32 %v6634_v58, %v6633_v31 }
 0x63b   :  { %v6637_v60 = vadd.f32 %v6636_v42, %v6635_v63 }
 0x63d   :  { %v6639_v33 = vadd.f32 %v6638_v27, %v6637_v60 }
 0x63e   :  { %v5878_v35 = vpop.permute.xlu0 %5877 }
 0x63f   :  { %v6143_v51 = vadd.f32 %v5878_v35, %v5247_v22  ;;  %v6400_v22 = vld [vmem:[#allocation2 + $0x398] sm:$0xff]  ;;  %v6401_v35 = vld [vmem:[#allocation2 + $0x3a0] sm:$0xff]  ;;  %v6402_v8 = vld [vmem:[#allocation2 + $0x3a8] sm:$0xff]  ;;  %v6641_v4 = vadd.f32 %v6640_v34, %v6639_v33 }
 0x640   :  { %v6646_v3 = vsel %vm42_vm15, %v6402_v8, 0.0 }
 0x641   :  { %6272 = vst.msk [vmem:[#allocation2 + $0x3b0] sm:$0xff] %vm42_vm15, %v6143_v51  ;;  %v5880_v38 = vpop.permute.xlu1 %5879 }
 0x642   :  { %v6144_v16 = vadd.f32 %v5880_v38, %v5248_v50  ;;  %v6642_v50 = vsel %vm42_vm15, %v6400_v22, 0.0  ;;  %v6644_v38 = vsel %vm42_vm15, %v6401_v35, 0.0 }
 0x643   :  { %v6643_v13 = vadd.f32 %v6642_v50, %v6641_v4 }
 0x644   :  { %6273 = vst.msk [vmem:[#allocation2 + $0x3b8] sm:$0xff] %vm42_vm15, %v6144_v16  ;;  %v5254_v16 = vld [vmem:[#allocation2 + $0x3e8] sm:$0xff] }
 0x645   :  { %v6645_v29 = vadd.f32 %v6644_v38, %v6643_v13 }
 0x648   :  { %v6403_v53 = vld [vmem:[#allocation2 + $0x3b0] sm:$0xff] }
 0x649   :  { %v5882_v24 = vpop.permute.xlu0 %5881  ;;  %v6648_v11 = vsel %vm42_vm15, %v6403_v53, 0.0 }
 0x64a   :  { %v6145_v7 = vadd.f32 %v5882_v24, %v5249_v46  ;;  %v6647_v46 = vadd.f32 %v6646_v3, %v6645_v29  ;;  %v5255_v24 = vld [vmem:[#allocation2 + $0x3f0] sm:$0xff] }
 0x64b   :  { %v6404_v1 = vld [vmem:[#allocation2 + $0x3b8] sm:$0xff] }
 0x64c   :  { %6274 = vst.msk [vmem:[#allocation2 + $0x3c0] sm:$0xff] %vm42_vm15, %v6145_v7  ;;  %v6650_v23 = vsel %vm42_vm15, %v6404_v1, 0.0  ;;  %v6649_v54 = vadd.f32 %v6648_v11, %v6647_v46 }
 0x64e   :  { %v6651_v7 = vadd.f32 %v6650_v23, %v6649_v54 }
 0x64f   :  { %v5884_v44 = vpop.permute.xlu1 %5883 }
 0x650   :  { %v6146_v26 = vadd.f32 %v5884_v44, %v5250_v40 }
 0x652   :  { %6275 = vst.msk [vmem:[#allocation2 + $0x3c8] sm:$0xff] %vm42_vm15, %v6146_v26 }
 0x653   :  { %v6405_v47 = vld [vmem:[#allocation2 + $0x3c0] sm:$0xff] }
 0x654   :  { %v5886_v39 = vpop.permute.xlu0 %5885  ;;  %v6652_v48 = vsel %vm42_vm15, %v6405_v47, 0.0 }
 0x655   :  { %v6147_v14 = vadd.f32 %v5886_v39, %v5251_v9  ;;  %v6653_v6 = vadd.f32 %v6652_v48, %v6651_v7 }
 0x657   :  { %6276 = vst.msk [vmem:[#allocation2 + $0x3d0] sm:$0xff] %vm42_vm15, %v6147_v14 }
 0x658   :  { %v5888_v41 = vpop.permute.xlu1 %5887 }
 0x659   :  { %v6148_v52 = vadd.f32 %v5888_v41, %v5252_v12  ;;  %v6406_v28 = vld [vmem:[#allocation2 + $0x3c8] sm:$0xff] }
 0x65a   :  { %v6654_v20 = vsel %vm42_vm15, %v6406_v28, 0.0 }
 0x65b   :  { %6277 = vst.msk [vmem:[#allocation2 + $0x3d8] sm:$0xff] %vm42_vm15, %v6148_v52  ;;  %v6655_v45 = vadd.f32 %v6654_v20, %v6653_v6 }
 0x65e   :  { %v5890_v56 = vpop.permute.xlu0 %5889  ;;  %v6407_v37 = vld [vmem:[#allocation2 + $0x3d0] sm:$0xff] }
 0x65f   :  { %v6149_v51 = vadd.f32 %v5890_v56, %v5253_v25  ;;  %v6656_v62 = vsel %vm42_vm15, %v6407_v37, 0.0 }
 0x660   :  { %v6657_v30 = vadd.f32 %v6656_v62, %v6655_v45 }
 0x661   :  { %6278 = vst.msk [vmem:[#allocation2 + $0x3e0] sm:$0xff] %vm42_vm15, %v6149_v51 }
 0x662   :  { %v6408_v40 = vld [vmem:[#allocation2 + $0x3d8] sm:$0xff] }
 0x663   :  { %v6658_v26 = vsel %vm42_vm15, %v6408_v40, 0.0 }
 0x664   :  { %v6659_v9 = vadd.f32 %v6658_v26, %v6657_v30 }
 0x665   :  { %v5892_v10 = vpop.permute.xlu1 %5891 }
 0x666   :  { %v6150_v2 = vadd.f32 %v5892_v10, %v5254_v16 }
 0x668   :  { %6279 = vst.msk [vmem:[#allocation2 + $0x3e8] sm:$0xff] %vm42_vm15, %v6150_v2  ;;  %v6409_v44 = vld [vmem:[#allocation2 + $0x3e0] sm:$0xff] }
 0x669   :  { %v6660_v49 = vsel %vm42_vm15, %v6409_v44, 0.0 }
 0x66a   :  { %v5894_v15 = vpop.permute.xlu0 %5893  ;;  %v6661_v5 = vadd.f32 %v6660_v49, %v6659_v9 }
 0x66b   :  { %v6151_v0 = vadd.f32 %v5894_v15, %v5255_v24 }
 0x66d   :  { %6280 = vst.msk [vmem:[#allocation2 + $0x3f0] sm:$0xff] %vm42_vm15, %v6151_v0  ;;  %v5896_v21 = vpop.permute.xlu1 %5895 }
 0x66e   :  { %v6152_v59 = vadd.f32 %v5896_v21, %v5256_v55 }
 0x66f   :  { %v6410_v57 = vld [vmem:[#allocation2 + $0x3e8] sm:$0xff] }
 0x670   :  { %6281 = vst.msk [vmem:[#allocation2 + $0x3f8] sm:$0xff] %vm42_vm15, %v6152_v59  ;;  %v6662_v32 = vsel %vm42_vm15, %v6410_v57, 0.0 }
 0x671   :  { %v6663_v39 = vadd.f32 %v6662_v32, %v6661_v5 }
 0x674   :  { %v6411_v17 = vld [vmem:[#allocation2 + $0x3f0] sm:$0xff] }
 0x675   :  { %v6664_v61 = vsel %vm42_vm15, %v6411_v17, 0.0 }
 0x676   :  { %v6665_v19 = vadd.f32 %v6664_v61, %v6663_v39 }
 0x677   :  { %v6412_v14 = vld [vmem:[#allocation2 + $0x3f8] sm:$0xff] }
 0x678   :  { %v6666_v12 = vsel %vm42_vm15, %v6412_v14, 0.0 }
 0x679   :  { %v6667_v36 = vadd.f32 %v6666_v12, %v6665_v19 }
 0x67b   :  { %6668 = vadd.xlane.f32.xlu0 %v6667_v36 }
 0x704   :  { %v6669_v58 = vpop.xlane.xlu0 %6668 }
 0x705   :  { %v6670_v41 = vrot.slane %v6669_v58, 4 }
 0x707   :  { %v6671_v18 = vadd.f32 %v6670_v41, %v6669_v58 }
 0x709   :  { %v6672_v31 = vrot.slane %v6671_v18, 2 }
 0x70b   :  { %v6673_v52 = vadd.f32 %v6672_v31, %v6671_v18 }
 0x70d   :  { %v6674_v42 = vrot.slane %v6673_v52, 1 }
 0x70f   :  { %v6675_v43 = vadd.f32 %v6674_v42, %v6673_v52 }
 0x711   :  { %7050 = vpush %v6675_v43 }
 0x742   :  { %s7051_s30 = spop %7050 }
 0x743   :  { %v6677_v63 = vstv %s7051_s30 }
 0x744   :  { %6679 = vst.msk [vmem:[#allocation3] sm:$0x1] %vm6678_vm0, %v6677_v63 }
 0x745   :  { %7777 = shalt.err (!%p7774_p4)
}
 0x746   :  { %6689 = dma.vmem_to_hbm [thread:$0]  %s6687_s10, 16, %s14077_s3, [#allocation4]  }
 0x747   :  { %7786 = dma.done.wait [#allocation4], 16  }
 0x748   :  { %7787 = vsyncadd [#allocation4], 4294967280 }
 0x749   :  { %6693 = vsyncpa [#allocation4], 1 }

</bundles_post_ra>
